<compile_context>
chip_gen: v5e
topology: v5e:2x2
jax: 0.10.0
libtpu: 0.0.40
codegen_flags: <defaults>
</compile_context>

<pallas_src>
import functools

import jax
import jax.numpy as jnp
from jax.experimental import pallas as pl
from jax.experimental.pallas import tpu as pltpu


def _round_up(x, m):
    return (x + m - 1) // m * m


def _num_tensorcores():
    """Best-effort per-chip TensorCore count (v7x / v4 / v5p megacore -> 2)."""
    try:
        kind = jax.devices()[0].device_kind.lower()
    except Exception:
        return 1
    if any(tag in kind for tag in ("v7", "7x", "v4", "v5p")):
        return 2
    return 1


_DUAL_TC = _num_tensorcores() >= 2
_MAX_BLOCK_M = 2048                      # sublane-dim block cap
_MAX_BLOCK_N = 2048                      # lane-dim block cap
_SINGLE_K_BUDGET = 8 * 1024 * 1024       # double-buffered bf16 A+B tile budget


def _select_dim(d, align, max_block, split):
    """Return (padded_dim, block): padded % block == 0, block % align == 0."""
    dp = _round_up(d, align)
    nb = 2 if (split and dp >= 1024) else 1
    blk = _round_up(-(-dp // nb), align)
    while blk > max_block:
        nb += 1
        blk = _round_up(-(-dp // nb), align)
    return blk * nb, blk


# ----------------------------------------------------------------------------
# Pallas GEMM kernels: fused bias + activation epilogue
# ----------------------------------------------------------------------------
def _epilogue(y, b_ref, act, bias_mode):
    if bias_mode != "none":
        y = y + b_ref[...]               # (1,tn) row-bias or (tm,1) col-bias
    if act == "leaky_relu":
        y = jnp.where(y > 0, y, 0.1 * y)  # module uses LeakyReLU(0.1)
    elif act == "relu":
        y = jnp.maximum(y, 0.0)
    return y


def _mm_kernel_single(*refs, act, bias_mode):
    """Single reduction block: MXU dot -> fused epilogue -> single store."""
    if bias_mode == "none":
        x_ref, w_ref, o_ref = refs
        b_ref = None
    else:
        x_ref, w_ref, b_ref, o_ref = refs
    y = jnp.dot(x_ref[...], w_ref[...], preferred_element_type=jnp.float32)
    o_ref[...] = _epilogue(y, b_ref, act, bias_mode).astype(o_ref.dtype)


def _mm_kernel_gridk(*refs, act, bias_mode):
    """Gridded reduction: f32 accumulator in VMEM scratch, epilogue at last k."""
    if bias_mode == "none":
        x_ref, w_ref, o_ref, acc_ref = refs
        b_ref = None
    else:
        x_ref, w_ref, b_ref, o_ref, acc_ref = refs
    k = pl.program_id(2)

    @pl.when(k == 0)
    def _():
        acc_ref[...] = jnp.zeros_like(acc_ref)

    acc_ref[...] += jnp.dot(x_ref[...], w_ref[...],
                            preferred_element_type=jnp.float32)

    @pl.when(k == pl.num_programs(2) - 1)
    def _():
        o_ref[...] = _epilogue(acc_ref[...], b_ref, act,
                               bias_mode).astype(o_ref.dtype)


def matmul_bias_act(a, b, bias=None, act="none", bias_mode="row",
                    out_dtype=jnp.bfloat16):
    """act(a @ b + bias). a:(M,K), b:(K,N); bf16 MXU inputs, f32 accumulation.

    bias_mode: "row" -> bias over N (lanes), "col" -> bias over M (sublanes),
               "none" -> no bias.
    """
    M, K = a.shape
    K2, N = b.shape
    assert K == K2

    Mp, tm = _select_dim(M, 8, _MAX_BLOCK_M, _DUAL_TC)
    Np, tn = _select_dim(N, 128, _MAX_BLOCK_N, _DUAL_TC)

    Kp = _round_up(K, 8)
    if 2 * 2 * (tm * Kp + Kp * tn) <= _SINGLE_K_BUDGET:
        tk = Kp                           # single reduction block
    else:
        tk = 512
        Kp = _round_up(K, tk)
    nk = Kp // tk

    a = a.astype(jnp.bfloat16)
    b = b.astype(jnp.bfloat16)
    if (Mp, Kp) != (M, K):
        a = jnp.pad(a, ((0, Mp - M), (0, Kp - K)))
    if (Kp, Np) != (K, N):
        b = jnp.pad(b, ((0, Kp - K), (0, Np - N)))

    if nk == 1:
        in_specs = [pl.BlockSpec((tm, tk), lambda i, j: (i, 0)),
                    pl.BlockSpec((tk, tn), lambda i, j: (0, j))]
        bias_spec = {"row": pl.BlockSpec((1, tn), lambda i, j: (0, j)),
                     "col": pl.BlockSpec((tm, 1), lambda i, j: (i, 0))}
        out_spec = pl.BlockSpec((tm, tn), lambda i, j: (i, j))
        grid = (Mp // tm, Np // tn)
        sem = ("parallel", "parallel")
        kern = _mm_kernel_single
        scratch = []
    else:
        in_specs = [pl.BlockSpec((tm, tk), lambda i, j, k: (i, k)),
                    pl.BlockSpec((tk, tn), lambda i, j, k: (k, j))]
        bias_spec = {"row": pl.BlockSpec((1, tn), lambda i, j, k: (0, j)),
                     "col": pl.BlockSpec((tm, 1), lambda i, j, k: (i, 0))}
        out_spec = pl.BlockSpec((tm, tn), lambda i, j, k: (i, j))
        grid = (Mp // tm, Np // tn, nk)
        sem = ("parallel", "parallel", "arbitrary")
        kern = _mm_kernel_gridk
        scratch = [pltpu.VMEM((tm, tn), jnp.float32)]

    inputs = [a, b]
    if bias_mode == "row":
        brow = bias.astype(jnp.float32).reshape(1, N)
        if Np != N:
            brow = jnp.pad(brow, ((0, 0), (0, Np - N)))
        inputs.append(brow)
        in_specs.append(bias_spec["row"])
    elif bias_mode == "col":
        bcol = bias.astype(jnp.float32).reshape(M, 1)
        if Mp != M:
            bcol = jnp.pad(bcol, ((0, Mp - M), (0, 0)))
        inputs.append(bcol)
        in_specs.append(bias_spec["col"])

    out = pl.pallas_call(
        functools.partial(kern, act=act, bias_mode=bias_mode),
        out_shape=jax.ShapeDtypeStruct((Mp, Np), out_dtype),
        grid_spec=pltpu.PrefetchScalarGridSpec(
            num_scalar_prefetch=0,
            grid=grid,
            in_specs=in_specs,
            out_specs=out_spec,
            scratch_shapes=scratch,
        ),
        compiler_params=pltpu.CompilerParams(dimension_semantics=sem),
    )(*inputs)
    if (Mp, Np) != (M, N):
        out = out[:M, :N]
    return out


# ----------------------------------------------------------------------------
# Conv2d on channel-first-of-all activations (C, B, H, W)  [encoder]
# ----------------------------------------------------------------------------
def _im2col_cf(x, kh, kw, sh, sw, ph, pw):
    """x: (Cin, B, H, W) bf16 -> patches (Cin*kh*kw, B*OH*OW), OH, OW."""
    C, B, H, W = x.shape
    xp = jnp.pad(x, ((0, 0), (0, 0), (ph, ph), (pw, pw)))
    OH = (H + 2 * ph - kh) // sh + 1
    OW = (W + 2 * pw - kw) // sw + 1
    cols = []
    for i in range(kh):
        for j in range(kw):
            cols.append(xp[:, :, i:i + sh * OH:sh, j:j + sw * OW:sw])
    p = jnp.stack(cols, axis=1)                      # (Cin, kh*kw, B, OH, OW)
    return p.reshape(C * kh * kw, B * OH * OW), OH, OW


def conv2d_cf(x, w_mat, b, ksize, stride, padding, act):
    """x: (Cin, B, H, W), w_mat: (Cout, Cin*kh*kw) bf16 -> (Cout, B, OH, OW) bf16."""
    kh, kw = ksize
    Cin, B, H, W = x.shape
    Cout = w_mat.shape[0]
    patches, OH, OW = _im2col_cf(x.astype(jnp.bfloat16), kh, kw,
                                 stride[0], stride[1], padding[0], padding[1])
    y = matmul_bias_act(w_mat, patches, b, act=act, bias_mode="col",
                        out_dtype=jnp.bfloat16)
    return y.reshape(Cout, B, OH, OW)


# ----------------------------------------------------------------------------
# ConvTranspose2d as a flipped col2im GEMM, channel-last activations  [decoder]
# ----------------------------------------------------------------------------
def conv_transpose2d_cl(x, w_mat, b, ksize, stride, padding, act,
                        out_dtype=jnp.bfloat16):
    """x: (B, H, W, Cin), w_mat: (Cin, Cout*kh*kw) bf16 -> (B, OH, OW, Cout)."""
    kh, kw = ksize
    sh, sw = stride
    ph, pw = padding
    B, H, W, Cin = x.shape
    Cout = w_mat.shape[1] // (kh * kw)

    xm = x.reshape(B * H * W, Cin)
    cols = matmul_bias_act(xm, w_mat, None, act="none", bias_mode="none",
                           out_dtype=jnp.bfloat16)       # (B*H*W, Cout*kh*kw)
    cols = cols.reshape(B, H, W, Cout, kh, kw)

    OH = (H - 1) * sh - 2 * ph + kh
    OW = (W - 1) * sw - 2 * pw + kw
    Gh = -(-kh // sh)
    Gw = -(-kw // sw)
    OHf = (H + Gh - 1) * sh
    OWf = (W + Gw - 1) * sw

    # col2im: each (gh, gw) group tiles a dense (B, H*sh, W*sw, Cout) slab; the
    # full scatter is just Gh*Gw shifted pad+add terms (<= 6 here).
    acc_dtype = jnp.float32 if out_dtype == jnp.float32 else jnp.bfloat16
    canvas = jnp.zeros((B, OHf, OWf, Cout), acc_dtype)
    for gh in range(Gh):
        for gw in range(Gw):
            h0, h1 = gh * sh, min((gh + 1) * sh, kh)
            w0, w1 = gw * sw, min((gw + 1) * sw, kw)
            blk = cols[:, :, :, :, h0:h1, w0:w1]         # (B,H,W,Cout,dh,dw)
            blk = jnp.pad(blk, ((0, 0), (0, 0), (0, 0), (0, 0),
                                (0, sh - (h1 - h0)), (0, sw - (w1 - w0))))
            blk = blk.transpose(0, 1, 4, 2, 5, 3).reshape(B, H * sh, W * sw, Cout)
            canvas = canvas + jnp.pad(
                blk.astype(acc_dtype),
                ((0, 0), (h0, OHf - h0 - H * sh), (w0, OWf - w0 - W * sw), (0, 0)))

    # bias + activation folded into the final (XLA-fused) elementwise pass
    out = canvas[:, ph:ph + OH, pw:pw + OW, :] + b.reshape(1, 1, 1, Cout)
    if act == "relu":
        out = jnp.maximum(out, 0.0)
    return out.astype(out_dtype)


def conv_transpose2d_1x1_cl(z, w_mat, b_tap, ksize, act):
    """ConvTranspose2d with 1x1 input, stride 1, pad 0: a plain fused GEMM.

    z: (B, Cin), w_mat: (Cin, kh*kw*Cout) bf16, b_tap: bias tiled per tap.
    Returns (B, kh, kw, Cout) channel-last bf16."""
    kh, kw = ksize
    B = z.shape[0]
    Cout = w_mat.shape[1] // (kh * kw)
    y = matmul_bias_act(z, w_mat, b_tap, act=act, bias_mode="row",
                        out_dtype=jnp.bfloat16)          # (B, kh*kw*Cout)
    return y.reshape(B, kh, kw, Cout)


# ----------------------------------------------------------------------------
# Parameter setup: spectral norm once, then GEMM-ready (reshaped, bf16) weights
# ----------------------------------------------------------------------------
def spectral_normalize(w, dim=0, n_iters=5):
    perm = (dim,) + tuple(i for i in range(w.ndim) if i != dim)
    wm = jnp.transpose(w, perm).reshape(w.shape[dim], -1)
    u = jnp.ones((wm.shape[0],), jnp.float32) / jnp.sqrt(wm.shape[0])
    v = jnp.ones((wm.shape[1],), jnp.float32) / jnp.sqrt(wm.shape[1])
    for _ in range(n_iters):
        v = wm.T @ u
        v = v / (jnp.linalg.norm(v) + 1e-12)
        u = wm @ v
        u = u / (jnp.linalg.norm(u) + 1e-12)
    sigma = jnp.dot(u, wm @ v)
    return w / sigma


def init_params(key, channels, latent, vocab):
    ks = jax.random.split(key, 10)

    def conv_p(k, cout, cin, kh, kw):
        k1, k2 = jax.random.split(k)
        w = jax.random.normal(k1, (cout, cin, kh, kw), jnp.float32) / jnp.sqrt(cin * kh * kw)
        b = 0.01 * jax.random.normal(k2, (cout,), jnp.float32)
        w = spectral_normalize(w, dim=0)
        return w.reshape(cout, cin * kh * kw).astype(jnp.bfloat16), b

    def convT_p(k, cin, cout, kh, kw, first=False):
        k1, k2 = jax.random.split(k)
        w = jax.random.normal(k1, (cin, cout, kh, kw), jnp.float32) / jnp.sqrt(cin * kh * kw)
        b = 0.01 * jax.random.normal(k2, (cout,), jnp.float32)
        w = spectral_normalize(w, dim=1)   # torch default dim=1 for ConvTranspose
        if first:
            # 1x1-input layer -> plain GEMM with (kh, kw, Cout) column ordering
            wm = jnp.transpose(w, (0, 2, 3, 1)).reshape(cin, kh * kw * cout)
            return wm.astype(jnp.bfloat16), jnp.tile(b, kh * kw)
        # flipped col2im GEMM: columns ordered (Cout, kh, kw)
        return w.reshape(cin, cout * kh * kw).astype(jnp.bfloat16), b

    def lin_p(k, cin, cout):
        k1, k2 = jax.random.split(k)
        w = jax.random.normal(k1, (cout, cin), jnp.float32) / jnp.sqrt(cin)
        b = 0.01 * jax.random.normal(k2, (cout,), jnp.float32)
        w = spectral_normalize(w, dim=0)
        return w.T.astype(jnp.bfloat16), b           # stored as (in, out)

    return {
        "enc1": conv_p(ks[0], channels, 1, 3, 32),
        "enc2": conv_p(ks[1], channels, channels, 3, 12),
        "enc3": conv_p(ks[2], channels, channels, 3, 3),
        "enc4": conv_p(ks[3], latent, channels, 3, 3),
        "enc_fc": lin_p(ks[4], latent * 3 * 2, latent),          # ae_type = 0
        "dec1": convT_p(ks[5], latent, channels, 7, 4, first=True),
        "dec2": convT_p(ks[6], channels, channels, 3, 3),
        "dec3": convT_p(ks[7], channels, channels, 3, 12),
        "dec4": convT_p(ks[8], channels, 1, 3, 32),
        "dec_fc": lin_p(ks[9], 768, vocab),
    }


# ----------------------------------------------------------------------------
# Text_VAE.forward (ae_type = 0): returns (logits, decode_emb, z)
# ----------------------------------------------------------------------------
def text_vae_forward(params, embs):
    B, S, E = embs.shape
    # encode: torch view (B, 1, 15, 768) -> channel-first-of-all (1, B, 15, 768)
    x = embs.reshape(B, 1, S, E).transpose(1, 0, 2, 3).astype(jnp.bfloat16)
    x = conv2d_cf(x, *params["enc1"], ksize=(3, 32), stride=(1, 16), padding=(1, 8), act="leaky_relu")
    x = conv2d_cf(x, *params["enc2"], ksize=(3, 12), stride=(1, 6), padding=(0, 0), act="leaky_relu")
    x = conv2d_cf(x, *params["enc3"], ksize=(3, 3), stride=(2, 2), padding=(1, 1), act="leaky_relu")
    x = conv2d_cf(x, *params["enc4"], ksize=(3, 3), stride=(2, 1), padding=(0, 0), act="leaky_relu")
    flat = x.transpose(1, 0, 2, 3).reshape(B, -1)    # torch Flatten order (C, H, W)
    w_fc, b_fc = params["enc_fc"]
    z = matmul_bias_act(flat, w_fc, b_fc, act="none", bias_mode="row",
                        out_dtype=jnp.float32)       # (B, latent)

    # decode: latent viewed as (B, latent, 1, 1); activations kept channel-last
    d = conv_transpose2d_1x1_cl(z, *params["dec1"], ksize=(7, 4), act="relu")      # (B,7,4,ch)
    d = conv_transpose2d_cl(d, *params["dec2"], ksize=(3, 3), stride=(2, 2), padding=(1, 1), act="relu")
    d = conv_transpose2d_cl(d, *params["dec3"], ksize=(3, 12), stride=(1, 6), padding=(0, 0), act="relu")
    d = conv_transpose2d_cl(d, *params["dec4"], ksize=(3, 32), stride=(1, 16), padding=(1, 8),
                            act="none", out_dtype=jnp.float32)                      # (B,15,768,1)
    decode_emb = d[..., 0]                           # (B, 15, 768)

    w_dfc, b_dfc = params["dec_fc"]
    logits = matmul_bias_act(decode_emb.reshape(B * S, E), w_dfc, b_dfc,
                             act="none", bias_mode="row",
                             out_dtype=jnp.float32)  # (B*15, vocab)
    return logits, decode_emb, z


if __name__ == "__main__":
    # seq_len=15 / emb_size=768 are structurally fixed by the module
    # (decoder_fc Linear(768, ...) and .view(-1, 15, 768)); channels/latent/
    # vocab are reduced from the defaults (256/128/2098) to keep this small.
    B, seq_len, emb_size = 2, 15, 768
    channels, latent, vocab = 32, 16, 256

    key = jax.random.PRNGKey(0)
    pkey, xkey = jax.random.split(key)
    params = init_params(pkey, channels, latent, vocab)
    embs = jax.random.normal(xkey, (B, seq_len, emb_size), jnp.float32)

    fwd = jax.jit(text_vae_forward)
    logits, decode_emb, z = fwd(params, embs)
    jax.block_until_ready((logits, decode_emb, z))

    assert logits.shape == (B * seq_len, vocab)
    assert decode_emb.shape == (B, seq_len, emb_size)
    assert z.shape == (B, latent)
    assert bool(jnp.all(jnp.isfinite(logits))) and bool(jnp.all(jnp.isfinite(decode_emb)))
    print("KERNEL_OK")
</pallas_src>

<mosaic_0001>
module attributes {stable_mosaic.version = 11 : i64} {
  func.func @_mm_kernel_single(%arg0: i32, %arg1: i32, %arg2: memref<32x96xbf16, #tpu.memory_space<vmem>>, %arg3: memref<96x1536xbf16, #tpu.memory_space<vmem>>, %arg4: memref<32x1xf32, #tpu.memory_space<vmem>>, %arg5: memref<32x1536xbf16, #tpu.memory_space<vmem>>) attributes {dimension_semantics = [#tpu.dimension_semantics<parallel>, #tpu.dimension_semantics<parallel>], iteration_bounds = array<i64: 1, 1>, scalar_prefetch = 0 : i64, scratch_operands = 0 : i64, tpu.core_type = #tpu.core_type<tc>, window_params = [{transform_indices = @transform_0, window_bounds = array<i64: 32, 96>}, {transform_indices = @transform_1, window_bounds = array<i64: 96, 1536>}, {transform_indices = @transform_2, window_bounds = array<i64: 32, 1>}, {transform_indices = @transform_3, window_bounds = array<i64: 32, 1536>}]} {
    %c0 = arith.constant 0 : index
    %c0_0 = arith.constant 0 : index
    %0 = vector.load %arg2[%c0, %c0_0] : memref<32x96xbf16, #tpu.memory_space<vmem>>, vector<32x96xbf16>
    %c0_1 = arith.constant 0 : index
    %c0_2 = arith.constant 0 : index
    %1 = vector.load %arg3[%c0_1, %c0_2] : memref<96x1536xbf16, #tpu.memory_space<vmem>>, vector<96x1536xbf16>
    %cst = arith.constant dense<0.000000e+00> : vector<32x1536xf32>
    %2 = tpu.matmul %0, %1, %cst {dimension_numbers = #tpu.dot_dimension_numbers<[1], [0], [0], [1], [0, 0, 1, 1], [], []>} : vector<32x96xbf16>, vector<96x1536xbf16>, vector<32x1536xf32> -> vector<32x1536xf32>
    %c0_3 = arith.constant 0 : index
    %c0_4 = arith.constant 0 : index
    %3 = vector.load %arg4[%c0_3, %c0_4] : memref<32x1xf32, #tpu.memory_space<vmem>>, vector<32x1xf32>
    %4 = vector.broadcast %3 : vector<32x1xf32> to vector<32x1536xf32>
    %5 = arith.addf %2, %4 : vector<32x1536xf32>
    %cst_5 = arith.constant 0.000000e+00 : f32
    %6 = vector.broadcast %cst_5 : f32 to vector<32x1536xf32>
    %7 = arith.cmpf ogt, %5, %6 : vector<32x1536xf32>
    %cst_6 = arith.constant 1.000000e-01 : f32
    %8 = vector.broadcast %cst_6 : f32 to vector<32x1536xf32>
    %9 = arith.mulf %8, %5 : vector<32x1536xf32>
    %10 = arith.select %7, %5, %9 : vector<32x1536xi1>, vector<32x1536xf32>
    %11 = arith.truncf %10 : vector<32x1536xf32> to vector<32x1536xbf16>
    %c0_7 = arith.constant 0 : index
    %c0_8 = arith.constant 0 : index
    %12 = vector.load %arg5[%c0_7, %c0_8] : memref<32x1536xbf16, #tpu.memory_space<vmem>>, vector<32x1536xbf16>
    tpu.vector_store %arg5[%c0_7, %c0_8], %11 {strides = array<i32>} : memref<32x1536xbf16, #tpu.memory_space<vmem>>, vector<32x1536xbf16>,
    return
  }
  func.func @transform_0(%arg0: i32, %arg1: i32) -> (i32, i32) {
    %c0_i32 = arith.constant 0 : i32
    %c0_i32_0 = arith.constant 0 : i32
    return %arg0, %c0_i32 : i32, i32
  }
  func.func @transform_1(%arg0: i32, %arg1: i32) -> (i32, i32) {
    %c0_i32 = arith.constant 0 : i32
    %c0_i32_0 = arith.constant 0 : i32
    return %c0_i32, %arg1 : i32, i32
  }
  func.func @transform_2(%arg0: i32, %arg1: i32) -> (i32, i32) {
    %c0_i32 = arith.constant 0 : i32
    %c0_i32_0 = arith.constant 0 : i32
    return %arg0, %c0_i32 : i32, i32
  }
  func.func @transform_3(%arg0: i32, %arg1: i32) -> (i32, i32) {
    %c0_i32 = arith.constant 0 : i32
    return %arg0, %arg1 : i32, i32
  }
}

module attributes {stable_mosaic.version = 11 : i64} {
  func.func @_mm_kernel_single(%arg0: i32, %arg1: i32, %arg2: memref<32x1152xbf16, #tpu.memory_space<vmem>>, %arg3: memref<1152x256xbf16, #tpu.memory_space<vmem>>, %arg4: memref<32x1xf32, #tpu.memory_space<vmem>>, %arg5: memref<32x256xbf16, #tpu.memory_space<vmem>>) attributes {dimension_semantics = [#tpu.dimension_semantics<parallel>, #tpu.dimension_semantics<parallel>], iteration_bounds = array<i64: 1, 1>, scalar_prefetch = 0 : i64, scratch_operands = 0 : i64, tpu.core_type = #tpu.core_type<tc>, window_params = [{transform_indices = @transform_0, window_bounds = array<i64: 32, 1152>}, {transform_indices = @transform_1, window_bounds = array<i64: 1152, 256>}, {transform_indices = @transform_2, window_bounds = array<i64: 32, 1>}, {transform_indices = @transform_3, window_bounds = array<i64: 32, 256>}]} {
    %c0 = arith.constant 0 : index
    %c0_0 = arith.constant 0 : index
    %0 = vector.load %arg2[%c0, %c0_0] : memref<32x1152xbf16, #tpu.memory_space<vmem>>, vector<32x1152xbf16>
    %c0_1 = arith.constant 0 : index
    %c0_2 = arith.constant 0 : index
    %1 = vector.load %arg3[%c0_1, %c0_2] : memref<1152x256xbf16, #tpu.memory_space<vmem>>, vector<1152x256xbf16>
    %cst = arith.constant dense<0.000000e+00> : vector<32x256xf32>
    %2 = tpu.matmul %0, %1, %cst {dimension_numbers = #tpu.dot_dimension_numbers<[1], [0], [0], [1], [0, 0, 1, 1], [], []>} : vector<32x1152xbf16>, vector<1152x256xbf16>, vector<32x256xf32> -> vector<32x256xf32>
    %c0_3 = arith.constant 0 : index
    %c0_4 = arith.constant 0 : index
    %3 = vector.load %arg4[%c0_3, %c0_4] : memref<32x1xf32, #tpu.memory_space<vmem>>, vector<32x1xf32>
    %4 = vector.broadcast %3 : vector<32x1xf32> to vector<32x256xf32>
    %5 = arith.addf %2, %4 : vector<32x256xf32>
    %cst_5 = arith.constant 0.000000e+00 : f32
    %6 = vector.broadcast %cst_5 : f32 to vector<32x256xf32>
    %7 = arith.cmpf ogt, %5, %6 : vector<32x256xf32>
    %cst_6 = arith.constant 1.000000e-01 : f32
    %8 = vector.broadcast %cst_6 : f32 to vector<32x256xf32>
    %9 = arith.mulf %8, %5 : vector<32x256xf32>
    %10 = arith.select %7, %5, %9 : vector<32x256xi1>, vector<32x256xf32>
    %11 = arith.truncf %10 : vector<32x256xf32> to vector<32x256xbf16>
    %c0_7 = arith.constant 0 : index
    %c0_8 = arith.constant 0 : index
    %12 = vector.load %arg5[%c0_7, %c0_8] : memref<32x256xbf16, #tpu.memory_space<vmem>>, vector<32x256xbf16>
    tpu.vector_store %arg5[%c0_7, %c0_8], %11 {strides = array<i32>} : memref<32x256xbf16, #tpu.memory_space<vmem>>, vector<32x256xbf16>,
    return
  }
  func.func @transform_0(%arg0: i32, %arg1: i32) -> (i32, i32) {
    %c0_i32 = arith.constant 0 : i32
    %c0_i32_0 = arith.constant 0 : i32
    return %arg0, %c0_i32 : i32, i32
  }
  func.func @transform_1(%arg0: i32, %arg1: i32) -> (i32, i32) {
    %c0_i32 = arith.constant 0 : i32
    %c0_i32_0 = arith.constant 0 : i32
    return %c0_i32, %arg1 : i32, i32
  }
  func.func @transform_2(%arg0: i32, %arg1: i32) -> (i32, i32) {
    %c0_i32 = arith.constant 0 : i32
    %c0_i32_0 = arith.constant 0 : i32
    return %arg0, %c0_i32 : i32, i32
  }
  func.func @transform_3(%arg0: i32, %arg1: i32) -> (i32, i32) {
    %c0_i32 = arith.constant 0 : i32
    return %arg0, %arg1 : i32, i32
  }
}

module attributes {stable_mosaic.version = 11 : i64} {
  func.func @_mm_kernel_single(%arg0: i32, %arg1: i32, %arg2: memref<32x288xbf16, #tpu.memory_space<vmem>>, %arg3: memref<288x128xbf16, #tpu.memory_space<vmem>>, %arg4: memref<32x1xf32, #tpu.memory_space<vmem>>, %arg5: memref<32x128xbf16, #tpu.memory_space<vmem>>) attributes {dimension_semantics = [#tpu.dimension_semantics<parallel>, #tpu.dimension_semantics<parallel>], iteration_bounds = array<i64: 1, 1>, scalar_prefetch = 0 : i64, scratch_operands = 0 : i64, tpu.core_type = #tpu.core_type<tc>, window_params = [{transform_indices = @transform_0, window_bounds = array<i64: 32, 288>}, {transform_indices = @transform_1, window_bounds = array<i64: 288, 128>}, {transform_indices = @transform_2, window_bounds = array<i64: 32, 1>}, {transform_indices = @transform_3, window_bounds = array<i64: 32, 128>}]} {
    %c0 = arith.constant 0 : index
    %c0_0 = arith.constant 0 : index
    %0 = vector.load %arg2[%c0, %c0_0] : memref<32x288xbf16, #tpu.memory_space<vmem>>, vector<32x288xbf16>
    %c0_1 = arith.constant 0 : index
    %c0_2 = arith.constant 0 : index
    %1 = vector.load %arg3[%c0_1, %c0_2] : memref<288x128xbf16, #tpu.memory_space<vmem>>, vector<288x128xbf16>
    %cst = arith.constant dense<0.000000e+00> : vector<32x128xf32>
    %2 = tpu.matmul %0, %1, %cst {dimension_numbers = #tpu.dot_dimension_numbers<[1], [0], [0], [1], [0, 0, 1, 1], [], []>} : vector<32x288xbf16>, vector<288x128xbf16>, vector<32x128xf32> -> vector<32x128xf32>
    %c0_3 = arith.constant 0 : index
    %c0_4 = arith.constant 0 : index
    %3 = vector.load %arg4[%c0_3, %c0_4] : memref<32x1xf32, #tpu.memory_space<vmem>>, vector<32x1xf32>
    %4 = vector.broadcast %3 : vector<32x1xf32> to vector<32x128xf32>
    %5 = arith.addf %2, %4 : vector<32x128xf32>
    %cst_5 = arith.constant 0.000000e+00 : f32
    %6 = vector.broadcast %cst_5 : f32 to vector<32x128xf32>
    %7 = arith.cmpf ogt, %5, %6 : vector<32x128xf32>
    %cst_6 = arith.constant 1.000000e-01 : f32
    %8 = vector.broadcast %cst_6 : f32 to vector<32x128xf32>
    %9 = arith.mulf %8, %5 : vector<32x128xf32>
    %10 = arith.select %7, %5, %9 : vector<32x128xi1>, vector<32x128xf32>
    %11 = arith.truncf %10 : vector<32x128xf32> to vector<32x128xbf16>
    %c0_7 = arith.constant 0 : index
    %c0_8 = arith.constant 0 : index
    %12 = vector.load %arg5[%c0_7, %c0_8] : memref<32x128xbf16, #tpu.memory_space<vmem>>, vector<32x128xbf16>
    tpu.vector_store %arg5[%c0_7, %c0_8], %11 {strides = array<i32>} : memref<32x128xbf16, #tpu.memory_space<vmem>>, vector<32x128xbf16>,
    return
  }
  func.func @transform_0(%arg0: i32, %arg1: i32) -> (i32, i32) {
    %c0_i32 = arith.constant 0 : i32
    %c0_i32_0 = arith.constant 0 : i32
    return %arg0, %c0_i32 : i32, i32
  }
  func.func @transform_1(%arg0: i32, %arg1: i32) -> (i32, i32) {
    %c0_i32 = arith.constant 0 : i32
    %c0_i32_0 = arith.constant 0 : i32
    return %c0_i32, %arg1 : i32, i32
  }
  func.func @transform_2(%arg0: i32, %arg1: i32) -> (i32, i32) {
    %c0_i32 = arith.constant 0 : i32
    %c0_i32_0 = arith.constant 0 : i32
    return %arg0, %c0_i32 : i32, i32
  }
  func.func @transform_3(%arg0: i32, %arg1: i32) -> (i32, i32) {
    %c0_i32 = arith.constant 0 : i32
    return %arg0, %arg1 : i32, i32
  }
}

module attributes {stable_mosaic.version = 11 : i64} {
  func.func @_mm_kernel_single(%arg0: i32, %arg1: i32, %arg2: memref<16x288xbf16, #tpu.memory_space<vmem>>, %arg3: memref<288x128xbf16, #tpu.memory_space<vmem>>, %arg4: memref<16x1xf32, #tpu.memory_space<vmem>>, %arg5: memref<16x128xbf16, #tpu.memory_space<vmem>>) attributes {dimension_semantics = [#tpu.dimension_semantics<parallel>, #tpu.dimension_semantics<parallel>], iteration_bounds = array<i64: 1, 1>, scalar_prefetch = 0 : i64, scratch_operands = 0 : i64, tpu.core_type = #tpu.core_type<tc>, window_params = [{transform_indices = @transform_0, window_bounds = array<i64: 16, 288>}, {transform_indices = @transform_1, window_bounds = array<i64: 288, 128>}, {transform_indices = @transform_2, window_bounds = array<i64: 16, 1>}, {transform_indices = @transform_3, window_bounds = array<i64: 16, 128>}]} {
    %c0 = arith.constant 0 : index
    %c0_0 = arith.constant 0 : index
    %0 = vector.load %arg2[%c0, %c0_0] : memref<16x288xbf16, #tpu.memory_space<vmem>>, vector<16x288xbf16>
    %c0_1 = arith.constant 0 : index
    %c0_2 = arith.constant 0 : index
    %1 = vector.load %arg3[%c0_1, %c0_2] : memref<288x128xbf16, #tpu.memory_space<vmem>>, vector<288x128xbf16>
    %cst = arith.constant dense<0.000000e+00> : vector<16x128xf32>
    %2 = tpu.matmul %0, %1, %cst {dimension_numbers = #tpu.dot_dimension_numbers<[1], [0], [0], [1], [0, 0, 1, 1], [], []>} : vector<16x288xbf16>, vector<288x128xbf16>, vector<16x128xf32> -> vector<16x128xf32>
    %c0_3 = arith.constant 0 : index
    %c0_4 = arith.constant 0 : index
    %3 = vector.load %arg4[%c0_3, %c0_4] : memref<16x1xf32, #tpu.memory_space<vmem>>, vector<16x1xf32>
    %4 = vector.broadcast %3 : vector<16x1xf32> to vector<16x128xf32>
    %5 = arith.addf %2, %4 : vector<16x128xf32>
    %cst_5 = arith.constant 0.000000e+00 : f32
    %6 = vector.broadcast %cst_5 : f32 to vector<16x128xf32>
    %7 = arith.cmpf ogt, %5, %6 : vector<16x128xf32>
    %cst_6 = arith.constant 1.000000e-01 : f32
    %8 = vector.broadcast %cst_6 : f32 to vector<16x128xf32>
    %9 = arith.mulf %8, %5 : vector<16x128xf32>
    %10 = arith.select %7, %5, %9 : vector<16x128xi1>, vector<16x128xf32>
    %11 = arith.truncf %10 : vector<16x128xf32> to vector<16x128xbf16>
    %c0_7 = arith.constant 0 : index
    %c0_8 = arith.constant 0 : index
    %12 = vector.load %arg5[%c0_7, %c0_8] : memref<16x128xbf16, #tpu.memory_space<vmem>>, vector<16x128xbf16>
    tpu.vector_store %arg5[%c0_7, %c0_8], %11 {strides = array<i32>} : memref<16x128xbf16, #tpu.memory_space<vmem>>, vector<16x128xbf16>,
    return
  }
  func.func @transform_0(%arg0: i32, %arg1: i32) -> (i32, i32) {
    %c0_i32 = arith.constant 0 : i32
    %c0_i32_0 = arith.constant 0 : i32
    return %arg0, %c0_i32 : i32, i32
  }
  func.func @transform_1(%arg0: i32, %arg1: i32) -> (i32, i32) {
    %c0_i32 = arith.constant 0 : i32
    %c0_i32_0 = arith.constant 0 : i32
    return %c0_i32, %arg1 : i32, i32
  }
  func.func @transform_2(%arg0: i32, %arg1: i32) -> (i32, i32) {
    %c0_i32 = arith.constant 0 : i32
    %c0_i32_0 = arith.constant 0 : i32
    return %arg0, %c0_i32 : i32, i32
  }
  func.func @transform_3(%arg0: i32, %arg1: i32) -> (i32, i32) {
    %c0_i32 = arith.constant 0 : i32
    return %arg0, %arg1 : i32, i32
  }
}

module attributes {stable_mosaic.version = 11 : i64} {
  func.func @_mm_kernel_single(%arg0: i32, %arg1: i32, %arg2: memref<8x96xbf16, #tpu.memory_space<vmem>>, %arg3: memref<96x128xbf16, #tpu.memory_space<vmem>>, %arg4: memref<1x128xf32, #tpu.memory_space<vmem>>, %arg5: memref<8x128xf32, #tpu.memory_space<vmem>>) attributes {dimension_semantics = [#tpu.dimension_semantics<parallel>, #tpu.dimension_semantics<parallel>], iteration_bounds = array<i64: 1, 1>, scalar_prefetch = 0 : i64, scratch_operands = 0 : i64, tpu.core_type = #tpu.core_type<tc>, window_params = [{transform_indices = @transform_0, window_bounds = array<i64: 8, 96>}, {transform_indices = @transform_1, window_bounds = array<i64: 96, 128>}, {transform_indices = @transform_2, window_bounds = array<i64: 1, 128>}, {transform_indices = @transform_3, window_bounds = array<i64: 8, 128>}]} {
    %c0 = arith.constant 0 : index
    %c0_0 = arith.constant 0 : index
    %0 = vector.load %arg2[%c0, %c0_0] : memref<8x96xbf16, #tpu.memory_space<vmem>>, vector<8x96xbf16>
    %c0_1 = arith.constant 0 : index
    %c0_2 = arith.constant 0 : index
    %1 = vector.load %arg3[%c0_1, %c0_2] : memref<96x128xbf16, #tpu.memory_space<vmem>>, vector<96x128xbf16>
    %cst = arith.constant dense<0.000000e+00> : vector<8x128xf32>
    %2 = tpu.matmul %0, %1, %cst {dimension_numbers = #tpu.dot_dimension_numbers<[1], [0], [0], [1], [0, 0, 1, 1], [], []>} : vector<8x96xbf16>, vector<96x128xbf16>, vector<8x128xf32> -> vector<8x128xf32>
    %c0_3 = arith.constant 0 : index
    %c0_4 = arith.constant 0 : index
    %3 = vector.load %arg4[%c0_3, %c0_4] : memref<1x128xf32, #tpu.memory_space<vmem>>, vector<1x128xf32>
    %4 = vector.broadcast %3 : vector<1x128xf32> to vector<8x128xf32>
    %5 = arith.addf %2, %4 : vector<8x128xf32>
    %c0_5 = arith.constant 0 : index
    %c0_6 = arith.constant 0 : index
    %6 = vector.load %arg5[%c0_5, %c0_6] : memref<8x128xf32, #tpu.memory_space<vmem>>, vector<8x128xf32>
    tpu.vector_store %arg5[%c0_5, %c0_6], %5 {strides = array<i32>} : memref<8x128xf32, #tpu.memory_space<vmem>>, vector<8x128xf32>,
    return
  }
  func.func @transform_0(%arg0: i32, %arg1: i32) -> (i32, i32) {
    %c0_i32 = arith.constant 0 : i32
    %c0_i32_0 = arith.constant 0 : i32
    return %arg0, %c0_i32 : i32, i32
  }
  func.func @transform_1(%arg0: i32, %arg1: i32) -> (i32, i32) {
    %c0_i32 = arith.constant 0 : i32
    %c0_i32_0 = arith.constant 0 : i32
    return %c0_i32, %arg1 : i32, i32
  }
  func.func @transform_2(%arg0: i32, %arg1: i32) -> (i32, i32) {
    %c0_i32 = arith.constant 0 : i32
    %c0_i32_0 = arith.constant 0 : i32
    return %c0_i32, %arg1 : i32, i32
  }
  func.func @transform_3(%arg0: i32, %arg1: i32) -> (i32, i32) {
    %c0_i32 = arith.constant 0 : i32
    return %arg0, %arg1 : i32, i32
  }
}

module attributes {stable_mosaic.version = 11 : i64} {
  func.func @_mm_kernel_single(%arg0: i32, %arg1: i32, %arg2: memref<8x16xbf16, #tpu.memory_space<vmem>>, %arg3: memref<16x896xbf16, #tpu.memory_space<vmem>>, %arg4: memref<1x896xf32, #tpu.memory_space<vmem>>, %arg5: memref<8x896xbf16, #tpu.memory_space<vmem>>) attributes {dimension_semantics = [#tpu.dimension_semantics<parallel>, #tpu.dimension_semantics<parallel>], iteration_bounds = array<i64: 1, 1>, scalar_prefetch = 0 : i64, scratch_operands = 0 : i64, tpu.core_type = #tpu.core_type<tc>, window_params = [{transform_indices = @transform_0, window_bounds = array<i64: 8, 16>}, {transform_indices = @transform_1, window_bounds = array<i64: 16, 896>}, {transform_indices = @transform_2, window_bounds = array<i64: 1, 896>}, {transform_indices = @transform_3, window_bounds = array<i64: 8, 896>}]} {
    %c0 = arith.constant 0 : index
    %c0_0 = arith.constant 0 : index
    %0 = vector.load %arg2[%c0, %c0_0] : memref<8x16xbf16, #tpu.memory_space<vmem>>, vector<8x16xbf16>
    %c0_1 = arith.constant 0 : index
    %c0_2 = arith.constant 0 : index
    %1 = vector.load %arg3[%c0_1, %c0_2] : memref<16x896xbf16, #tpu.memory_space<vmem>>, vector<16x896xbf16>
    %cst = arith.constant dense<0.000000e+00> : vector<8x896xf32>
    %2 = tpu.matmul %0, %1, %cst {dimension_numbers = #tpu.dot_dimension_numbers<[1], [0], [0], [1], [0, 0, 1, 1], [], []>} : vector<8x16xbf16>, vector<16x896xbf16>, vector<8x896xf32> -> vector<8x896xf32>
    %c0_3 = arith.constant 0 : index
    %c0_4 = arith.constant 0 : index
    %3 = vector.load %arg4[%c0_3, %c0_4] : memref<1x896xf32, #tpu.memory_space<vmem>>, vector<1x896xf32>
    %4 = vector.broadcast %3 : vector<1x896xf32> to vector<8x896xf32>
    %5 = arith.addf %2, %4 : vector<8x896xf32>
    %cst_5 = arith.constant 0.000000e+00 : f32
    %6 = vector.broadcast %cst_5 : f32 to vector<8x896xf32>
    %7 = arith.maximumf %5, %6 : vector<8x896xf32>
    %8 = arith.truncf %7 : vector<8x896xf32> to vector<8x896xbf16>
    %c0_6 = arith.constant 0 : index
    %c0_7 = arith.constant 0 : index
    %9 = vector.load %arg5[%c0_6, %c0_7] : memref<8x896xbf16, #tpu.memory_space<vmem>>, vector<8x896xbf16>
    tpu.vector_store %arg5[%c0_6, %c0_7], %8 {strides = array<i32>} : memref<8x896xbf16, #tpu.memory_space<vmem>>, vector<8x896xbf16>,
    return
  }
  func.func @transform_0(%arg0: i32, %arg1: i32) -> (i32, i32) {
    %c0_i32 = arith.constant 0 : i32
    %c0_i32_0 = arith.constant 0 : i32
    return %arg0, %c0_i32 : i32, i32
  }
  func.func @transform_1(%arg0: i32, %arg1: i32) -> (i32, i32) {
    %c0_i32 = arith.constant 0 : i32
    %c0_i32_0 = arith.constant 0 : i32
    return %c0_i32, %arg1 : i32, i32
  }
  func.func @transform_2(%arg0: i32, %arg1: i32) -> (i32, i32) {
    %c0_i32 = arith.constant 0 : i32
    %c0_i32_0 = arith.constant 0 : i32
    return %c0_i32, %arg1 : i32, i32
  }
  func.func @transform_3(%arg0: i32, %arg1: i32) -> (i32, i32) {
    %c0_i32 = arith.constant 0 : i32
    return %arg0, %arg1 : i32, i32
  }
}

module attributes {stable_mosaic.version = 11 : i64} {
  func.func @_mm_kernel_single(%arg0: i32, %arg1: i32, %arg2: memref<56x32xbf16, #tpu.memory_space<vmem>>, %arg3: memref<32x384xbf16, #tpu.memory_space<vmem>>, %arg4: memref<56x384xbf16, #tpu.memory_space<vmem>>) attributes {dimension_semantics = [#tpu.dimension_semantics<parallel>, #tpu.dimension_semantics<parallel>], iteration_bounds = array<i64: 1, 1>, scalar_prefetch = 0 : i64, scratch_operands = 0 : i64, tpu.core_type = #tpu.core_type<tc>, window_params = [{transform_indices = @transform_0, window_bounds = array<i64: 56, 32>}, {transform_indices = @transform_1, window_bounds = array<i64: 32, 384>}, {transform_indices = @transform_2, window_bounds = array<i64: 56, 384>}]} {
    %c0 = arith.constant 0 : index
    %c0_0 = arith.constant 0 : index
    %0 = vector.load %arg2[%c0, %c0_0] : memref<56x32xbf16, #tpu.memory_space<vmem>>, vector<56x32xbf16>
    %c0_1 = arith.constant 0 : index
    %c0_2 = arith.constant 0 : index
    %1 = vector.load %arg3[%c0_1, %c0_2] : memref<32x384xbf16, #tpu.memory_space<vmem>>, vector<32x384xbf16>
    %cst = arith.constant dense<0.000000e+00> : vector<56x384xf32>
    %2 = tpu.matmul %0, %1, %cst {dimension_numbers = #tpu.dot_dimension_numbers<[1], [0], [0], [1], [0, 0, 1, 1], [], []>} : vector<56x32xbf16>, vector<32x384xbf16>, vector<56x384xf32> -> vector<56x384xf32>
    %3 = arith.truncf %2 : vector<56x384xf32> to vector<56x384xbf16>
    %c0_3 = arith.constant 0 : index
    %c0_4 = arith.constant 0 : index
    %4 = vector.load %arg4[%c0_3, %c0_4] : memref<56x384xbf16, #tpu.memory_space<vmem>>, vector<56x384xbf16>
    tpu.vector_store %arg4[%c0_3, %c0_4], %3 {strides = array<i32>} : memref<56x384xbf16, #tpu.memory_space<vmem>>, vector<56x384xbf16>,
    return
  }
  func.func @transform_0(%arg0: i32, %arg1: i32) -> (i32, i32) {
    %c0_i32 = arith.constant 0 : i32
    %c0_i32_0 = arith.constant 0 : i32
    return %arg0, %c0_i32 : i32, i32
  }
  func.func @transform_1(%arg0: i32, %arg1: i32) -> (i32, i32) {
    %c0_i32 = arith.constant 0 : i32
    %c0_i32_0 = arith.constant 0 : i32
    return %c0_i32, %arg1 : i32, i32
  }
  func.func @transform_2(%arg0: i32, %arg1: i32) -> (i32, i32) {
    %c0_i32 = arith.constant 0 : i32
    return %arg0, %arg1 : i32, i32
  }
}

module attributes {stable_mosaic.version = 11 : i64} {
  func.func @_mm_kernel_single(%arg0: i32, %arg1: i32, %arg2: memref<184x32xbf16, #tpu.memory_space<vmem>>, %arg3: memref<32x1152xbf16, #tpu.memory_space<vmem>>, %arg4: memref<184x1152xbf16, #tpu.memory_space<vmem>>) attributes {dimension_semantics = [#tpu.dimension_semantics<parallel>, #tpu.dimension_semantics<parallel>], iteration_bounds = array<i64: 1, 1>, scalar_prefetch = 0 : i64, scratch_operands = 0 : i64, tpu.core_type = #tpu.core_type<tc>, window_params = [{transform_indices = @transform_0, window_bounds = array<i64: 184, 32>}, {transform_indices = @transform_1, window_bounds = array<i64: 32, 1152>}, {transform_indices = @transform_2, window_bounds = array<i64: 184, 1152>}]} {
    %c0 = arith.constant 0 : index
    %c0_0 = arith.constant 0 : index
    %0 = vector.load %arg2[%c0, %c0_0] : memref<184x32xbf16, #tpu.memory_space<vmem>>, vector<184x32xbf16>
    %c0_1 = arith.constant 0 : index
    %c0_2 = arith.constant 0 : index
    %1 = vector.load %arg3[%c0_1, %c0_2] : memref<32x1152xbf16, #tpu.memory_space<vmem>>, vector<32x1152xbf16>
    %cst = arith.constant dense<0.000000e+00> : vector<184x1152xf32>
    %2 = tpu.matmul %0, %1, %cst {dimension_numbers = #tpu.dot_dimension_numbers<[1], [0], [0], [1], [0, 0, 1, 1], [], []>} : vector<184x32xbf16>, vector<32x1152xbf16>, vector<184x1152xf32> -> vector<184x1152xf32>
    %3 = arith.truncf %2 : vector<184x1152xf32> to vector<184x1152xbf16>
    %c0_3 = arith.constant 0 : index
    %c0_4 = arith.constant 0 : index
    %4 = vector.load %arg4[%c0_3, %c0_4] : memref<184x1152xbf16, #tpu.memory_space<vmem>>, vector<184x1152xbf16>
    tpu.vector_store %arg4[%c0_3, %c0_4], %3 {strides = array<i32>} : memref<184x1152xbf16, #tpu.memory_space<vmem>>, vector<184x1152xbf16>,
    return
  }
  func.func @transform_0(%arg0: i32, %arg1: i32) -> (i32, i32) {
    %c0_i32 = arith.constant 0 : i32
    %c0_i32_0 = arith.constant 0 : i32
    return %arg0, %c0_i32 : i32, i32
  }
  func.func @transform_1(%arg0: i32, %arg1: i32) -> (i32, i32) {
    %c0_i32 = arith.constant 0 : i32
    %c0_i32_0 = arith.constant 0 : i32
    return %c0_i32, %arg1 : i32, i32
  }
  func.func @transform_2(%arg0: i32, %arg1: i32) -> (i32, i32) {
    %c0_i32 = arith.constant 0 : i32
    return %arg0, %arg1 : i32, i32
  }
}

module attributes {stable_mosaic.version = 11 : i64} {
  func.func @_mm_kernel_single(%arg0: i32, %arg1: i32, %arg2: memref<1440x32xbf16, #tpu.memory_space<vmem>>, %arg3: memref<32x128xbf16, #tpu.memory_space<vmem>>, %arg4: memref<1440x128xbf16, #tpu.memory_space<vmem>>) attributes {dimension_semantics = [#tpu.dimension_semantics<parallel>, #tpu.dimension_semantics<parallel>], iteration_bounds = array<i64: 1, 1>, scalar_prefetch = 0 : i64, scratch_operands = 0 : i64, tpu.core_type = #tpu.core_type<tc>, window_params = [{transform_indices = @transform_0, window_bounds = array<i64: 1440, 32>}, {transform_indices = @transform_1, window_bounds = array<i64: 32, 128>}, {transform_indices = @transform_2, window_bounds = array<i64: 1440, 128>}]} {
    %c0 = arith.constant 0 : index
    %c0_0 = arith.constant 0 : index
    %0 = vector.load %arg2[%c0, %c0_0] : memref<1440x32xbf16, #tpu.memory_space<vmem>>, vector<1440x32xbf16>
    %c0_1 = arith.constant 0 : index
    %c0_2 = arith.constant 0 : index
    %1 = vector.load %arg3[%c0_1, %c0_2] : memref<32x128xbf16, #tpu.memory_space<vmem>>, vector<32x128xbf16>
    %cst = arith.constant dense<0.000000e+00> : vector<1440x128xf32>
    %2 = tpu.matmul %0, %1, %cst {dimension_numbers = #tpu.dot_dimension_numbers<[1], [0], [0], [1], [0, 0, 1, 1], [], []>} : vector<1440x32xbf16>, vector<32x128xbf16>, vector<1440x128xf32> -> vector<1440x128xf32>
    %3 = arith.truncf %2 : vector<1440x128xf32> to vector<1440x128xbf16>
    %c0_3 = arith.constant 0 : index
    %c0_4 = arith.constant 0 : index
    %4 = vector.load %arg4[%c0_3, %c0_4] : memref<1440x128xbf16, #tpu.memory_space<vmem>>, vector<1440x128xbf16>
    tpu.vector_store %arg4[%c0_3, %c0_4], %3 {strides = array<i32>} : memref<1440x128xbf16, #tpu.memory_space<vmem>>, vector<1440x128xbf16>,
    return
  }
  func.func @transform_0(%arg0: i32, %arg1: i32) -> (i32, i32) {
    %c0_i32 = arith.constant 0 : i32
    %c0_i32_0 = arith.constant 0 : i32
    return %arg0, %c0_i32 : i32, i32
  }
  func.func @transform_1(%arg0: i32, %arg1: i32) -> (i32, i32) {
    %c0_i32 = arith.constant 0 : i32
    %c0_i32_0 = arith.constant 0 : i32
    return %c0_i32, %arg1 : i32, i32
  }
  func.func @transform_2(%arg0: i32, %arg1: i32) -> (i32, i32) {
    %c0_i32 = arith.constant 0 : i32
    return %arg0, %arg1 : i32, i32
  }
}

module attributes {stable_mosaic.version = 11 : i64} {
  func.func @_mm_kernel_single(%arg0: i32, %arg1: i32, %arg2: memref<32x768xbf16, #tpu.memory_space<vmem>>, %arg3: memref<768x256xbf16, #tpu.memory_space<vmem>>, %arg4: memref<1x256xf32, #tpu.memory_space<vmem>>, %arg5: memref<32x256xf32, #tpu.memory_space<vmem>>) attributes {dimension_semantics = [#tpu.dimension_semantics<parallel>, #tpu.dimension_semantics<parallel>], iteration_bounds = array<i64: 1, 1>, scalar_prefetch = 0 : i64, scratch_operands = 0 : i64, tpu.core_type = #tpu.core_type<tc>, window_params = [{transform_indices = @transform_0, window_bounds = array<i64: 32, 768>}, {transform_indices = @transform_1, window_bounds = array<i64: 768, 256>}, {transform_indices = @transform_2, window_bounds = array<i64: 1, 256>}, {transform_indices = @transform_3, window_bounds = array<i64: 32, 256>}]} {
    %c0 = arith.constant 0 : index
    %c0_0 = arith.constant 0 : index
    %0 = vector.load %arg2[%c0, %c0_0] : memref<32x768xbf16, #tpu.memory_space<vmem>>, vector<32x768xbf16>
    %c0_1 = arith.constant 0 : index
    %c0_2 = arith.constant 0 : index
    %1 = vector.load %arg3[%c0_1, %c0_2] : memref<768x256xbf16, #tpu.memory_space<vmem>>, vector<768x256xbf16>
    %cst = arith.constant dense<0.000000e+00> : vector<32x256xf32>
    %2 = tpu.matmul %0, %1, %cst {dimension_numbers = #tpu.dot_dimension_numbers<[1], [0], [0], [1], [0, 0, 1, 1], [], []>} : vector<32x768xbf16>, vector<768x256xbf16>, vector<32x256xf32> -> vector<32x256xf32>
    %c0_3 = arith.constant 0 : index
    %c0_4 = arith.constant 0 : index
    %3 = vector.load %arg4[%c0_3, %c0_4] : memref<1x256xf32, #tpu.memory_space<vmem>>, vector<1x256xf32>
    %4 = vector.broadcast %3 : vector<1x256xf32> to vector<32x256xf32>
    %5 = arith.addf %2, %4 : vector<32x256xf32>
    %c0_5 = arith.constant 0 : index
    %c0_6 = arith.constant 0 : index
    %6 = vector.load %arg5[%c0_5, %c0_6] : memref<32x256xf32, #tpu.memory_space<vmem>>, vector<32x256xf32>
    tpu.vector_store %arg5[%c0_5, %c0_6], %5 {strides = array<i32>} : memref<32x256xf32, #tpu.memory_space<vmem>>, vector<32x256xf32>,
    return
  }
  func.func @transform_0(%arg0: i32, %arg1: i32) -> (i32, i32) {
    %c0_i32 = arith.constant 0 : i32
    %c0_i32_0 = arith.constant 0 : i32
    return %arg0, %c0_i32 : i32, i32
  }
  func.func @transform_1(%arg0: i32, %arg1: i32) -> (i32, i32) {
    %c0_i32 = arith.constant 0 : i32
    %c0_i32_0 = arith.constant 0 : i32
    return %c0_i32, %arg1 : i32, i32
  }
  func.func @transform_2(%arg0: i32, %arg1: i32) -> (i32, i32) {
    %c0_i32 = arith.constant 0 : i32
    %c0_i32_0 = arith.constant 0 : i32
    return %c0_i32, %arg1 : i32, i32
  }
  func.func @transform_3(%arg0: i32, %arg1: i32) -> (i32, i32) {
    %c0_i32 = arith.constant 0 : i32
    return %arg0, %arg1 : i32, i32
  }
}

</mosaic_0001>

<bundles_post_ra>
// kernel: text_vae_forward.10
= control target key start
LH: loop header
LB: loop body
LE: loop exit
PB: predicated region body
PF: predicated region fallthrough
CT: control target
= control target key end

     0   :  { %v1313_v3 = vmov 0   ;;  %vm485_vm0 = vcmask 785408   ;;  %s1964_s1 = inlined_call_operand.vmem [shape: bf16[96,1536], index: 1, kind: input, shape index: {}]   ;;  %s1965_s0 = inlined_call_operand.vmem [shape: bf16[32,96], index: 0, kind: input, shape index: {}]   ;;  %s1966_s2 = inlined_call_operand.vmem [shape: f32[32,1], index: 2, kind: input, shape index: {}]   ;;  %s1967_s3 = inlined_call_operand.vmem [shape: bf16[32,1536], index: 3, kind: output, shape index: {}]  }
   0x1   :  { %v1166_v0 = vld [vmem:[%s1964_s1 + $0x1e0] sm:$0xf]  ;;  %v1304_v1 = vld [vmem:[%s1964_s1 + $0x20c] sm:$0xf0]  ;;  %v1298_v2 = vld [vmem:[%s1964_s1 + $0x1e4] sm:$0xf]  ;;  %1311 = vset.pattern.permute.xlu0 %v1313_v3  ;;  %1312 = vset.pattern.permute.xlu1 %v1313_v3 }
   0x2   :  { %v1167_v4 = vor.u32 %v1304_v1, %v1166_v0  ;;  %v1168_v5 = vld [vmem:[%s1964_s1 + $0x210] sm:$0xf0]  ;;  %v1174_v6 = vld [vmem:[%s1964_s1 + $0x1e8] sm:$0xf]  ;;  %v1305_v7 = vld [vmem:[%s1964_s1 + $0x214] sm:$0xf0] }
   0x3   :  { %v1171_v8 = vor.u32 %v1298_v2, %v1168_v5  ;;  %v1175_v9 = vor.u32 %v1305_v7, %v1174_v6  ;;  %v1299_v10 = vld [vmem:[%s1964_s1 + $0x1ec] sm:$0xf]  ;;  %v1176_v11 = vld [vmem:[%s1964_s1 + $0x218] sm:$0xf0]  ;;  %v1118_v12 = vld [vmem:[%s1964_s1 + $0x180] sm:$0xf] }
   0x4   :  { %494 = vmatpush.bf16.msra.mxu0 %v1167_v4  ;;  %v1179_v13 = vor.u32 %v1299_v10, %v1176_v11  ;;  %v1292_v14 = vld [vmem:[%s1964_s1 + $0x1ac] sm:$0xf0]  ;;  %v1286_v15 = vld [vmem:[%s1964_s1 + $0x184] sm:$0xf]  ;;  %v1120_v16 = vld [vmem:[%s1964_s1 + $0x1b0] sm:$0xf0] }
   0x5   :  { %513 = vmatpush.bf16.msra.mxu1 %v1171_v8  ;;  %532 = vmatpush.bf16.msra.mxu2 %v1175_v9  ;;  %v1119_v17 = vor.u32 %v1292_v14, %v1118_v12  ;;  %v1123_v18 = vor.u32 %v1286_v15, %v1120_v16  ;;  %v1126_v19 = vld [vmem:[%s1964_s1 + $0x188] sm:$0xf]  ;;  %v1293_v20 = vld [vmem:[%s1964_s1 + $0x1b4] sm:$0xf0]  ;;  %v1287_v21 = vld [vmem:[%s1964_s1 + $0x18c] sm:$0xf] }
   0x6   :  { %551 = vmatpush.bf16.msra.mxu3 %v1179_v13  ;;  %v1127_v22 = vor.u32 %v1293_v20, %v1126_v19  ;;  %v1128_v23 = vld [vmem:[%s1964_s1 + $0x1b8] sm:$0xf0]  ;;  %v1070_v24 = vld [vmem:[%s1964_s1 + $0x120] sm:$0xf]  ;;  %v1280_v25 = vld [vmem:[%s1964_s1 + $0x14c] sm:$0xf0] }
   0x7   :  { %v1131_v26 = vor.u32 %v1287_v21, %v1128_v23  ;;  %v1274_v27 = vld [vmem:[%s1964_s1 + $0x124] sm:$0xf]  ;;  %v1072_v28 = vld [vmem:[%s1964_s1 + $0x150] sm:$0xf0]  ;;  %v1078_v29 = vld [vmem:[%s1964_s1 + $0x128] sm:$0xf]  ;;  %v1071_v30 = vor.u32 %v1280_v25, %v1070_v24 }
   0x8   :  { %495 = vmatpush.bf16.msra.mxu0 %v1119_v17  ;;  %v1281_v31 = vld [vmem:[%s1964_s1 + $0x154] sm:$0xf0]  ;;  %v1275_v32 = vld [vmem:[%s1964_s1 + $0x12c] sm:$0xf]  ;;  %v1080_v33 = vld [vmem:[%s1964_s1 + $0x158] sm:$0xf0]  ;;  %v1075_v34 = vor.u32 %v1274_v27, %v1072_v28 }
   0x9   :  { %514 = vmatpush.bf16.msra.mxu1 %v1123_v18  ;;  %533 = vmatpush.bf16.msra.mxu2 %v1127_v22  ;;  %v1079_v35 = vor.u32 %v1281_v31, %v1078_v29  ;;  %v1022_v36 = vld [vmem:[%s1964_s1 + $0xc0] sm:$0xf]  ;;  %v1268_v37 = vld [vmem:[%s1964_s1 + $0xec] sm:$0xf0]  ;;  %v1262_v38 = vld [vmem:[%s1964_s1 + $0xc4] sm:$0xf]  ;;  %v1083_v39 = vor.u32 %v1275_v32, %v1080_v33 }
   0xa   :  { %552 = vmatpush.bf16.msra.mxu3 %v1131_v26  ;;  %v1024_v40 = vld [vmem:[%s1964_s1 + $0xf0] sm:$0xf0]  ;;  %v1030_v41 = vld [vmem:[%s1964_s1 + $0xc8] sm:$0xf]  ;;  %v1269_v42 = vld [vmem:[%s1964_s1 + $0xf4] sm:$0xf0]  ;;  %v1023_v45 = vor.u32 %v1268_v37, %v1022_v36 }
   0xb   :  { %v1263_v43 = vld [vmem:[%s1964_s1 + $0xcc] sm:$0xf]  ;;  %v1032_v44 = vld [vmem:[%s1964_s1 + $0xf8] sm:$0xf0]  ;;  %v1027_v46 = vor.u32 %v1262_v38, %v1024_v40  ;;  %v1031_v47 = vor.u32 %v1269_v42, %v1030_v41  ;;  %v974_v48 = vld [vmem:[%s1964_s1 + $0x60] sm:$0xf] }
   0xc   :  { %496 = vmatpush.bf16.msra.mxu0 %v1071_v30  ;;  %v1256_v49 = vld [vmem:[%s1964_s1 + $0x8c] sm:$0xf0]  ;;  %v1250_v50 = vld [vmem:[%s1964_s1 + $0x64] sm:$0xf]  ;;  %v1035_v51 = vor.u32 %v1263_v43, %v1032_v44  ;;  %v976_v52 = vld [vmem:[%s1964_s1 + $0x90] sm:$0xf0] }
   0xd   :  { %515 = vmatpush.bf16.msra.mxu1 %v1075_v34  ;;  %534 = vmatpush.bf16.msra.mxu2 %v1079_v35  ;;  %v982_v53 = vld [vmem:[%s1964_s1 + $0x68] sm:$0xf]  ;;  %v1257_v54 = vld [vmem:[%s1964_s1 + $0x94] sm:$0xf0]  ;;  %v1251_v55 = vld [vmem:[%s1964_s1 + $0x6c] sm:$0xf]  ;;  %v975_v57 = vor.u32 %v1256_v49, %v974_v48  ;;  %v979_v59 = vor.u32 %v1250_v50, %v976_v52 }
   0xe   :  { %553 = vmatpush.bf16.msra.mxu3 %v1083_v39  ;;  %v984_v56 = vld [vmem:[%s1964_s1 + $0x98] sm:$0xf0]  ;;  %v926_v58 = vld [vmem:[%s1964_s1] sm:$0xf]  ;;  %v983_v60 = vor.u32 %v1257_v54, %v982_v53  ;;  %v1244_v61 = vld [vmem:[%s1964_s1 + $0x2c] sm:$0xf0] }
   0xf   :  { %v1238_v62 = vld [vmem:[%s1964_s1 + $0x4] sm:$0xf]  ;;  %v928_v63 = vld [vmem:[%s1964_s1 + $0x30] sm:$0xf0]  ;;  %v987_v0 = vor.u32 %v1251_v55, %v984_v56  ;;  %v934_v1 = vld [vmem:[%s1964_s1 + $0x8] sm:$0xf]  ;;  %v927_v7 = vor.u32 %v1244_v61, %v926_v58 }
  0x10   :  { %497 = vmatpush.bf16.msra.mxu0 %v1023_v45  ;;  %v1245_v2 = vld [vmem:[%s1964_s1 + $0x34] sm:$0xf0]  ;;  %v1239_v3 = vld [vmem:[%s1964_s1 + $0xc] sm:$0xf]  ;;  %v936_v4 = vld [vmem:[%s1964_s1 + $0x38] sm:$0xf0]  ;;  %v931_v10 = vor.u32 %v1238_v62, %v928_v63 }
  0x11   :  { %516 = vmatpush.bf16.msra.mxu1 %v1027_v46  ;;  %535 = vmatpush.bf16.msra.mxu2 %v1031_v47  ;;  %v1190_v5 = vld [vmem:[%s1964_s1 + $0x1f8] sm:$0xf]  ;;  %v1307_v6 = vld [vmem:[%s1964_s1 + $0x224] sm:$0xf0]  ;;  %v1301_v8 = vld [vmem:[%s1964_s1 + $0x1fc] sm:$0xf]  ;;  %v935_v11 = vor.u32 %v1245_v2, %v934_v1  ;;  %v939_v14 = vor.u32 %v1239_v3, %v936_v4 }
  0x12   :  { %554 = vmatpush.bf16.msra.mxu3 %v1035_v51  ;;  %v1192_v9 = vld [vmem:[%s1964_s1 + $0x228] sm:$0xf0]  ;;  %v1493_v12 = vld [vmem:[%s1965_s0] sm:$0xff]  ;;  %v1191_v15 = vor.u32 %v1307_v6, %v1190_v5  ;;  %v1182_v16 = vld [vmem:[%s1964_s1 + $0x1f0] sm:$0xf] }
  0x13   :  { %v91_v13 = vld [vmem:[%s1966_s2] sm:$0xff]  ;;  %v1300_v18 = vld [vmem:[%s1964_s1 + $0x1f4] sm:$0xf]  ;;  %v1195_v19 = vor.u32 %v1301_v8, %v1192_v9  ;;  %v1142_v21 = vld [vmem:[%s1964_s1 + $0x198] sm:$0xf] }
  0x14   :  { %498 = vmatpush.bf16.msra.mxu0 %v975_v57  ;;  %v1306_v17 = vld [vmem:[%s1964_s1 + $0x21c] sm:$0xf0]  ;;  %97 = vperm.xlu0 %1311, %v91_v13   ;;  %v1184_v20 = vld [vmem:[%s1964_s1 + $0x220] sm:$0xf0]  ;;  %v1295_v22 = vld [vmem:[%s1964_s1 + $0x1c4] sm:$0xf0] }
  0x15   :  { %517 = vmatpush.bf16.msra.mxu1 %v979_v59  ;;  %536 = vmatpush.bf16.msra.mxu2 %v983_v60  ;;  %v1289_v23 = vld [vmem:[%s1964_s1 + $0x19c] sm:$0xf]  ;;  %v1144_v24 = vld [vmem:[%s1964_s1 + $0x1c8] sm:$0xf0]  ;;  %v1183_v25 = vor.u32 %v1306_v17, %v1182_v16  ;;  %v1187_v26 = vor.u32 %v1300_v18, %v1184_v20  ;;  %v1143_v27 = vor.u32 %v1295_v22, %v1142_v21  ;;  %v1094_v28 = vld [vmem:[%s1964_s1 + $0x138] sm:$0xf] }
  0x16   :  { %555 = vmatpush.bf16.msra.mxu3 %v987_v0  ;;  %v1134_v29 = vld [vmem:[%s1964_s1 + $0x190] sm:$0xf]  ;;  %v1294_v30 = vld [vmem:[%s1964_s1 + $0x1bc] sm:$0xf0]  ;;  %v1147_v31 = vor.u32 %v1289_v23, %v1144_v24  ;;  %v1283_v32 = vld [vmem:[%s1964_s1 + $0x164] sm:$0xf0] }
  0x17   :  { %v1288_v33 = vld [vmem:[%s1964_s1 + $0x194] sm:$0xf]  ;;  %v1136_v34 = vld [vmem:[%s1964_s1 + $0x1c0] sm:$0xf0]  ;;  %v1277_v35 = vld [vmem:[%s1964_s1 + $0x13c] sm:$0xf]  ;;  %v1135_v38 = vor.u32 %v1294_v30, %v1134_v29  ;;  %v1095_v40 = vor.u32 %v1283_v32, %v1094_v28 }
  0x18   :  { %499 = vmatpush.bf16.msra.mxu0 %v927_v7  ;;  %v1096_v36 = vld [vmem:[%s1964_s1 + $0x168] sm:$0xf0]  ;;  %v1046_v39 = vld [vmem:[%s1964_s1 + $0xd8] sm:$0xf]  ;;  %v1139_v41 = vor.u32 %v1288_v33, %v1136_v34  ;;  %v1271_v42 = vld [vmem:[%s1964_s1 + $0x104] sm:$0xf0] }
  0x19   :  { %518 = vmatpush.bf16.msra.mxu1 %v931_v10  ;;  %537 = vmatpush.bf16.msra.mxu2 %v935_v11  ;;  %v92_v37 = vld [vmem:[%s1966_s2 + $0x8] sm:$0xff]  ;;  %v1086_v43 = vld [vmem:[%s1964_s1 + $0x130] sm:$0xf]  ;;  %v1282_v44 = vld [vmem:[%s1964_s1 + $0x15c] sm:$0xf0]  ;;  %v1099_v45 = vor.u32 %v1277_v35, %v1096_v36  ;;  %v1047_v52 = vor.u32 %v1271_v42, %v1046_v39 }
  0x1a   :  { %556 = vmatpush.bf16.msra.mxu3 %v939_v14  ;;  %v1276_v46 = vld [vmem:[%s1964_s1 + $0x134] sm:$0xf]  ;;  %v1088_v47 = vld [vmem:[%s1964_s1 + $0x160] sm:$0xf0]  ;;  %v1265_v49 = vld [vmem:[%s1964_s1 + $0xdc] sm:$0xf]  ;;  %v1087_v51 = vor.u32 %v1282_v44, %v1086_v43 }
  0x1b   :  { %1212 = vmatmul.msk.bf16.vlgmr.msra.gmra.mxu0 %vm485_vm0, %v1493_v12  ;;  %v93_v48 = vld [vmem:[%s1966_s2 + $0x10] sm:$0xff]  ;;  %v1048_v50 = vld [vmem:[%s1964_s1 + $0x108] sm:$0xf0]  ;;  %v1091_v53 = vor.u32 %v1276_v46, %v1088_v47  ;;  %v1270_v55 = vld [vmem:[%s1964_s1 + $0xfc] sm:$0xf0] }
  0x1c   :  { %1214 = vmatmul.msk.bf16.vlgmr.msra.gmra.mxu1 %vm485_vm0, %v1493_v12  ;;  %1216 = vmatmul.msk.bf16.vlgmr.msra.gmra.mxu2 %vm485_vm0, %v1493_v12  ;;  %v1038_v54 = vld [vmem:[%s1964_s1 + $0xd0] sm:$0xf]  ;;  %v1264_v56 = vld [vmem:[%s1964_s1 + $0xd4] sm:$0xf]  ;;  %v1051_v57 = vor.u32 %v1265_v49, %v1048_v50  ;;  %v1040_v58 = vld [vmem:[%s1964_s1 + $0x100] sm:$0xf0] }
  0x1d   :  { %608 = vmatpush.bf16.msrb.mxu2 %v1191_v15  ;;  %1218 = vmatmul.msk.bf16.vlgmr.msra.gmra.mxu3 %vm485_vm0, %v1493_v12  ;;  %v998_v59 = vld [vmem:[%s1964_s1 + $0x78] sm:$0xf]  ;;  %v1259_v60 = vld [vmem:[%s1964_s1 + $0xa4] sm:$0xf0]  ;;  %v1253_v61 = vld [vmem:[%s1964_s1 + $0x7c] sm:$0xf]  ;;  %v1039_v0 = vor.u32 %v1270_v55, %v1038_v54  ;;  %v1043_v3 = vor.u32 %v1264_v56, %v1040_v58 }
  0x1e   :  { %627 = vmatpush.bf16.msrb.mxu3 %v1195_v19  ;;  %570 = vmatpush.bf16.msrb.mxu0 %v1183_v25  ;;  %v1000_v62 = vld [vmem:[%s1964_s1 + $0xa8] sm:$0xf0]  ;;  %v990_v1 = vld [vmem:[%s1964_s1 + $0x70] sm:$0xf]  ;;  %v94_v2 = vld [vmem:[%s1966_s2 + $0x18] sm:$0xff]  ;;  %v999_v4 = vor.u32 %v1259_v60, %v998_v59 }
  0x1f   :  { %589 = vmatpush.bf16.msrb.mxu1 %v1187_v26  ;;  %102 = vperm.xlu0 %1311, %v92_v37   ;;  %v1611_v63 = vld [vmem:[%s1965_s0 + $0x8] sm:$0xff]  ;;  %v1258_v5 = vld [vmem:[%s1964_s1 + $0x9c] sm:$0xf0]  ;;  %v1252_v6 = vld [vmem:[%s1964_s1 + $0x74] sm:$0xf]  ;;  %v1003_v8 = vor.u32 %v1253_v61, %v1000_v62 }
  0x20   :  { %107 = vperm.xlu1 %1312, %v93_v48   ;;  %v992_v7 = vld [vmem:[%s1964_s1 + $0xa0] sm:$0xf0]  ;;  %v950_v9 = vld [vmem:[%s1964_s1 + $0x18] sm:$0xf]  ;;  %v1247_v10 = vld [vmem:[%s1964_s1 + $0x44] sm:$0xf0]  ;;  %v991_v16 = vor.u32 %v1258_v5, %v990_v1 }
  0x21   :  { %609 = vmatpush.bf16.msrb.mxu2 %v1143_v27  ;;  %v1241_v11 = vld [vmem:[%s1964_s1 + $0x1c] sm:$0xf]  ;;  %v952_v13 = vld [vmem:[%s1964_s1 + $0x48] sm:$0xf0]  ;;  %v1206_v14 = vld [vmem:[%s1964_s1 + $0x208] sm:$0xf]  ;;  %v995_v20 = vor.u32 %v1252_v6, %v992_v7  ;;  %v951_v21 = vor.u32 %v1247_v10, %v950_v9 }
  0x22   :  { %628 = vmatpush.bf16.msrb.mxu3 %v1147_v31  ;;  %571 = vmatpush.bf16.msrb.mxu0 %v1135_v38  ;;  %v1309_v15 = vld [vmem:[%s1964_s1 + $0x234] sm:$0xf0]  ;;  %v942_v17 = vld [vmem:[%s1964_s1 + $0x10] sm:$0xf]  ;;  %v1303_v18 = vld [vmem:[%s1964_s1 + $0x20c] sm:$0xf]  ;;  %v955_v25 = vor.u32 %v1241_v11, %v952_v13 }
  0x23   :  { %590 = vmatpush.bf16.msrb.mxu1 %v1139_v41  ;;  %v1208_v19 = vld [vmem:[%s1964_s1 + $0x238] sm:$0xf0]  ;;  %v1246_v22 = vld [vmem:[%s1964_s1 + $0x3c] sm:$0xf0]  ;;  %v1240_v23 = vld [vmem:[%s1964_s1 + $0x14] sm:$0xf]  ;;  %v1207_v26 = vor.u32 %v1309_v15, %v1206_v14 }
  0x24   :  { %v944_v24 = vld [vmem:[%s1964_s1 + $0x40] sm:$0xf0]  ;;  %v1198_v27 = vld [vmem:[%s1964_s1 + $0x200] sm:$0xf]  ;;  %v1308_v28 = vld [vmem:[%s1964_s1 + $0x22c] sm:$0xf0]  ;;  %v1211_v30 = vor.u32 %v1303_v18, %v1208_v19  ;;  %v943_v34 = vor.u32 %v1246_v22, %v942_v17 }
  0x25   :  { %610 = vmatpush.bf16.msrb.mxu2 %v1095_v40  ;;  %v1302_v29 = vld [vmem:[%s1964_s1 + $0x204] sm:$0xf]  ;;  %v1200_v31 = vld [vmem:[%s1964_s1 + $0x230] sm:$0xf0]  ;;  %v1158_v32 = vld [vmem:[%s1964_s1 + $0x1a8] sm:$0xf]  ;;  %v947_v37 = vor.u32 %v1240_v23, %v944_v24  ;;  %v1199_v38 = vor.u32 %v1308_v28, %v1198_v27 }
  0x26   :  { %629 = vmatpush.bf16.msrb.mxu3 %v1099_v45  ;;  %572 = vmatpush.bf16.msrb.mxu0 %v1087_v51  ;;  %v1297_v33 = vld [vmem:[%s1964_s1 + $0x1d4] sm:$0xf0]  ;;  %v1291_v35 = vld [vmem:[%s1964_s1 + $0x1ac] sm:$0xf]  ;;  %v1160_v36 = vld [vmem:[%s1964_s1 + $0x1d8] sm:$0xf0]  ;;  %v1203_v39 = vor.u32 %v1302_v29, %v1200_v31 }
  0x27   :  { %591 = vmatpush.bf16.msrb.mxu1 %v1091_v53  ;;  %v1159_v40 = vor.u32 %v1297_v33, %v1158_v32  ;;  %v1110_v41 = vld [vmem:[%s1964_s1 + $0x148] sm:$0xf]  ;;  %v1150_v42 = vld [vmem:[%s1964_s1 + $0x1a0] sm:$0xf]  ;;  %v1296_v43 = vld [vmem:[%s1964_s1 + $0x1cc] sm:$0xf0]  ;;  %v1163_v44 = vor.u32 %v1291_v35, %v1160_v36 }
  0x28   :  { %112 = vperm.xlu1 %1312, %v94_v2   ;;  %v1285_v45 = vld [vmem:[%s1964_s1 + $0x174] sm:$0xf0]  ;;  %v1290_v46 = vld [vmem:[%s1964_s1 + $0x1a4] sm:$0xf]  ;;  %v1152_v47 = vld [vmem:[%s1964_s1 + $0x1d0] sm:$0xf0]  ;;  %v1151_v50 = vor.u32 %v1296_v43, %v1150_v42 }
  0x29   :  { %611 = vmatpush.bf16.msrb.mxu2 %v1047_v52  ;;  %v1279_v48 = vld [vmem:[%s1964_s1 + $0x14c] sm:$0xf]  ;;  %v1112_v49 = vld [vmem:[%s1964_s1 + $0x178] sm:$0xf0]  ;;  %v1111_v51 = vor.u32 %v1285_v45, %v1110_v41  ;;  %v1155_v52 = vor.u32 %v1290_v46, %v1152_v47  ;;  %v1102_v53 = vld [vmem:[%s1964_s1 + $0x140] sm:$0xf] }
  0x2a   :  { %630 = vmatpush.bf16.msrb.mxu3 %v1051_v57  ;;  %573 = vmatpush.bf16.msrb.mxu0 %v1039_v0  ;;  %v1284_v54 = vld [vmem:[%s1964_s1 + $0x16c] sm:$0xf0]  ;;  %v1115_v55 = vor.u32 %v1279_v48, %v1112_v49  ;;  %v1062_v56 = vld [vmem:[%s1964_s1 + $0xe8] sm:$0xf]  ;;  %v1273_v57 = vld [vmem:[%s1964_s1 + $0x114] sm:$0xf0] }
  0x2b   :  { %592 = vmatpush.bf16.msrb.mxu1 %v1043_v3  ;;  %1213 = vmatmul.msk.bf16.gmra.mxu0 %vm485_vm0, %v1611_v63  ;;  %v1267_v58 = vld [vmem:[%s1964_s1 + $0xec] sm:$0xf]  ;;  %v1103_v59 = vor.u32 %v1284_v54, %v1102_v53  ;;  %v1278_v60 = vld [vmem:[%s1964_s1 + $0x144] sm:$0xf]  ;;  %v1104_v61 = vld [vmem:[%s1964_s1 + $0x170] sm:$0xf0]  ;;  %v1063_v62 = vor.u32 %v1273_v57, %v1062_v56 }
  0x2c   :  { %1215 = vmatmul.msk.bf16.gmra.mxu1 %vm485_vm0, %v1611_v63  ;;  %1217 = vmatmul.msk.bf16.gmra.mxu2 %vm485_vm0, %v1611_v63  ;;  %v1064_v0 = vld [vmem:[%s1964_s1 + $0x118] sm:$0xf0]  ;;  %v1054_v1 = vld [vmem:[%s1964_s1 + $0xe0] sm:$0xf]  ;;  %v1272_v2 = vld [vmem:[%s1964_s1 + $0x10c] sm:$0xf0]  ;;  %v1107_v5 = vor.u32 %v1278_v60, %v1104_v61 }
  0x2d   :  { %612 = vmatpush.bf16.msrb.mxu2 %v999_v4  ;;  %1219 = vmatmul.msk.bf16.gmra.mxu3 %vm485_vm0, %v1611_v63  ;;  %v1014_v3 = vld [vmem:[%s1964_s1 + $0x88] sm:$0xf]  ;;  %v1261_v4 = vld [vmem:[%s1964_s1 + $0xb4] sm:$0xf0]  ;;  %v1067_v6 = vor.u32 %v1267_v58, %v1064_v0  ;;  %v1055_v7 = vor.u32 %v1272_v2, %v1054_v1  ;;  %v1056_v9 = vld [vmem:[%s1964_s1 + $0x110] sm:$0xf0] }
  0x2e   :  { %631 = vmatpush.bf16.msrb.mxu3 %v1003_v8  ;;  %574 = vmatpush.bf16.msrb.mxu0 %v991_v16  ;;  %v1266_v8 = vld [vmem:[%s1964_s1 + $0xe4] sm:$0xf]  ;;  %v1255_v10 = vld [vmem:[%s1964_s1 + $0x8c] sm:$0xf]  ;;  %v1015_v11 = vor.u32 %v1261_v4, %v1014_v3  ;;  %v1016_v13 = vld [vmem:[%s1964_s1 + $0xb8] sm:$0xf0] }
  0x2f   :  { %593 = vmatpush.bf16.msrb.mxu1 %v995_v20  ;;  %v1006_v14 = vld [vmem:[%s1964_s1 + $0x80] sm:$0xf]  ;;  %v1260_v15 = vld [vmem:[%s1964_s1 + $0xac] sm:$0xf0]  ;;  %v966_v16 = vld [vmem:[%s1964_s1 + $0x28] sm:$0xf]  ;;  %v1059_v18 = vor.u32 %v1266_v8, %v1056_v9  ;;  %v1019_v19 = vor.u32 %v1255_v10, %v1016_v13 }
  0x30   :  { %v1249_v17 = vld [vmem:[%s1964_s1 + $0x54] sm:$0xf0]  ;;  %v1007_v20 = vor.u32 %v1260_v15, %v1006_v14  ;;  %v1008_v22 = vld [vmem:[%s1964_s1 + $0xb0] sm:$0xf0]  ;;  %v1243_v23 = vld [vmem:[%s1964_s1 + $0x2c] sm:$0xf] }
  0x31   :  { %613 = vmatpush.bf16.msrb.mxu2 %v951_v21  ;;  %v1254_v21 = vld [vmem:[%s1964_s1 + $0x84] sm:$0xf]  ;;  %v967_v24 = vor.u32 %v1249_v17, %v966_v16  ;;  %v1248_v27 = vld [vmem:[%s1964_s1 + $0x4c] sm:$0xf0]  ;;  %v960_v32 = vld [vmem:[%s1964_s1 + $0x50] sm:$0xf0] }
  0x32   :  { %632 = vmatpush.bf16.msrb.mxu3 %v955_v25  ;;  %575 = vmatpush.bf16.msrb.mxu0 %v943_v34  ;;  %v968_v25 = vld [vmem:[%s1964_s1 + $0x58] sm:$0xf0]  ;;  %v1011_v28 = vor.u32 %v1254_v21, %v1008_v22  ;;  %v1242_v31 = vld [vmem:[%s1964_s1 + $0x24] sm:$0xf] }
  0x33   :  { %594 = vmatpush.bf16.msrb.mxu1 %v947_v37  ;;  %v971_v29 = vor.u32 %v1243_v23, %v968_v25  ;;  %v963_v33 = vor.u32 %v1242_v31, %v960_v32 }
  0x35   :  { %684 = vmatpush.bf16.msra.mxu2 %v1207_v26  ;;  %v958_v26 = vld [vmem:[%s1964_s1 + $0x20] sm:$0xf] }
  0x36   :  { %703 = vmatpush.bf16.msra.mxu3 %v1211_v30  ;;  %646 = vmatpush.bf16.msra.mxu0 %v1199_v38  ;;  %v959_v30 = vor.u32 %v1248_v27, %v958_v26 }
  0x37   :  { %665 = vmatpush.bf16.msra.mxu1 %v1203_v39 }
  0x39   :  { %685 = vmatpush.bf16.msra.mxu2 %v1159_v40 }
  0x3a   :  { %704 = vmatpush.bf16.msra.mxu3 %v1163_v44  ;;  %647 = vmatpush.bf16.msra.mxu0 %v1151_v50 }
  0x3b   :  { %666 = vmatpush.bf16.msra.mxu1 %v1155_v52  ;;  %1220 = vmatmul.msk.bf16.vlgmr.msrb.gmra.mxu0 %vm485_vm0, %v1493_v12 }
  0x3c   :  { %1222 = vmatmul.msk.bf16.vlgmr.msrb.gmra.mxu1 %vm485_vm0, %v1493_v12  ;;  %1224 = vmatmul.msk.bf16.vlgmr.msrb.gmra.mxu2 %vm485_vm0, %v1493_v12 }
  0x3d   :  { %686 = vmatpush.bf16.msra.mxu2 %v1111_v51  ;;  %1226 = vmatmul.msk.bf16.vlgmr.msrb.gmra.mxu3 %vm485_vm0, %v1493_v12 }
  0x3e   :  { %705 = vmatpush.bf16.msra.mxu3 %v1115_v55  ;;  %648 = vmatpush.bf16.msra.mxu0 %v1103_v59 }
  0x3f   :  { %667 = vmatpush.bf16.msra.mxu1 %v1107_v5 }
  0x41   :  { %687 = vmatpush.bf16.msra.mxu2 %v1063_v62 }
  0x42   :  { %706 = vmatpush.bf16.msra.mxu3 %v1067_v6  ;;  %649 = vmatpush.bf16.msra.mxu0 %v1055_v7 }
  0x43   :  { %668 = vmatpush.bf16.msra.mxu1 %v1059_v18 }
  0x45   :  { %688 = vmatpush.bf16.msra.mxu2 %v1015_v11 }
  0x46   :  { %707 = vmatpush.bf16.msra.mxu3 %v1019_v19  ;;  %650 = vmatpush.bf16.msra.mxu0 %v1007_v20 }
  0x47   :  { %669 = vmatpush.bf16.msra.mxu1 %v1011_v28 }
  0x49   :  { %689 = vmatpush.bf16.msra.mxu2 %v967_v24 }
  0x4a   :  { %708 = vmatpush.bf16.msra.mxu3 %v971_v29  ;;  %651 = vmatpush.bf16.msra.mxu0 %v959_v30 }
  0x4b   :  { %670 = vmatpush.bf16.msra.mxu1 %v963_v33  ;;  %1221 = vmatmul.msk.bf16.gmra.mxu0 %vm485_vm0, %v1611_v63 }
  0x4c   :  { %1223 = vmatmul.msk.bf16.gmra.mxu1 %vm485_vm0, %v1611_v63  ;;  %1225 = vmatmul.msk.bf16.gmra.mxu2 %vm485_vm0, %v1611_v63 }
  0x4d   :  { %1227 = vmatmul.msk.bf16.gmra.mxu3 %vm485_vm0, %v1611_v63 }
  0x5b   :  { %1228 = vmatmul.msk.bf16.vlgmr.msra.gmra.mxu0 %vm485_vm0, %v1493_v12 }
  0x5c   :  { %1230 = vmatmul.msk.bf16.vlgmr.msra.gmra.mxu1 %vm485_vm0, %v1493_v12  ;;  %1232 = vmatmul.msk.bf16.vlgmr.msra.gmra.mxu2 %vm485_vm0, %v1493_v12 }
  0x5d   :  { %1234 = vmatmul.msk.bf16.vlgmr.msra.gmra.mxu3 %vm485_vm0, %v1493_v12 }
  0x6b   :  { %1229 = vmatmul.msk.bf16.gmra.mxu0 %vm485_vm0, %v1611_v63 }
  0x6c   :  { %1231 = vmatmul.msk.bf16.gmra.mxu1 %vm485_vm0, %v1611_v63  ;;  %1233 = vmatmul.msk.bf16.gmra.mxu2 %vm485_vm0, %v1611_v63 }
  0x6d   :  { %1235 = vmatmul.msk.bf16.gmra.mxu3 %vm485_vm0, %v1611_v63 }
  0x86   :  { %v1836_v34 = vpop.permute.xlu0 %97 }
  0x91   :  { %v1840_v42 = vpop.permute.xlu0 %102 }
  0x92   :  { %v1849_v56 = vpop.permute.xlu1 %107 }
  0x98   :  { %v501_v35 = vpop.f32.mrf.mxu0 }
  0x99   :  { %v502_v36 = vadd.f32 %v501_v35, %v1836_v34  ;;  %v520_v37 = vpop.f32.mrf.mxu1 }
  0x9a   :  { %v521_v12 = vadd.f32 %v520_v37, %v1836_v34  ;;  %v1861_v17 = vpop.permute.xlu1 %112 }
  0x9b   :  { %vm720_vm1 = vcmp.gt.f32.partialorder %v502_v36, 0.0  ;;  %v768_v38 = vmul.f32 0.1, %v502_v36 }
  0x9c   :  { %vm721_vm2 = vcmp.gt.f32.partialorder %v521_v12, 0.0  ;;  %v769_v39 = vmul.f32 0.1, %v521_v12 }
  0x9d   :  { %v816_v40 = vsel %vm720_vm1, %v502_v36, %v768_v38 }
  0x9e   :  { %v817_v41 = vsel %vm721_vm2, %v521_v12, %v769_v39 }
  0x9f   :  { %v864_v43 = vpack.c.bf16 %v817_v41, %v816_v40  ;;  %v539_v44 = vpop.f32.mrf.mxu2 }
  0xa0   :  { %v540_v63 = vadd.f32 %v539_v44, %v1836_v34  ;;  %v558_v45 = vpop.f32.mrf.mxu3  ;;  %v503_v46 = vpop.f32.mrf.mxu0 }
  0xa1   :  { %888 = vst [vmem:[%s1967_s3] sm:$0xff] %v864_v43  ;;  %v559_v47 = vadd.f32 %v558_v45, %v1836_v34  ;;  %v504_v48 = vadd.f32 %v503_v46, %v1840_v42  ;;  %v522_v49 = vpop.f32.mrf.mxu1 }
  0xa2   :  { %vm722_vm3 = vcmp.gt.f32.partialorder %v540_v63, 0.0  ;;  %v770_v50 = vmul.f32 0.1, %v540_v63  ;;  %v523_v51 = vadd.f32 %v522_v49, %v1840_v42 }
  0xa3   :  { %vm723_vm4 = vcmp.gt.f32.partialorder %v559_v47, 0.0  ;;  %v771_v52 = vmul.f32 0.1, %v559_v47  ;;  %vm732_vm5 = vcmp.gt.f32.partialorder %v504_v48, 0.0  ;;  %v780_v53 = vmul.f32 0.1, %v504_v48 }
  0xa4   :  { %v818_v54 = vsel %vm722_vm3, %v540_v63, %v770_v50  ;;  %vm733_vm6 = vcmp.gt.f32.partialorder %v523_v51, 0.0  ;;  %v781_v55 = vmul.f32 0.1, %v523_v51 }
  0xa5   :  { %v819_v57 = vsel %vm723_vm4, %v559_v47, %v771_v52  ;;  %v828_v58 = vsel %vm732_vm5, %v504_v48, %v780_v53 }
  0xa6   :  { %v865_v59 = vpack.c.bf16 %v819_v57, %v818_v54  ;;  %v829_v60 = vsel %vm733_vm6, %v523_v51, %v781_v55 }
  0xa7   :  { %v870_v61 = vpack.c.bf16 %v829_v60, %v828_v58  ;;  %v541_v62 = vpop.f32.mrf.mxu2 }
  0xa8   :  { %889 = vst [vmem:[%s1967_s3 + $0x8] sm:$0xff] %v865_v59  ;;  %v542_v0 = vadd.f32 %v541_v62, %v1840_v42  ;;  %v560_v1 = vpop.f32.mrf.mxu3  ;;  %v506_v2 = vpop.f32.mrf.mxu0 }
  0xa9   :  { %894 = vst [vmem:[%s1967_s3 + $0x30] sm:$0xff] %v870_v61  ;;  %v561_v3 = vadd.f32 %v560_v1, %v1840_v42  ;;  %v507_v4 = vadd.f32 %v506_v2, %v1849_v56  ;;  %v525_v5 = vpop.f32.mrf.mxu1 }
  0xaa   :  { %vm734_vm7 = vcmp.gt.f32.partialorder %v542_v0, 0.0  ;;  %v782_v6 = vmul.f32 0.1, %v542_v0  ;;  %v526_v7 = vadd.f32 %v525_v5, %v1849_v56 }
  0xab   :  { %vm735_vm8 = vcmp.gt.f32.partialorder %v561_v3, 0.0  ;;  %v783_v8 = vmul.f32 0.1, %v561_v3  ;;  %vm744_vm9 = vcmp.gt.f32.partialorder %v507_v4, 0.0  ;;  %v792_v9 = vmul.f32 0.1, %v507_v4 }
  0xac   :  { %v830_v10 = vsel %vm734_vm7, %v542_v0, %v782_v6  ;;  %vm745_vm10 = vcmp.gt.f32.partialorder %v526_v7, 0.0  ;;  %v793_v11 = vmul.f32 0.1, %v526_v7 }
  0xad   :  { %v831_v13 = vsel %vm735_vm8, %v561_v3, %v783_v8  ;;  %v840_v14 = vsel %vm744_vm9, %v507_v4, %v792_v9 }
  0xae   :  { %v871_v15 = vpack.c.bf16 %v831_v13, %v830_v10  ;;  %v841_v16 = vsel %vm745_vm10, %v526_v7, %v793_v11 }
  0xaf   :  { %v876_v18 = vpack.c.bf16 %v841_v16, %v840_v14  ;;  %v544_v19 = vpop.f32.mrf.mxu2 }
  0xb0   :  { %895 = vst [vmem:[%s1967_s3 + $0x38] sm:$0xff] %v871_v15  ;;  %v545_v20 = vadd.f32 %v544_v19, %v1849_v56  ;;  %v563_v21 = vpop.f32.mrf.mxu3  ;;  %v508_v22 = vpop.f32.mrf.mxu0 }
  0xb1   :  { %900 = vst [vmem:[%s1967_s3 + $0x60] sm:$0xff] %v876_v18  ;;  %v564_v23 = vadd.f32 %v563_v21, %v1849_v56  ;;  %v509_v24 = vadd.f32 %v508_v22, %v1861_v17  ;;  %v527_v25 = vpop.f32.mrf.mxu1 }
  0xb2   :  { %vm746_vm11 = vcmp.gt.f32.partialorder %v545_v20, 0.0  ;;  %v794_v26 = vmul.f32 0.1, %v545_v20  ;;  %v528_v27 = vadd.f32 %v527_v25, %v1861_v17 }
  0xb3   :  { %vm747_vm12 = vcmp.gt.f32.partialorder %v564_v23, 0.0  ;;  %v795_v28 = vmul.f32 0.1, %v564_v23  ;;  %vm756_vm13 = vcmp.gt.f32.partialorder %v509_v24, 0.0  ;;  %v804_v29 = vmul.f32 0.1, %v509_v24 }
  0xb4   :  { %v842_v30 = vsel %vm746_vm11, %v545_v20, %v794_v26  ;;  %vm757_vm14 = vcmp.gt.f32.partialorder %v528_v27, 0.0  ;;  %v805_v31 = vmul.f32 0.1, %v528_v27 }
  0xb5   :  { %v843_v32 = vsel %vm747_vm12, %v564_v23, %v795_v28  ;;  %v852_v33 = vsel %vm756_vm13, %v509_v24, %v804_v29 }
  0xb6   :  { %v877_v35 = vpack.c.bf16 %v843_v32, %v842_v30  ;;  %v853_v36 = vsel %vm757_vm14, %v528_v27, %v805_v31 }
  0xb7   :  { %v882_v37 = vpack.c.bf16 %v853_v36, %v852_v33  ;;  %v546_v12 = vpop.f32.mrf.mxu2 }
  0xb8   :  { %901 = vst [vmem:[%s1967_s3 + $0x68] sm:$0xff] %v877_v35  ;;  %v547_v38 = vadd.f32 %v546_v12, %v1861_v17  ;;  %v565_v39 = vpop.f32.mrf.mxu3  ;;  %v577_v40 = vpop.f32.mrf.mxu0 }
  0xb9   :  { %906 = vst [vmem:[%s1967_s3 + $0x90] sm:$0xff] %v882_v37  ;;  %v566_v41 = vadd.f32 %v565_v39, %v1861_v17  ;;  %v578_v43 = vadd.f32 %v577_v40, %v1836_v34  ;;  %v596_v44 = vpop.f32.mrf.mxu1 }
  0xba   :  { %vm758_vm15 = vcmp.gt.f32.partialorder %v547_v38, 0.0  ;;  %v806_v63 = vmul.f32 0.1, %v547_v38  ;;  %v597_v45 = vadd.f32 %v596_v44, %v1836_v34 }
  0xbb   :  { %vm759_vm0 = vcmp.gt.f32.partialorder %v566_v41, 0.0  ;;  %v807_v46 = vmul.f32 0.1, %v566_v41  ;;  %vm724_vm1 = vcmp.gt.f32.partialorder %v578_v43, 0.0  ;;  %v772_v47 = vmul.f32 0.1, %v578_v43 }
  0xbc   :  { %v854_v48 = vsel %vm758_vm15, %v547_v38, %v806_v63  ;;  %vm725_vm2 = vcmp.gt.f32.partialorder %v597_v45, 0.0  ;;  %v773_v49 = vmul.f32 0.1, %v597_v45 }
  0xbd   :  { %v855_v50 = vsel %vm759_vm0, %v566_v41, %v807_v46  ;;  %v820_v51 = vsel %vm724_vm1, %v578_v43, %v772_v47 }
  0xbe   :  { %v883_v52 = vpack.c.bf16 %v855_v50, %v854_v48  ;;  %v821_v53 = vsel %vm725_vm2, %v597_v45, %v773_v49 }
  0xbf   :  { %v866_v54 = vpack.c.bf16 %v821_v53, %v820_v51  ;;  %v615_v55 = vpop.f32.mrf.mxu2 }
  0xc0   :  { %907 = vst [vmem:[%s1967_s3 + $0x98] sm:$0xff] %v883_v52  ;;  %v616_v57 = vadd.f32 %v615_v55, %v1836_v34  ;;  %v634_v58 = vpop.f32.mrf.mxu3  ;;  %v579_v59 = vpop.f32.mrf.mxu0 }
  0xc1   :  { %890 = vst [vmem:[%s1967_s3 + $0x10] sm:$0xff] %v866_v54  ;;  %v635_v60 = vadd.f32 %v634_v58, %v1836_v34  ;;  %v580_v61 = vadd.f32 %v579_v59, %v1840_v42  ;;  %v598_v62 = vpop.f32.mrf.mxu1 }
  0xc2   :  { %vm726_vm3 = vcmp.gt.f32.partialorder %v616_v57, 0.0  ;;  %v774_v0 = vmul.f32 0.1, %v616_v57  ;;  %v599_v1 = vadd.f32 %v598_v62, %v1840_v42 }
  0xc3   :  { %vm727_vm4 = vcmp.gt.f32.partialorder %v635_v60, 0.0  ;;  %v775_v2 = vmul.f32 0.1, %v635_v60  ;;  %vm736_vm5 = vcmp.gt.f32.partialorder %v580_v61, 0.0  ;;  %v784_v3 = vmul.f32 0.1, %v580_v61 }
  0xc4   :  { %v822_v4 = vsel %vm726_vm3, %v616_v57, %v774_v0  ;;  %vm737_vm6 = vcmp.gt.f32.partialorder %v599_v1, 0.0  ;;  %v785_v5 = vmul.f32 0.1, %v599_v1 }
  0xc5   :  { %v823_v6 = vsel %vm727_vm4, %v635_v60, %v775_v2  ;;  %v832_v7 = vsel %vm736_vm5, %v580_v61, %v784_v3 }
  0xc6   :  { %v867_v8 = vpack.c.bf16 %v823_v6, %v822_v4  ;;  %v833_v9 = vsel %vm737_vm6, %v599_v1, %v785_v5 }
  0xc7   :  { %v872_v10 = vpack.c.bf16 %v833_v9, %v832_v7  ;;  %v617_v11 = vpop.f32.mrf.mxu2 }
  0xc8   :  { %891 = vst [vmem:[%s1967_s3 + $0x18] sm:$0xff] %v867_v8  ;;  %v618_v13 = vadd.f32 %v617_v11, %v1840_v42  ;;  %v636_v14 = vpop.f32.mrf.mxu3  ;;  %v582_v15 = vpop.f32.mrf.mxu0 }
  0xc9   :  { %896 = vst [vmem:[%s1967_s3 + $0x40] sm:$0xff] %v872_v10  ;;  %v637_v16 = vadd.f32 %v636_v14, %v1840_v42  ;;  %v583_v18 = vadd.f32 %v582_v15, %v1849_v56  ;;  %v601_v19 = vpop.f32.mrf.mxu1 }
  0xca   :  { %vm738_vm7 = vcmp.gt.f32.partialorder %v618_v13, 0.0  ;;  %v786_v20 = vmul.f32 0.1, %v618_v13  ;;  %v602_v21 = vadd.f32 %v601_v19, %v1849_v56 }
  0xcb   :  { %vm739_vm8 = vcmp.gt.f32.partialorder %v637_v16, 0.0  ;;  %v787_v22 = vmul.f32 0.1, %v637_v16  ;;  %vm748_vm9 = vcmp.gt.f32.partialorder %v583_v18, 0.0  ;;  %v796_v23 = vmul.f32 0.1, %v583_v18 }
  0xcc   :  { %v834_v24 = vsel %vm738_vm7, %v618_v13, %v786_v20  ;;  %vm749_vm10 = vcmp.gt.f32.partialorder %v602_v21, 0.0  ;;  %v797_v25 = vmul.f32 0.1, %v602_v21 }
  0xcd   :  { %v835_v26 = vsel %vm739_vm8, %v637_v16, %v787_v22  ;;  %v844_v27 = vsel %vm748_vm9, %v583_v18, %v796_v23 }
  0xce   :  { %v873_v28 = vpack.c.bf16 %v835_v26, %v834_v24  ;;  %v845_v29 = vsel %vm749_vm10, %v602_v21, %v797_v25 }
  0xcf   :  { %v878_v30 = vpack.c.bf16 %v845_v29, %v844_v27  ;;  %v620_v31 = vpop.f32.mrf.mxu2 }
  0xd0   :  { %897 = vst [vmem:[%s1967_s3 + $0x48] sm:$0xff] %v873_v28  ;;  %v621_v32 = vadd.f32 %v620_v31, %v1849_v56  ;;  %v639_v33 = vpop.f32.mrf.mxu3  ;;  %v584_v35 = vpop.f32.mrf.mxu0 }
  0xd1   :  { %902 = vst [vmem:[%s1967_s3 + $0x70] sm:$0xff] %v878_v30  ;;  %v640_v36 = vadd.f32 %v639_v33, %v1849_v56  ;;  %v585_v37 = vadd.f32 %v584_v35, %v1861_v17  ;;  %v603_v12 = vpop.f32.mrf.mxu1 }
  0xd2   :  { %vm750_vm11 = vcmp.gt.f32.partialorder %v621_v32, 0.0  ;;  %v798_v38 = vmul.f32 0.1, %v621_v32  ;;  %v604_v39 = vadd.f32 %v603_v12, %v1861_v17 }
  0xd3   :  { %vm751_vm12 = vcmp.gt.f32.partialorder %v640_v36, 0.0  ;;  %v799_v40 = vmul.f32 0.1, %v640_v36  ;;  %vm760_vm13 = vcmp.gt.f32.partialorder %v585_v37, 0.0  ;;  %v808_v41 = vmul.f32 0.1, %v585_v37 }
  0xd4   :  { %v846_v43 = vsel %vm750_vm11, %v621_v32, %v798_v38  ;;  %vm761_vm14 = vcmp.gt.f32.partialorder %v604_v39, 0.0  ;;  %v809_v44 = vmul.f32 0.1, %v604_v39 }
  0xd5   :  { %v847_v63 = vsel %vm751_vm12, %v640_v36, %v799_v40  ;;  %v856_v45 = vsel %vm760_vm13, %v585_v37, %v808_v41 }
  0xd6   :  { %v879_v46 = vpack.c.bf16 %v847_v63, %v846_v43  ;;  %v857_v47 = vsel %vm761_vm14, %v604_v39, %v809_v44 }
  0xd7   :  { %v884_v48 = vpack.c.bf16 %v857_v47, %v856_v45  ;;  %v622_v49 = vpop.f32.mrf.mxu2 }
  0xd8   :  { %903 = vst [vmem:[%s1967_s3 + $0x78] sm:$0xff] %v879_v46  ;;  %v623_v50 = vadd.f32 %v622_v49, %v1861_v17  ;;  %v641_v51 = vpop.f32.mrf.mxu3  ;;  %v653_v52 = vpop.f32.mrf.mxu0 }
  0xd9   :  { %908 = vst [vmem:[%s1967_s3 + $0xa0] sm:$0xff] %v884_v48  ;;  %v642_v53 = vadd.f32 %v641_v51, %v1861_v17  ;;  %v654_v54 = vadd.f32 %v653_v52, %v1836_v34  ;;  %v672_v55 = vpop.f32.mrf.mxu1 }
  0xda   :  { %vm762_vm15 = vcmp.gt.f32.partialorder %v623_v50, 0.0  ;;  %v810_v57 = vmul.f32 0.1, %v623_v50  ;;  %v673_v58 = vadd.f32 %v672_v55, %v1836_v34 }
  0xdb   :  { %vm763_vm0 = vcmp.gt.f32.partialorder %v642_v53, 0.0  ;;  %v811_v59 = vmul.f32 0.1, %v642_v53  ;;  %vm728_vm1 = vcmp.gt.f32.partialorder %v654_v54, 0.0  ;;  %v776_v60 = vmul.f32 0.1, %v654_v54 }
  0xdc   :  { %v858_v61 = vsel %vm762_vm15, %v623_v50, %v810_v57  ;;  %vm729_vm2 = vcmp.gt.f32.partialorder %v673_v58, 0.0  ;;  %v777_v62 = vmul.f32 0.1, %v673_v58 }
  0xdd   :  { %v859_v0 = vsel %vm763_vm0, %v642_v53, %v811_v59  ;;  %v824_v1 = vsel %vm728_vm1, %v654_v54, %v776_v60 }
  0xde   :  { %v885_v2 = vpack.c.bf16 %v859_v0, %v858_v61  ;;  %v825_v3 = vsel %vm729_vm2, %v673_v58, %v777_v62 }
  0xdf   :  { %v868_v4 = vpack.c.bf16 %v825_v3, %v824_v1  ;;  %v691_v5 = vpop.f32.mrf.mxu2 }
  0xe0   :  { %909 = vst [vmem:[%s1967_s3 + $0xa8] sm:$0xff] %v885_v2  ;;  %v692_v6 = vadd.f32 %v691_v5, %v1836_v34  ;;  %v710_v7 = vpop.f32.mrf.mxu3  ;;  %v655_v8 = vpop.f32.mrf.mxu0 }
  0xe1   :  { %892 = vst [vmem:[%s1967_s3 + $0x20] sm:$0xff] %v868_v4  ;;  %v711_v9 = vadd.f32 %v710_v7, %v1836_v34  ;;  %v656_v10 = vadd.f32 %v655_v8, %v1840_v42  ;;  %v674_v11 = vpop.f32.mrf.mxu1 }
  0xe2   :  { %vm730_vm3 = vcmp.gt.f32.partialorder %v692_v6, 0.0  ;;  %v778_v13 = vmul.f32 0.1, %v692_v6  ;;  %v675_v14 = vadd.f32 %v674_v11, %v1840_v42 }
  0xe3   :  { %vm731_vm4 = vcmp.gt.f32.partialorder %v711_v9, 0.0  ;;  %v779_v15 = vmul.f32 0.1, %v711_v9  ;;  %vm740_vm5 = vcmp.gt.f32.partialorder %v656_v10, 0.0  ;;  %v788_v16 = vmul.f32 0.1, %v656_v10 }
  0xe4   :  { %v826_v18 = vsel %vm730_vm3, %v692_v6, %v778_v13  ;;  %vm741_vm6 = vcmp.gt.f32.partialorder %v675_v14, 0.0  ;;  %v789_v19 = vmul.f32 0.1, %v675_v14 }
  0xe5   :  { %v827_v20 = vsel %vm731_vm4, %v711_v9, %v779_v15  ;;  %v836_v21 = vsel %vm740_vm5, %v656_v10, %v788_v16 }
  0xe6   :  { %v869_v22 = vpack.c.bf16 %v827_v20, %v826_v18  ;;  %v837_v23 = vsel %vm741_vm6, %v675_v14, %v789_v19 }
  0xe7   :  { %v874_v24 = vpack.c.bf16 %v837_v23, %v836_v21  ;;  %v693_v34 = vpop.f32.mrf.mxu2 }
  0xe8   :  { %893 = vst [vmem:[%s1967_s3 + $0x28] sm:$0xff] %v869_v22  ;;  %v694_v25 = vadd.f32 %v693_v34, %v1840_v42  ;;  %v712_v26 = vpop.f32.mrf.mxu3  ;;  %v658_v27 = vpop.f32.mrf.mxu0 }
  0xe9   :  { %898 = vst [vmem:[%s1967_s3 + $0x50] sm:$0xff] %v874_v24  ;;  %v713_v28 = vadd.f32 %v712_v26, %v1840_v42  ;;  %v659_v29 = vadd.f32 %v658_v27, %v1849_v56  ;;  %v677_v30 = vpop.f32.mrf.mxu1 }
  0xea   :  { %vm742_vm7 = vcmp.gt.f32.partialorder %v694_v25, 0.0  ;;  %v790_v31 = vmul.f32 0.1, %v694_v25  ;;  %v678_v32 = vadd.f32 %v677_v30, %v1849_v56 }
  0xeb   :  { %vm743_vm8 = vcmp.gt.f32.partialorder %v713_v28, 0.0  ;;  %v791_v33 = vmul.f32 0.1, %v713_v28  ;;  %vm752_vm9 = vcmp.gt.f32.partialorder %v659_v29, 0.0  ;;  %v800_v35 = vmul.f32 0.1, %v659_v29 }
  0xec   :  { %v838_v36 = vsel %vm742_vm7, %v694_v25, %v790_v31  ;;  %vm753_vm10 = vcmp.gt.f32.partialorder %v678_v32, 0.0  ;;  %v801_v37 = vmul.f32 0.1, %v678_v32 }
  0xed   :  { %v839_v12 = vsel %vm743_vm8, %v713_v28, %v791_v33  ;;  %v848_v38 = vsel %vm752_vm9, %v659_v29, %v800_v35 }
  0xee   :  { %v875_v39 = vpack.c.bf16 %v839_v12, %v838_v36  ;;  %v849_v40 = vsel %vm753_vm10, %v678_v32, %v801_v37 }
  0xef   :  { %v880_v41 = vpack.c.bf16 %v849_v40, %v848_v38  ;;  %v696_v42 = vpop.f32.mrf.mxu2 }
  0xf0   :  { %899 = vst [vmem:[%s1967_s3 + $0x58] sm:$0xff] %v875_v39  ;;  %v697_v43 = vadd.f32 %v696_v42, %v1849_v56  ;;  %v715_v44 = vpop.f32.mrf.mxu3  ;;  %v660_v63 = vpop.f32.mrf.mxu0 }
  0xf1   :  { %904 = vst [vmem:[%s1967_s3 + $0x80] sm:$0xff] %v880_v41  ;;  %v716_v45 = vadd.f32 %v715_v44, %v1849_v56  ;;  %v661_v46 = vadd.f32 %v660_v63, %v1861_v17  ;;  %v679_v47 = vpop.f32.mrf.mxu1 }
  0xf2   :  { %vm754_vm11 = vcmp.gt.f32.partialorder %v697_v43, 0.0  ;;  %v802_v48 = vmul.f32 0.1, %v697_v43  ;;  %v680_v49 = vadd.f32 %v679_v47, %v1861_v17 }
  0xf3   :  { %vm755_vm12 = vcmp.gt.f32.partialorder %v716_v45, 0.0  ;;  %v803_v50 = vmul.f32 0.1, %v716_v45  ;;  %vm764_vm13 = vcmp.gt.f32.partialorder %v661_v46, 0.0  ;;  %v812_v51 = vmul.f32 0.1, %v661_v46 }
  0xf4   :  { %v850_v52 = vsel %vm754_vm11, %v697_v43, %v802_v48  ;;  %vm765_vm14 = vcmp.gt.f32.partialorder %v680_v49, 0.0  ;;  %v813_v53 = vmul.f32 0.1, %v680_v49 }
  0xf5   :  { %v851_v54 = vsel %vm755_vm12, %v716_v45, %v803_v50  ;;  %v860_v55 = vsel %vm764_vm13, %v661_v46, %v812_v51 }
  0xf6   :  { %v881_v57 = vpack.c.bf16 %v851_v54, %v850_v52  ;;  %v861_v58 = vsel %vm765_vm14, %v680_v49, %v813_v53 }
  0xf7   :  { %v886_v59 = vpack.c.bf16 %v861_v58, %v860_v55  ;;  %v698_v56 = vpop.f32.mrf.mxu2 }
  0xf8   :  { %905 = vst [vmem:[%s1967_s3 + $0x88] sm:$0xff] %v881_v57  ;;  %v699_v60 = vadd.f32 %v698_v56, %v1861_v17  ;;  %v717_v61 = vpop.f32.mrf.mxu3 }
  0xf9   :  { %910 = vst [vmem:[%s1967_s3 + $0xb0] sm:$0xff] %v886_v59  ;;  %v718_v62 = vadd.f32 %v717_v61, %v1861_v17 }
  0xfa   :  { %vm766_vm15 = vcmp.gt.f32.partialorder %v699_v60, 0.0  ;;  %v814_v0 = vmul.f32 0.1, %v699_v60 }
  0xfb   :  { %vm767_vm0 = vcmp.gt.f32.partialorder %v718_v62, 0.0  ;;  %v815_v1 = vmul.f32 0.1, %v718_v62 }
  0xfc   :  { %v862_v2 = vsel %vm766_vm15, %v699_v60, %v814_v0 }
  0xfd   :  { %v863_v3 = vsel %vm767_vm0, %v718_v62, %v815_v1 }
  0xfe   :  { %v887_v4 = vpack.c.bf16 %v863_v3, %v862_v2 }
 0x100   :  { %911 = vst [vmem:[%s1967_s3 + $0xb8] sm:$0xff] %v887_v4 }

// kernel: text_vae_forward.11
= control target key start
LH: loop header
LB: loop body
LE: loop exit
PB: predicated region body
PF: predicated region fallthrough
CT: control target
= control target key end

     0   :  { %s3345_s1 = inlined_call_operand.vmem [shape: bf16[1152,256], index: 1, kind: input, shape index: {}]   ;;  %s3346_s0 = inlined_call_operand.vmem [shape: bf16[32,1152], index: 0, kind: input, shape index: {}]   ;;  %s3347_s2 = inlined_call_operand.vmem [shape: f32[32,1], index: 2, kind: input, shape index: {}]   ;;  %s3348_s3 = inlined_call_operand.vmem [shape: bf16[32,256], index: 3, kind: output, shape index: {}]  }
   0x1   :  { %v1522_v0 = vld [vmem:[%s3345_s1 + $0x70] sm:$0xf]  ;;  %v2073_v1 = vld [vmem:[%s3345_s1 + $0x74] sm:$0xf0]  ;;  %v1514_v11 = vld [vmem:[%s3345_s1 + $0x60] sm:$0xf] }
   0x2   :  { %v1586_v2 = vld [vmem:[%s3345_s1 + $0xf0] sm:$0xf]  ;;  %v1523_v3 = vor.u32 %v2073_v1, %v1522_v0  ;;  %v2089_v4 = vld [vmem:[%s3345_s1 + $0xf4] sm:$0xf0]  ;;  %v2071_v13 = vld [vmem:[%s3345_s1 + $0x64] sm:$0xf0] }
   0x3   :  { %v1650_v5 = vld [vmem:[%s3345_s1 + $0x170] sm:$0xf]  ;;  %v2105_v6 = vld [vmem:[%s3345_s1 + $0x174] sm:$0xf0]  ;;  %v1587_v7 = vor.u32 %v2089_v4, %v1586_v2  ;;  %v1578_v14 = vld [vmem:[%s3345_s1 + $0xe0] sm:$0xf]  ;;  %v1515_v16 = vor.u32 %v2071_v13, %v1514_v11 }
   0x4   :  { %v1651_v8 = vor.u32 %v2105_v6, %v1650_v5  ;;  %v1714_v9 = vld [vmem:[%s3345_s1 + $0x1f0] sm:$0xf]  ;;  %v2121_v10 = vld [vmem:[%s3345_s1 + $0x1f4] sm:$0xf0]  ;;  %1014 = vmatpush.bf16.msra.mxu0 %v1523_v3  ;;  %v2087_v15 = vld [vmem:[%s3345_s1 + $0xe4] sm:$0xf0] }
   0x5   :  { %v1715_v12 = vor.u32 %v2121_v10, %v1714_v9  ;;  %1033 = vmatpush.bf16.msra.mxu1 %v1587_v7  ;;  %v1579_v17 = vor.u32 %v2087_v15, %v1578_v14  ;;  %v1642_v18 = vld [vmem:[%s3345_s1 + $0x160] sm:$0xf]  ;;  %v2103_v19 = vld [vmem:[%s3345_s1 + $0x164] sm:$0xf0]  ;;  %v1506_v23 = vld [vmem:[%s3345_s1 + $0x50] sm:$0xf] }
   0x6   :  { %1052 = vmatpush.bf16.msra.mxu2 %v1651_v8  ;;  %v1706_v20 = vld [vmem:[%s3345_s1 + $0x1e0] sm:$0xf]  ;;  %v1643_v21 = vor.u32 %v2103_v19, %v1642_v18  ;;  %v2119_v22 = vld [vmem:[%s3345_s1 + $0x1e4] sm:$0xf0]  ;;  %v2069_v24 = vld [vmem:[%s3345_s1 + $0x54] sm:$0xf0] }
   0x7   :  { %1071 = vmatpush.bf16.msra.mxu3 %v1715_v12  ;;  %v1707_v25 = vor.u32 %v2119_v22, %v1706_v20  ;;  %v1570_v26 = vld [vmem:[%s3345_s1 + $0xd0] sm:$0xf]  ;;  %v2085_v27 = vld [vmem:[%s3345_s1 + $0xd4] sm:$0xf0]  ;;  %v1507_v29 = vor.u32 %v2069_v24, %v1506_v23  ;;  %v1498_v35 = vld [vmem:[%s3345_s1 + $0x40] sm:$0xf] }
   0x8   :  { %v1634_v28 = vld [vmem:[%s3345_s1 + $0x150] sm:$0xf]  ;;  %1015 = vmatpush.bf16.msra.mxu0 %v1515_v16  ;;  %v2101_v30 = vld [vmem:[%s3345_s1 + $0x154] sm:$0xf0]  ;;  %v1571_v33 = vor.u32 %v2085_v27, %v1570_v26  ;;  %v2067_v36 = vld [vmem:[%s3345_s1 + $0x44] sm:$0xf0] }
   0x9   :  { %v1698_v31 = vld [vmem:[%s3345_s1 + $0x1d0] sm:$0xf]  ;;  %v2117_v32 = vld [vmem:[%s3345_s1 + $0x1d4] sm:$0xf0]  ;;  %1034 = vmatpush.bf16.msra.mxu1 %v1579_v17  ;;  %v1635_v34 = vor.u32 %v2101_v30, %v1634_v28  ;;  %v1562_v37 = vld [vmem:[%s3345_s1 + $0xc0] sm:$0xf]  ;;  %v1499_v44 = vor.u32 %v2067_v36, %v1498_v35 }
   0xa   :  { %1053 = vmatpush.bf16.msra.mxu2 %v1643_v21  ;;  %v1699_v38 = vor.u32 %v2117_v32, %v1698_v31  ;;  %v2083_v39 = vld [vmem:[%s3345_s1 + $0xc4] sm:$0xf0]  ;;  %v1626_v40 = vld [vmem:[%s3345_s1 + $0x140] sm:$0xf]  ;;  %v1490_v47 = vld [vmem:[%s3345_s1 + $0x30] sm:$0xf] }
   0xb   :  { %1072 = vmatpush.bf16.msra.mxu3 %v1707_v25  ;;  %v2099_v41 = vld [vmem:[%s3345_s1 + $0x144] sm:$0xf0]  ;;  %v1690_v42 = vld [vmem:[%s3345_s1 + $0x1c0] sm:$0xf]  ;;  %v1563_v45 = vor.u32 %v2083_v39, %v1562_v37  ;;  %v2065_v48 = vld [vmem:[%s3345_s1 + $0x34] sm:$0xf0] }
   0xc   :  { %v2115_v43 = vld [vmem:[%s3345_s1 + $0x1c4] sm:$0xf0]  ;;  %1016 = vmatpush.bf16.msra.mxu0 %v1507_v29  ;;  %v1627_v46 = vor.u32 %v2099_v41, %v1626_v40  ;;  %v1554_v49 = vld [vmem:[%s3345_s1 + $0xb0] sm:$0xf]  ;;  %v2081_v51 = vld [vmem:[%s3345_s1 + $0xb4] sm:$0xf0]  ;;  %v1491_v56 = vor.u32 %v2065_v48, %v1490_v47 }
   0xd   :  { %1035 = vmatpush.bf16.msra.mxu1 %v1571_v33  ;;  %v1691_v50 = vor.u32 %v2115_v43, %v1690_v42  ;;  %v1618_v52 = vld [vmem:[%s3345_s1 + $0x130] sm:$0xf]  ;;  %v2097_v53 = vld [vmem:[%s3345_s1 + $0x134] sm:$0xf0]  ;;  %v1555_v57 = vor.u32 %v2081_v51, %v1554_v49  ;;  %v1482_v59 = vld [vmem:[%s3345_s1 + $0x20] sm:$0xf] }
   0xe   :  { %1054 = vmatpush.bf16.msra.mxu2 %v1635_v34  ;;  %v1682_v54 = vld [vmem:[%s3345_s1 + $0x1b0] sm:$0xf]  ;;  %v2113_v55 = vld [vmem:[%s3345_s1 + $0x1b4] sm:$0xf0]  ;;  %v1619_v58 = vor.u32 %v2097_v53, %v1618_v52  ;;  %v2063_v60 = vld [vmem:[%s3345_s1 + $0x24] sm:$0xf0] }
   0xf   :  { %1073 = vmatpush.bf16.msra.mxu3 %v1699_v38  ;;  %v1546_v61 = vld [vmem:[%s3345_s1 + $0xa0] sm:$0xf]  ;;  %v1683_v62 = vor.u32 %v2113_v55, %v1682_v54  ;;  %v2079_v63 = vld [vmem:[%s3345_s1 + $0xa4] sm:$0xf0]  ;;  %v1483_v4 = vor.u32 %v2063_v60, %v1482_v59  ;;  %v1474_v7 = vld [vmem:[%s3345_s1 + $0x10] sm:$0xf] }
  0x10   :  { %1017 = vmatpush.bf16.msra.mxu0 %v1499_v44  ;;  %v1610_v0 = vld [vmem:[%s3345_s1 + $0x120] sm:$0xf]  ;;  %v2095_v1 = vld [vmem:[%s3345_s1 + $0x124] sm:$0xf0]  ;;  %v1547_v5 = vor.u32 %v2079_v63, %v1546_v61  ;;  %v2061_v8 = vld [vmem:[%s3345_s1 + $0x14] sm:$0xf0] }
  0x11   :  { %1036 = vmatpush.bf16.msra.mxu1 %v1563_v45  ;;  %v1674_v2 = vld [vmem:[%s3345_s1 + $0x1a0] sm:$0xf]  ;;  %v2111_v3 = vld [vmem:[%s3345_s1 + $0x1a4] sm:$0xf0]  ;;  %v1611_v6 = vor.u32 %v2095_v1, %v1610_v0  ;;  %v1538_v9 = vld [vmem:[%s3345_s1 + $0x90] sm:$0xf]  ;;  %v1475_v17 = vor.u32 %v2061_v8, %v1474_v7 }
  0x12   :  { %1055 = vmatpush.bf16.msra.mxu2 %v1627_v46  ;;  %v1675_v10 = vor.u32 %v2111_v3, %v1674_v2  ;;  %v2077_v11 = vld [vmem:[%s3345_s1 + $0x94] sm:$0xf0]  ;;  %v1602_v12 = vld [vmem:[%s3345_s1 + $0x110] sm:$0xf]  ;;  %v1466_v16 = vld [vmem:[%s3345_s1] sm:$0xf] }
  0x13   :  { %1074 = vmatpush.bf16.msra.mxu3 %v1691_v50  ;;  %v2093_v13 = vld [vmem:[%s3345_s1 + $0x114] sm:$0xf0]  ;;  %v1666_v14 = vld [vmem:[%s3345_s1 + $0x190] sm:$0xf]  ;;  %v2059_v18 = vld [vmem:[%s3345_s1 + $0x4] sm:$0xf0]  ;;  %v1539_v21 = vor.u32 %v2077_v11, %v1538_v9 }
  0x14   :  { %1018 = vmatpush.bf16.msra.mxu0 %v1491_v56  ;;  %v2109_v15 = vld [vmem:[%s3345_s1 + $0x194] sm:$0xf0]  ;;  %v1530_v19 = vld [vmem:[%s3345_s1 + $0x80] sm:$0xf]  ;;  %v2075_v20 = vld [vmem:[%s3345_s1 + $0x84] sm:$0xf0]  ;;  %v1603_v22 = vor.u32 %v2093_v13, %v1602_v12  ;;  %v1467_v34 = vor.u32 %v2059_v18, %v1466_v16 }
  0x15   :  { %1037 = vmatpush.bf16.msra.mxu1 %v1555_v57  ;;  %v1594_v23 = vld [vmem:[%s3345_s1 + $0x100] sm:$0xf]  ;;  %v2091_v24 = vld [vmem:[%s3345_s1 + $0x104] sm:$0xf0]  ;;  %v1667_v26 = vor.u32 %v2109_v15, %v1666_v14  ;;  %v2044_v29 = vld [vmem:[%s3346_s0 + $0x20] sm:$0xf0]  ;;  %v1531_v38 = vor.u32 %v2075_v20, %v1530_v19 }
  0x16   :  { %1056 = vmatpush.bf16.msra.mxu2 %v1619_v58  ;;  %v1658_v25 = vld [vmem:[%s3345_s1 + $0x180] sm:$0xf]  ;;  %v2107_v27 = vld [vmem:[%s3345_s1 + $0x184] sm:$0xf0]  ;;  %v2040_v30 = vld [vmem:[%s3346_s0 + $0x4] sm:$0xf]  ;;  %v1595_v39 = vor.u32 %v2091_v24, %v1594_v23 }
  0x17   :  { %1075 = vmatpush.bf16.msra.mxu3 %v1683_v62  ;;  %v1394_v28 = vld [vmem:[%s3346_s0] sm:$0xf]  ;;  %v1396_v31 = vld [vmem:[%s3346_s0 + $0x24] sm:$0xf0]  ;;  %v1906_v32 = vld [vmem:[%s3345_s1 + $0x370] sm:$0xf]  ;;  %v1659_v43 = vor.u32 %v2107_v27, %v1658_v25 }
  0x18   :  { %1019 = vmatpush.bf16.msra.mxu0 %v1483_v4  ;;  %v2169_v33 = vld [vmem:[%s3345_s1 + $0x374] sm:$0xf0]  ;;  %v1402_v35 = vld [vmem:[%s3346_s0 + $0x8] sm:$0xf]  ;;  %v1842_v36 = vld [vmem:[%s3345_s1 + $0x2f0] sm:$0xf]  ;;  %v2479_v48 = vor.u32 %v2044_v29, %v1394_v28  ;;  %v2490_v53 = vor.u32 %v2040_v30, %v1396_v31 }
  0x19   :  { %1038 = vmatpush.bf16.msra.mxu1 %v1547_v5  ;;  %v2153_v37 = vld [vmem:[%s3345_s1 + $0x2f4] sm:$0xf0]  ;;  %v2045_v40 = vld [vmem:[%s3346_s0 + $0x28] sm:$0xf0]  ;;  %v1404_v42 = vld [vmem:[%s3346_s0 + $0x2c] sm:$0xf0]  ;;  %v1907_v44 = vor.u32 %v2169_v33, %v1906_v32 }
  0x1a   :  { %1057 = vmatpush.bf16.msra.mxu2 %v1611_v6  ;;  %v2041_v41 = vld [vmem:[%s3346_s0 + $0xc] sm:$0xf]  ;;  %v1778_v45 = vld [vmem:[%s3345_s1 + $0x270] sm:$0xf]  ;;  %v2137_v46 = vld [vmem:[%s3345_s1 + $0x274] sm:$0xf0]  ;;  %v1843_v49 = vor.u32 %v2153_v37, %v1842_v36  ;;  %v2492_v54 = vor.u32 %v2045_v40, %v1402_v35 }
  0x1b   :  { %1076 = vmatpush.bf16.msra.mxu3 %v1675_v10  ;;  %v1970_v47 = vld [vmem:[%s3345_s1 + $0x3f0] sm:$0xf]  ;;  %v2185_v50 = vld [vmem:[%s3345_s1 + $0x3f4] sm:$0xf0]  ;;  %v1898_v51 = vld [vmem:[%s3345_s1 + $0x360] sm:$0xf]  ;;  %v2500_v57 = vor.u32 %v2041_v41, %v1404_v42  ;;  %v1779_v58 = vor.u32 %v2137_v46, %v1778_v45 }
  0x1c   :  { %1020 = vmatpush.bf16.msra.mxu0 %v1475_v17  ;;  %v2167_v52 = vld [vmem:[%s3345_s1 + $0x364] sm:$0xf0]  ;;  %v1834_v55 = vld [vmem:[%s3345_s1 + $0x2e0] sm:$0xf]  ;;  %v1971_v59 = vor.u32 %v2185_v50, %v1970_v47  ;;  %v1890_v2 = vld [vmem:[%s3345_s1 + $0x350] sm:$0xf] }
  0x1d   :  { %1039 = vmatpush.bf16.msra.mxu1 %v1539_v21  ;;  %v2151_v56 = vld [vmem:[%s3345_s1 + $0x2e4] sm:$0xf0]  ;;  %v1899_v60 = vor.u32 %v2167_v52, %v1898_v51  ;;  %v1770_v61 = vld [vmem:[%s3345_s1 + $0x260] sm:$0xf]  ;;  %v2165_v3 = vld [vmem:[%s3345_s1 + $0x354] sm:$0xf0] }
  0x1e   :  { %1058 = vmatpush.bf16.msra.mxu2 %v1603_v22  ;;  %v2135_v62 = vld [vmem:[%s3345_s1 + $0x264] sm:$0xf0]  ;;  %v1962_v63 = vld [vmem:[%s3345_s1 + $0x3e0] sm:$0xf]  ;;  %v1835_v0 = vor.u32 %v2151_v56, %v1834_v55  ;;  %v1826_v4 = vld [vmem:[%s3345_s1 + $0x2d0] sm:$0xf]  ;;  %v1891_v9 = vor.u32 %v2165_v3, %v1890_v2 }
  0x1f   :  { %1077 = vmatpush.bf16.msra.mxu3 %v1667_v26  ;;  %v2183_v1 = vld [vmem:[%s3345_s1 + $0x3e4] sm:$0xf0]  ;;  %v2149_v5 = vld [vmem:[%s3345_s1 + $0x2d4] sm:$0xf0]  ;;  %v1771_v6 = vor.u32 %v2135_v62, %v1770_v61  ;;  %v178_v7 = vld [vmem:[%s3347_s2] sm:$0xff]  ;;  %v2221_v15 = vmov 0  }
  0x20   :  { %1021 = vmatpush.bf16.msra.mxu0 %v1467_v34  ;;  %v1963_v8 = vor.u32 %v2183_v1, %v1962_v63  ;;  %v1762_v10 = vld [vmem:[%s3345_s1 + $0x250] sm:$0xf]  ;;  %v2133_v11 = vld [vmem:[%s3345_s1 + $0x254] sm:$0xf0]  ;;  %v1827_v13 = vor.u32 %v2149_v5, %v1826_v4  ;;  %2219 = vset.pattern.permute.xlu0 %v2221_v15  ;;  %v1882_v16 = vld [vmem:[%s3345_s1 + $0x340] sm:$0xf] }
  0x21   :  { %1040 = vmatpush.bf16.msra.mxu1 %v1531_v38  ;;  %v1954_v12 = vld [vmem:[%s3345_s1 + $0x3d0] sm:$0xf]  ;;  %v2181_v14 = vld [vmem:[%s3345_s1 + $0x3d4] sm:$0xf0]  ;;  %v2163_v17 = vld [vmem:[%s3345_s1 + $0x344] sm:$0xf0]  ;;  %184 = vperm.xlu0 %2219, %v178_v7   ;;  %v1763_v20 = vor.u32 %v2133_v11, %v1762_v10 }
  0x22   :  { %1059 = vmatpush.bf16.msra.mxu2 %v1595_v39  ;;  %v1818_v18 = vld [vmem:[%s3345_s1 + $0x2c0] sm:$0xf]  ;;  %v2147_v19 = vld [vmem:[%s3345_s1 + $0x2c4] sm:$0xf0]  ;;  %2220 = vset.pattern.permute.xlu1 %v2221_v15  ;;  %v1955_v24 = vor.u32 %v2181_v14, %v1954_v12  ;;  %v1883_v25 = vor.u32 %v2163_v17, %v1882_v16  ;;  %v2053_v28 = vld [vmem:[%s3346_s0 + $0x68] sm:$0xf0] }
  0x23   :  { %1078 = vmatpush.bf16.msra.mxu3 %v1659_v43  ;;  %1022 = vmatmul.bf16.vlgmr.msra.gmra.mxu0 %v2479_v48  ;;  %v1754_v21 = vld [vmem:[%s3345_s1 + $0x240] sm:$0xf]  ;;  %v2131_v22 = vld [vmem:[%s3345_s1 + $0x244] sm:$0xf0]  ;;  %v1819_v29 = vor.u32 %v2147_v19, %v1818_v18  ;;  %v2049_v30 = vld [vmem:[%s3346_s0 + $0x4c] sm:$0xf] }
  0x24   :  { %1041 = vmatmul.bf16.vlgmr.msra.gmra.mxu1 %v2490_v53  ;;  %1090 = vmatpush.bf16.msrb.mxu0 %v1779_v58  ;;  %v1946_v23 = vld [vmem:[%s3345_s1 + $0x3c0] sm:$0xf]  ;;  %v2179_v26 = vld [vmem:[%s3345_s1 + $0x3c4] sm:$0xf0]  ;;  %v1432_v31 = vld [vmem:[%s3346_s0 + $0x6c] sm:$0xf0]  ;;  %v1755_v39 = vor.u32 %v2131_v22, %v1754_v21 }
  0x25   :  { %1109 = vmatpush.bf16.msrb.mxu1 %v1843_v49  ;;  %1060 = vmatmul.bf16.vlgmr.msra.gmra.mxu2 %v2492_v54  ;;  %v1430_v27 = vld [vmem:[%s3346_s0 + $0x48] sm:$0xf]  ;;  %v1438_v32 = vld [vmem:[%s3346_s0 + $0x50] sm:$0xf]  ;;  %v2054_v33 = vld [vmem:[%s3346_s0 + $0x70] sm:$0xf0]  ;;  %v1947_v43 = vor.u32 %v2179_v26, %v1946_v23  ;;  %v2631_v56 = vor.u32 %v2049_v30, %v1432_v31 }
  0x26   :  { %1128 = vmatpush.bf16.msrb.mxu2 %v1907_v44  ;;  %1079 = vmatmul.bf16.vlgmr.msra.gmra.mxu3 %v2500_v57  ;;  %v1874_v34 = vld [vmem:[%s3345_s1 + $0x330] sm:$0xf]  ;;  %v2161_v35 = vld [vmem:[%s3345_s1 + $0x334] sm:$0xf0]  ;;  %v2050_v36 = vld [vmem:[%s3346_s0 + $0x54] sm:$0xf]  ;;  %v2620_v49 = vor.u32 %v2053_v28, %v1430_v27  ;;  %v2633_v58 = vor.u32 %v2054_v33, %v1438_v32 }
  0x27   :  { %1147 = vmatpush.bf16.msrb.mxu3 %v1971_v59  ;;  %v1810_v37 = vld [vmem:[%s3345_s1 + $0x2b0] sm:$0xf]  ;;  %v2145_v38 = vld [vmem:[%s3345_s1 + $0x2b4] sm:$0xf0]  ;;  %v179_v42 = vld [vmem:[%s3347_s2 + $0x8] sm:$0xff]  ;;  %v1875_v44 = vor.u32 %v2161_v35, %v1874_v34 }
  0x28   :  { %1091 = vmatpush.bf16.msrb.mxu0 %v1771_v6  ;;  %v1440_v40 = vld [vmem:[%s3346_s0 + $0x74] sm:$0xf0]  ;;  %v1746_v41 = vld [vmem:[%s3345_s1 + $0x230] sm:$0xf]  ;;  %v1811_v50 = vor.u32 %v2145_v38, %v1810_v37  ;;  %v1866_v51 = vld [vmem:[%s3345_s1 + $0x320] sm:$0xf] }
  0x29   :  { %1110 = vmatpush.bf16.msrb.mxu1 %v1835_v0  ;;  %v2129_v45 = vld [vmem:[%s3345_s1 + $0x234] sm:$0xf0]  ;;  %v1938_v46 = vld [vmem:[%s3345_s1 + $0x3b0] sm:$0xf]  ;;  %v2159_v52 = vld [vmem:[%s3345_s1 + $0x324] sm:$0xf0]  ;;  %189 = vperm.xlu0 %2219, %v179_v42   ;;  %v2641_v61 = vor.u32 %v2050_v36, %v1440_v40 }
  0x2a   :  { %1129 = vmatpush.bf16.msrb.mxu2 %v1899_v60  ;;  %v2177_v47 = vld [vmem:[%s3345_s1 + $0x3b4] sm:$0xf0]  ;;  %v180_v55 = vld [vmem:[%s3347_s2 + $0x10] sm:$0xff]  ;;  %v1802_v59 = vld [vmem:[%s3345_s1 + $0x2a0] sm:$0xf]  ;;  %v1747_v62 = vor.u32 %v2129_v45, %v1746_v41  ;;  %v1867_v0 = vor.u32 %v2159_v52, %v1866_v51 }
  0x2b   :  { %1148 = vmatpush.bf16.msrb.mxu3 %v1963_v8  ;;  %v2143_v60 = vld [vmem:[%s3345_s1 + $0x2a4] sm:$0xf0]  ;;  %194 = vperm.xlu1 %2220, %v180_v55   ;;  %v1939_v63 = vor.u32 %v2177_v47, %v1938_v46  ;;  %v1738_v1 = vld [vmem:[%s3345_s1 + $0x220] sm:$0xf]  ;;  %v1858_v6 = vld [vmem:[%s3345_s1 + $0x310] sm:$0xf] }
  0x2c   :  { %1092 = vmatpush.bf16.msrb.mxu0 %v1763_v20  ;;  %v2127_v2 = vld [vmem:[%s3345_s1 + $0x224] sm:$0xf0]  ;;  %v1930_v3 = vld [vmem:[%s3345_s1 + $0x3a0] sm:$0xf]  ;;  %v1803_v4 = vor.u32 %v2143_v60, %v1802_v59  ;;  %v2157_v7 = vld [vmem:[%s3345_s1 + $0x314] sm:$0xf0] }
  0x2d   :  { %1111 = vmatpush.bf16.msrb.mxu1 %v1827_v13  ;;  %v2175_v5 = vld [vmem:[%s3345_s1 + $0x3a4] sm:$0xf0]  ;;  %v1794_v8 = vld [vmem:[%s3345_s1 + $0x290] sm:$0xf]  ;;  %v1739_v10 = vor.u32 %v2127_v2, %v1738_v1  ;;  %v2125_v12 = vld [vmem:[%s3345_s1 + $0x214] sm:$0xf0]  ;;  %v1859_v14 = vor.u32 %v2157_v7, %v1858_v6 }
  0x2e   :  { %1130 = vmatpush.bf16.msrb.mxu2 %v1891_v9  ;;  %v2141_v9 = vld [vmem:[%s3345_s1 + $0x294] sm:$0xf0]  ;;  %v1730_v11 = vld [vmem:[%s3345_s1 + $0x210] sm:$0xf]  ;;  %v1931_v13 = vor.u32 %v2175_v5, %v1930_v3  ;;  %v1850_v17 = vld [vmem:[%s3345_s1 + $0x300] sm:$0xf] }
  0x2f   :  { %1149 = vmatpush.bf16.msrb.mxu3 %v1955_v24  ;;  %v1922_v15 = vld [vmem:[%s3345_s1 + $0x390] sm:$0xf]  ;;  %v2173_v16 = vld [vmem:[%s3345_s1 + $0x394] sm:$0xf0]  ;;  %v1795_v18 = vor.u32 %v2141_v9, %v1794_v8  ;;  %v2155_v19 = vld [vmem:[%s3345_s1 + $0x304] sm:$0xf0] }
  0x30   :  { %1093 = vmatpush.bf16.msrb.mxu0 %v1755_v39  ;;  %v1786_v20 = vld [vmem:[%s3345_s1 + $0x280] sm:$0xf]  ;;  %v181_v21 = vld [vmem:[%s3347_s2 + $0x18] sm:$0xff]  ;;  %v2139_v22 = vld [vmem:[%s3345_s1 + $0x284] sm:$0xf0]  ;;  %v1851_v30 = vor.u32 %v2155_v19, %v1850_v17 }
  0x31   :  { %1112 = vmatpush.bf16.msrb.mxu1 %v1819_v29  ;;  %v2088_v23 = vld [vmem:[%s3345_s1 + $0xf4] sm:$0xf]  ;;  %v1588_v24 = vld [vmem:[%s3345_s1 + $0xf8] sm:$0xf0]  ;;  %v1722_v26 = vld [vmem:[%s3345_s1 + $0x200] sm:$0xf]  ;;  %v1923_v29 = vor.u32 %v2173_v16, %v1922_v15  ;;  %v1787_v34 = vor.u32 %v2139_v22, %v1786_v20 }
  0x32   :  { %1131 = vmatpush.bf16.msrb.mxu2 %v1883_v25  ;;  %v1731_v25 = vor.u32 %v2125_v12, %v1730_v11  ;;  %v2072_v27 = vld [vmem:[%s3345_s1 + $0x74] sm:$0xf]  ;;  %v1524_v28 = vld [vmem:[%s3345_s1 + $0x78] sm:$0xf0]  ;;  %v2123_v31 = vld [vmem:[%s3345_s1 + $0x204] sm:$0xf0]  ;;  %v1591_v39 = vor.u32 %v2088_v23, %v1588_v24 }
  0x33   :  { %1150 = vmatpush.bf16.msrb.mxu3 %v1947_v43  ;;  %1027 = vmatmul.bf16.gmra.mxu0 %v2620_v49  ;;  %v1914_v32 = vld [vmem:[%s3345_s1 + $0x380] sm:$0xf]  ;;  %v2171_v33 = vld [vmem:[%s3345_s1 + $0x384] sm:$0xf0]  ;;  %v1410_v35 = vld [vmem:[%s3346_s0 + $0x10] sm:$0xf]  ;;  %v1527_v43 = vor.u32 %v2072_v27, %v1524_v28  ;;  %v1723_v47 = vor.u32 %v2123_v31, %v1722_v26 }
  0x34   :  { %1046 = vmatmul.bf16.gmra.mxu1 %v2631_v56  ;;  %1094 = vmatpush.bf16.msrb.mxu0 %v1747_v62  ;;  %v2046_v36 = vld [vmem:[%s3346_s0 + $0x30] sm:$0xf0]  ;;  %v1412_v38 = vld [vmem:[%s3346_s0 + $0x34] sm:$0xf0]  ;;  %v2034_v40 = vld [vmem:[%s3345_s1 + $0x470] sm:$0xf]  ;;  %v1915_v55 = vor.u32 %v2171_v33, %v1914_v32 }
  0x35   :  { %1113 = vmatpush.bf16.msrb.mxu1 %v1811_v50  ;;  %1065 = vmatmul.bf16.gmra.mxu2 %v2633_v58  ;;  %v2042_v37 = vld [vmem:[%s3346_s0 + $0x14] sm:$0xf]  ;;  %v2201_v41 = vld [vmem:[%s3345_s1 + $0x474] sm:$0xf0]  ;;  %v2086_v45 = vld [vmem:[%s3345_s1 + $0xe4] sm:$0xf]  ;;  %v2779_v5 = vor.u32 %v2046_v36, %v1410_v35 }
  0x36   :  { %1132 = vmatpush.bf16.msrb.mxu2 %v1875_v44  ;;  %1084 = vmatmul.bf16.gmra.mxu3 %v2641_v61  ;;  %v2104_v42 = vld [vmem:[%s3345_s1 + $0x174] sm:$0xf]  ;;  %v1652_v44 = vld [vmem:[%s3345_s1 + $0x178] sm:$0xf0]  ;;  %v1580_v46 = vld [vmem:[%s3345_s1 + $0xe8] sm:$0xf0]  ;;  %v2035_v60 = vor.u32 %v2201_v41, %v2034_v40  ;;  %v2781_v6 = vor.u32 %v2042_v37, %v1412_v38 }
  0x37   :  { %1151 = vmatpush.bf16.msrb.mxu3 %v1939_v63  ;;  %199 = vperm.xlu1 %2220, %v181_v21   ;;  %v1418_v50 = vld [vmem:[%s3346_s0 + $0x18] sm:$0xf]  ;;  %v2047_v51 = vld [vmem:[%s3346_s0 + $0x38] sm:$0xf0]  ;;  %v1420_v59 = vld [vmem:[%s3346_s0 + $0x3c] sm:$0xf0]  ;;  %v1583_v1 = vor.u32 %v2086_v45, %v1580_v46 }
  0x38   :  { %1095 = vmatpush.bf16.msrb.mxu0 %v1739_v10  ;;  %v2043_v52 = vld [vmem:[%s3346_s0 + $0x1c] sm:$0xf]  ;;  %v2026_v62 = vld [vmem:[%s3345_s1 + $0x460] sm:$0xf]  ;;  %v2199_v63 = vld [vmem:[%s3345_s1 + $0x464] sm:$0xf0]  ;;  %v2792_v10 = vor.u32 %v2047_v51, %v1418_v50 }
  0x39   :  { %1114 = vmatpush.bf16.msrb.mxu1 %v1803_v4  ;;  %v2070_v2 = vld [vmem:[%s3345_s1 + $0x64] sm:$0xf]  ;;  %v1516_v3 = vld [vmem:[%s3345_s1 + $0x68] sm:$0xf0]  ;;  %v2084_v8 = vld [vmem:[%s3345_s1 + $0xd4] sm:$0xf]  ;;  %v2794_v11 = vor.u32 %v2043_v52, %v1420_v59  ;;  %v2027_v12 = vor.u32 %v2199_v63, %v2026_v62 }
  0x3a   :  { %1133 = vmatpush.bf16.msrb.mxu2 %v1867_v0  ;;  %v1655_v0 = vor.u32 %v2104_v42, %v1652_v44  ;;  %v2102_v4 = vld [vmem:[%s3345_s1 + $0x164] sm:$0xf]  ;;  %v1644_v7 = vld [vmem:[%s3345_s1 + $0x168] sm:$0xf0]  ;;  %v1572_v9 = vld [vmem:[%s3345_s1 + $0xd8] sm:$0xf0] }
  0x3b   :  { %1152 = vmatpush.bf16.msrb.mxu3 %v1931_v13  ;;  %v1519_v13 = vor.u32 %v2070_v2, %v1516_v3  ;;  %v2197_v15 = vld [vmem:[%s3345_s1 + $0x454] sm:$0xf0]  ;;  %v1647_v16 = vor.u32 %v2102_v4, %v1644_v7  ;;  %v1575_v17 = vor.u32 %v2084_v8, %v1572_v9  ;;  %v1508_v19 = vld [vmem:[%s3345_s1 + $0x58] sm:$0xf0]  ;;  %v2100_v20 = vld [vmem:[%s3345_s1 + $0x154] sm:$0xf] }
  0x3c   :  { %1096 = vmatpush.bf16.msrb.mxu0 %v1731_v25  ;;  %v1636_v21 = vld [vmem:[%s3345_s1 + $0x158] sm:$0xf0]  ;;  %v2082_v22 = vld [vmem:[%s3345_s1 + $0xc4] sm:$0xf]  ;;  %v1564_v23 = vld [vmem:[%s3345_s1 + $0xc8] sm:$0xf0] }
  0x3d   :  { %1115 = vmatpush.bf16.msrb.mxu1 %v1795_v18  ;;  %v2068_v18 = vld [vmem:[%s3345_s1 + $0x54] sm:$0xf]  ;;  %v2010_v26 = vld [vmem:[%s3345_s1 + $0x440] sm:$0xf]  ;;  %v2195_v27 = vld [vmem:[%s3345_s1 + $0x444] sm:$0xf0]  ;;  %v1639_v28 = vor.u32 %v2100_v20, %v1636_v21 }
  0x3e   :  { %1134 = vmatpush.bf16.msrb.mxu2 %v1859_v14  ;;  %v2018_v14 = vld [vmem:[%s3345_s1 + $0x450] sm:$0xf]  ;;  %v1511_v25 = vor.u32 %v2068_v18, %v1508_v19  ;;  %v1500_v31 = vld [vmem:[%s3345_s1 + $0x48] sm:$0xf0]  ;;  %v2098_v32 = vld [vmem:[%s3345_s1 + $0x144] sm:$0xf]  ;;  %v2011_v36 = vor.u32 %v2195_v27, %v2010_v26 }
  0x3f   :  { %1153 = vmatpush.bf16.msrb.mxu3 %v1923_v29  ;;  %v2019_v24 = vor.u32 %v2197_v15, %v2018_v14  ;;  %v1567_v29 = vor.u32 %v2082_v22, %v1564_v23  ;;  %v1628_v33 = vld [vmem:[%s3345_s1 + $0x148] sm:$0xf0]  ;;  %v1556_v35 = vld [vmem:[%s3345_s1 + $0xb8] sm:$0xf0]  ;;  %v2002_v38 = vld [vmem:[%s3345_s1 + $0x430] sm:$0xf] }
  0x40   :  { %1097 = vmatpush.bf16.msrb.mxu0 %v1723_v47  ;;  %v1631_v40 = vor.u32 %v2098_v32, %v1628_v33  ;;  %v1446_v41 = vld [vmem:[%s3346_s0 + $0x58] sm:$0xf]  ;;  %v2055_v42 = vld [vmem:[%s3346_s0 + $0x78] sm:$0xf0]  ;;  %v1448_v44 = vld [vmem:[%s3346_s0 + $0x7c] sm:$0xf0] }
  0x41   :  { %1116 = vmatpush.bf16.msrb.mxu1 %v1787_v34  ;;  %v2080_v34 = vld [vmem:[%s3345_s1 + $0xb4] sm:$0xf]  ;;  %v1492_v47 = vld [vmem:[%s3345_s1 + $0x38] sm:$0xf0]  ;;  %v2078_v52 = vld [vmem:[%s3345_s1 + $0xa4] sm:$0xf] }
  0x42   :  { %1135 = vmatpush.bf16.msrb.mxu2 %v1851_v30  ;;  %v2066_v30 = vld [vmem:[%s3345_s1 + $0x44] sm:$0xf]  ;;  %v1559_v45 = vor.u32 %v2080_v34, %v1556_v35  ;;  %v2064_v46 = vld [vmem:[%s3345_s1 + $0x34] sm:$0xf]  ;;  %v1620_v51 = vld [vmem:[%s3345_s1 + $0x138] sm:$0xf0] }
  0x43   :  { %1154 = vmatpush.bf16.msrb.mxu3 %v1915_v55  ;;  %1098 = vmatmul.bf16.vlgmr.msrb.gmra.mxu0 %v2779_v5  ;;  %v1503_v37 = vor.u32 %v2066_v30, %v1500_v31  ;;  %v2096_v50 = vld [vmem:[%s3345_s1 + $0x134] sm:$0xf]  ;;  %v1548_v55 = vld [vmem:[%s3345_s1 + $0xa8] sm:$0xf0]  ;;  %v1454_v59 = vld [vmem:[%s3346_s0 + $0x60] sm:$0xf] }
  0x44   :  { %1166 = vmatpush.bf16.msra.mxu0 %v2035_v60  ;;  %1117 = vmatmul.bf16.vlgmr.msrb.gmra.mxu1 %v2781_v6  ;;  %v2056_v60 = vld [vmem:[%s3346_s0 + $0x80] sm:$0xf0]  ;;  %v1456_v63 = vld [vmem:[%s3346_s0 + $0x84] sm:$0xf0]  ;;  %v1994_v2 = vld [vmem:[%s3345_s1 + $0x420] sm:$0xf]  ;;  %v1623_v4 = vor.u32 %v2096_v50, %v1620_v51  ;;  %v1551_v7 = vor.u32 %v2078_v52, %v1548_v55 }
  0x45   :  { %1185 = vmatpush.bf16.msra.mxu1 %v1527_v43  ;;  %1136 = vmatmul.bf16.vlgmr.msrb.gmra.mxu2 %v2792_v10  ;;  %v2051_v43 = vld [vmem:[%s3346_s0 + $0x5c] sm:$0xf]  ;;  %v2052_v62 = vld [vmem:[%s3346_s0 + $0x64] sm:$0xf]  ;;  %v2191_v3 = vld [vmem:[%s3345_s1 + $0x424] sm:$0xf0]  ;;  %v2924_v18 = vor.u32 %v2056_v60, %v1454_v59 }
  0x46   :  { %1204 = vmatpush.bf16.msra.mxu2 %v1591_v39  ;;  %1155 = vmatmul.bf16.vlgmr.msrb.gmra.mxu3 %v2794_v11  ;;  %v2193_v39 = vld [vmem:[%s3345_s1 + $0x434] sm:$0xf0]  ;;  %v2062_v8 = vld [vmem:[%s3345_s1 + $0x24] sm:$0xf]  ;;  %v1484_v9 = vld [vmem:[%s3345_s1 + $0x28] sm:$0xf0]  ;;  %v2913_v14 = vor.u32 %v2051_v43, %v1448_v44  ;;  %v2926_v19 = vor.u32 %v2052_v62, %v1456_v63  ;;  %v1995_v20 = vor.u32 %v2191_v3, %v1994_v2 }
  0x47   :  { %1223 = vmatpush.bf16.msra.mxu3 %v1655_v0  ;;  %v2003_v0 = vor.u32 %v2193_v39, %v2002_v38  ;;  %v1612_v15 = vld [vmem:[%s3345_s1 + $0x128] sm:$0xf0]  ;;  %v1487_v21 = vor.u32 %v2062_v8, %v1484_v9  ;;  %v1986_v22 = vld [vmem:[%s3345_s1 + $0x410] sm:$0xf]  ;;  %v2189_v23 = vld [vmem:[%s3345_s1 + $0x414] sm:$0xf0] }
  0x48   :  { %1167 = vmatpush.bf16.msra.mxu0 %v2027_v12  ;;  %v2094_v12 = vld [vmem:[%s3345_s1 + $0x124] sm:$0xf]  ;;  %v2060_v26 = vld [vmem:[%s3345_s1 + $0x14] sm:$0xf]  ;;  %v1476_v27 = vld [vmem:[%s3345_s1 + $0x18] sm:$0xf0]  ;;  %v1987_v34 = vor.u32 %v2189_v23, %v1986_v22 }
  0x49   :  { %1186 = vmatpush.bf16.msra.mxu1 %v1519_v13  ;;  %v2911_v13 = vor.u32 %v2055_v42, %v1446_v41  ;;  %v2074_v30 = vld [vmem:[%s3345_s1 + $0x84] sm:$0xf]  ;;  %v1532_v31 = vld [vmem:[%s3345_s1 + $0x88] sm:$0xf0]  ;;  %v2152_v32 = vld [vmem:[%s3345_s1 + $0x2f4] sm:$0xf]  ;;  %v1479_v35 = vor.u32 %v2060_v26, %v1476_v27 }
  0x4a   :  { %1205 = vmatpush.bf16.msra.mxu2 %v1583_v1  ;;  %v1495_v1 = vor.u32 %v2064_v46, %v1492_v47  ;;  %v1844_v33 = vld [vmem:[%s3345_s1 + $0x2f8] sm:$0xf0]  ;;  %v2058_v38 = vld [vmem:[%s3345_s1 + $0x4] sm:$0xf]  ;;  %v1468_v41 = vld [vmem:[%s3345_s1 + $0x8] sm:$0xf0] }
  0x4b   :  { %1224 = vmatpush.bf16.msra.mxu3 %v1647_v16  ;;  %v2076_v16 = vld [vmem:[%s3345_s1 + $0x94] sm:$0xf]  ;;  %v2090_v42 = vld [vmem:[%s3345_s1 + $0x104] sm:$0xf]  ;;  %v1596_v43 = vld [vmem:[%s3345_s1 + $0x108] sm:$0xf0]  ;;  %v1847_v44 = vor.u32 %v2152_v32, %v1844_v33  ;;  %v1471_v59 = vor.u32 %v2058_v38, %v1468_v41 }
  0x4c   :  { %1168 = vmatpush.bf16.msra.mxu0 %v2019_v24  ;;  %v1615_v24 = vor.u32 %v2094_v12, %v1612_v15  ;;  %v1716_v46 = vld [vmem:[%s3345_s1 + $0x1f8] sm:$0xf0]  ;;  %v2136_v47 = vld [vmem:[%s3345_s1 + $0x274] sm:$0xf]  ;;  %v2150_v60 = vld [vmem:[%s3345_s1 + $0x2e4] sm:$0xf]  ;;  %v1599_v63 = vor.u32 %v2090_v42, %v1596_v43 }
  0x4d   :  { %1187 = vmatpush.bf16.msra.mxu1 %v1511_v25  ;;  %v1780_v50 = vld [vmem:[%s3345_s1 + $0x278] sm:$0xf0]  ;;  %v2168_v51 = vld [vmem:[%s3345_s1 + $0x374] sm:$0xf]  ;;  %v1836_v62 = vld [vmem:[%s3345_s1 + $0x2e8] sm:$0xf0] }
  0x4e   :  { %1206 = vmatpush.bf16.msra.mxu2 %v1575_v17  ;;  %v1540_v17 = vld [vmem:[%s3345_s1 + $0x98] sm:$0xf0]  ;;  %v2118_v3 = vld [vmem:[%s3345_s1 + $0x1e4] sm:$0xf]  ;;  %v1839_v9 = vor.u32 %v2150_v60, %v1836_v62  ;;  %v1772_v15 = vld [vmem:[%s3345_s1 + $0x268] sm:$0xf0] }
  0x4f   :  { %1225 = vmatpush.bf16.msra.mxu3 %v1639_v28  ;;  %v1543_v25 = vor.u32 %v2076_v16, %v1540_v17  ;;  %v2092_v28 = vld [vmem:[%s3345_s1 + $0x114] sm:$0xf]  ;;  %v1908_v52 = vld [vmem:[%s3345_s1 + $0x378] sm:$0xf0]  ;;  %v2048_v8 = vld [vmem:[%s3346_s0 + $0x40] sm:$0xf0] }
  0x50   :  { %1169 = vmatpush.bf16.msra.mxu0 %v2011_v36  ;;  %v1978_v36 = vld [vmem:[%s3345_s1 + $0x400] sm:$0xf]  ;;  %v1911_v2 = vor.u32 %v2168_v51, %v1908_v52  ;;  %v2134_v12 = vld [vmem:[%s3345_s1 + $0x264] sm:$0xf]  ;;  %v1828_v23 = vld [vmem:[%s3345_s1 + $0x2d8] sm:$0xf0] }
  0x51   :  { %1188 = vmatpush.bf16.msra.mxu1 %v1503_v37  ;;  %v2187_v37 = vld [vmem:[%s3345_s1 + $0x404] sm:$0xf0]  ;;  %v2166_v17 = vld [vmem:[%s3345_s1 + $0x364] sm:$0xf]  ;;  %v1775_v26 = vor.u32 %v2134_v12, %v1772_v15  ;;  %v2164_v32 = vld [vmem:[%s3345_s1 + $0x354] sm:$0xf] }
  0x52   :  { %1207 = vmatpush.bf16.msra.mxu2 %v1567_v29  ;;  %v1604_v29 = vld [vmem:[%s3345_s1 + $0x118] sm:$0xf0]  ;;  %v1979_v55 = vor.u32 %v2187_v37, %v1978_v36  ;;  %v2114_v36 = vld [vmem:[%s3345_s1 + $0x1c4] sm:$0xf]  ;;  %v1692_v37 = vld [vmem:[%s3345_s1 + $0x1c8] sm:$0xf0] }
  0x53   :  { %1226 = vmatpush.bf16.msra.mxu3 %v1631_v40  ;;  %1103 = vmatmul.bf16.gmra.mxu0 %v2911_v13  ;;  %v1607_v39 = vor.u32 %v2092_v28, %v1604_v29  ;;  %v1535_v40 = vor.u32 %v2074_v30, %v1532_v31  ;;  %v2132_v28 = vld [vmem:[%s3345_s1 + $0x254] sm:$0xf]  ;;  %v1764_v29 = vld [vmem:[%s3345_s1 + $0x258] sm:$0xf0]  ;;  %v1695_v42 = vor.u32 %v2114_v36, %v1692_v37  ;;  %v1740_v12 = vld [vmem:[%s3345_s1 + $0x228] sm:$0xf0] }
  0x54   :  { %1170 = vmatpush.bf16.msra.mxu0 %v2003_v0  ;;  %1122 = vmatmul.bf16.gmra.mxu1 %v2913_v14  ;;  %v1892_v33 = vld [vmem:[%s3345_s1 + $0x358] sm:$0xf0]  ;;  %v1767_v38 = vor.u32 %v2132_v28, %v1764_v29  ;;  %v2144_v43 = vld [vmem:[%s3345_s1 + $0x2b4] sm:$0xf]  ;;  %v1788_v36 = vld [vmem:[%s3345_s1 + $0x288] sm:$0xf0] }
  0x55   :  { %1189 = vmatpush.bf16.msra.mxu1 %v1495_v1  ;;  %1141 = vmatmul.bf16.gmra.mxu2 %v2924_v18  ;;  %v1783_v1 = vor.u32 %v2136_v47, %v1780_v50  ;;  %v2128_v51 = vld [vmem:[%s3345_s1 + $0x234] sm:$0xf]  ;;  %v1748_v52 = vld [vmem:[%s3345_s1 + $0x238] sm:$0xf0]  ;;  %v2106_v37 = vld [vmem:[%s3345_s1 + $0x184] sm:$0xf] }
  0x56   :  { %1208 = vmatpush.bf16.msra.mxu2 %v1559_v45  ;;  %1160 = vmatmul.bf16.gmra.mxu3 %v2926_v19  ;;  %v2120_v45 = vld [vmem:[%s3345_s1 + $0x1f4] sm:$0xf]  ;;  %v1876_v62 = vld [vmem:[%s3345_s1 + $0x338] sm:$0xf0] }
  0x57   :  { %1227 = vmatpush.bf16.msra.mxu3 %v1623_v4  ;;  %v1719_v0 = vor.u32 %v2120_v45, %v1716_v46  ;;  %v1708_v4 = vld [vmem:[%s3345_s1 + $0x1e8] sm:$0xf0]  ;;  %v2112_v45 = vld [vmem:[%s3345_s1 + $0x1b4] sm:$0xf]  ;;  %v1684_v46 = vld [vmem:[%s3345_s1 + $0x1b8] sm:$0xf0] }
  0x58   :  { %1171 = vmatpush.bf16.msra.mxu0 %v1995_v20  ;;  %v1711_v16 = vor.u32 %v2118_v3, %v1708_v4  ;;  %v1900_v20 = vld [vmem:[%s3345_s1 + $0x368] sm:$0xf0]  ;;  %v2160_v60 = vld [vmem:[%s3345_s1 + $0x334] sm:$0xf]  ;;  %v1462_v3 = vld [vmem:[%s3346_s0 + $0x68] sm:$0xf] }
  0x59   :  { %1190 = vmatpush.bf16.msra.mxu1 %v1487_v21  ;;  %v2148_v21 = vld [vmem:[%s3345_s1 + $0x2d4] sm:$0xf]  ;;  %v1903_v27 = vor.u32 %v2166_v17, %v1900_v20  ;;  %v2057_v4 = vld [vmem:[%s3346_s0 + $0x88] sm:$0xf0]  ;;  %v2158_v17 = vld [vmem:[%s3345_s1 + $0x324] sm:$0xf] }
  0x5a   :  { %1209 = vmatpush.bf16.msra.mxu2 %v1551_v7  ;;  %v1426_v7 = vld [vmem:[%s3346_s0 + $0x20] sm:$0xf]  ;;  %v1831_v30 = vor.u32 %v2148_v21, %v1828_v23  ;;  %v1868_v20 = vld [vmem:[%s3345_s1 + $0x328] sm:$0xf0]  ;;  %v2140_v21 = vld [vmem:[%s3345_s1 + $0x294] sm:$0xf]  ;;  %v3139_v23 = vor.u32 %v2057_v4, %v1462_v3 }
  0x5b   :  { %1228 = vmatpush.bf16.msra.mxu3 %v1615_v24  ;;  %v3031_v22 = vor.u32 %v2048_v8, %v1426_v7  ;;  %v2116_v24 = vld [vmem:[%s3345_s1 + $0x1d4] sm:$0xf]  ;;  %v1751_v7 = vor.u32 %v2128_v51, %v1748_v52  ;;  %v1879_v8 = vor.u32 %v2160_v60, %v1876_v62  ;;  %v1871_v28 = vor.u32 %v2158_v17, %v1868_v20  ;;  %v2028_v60 = vld [vmem:[%s3345_s1 + $0x468] sm:$0xf0] }
  0x5c   :  { %1172 = vmatpush.bf16.msra.mxu0 %v1987_v34  ;;  %v2146_v34 = vld [vmem:[%s3345_s1 + $0x2c4] sm:$0xf]  ;;  %v2124_v29 = vld [vmem:[%s3345_s1 + $0x214] sm:$0xf] }
  0x5d   :  { %1191 = vmatpush.bf16.msra.mxu1 %v1479_v35  ;;  %v1820_v35 = vld [vmem:[%s3345_s1 + $0x2c8] sm:$0xf0] }
  0x5e   :  { %1210 = vmatpush.bf16.msra.mxu2 %v1543_v25  ;;  %v1700_v25 = vld [vmem:[%s3345_s1 + $0x1d8] sm:$0xf0]  ;;  %v1823_v41 = vor.u32 %v2146_v34, %v1820_v35  ;;  %v2138_v35 = vld [vmem:[%s3345_s1 + $0x284] sm:$0xf] }
  0x5f   :  { %1229 = vmatpush.bf16.msra.mxu3 %v1607_v39  ;;  %v1703_v31 = vor.u32 %v2116_v24, %v1700_v25  ;;  %v2130_v39 = vld [vmem:[%s3345_s1 + $0x244] sm:$0xf]  ;;  %v1796_v24 = vld [vmem:[%s3345_s1 + $0x298] sm:$0xf0]  ;;  %v2108_v25 = vld [vmem:[%s3345_s1 + $0x194] sm:$0xf] }
  0x60   :  { %1173 = vmatpush.bf16.msra.mxu0 %v1979_v55  ;;  %v1860_v34 = vld [vmem:[%s3345_s1 + $0x318] sm:$0xf0] }
  0x61   :  { %1192 = vmatpush.bf16.msra.mxu1 %v1471_v59  ;;  %v1687_v59 = vor.u32 %v2112_v45, %v1684_v46  ;;  %v2036_v45 = vld [vmem:[%s3345_s1 + $0x478] sm:$0xf0]  ;;  %v2182_v46 = vld [vmem:[%s3345_s1 + $0x3e4] sm:$0xf] }
  0x62   :  { %1211 = vmatpush.bf16.msra.mxu2 %v1535_v40  ;;  %v1756_v40 = vld [vmem:[%s3345_s1 + $0x248] sm:$0xf0] }
  0x63   :  { %1230 = vmatpush.bf16.msra.mxu3 %v1599_v63  ;;  %1174 = vmatmul.bf16.vlgmr.msra.gmra.mxu0 %v3031_v22  ;;  %v1759_v47 = vor.u32 %v2130_v39, %v1756_v40  ;;  %v2142_v63 = vld [vmem:[%s3345_s1 + $0x2a4] sm:$0xf] }
  0x64   :  { %1242 = vmatpush.bf16.msrb.mxu0 %v1719_v0  ;;  %1193 = vmatmul.bf16.vlgmr.msra.gmra.mxu1 %v2479_v48  ;;  %v1895_v48 = vor.u32 %v2164_v32, %v1892_v33  ;;  %v1804_v0 = vld [vmem:[%s3345_s1 + $0x2a8] sm:$0xf0]  ;;  %v2156_v33 = vld [vmem:[%s3345_s1 + $0x314] sm:$0xf] }
  0x65   :  { %1261 = vmatpush.bf16.msrb.mxu1 %v1783_v1  ;;  %1212 = vmatmul.bf16.vlgmr.msra.gmra.mxu2 %v2490_v53  ;;  %v2162_v53 = vld [vmem:[%s3345_s1 + $0x344] sm:$0xf]  ;;  %v1807_v15 = vor.u32 %v2142_v63, %v1804_v0  ;;  %v1863_v40 = vor.u32 %v2156_v33, %v1860_v34  ;;  %v2180_v63 = vld [vmem:[%s3345_s1 + $0x3d4] sm:$0xf]  ;;  %v1956_v0 = vld [vmem:[%s3345_s1 + $0x3d8] sm:$0xf0] }
  0x66   :  { %1280 = vmatpush.bf16.msrb.mxu2 %v1847_v44  ;;  %1231 = vmatmul.bf16.vlgmr.msra.gmra.mxu3 %v2492_v54  ;;  %v1884_v54 = vld [vmem:[%s3345_s1 + $0x348] sm:$0xf0]  ;;  %v1812_v44 = vld [vmem:[%s3345_s1 + $0x2b8] sm:$0xf0]  ;;  %v2110_v1 = vld [vmem:[%s3345_s1 + $0x1a4] sm:$0xf]  ;;  %v1959_v3 = vor.u32 %v2180_v63, %v1956_v0 }
  0x67   :  { %1299 = vmatpush.bf16.msrb.mxu3 %v1911_v2  ;;  %v1887_v50 = vor.u32 %v2162_v53, %v1884_v54  ;;  %v1815_v55 = vor.u32 %v2144_v43, %v1812_v44  ;;  %v1676_v2 = vld [vmem:[%s3345_s1 + $0x1a8] sm:$0xf0]  ;;  %v2154_v53 = vld [vmem:[%s3345_s1 + $0x304] sm:$0xf]  ;;  %v2200_v44 = vld [vmem:[%s3345_s1 + $0x474] sm:$0xf] }
  0x68   :  { %1243 = vmatpush.bf16.msrb.mxu0 %v1711_v16  ;;  %v1679_v16 = vor.u32 %v2110_v1, %v1676_v2  ;;  %v1852_v54 = vld [vmem:[%s3345_s1 + $0x308] sm:$0xf0]  ;;  %v2039_v52 = vor.u32 %v2200_v44, %v2036_v45  ;;  %v2196_v1 = vld [vmem:[%s3345_s1 + $0x454] sm:$0xf]  ;;  %v2020_v2 = vld [vmem:[%s3345_s1 + $0x458] sm:$0xf0] }
  0x69   :  { %1262 = vmatpush.bf16.msrb.mxu1 %v1775_v26  ;;  %v1668_v26 = vld [vmem:[%s3345_s1 + $0x198] sm:$0xf0]  ;;  %v1855_v51 = vor.u32 %v2154_v53, %v1852_v54  ;;  %v2023_v4 = vor.u32 %v2196_v1, %v2020_v2 }
  0x6a   :  { %1281 = vmatpush.bf16.msrb.mxu2 %v1839_v9  ;;  %v2126_v9 = vld [vmem:[%s3345_s1 + $0x224] sm:$0xf]  ;;  %v1671_v32 = vor.u32 %v2108_v25, %v1668_v26  ;;  %v1996_v26 = vld [vmem:[%s3345_s1 + $0x428] sm:$0xf0] }
  0x6b   :  { %1300 = vmatpush.bf16.msrb.mxu3 %v1903_v27  ;;  %v1743_v27 = vor.u32 %v2126_v9, %v1740_v12  ;;  %v2194_v9 = vld [vmem:[%s3345_s1 + $0x444] sm:$0xf]  ;;  %v2012_v12 = vld [vmem:[%s3345_s1 + $0x448] sm:$0xf0] }
  0x6c   :  { %1244 = vmatpush.bf16.msrb.mxu0 %v1703_v31  ;;  %v1799_v31 = vor.u32 %v2140_v21, %v1796_v24  ;;  %v2174_v21 = vld [vmem:[%s3345_s1 + $0x3a4] sm:$0xf]  ;;  %v1932_v24 = vld [vmem:[%s3345_s1 + $0x3a8] sm:$0xf0] }
  0x6d   :  { %1263 = vmatpush.bf16.msrb.mxu1 %v1767_v38  ;;  %v1660_v38 = vld [vmem:[%s3345_s1 + $0x188] sm:$0xf0]  ;;  %v2190_v25 = vld [vmem:[%s3345_s1 + $0x424] sm:$0xf] }
  0x6e   :  { %1282 = vmatpush.bf16.msrb.mxu2 %v1831_v30  ;;  %v1732_v30 = vld [vmem:[%s3345_s1 + $0x218] sm:$0xf0] }
  0x6f   :  { %1301 = vmatpush.bf16.msrb.mxu3 %v1895_v48  ;;  %v1972_v48 = vld [vmem:[%s3345_s1 + $0x3f8] sm:$0xf0]  ;;  %v1735_v39 = vor.u32 %v2124_v29, %v1732_v30  ;;  %v2172_v29 = vld [vmem:[%s3345_s1 + $0x394] sm:$0xf] }
  0x70   :  { %1245 = vmatpush.bf16.msrb.mxu0 %v1695_v42  ;;  %v1724_v42 = vld [vmem:[%s3345_s1 + $0x208] sm:$0xf0]  ;;  %v1924_v30 = vld [vmem:[%s3345_s1 + $0x398] sm:$0xf0] }
  0x71   :  { %1264 = vmatpush.bf16.msrb.mxu1 %v1759_v47  ;;  %v1964_v47 = vld [vmem:[%s3345_s1 + $0x3e8] sm:$0xf0]  ;;  %v1927_v33 = vor.u32 %v2172_v29, %v1924_v30 }
  0x72   :  { %1283 = vmatpush.bf16.msrb.mxu2 %v1823_v41  ;;  %v2122_v41 = vld [vmem:[%s3345_s1 + $0x204] sm:$0xf] }
  0x73   :  { %1302 = vmatpush.bf16.msrb.mxu3 %v1887_v50  ;;  %1179 = vmatmul.bf16.gmra.mxu0 %v3139_v23  ;;  %v1727_v50 = vor.u32 %v2122_v41, %v1724_v42 }
  0x74   :  { %1246 = vmatpush.bf16.msrb.mxu0 %v1687_v59  ;;  %1198 = vmatmul.bf16.gmra.mxu1 %v2620_v49  ;;  %v2184_v49 = vld [vmem:[%s3345_s1 + $0x3f4] sm:$0xf]  ;;  %v2198_v59 = vld [vmem:[%s3345_s1 + $0x464] sm:$0xf] }
  0x75   :  { %1265 = vmatpush.bf16.msrb.mxu1 %v1751_v7  ;;  %1217 = vmatmul.bf16.gmra.mxu2 %v2631_v56  ;;  %v1791_v56 = vor.u32 %v2138_v35, %v1788_v36  ;;  %v1975_v43 = vor.u32 %v2184_v49, %v1972_v48  ;;  %v2031_v62 = vor.u32 %v2198_v59, %v2028_v60  ;;  %v2178_v7 = vld [vmem:[%s3345_s1 + $0x3c4] sm:$0xf]  ;;  %v1916_v36 = vld [vmem:[%s3345_s1 + $0x388] sm:$0xf0] }
  0x76   :  { %1284 = vmatpush.bf16.msrb.mxu2 %v1815_v55  ;;  %1236 = vmatmul.bf16.gmra.mxu3 %v2633_v58  ;;  %v1663_v58 = vor.u32 %v2106_v37, %v1660_v38  ;;  %v1967_v55 = vor.u32 %v2182_v46, %v1964_v47  ;;  %v2170_v35 = vld [vmem:[%s3345_s1 + $0x384] sm:$0xf]  ;;  %v1980_v38 = vld [vmem:[%s3345_s1 + $0x408] sm:$0xf0] }
  0x77   :  { %1303 = vmatpush.bf16.msrb.mxu3 %v1879_v8  ;;  %v1948_v8 = vld [vmem:[%s3345_s1 + $0x3c8] sm:$0xf0]  ;;  %v2186_v37 = vld [vmem:[%s3345_s1 + $0x404] sm:$0xf]  ;;  %v1919_v49 = vor.u32 %v2170_v35, %v1916_v36 }
  0x78   :  { %1247 = vmatpush.bf16.msrb.mxu0 %v1679_v16  ;;  %v1940_v16 = vld [vmem:[%s3345_s1 + $0x3b8] sm:$0xf0] }
  0x79   :  { %1266 = vmatpush.bf16.msrb.mxu1 %v1743_v27  ;;  %v1935_v27 = vor.u32 %v2174_v21, %v1932_v24 }
  0x7a   :  { %1285 = vmatpush.bf16.msrb.mxu2 %v1807_v15  ;;  %v1951_v15 = vor.u32 %v2178_v7, %v1948_v8 }
  0x7b   :  { %1304 = vmatpush.bf16.msrb.mxu3 %v1871_v28  ;;  %v1999_v28 = vor.u32 %v2190_v25, %v1996_v26 }
  0x7c   :  { %1248 = vmatpush.bf16.msrb.mxu0 %v1671_v32  ;;  %v1988_v32 = vld [vmem:[%s3345_s1 + $0x418] sm:$0xf0] }
  0x7d   :  { %1267 = vmatpush.bf16.msrb.mxu1 %v1735_v39 }
  0x7e   :  { %1286 = vmatpush.bf16.msrb.mxu2 %v1799_v31  ;;  %v2188_v31 = vld [vmem:[%s3345_s1 + $0x414] sm:$0xf] }
  0x7f   :  { %1305 = vmatpush.bf16.msrb.mxu3 %v1863_v40  ;;  %v1991_v34 = vor.u32 %v2188_v31, %v1988_v32 }
  0x80   :  { %1249 = vmatpush.bf16.msrb.mxu0 %v1663_v58 }
  0x81   :  { %1268 = vmatpush.bf16.msrb.mxu1 %v1727_v50 }
  0x82   :  { %1287 = vmatpush.bf16.msrb.mxu2 %v1791_v56 }
  0x83   :  { %1306 = vmatpush.bf16.msrb.mxu3 %v1855_v51  ;;  %1250 = vmatmul.bf16.vlgmr.msrb.gmra.mxu0 %v2500_v57  ;;  %v2015_v57 = vor.u32 %v2194_v9, %v2012_v12 }
  0x84   :  { %1318 = vmatpush.bf16.msra.mxu0 %v1975_v43  ;;  %1269 = vmatmul.bf16.vlgmr.msrb.gmra.mxu1 %v2779_v5  ;;  %v2176_v5 = vld [vmem:[%s3345_s1 + $0x3b4] sm:$0xf] }
  0x85   :  { %1337 = vmatpush.bf16.msra.mxu1 %v2039_v52  ;;  %1288 = vmatmul.bf16.vlgmr.msrb.gmra.mxu2 %v2781_v6  ;;  %v2192_v6 = vld [vmem:[%s3345_s1 + $0x434] sm:$0xf]  ;;  %v1943_v17 = vor.u32 %v2176_v5, %v1940_v16 }
  0x86   :  { %2202 = vmatpush.bf16.msra.mxu2 %v1975_v43  ;;  %1307 = vmatmul.bf16.vlgmr.msrb.gmra.mxu3 %v2792_v10  ;;  %v2004_v10 = vld [vmem:[%s3345_s1 + $0x438] sm:$0xf0] }
  0x87   :  { %2210 = vmatpush.bf16.msra.mxu3 %v2039_v52  ;;  %v2007_v20 = vor.u32 %v2192_v6, %v2004_v10 }
  0x88   :  { %1319 = vmatpush.bf16.msra.mxu0 %v1967_v55 }
  0x89   :  { %1338 = vmatpush.bf16.msra.mxu1 %v2031_v62 }
  0x8a   :  { %2203 = vmatpush.bf16.msra.mxu2 %v1967_v55 }
  0x8b   :  { %2211 = vmatpush.bf16.msra.mxu3 %v2031_v62 }
  0x8c   :  { %1320 = vmatpush.bf16.msra.mxu0 %v1959_v3 }
  0x8d   :  { %1339 = vmatpush.bf16.msra.mxu1 %v2023_v4 }
  0x8e   :  { %2204 = vmatpush.bf16.msra.mxu2 %v1959_v3 }
  0x8f   :  { %2212 = vmatpush.bf16.msra.mxu3 %v2023_v4 }
  0x90   :  { %1321 = vmatpush.bf16.msra.mxu0 %v1951_v15 }
  0x91   :  { %1340 = vmatpush.bf16.msra.mxu1 %v2015_v57 }
  0x92   :  { %2205 = vmatpush.bf16.msra.mxu2 %v1951_v15 }
  0x93   :  { %2213 = vmatpush.bf16.msra.mxu3 %v2015_v57  ;;  %1255 = vmatmul.bf16.gmra.mxu0 %v2641_v61  ;;  %v1983_v61 = vor.u32 %v2186_v37, %v1980_v38 }
  0x94   :  { %1322 = vmatpush.bf16.msra.mxu0 %v1943_v17  ;;  %1274 = vmatmul.bf16.gmra.mxu1 %v2911_v13  ;;  %v3294_v13 = vpop.permute.xlu0 %184 }
  0x95   :  { %1341 = vmatpush.bf16.msra.mxu1 %v2007_v20  ;;  %1293 = vmatmul.bf16.gmra.mxu2 %v2913_v14 }
  0x96   :  { %2206 = vmatpush.bf16.msra.mxu2 %v1943_v17  ;;  %1312 = vmatmul.bf16.gmra.mxu3 %v2924_v18 }
  0x97   :  { %2214 = vmatpush.bf16.msra.mxu3 %v2007_v20 }
  0x98   :  { %1323 = vmatpush.bf16.msra.mxu0 %v1935_v27 }
  0x99   :  { %1342 = vmatpush.bf16.msra.mxu1 %v1999_v28 }
  0x9a   :  { %2207 = vmatpush.bf16.msra.mxu2 %v1935_v27 }
  0x9b   :  { %2215 = vmatpush.bf16.msra.mxu3 %v1999_v28 }
  0x9c   :  { %1324 = vmatpush.bf16.msra.mxu0 %v1927_v33  ;;  %v3301_v14 = vpop.permute.xlu0 %189 }
  0x9d   :  { %1343 = vmatpush.bf16.msra.mxu1 %v1991_v34  ;;  %v3304_v45 = vpop.permute.xlu1 %194 }
  0x9e   :  { %2208 = vmatpush.bf16.msra.mxu2 %v1927_v33 }
  0x9f   :  { %2216 = vmatpush.bf16.msra.mxu3 %v1991_v34 }
  0xa0   :  { %1325 = vmatpush.bf16.msra.mxu0 %v1919_v49  ;;  %v1023_v48 = vpop.f32.mrf.mxu0 }
  0xa1   :  { %1344 = vmatpush.bf16.msra.mxu1 %v1983_v61  ;;  %v1024_v39 = vadd.f32 %v1023_v48, %v3294_v13  ;;  %v1042_v40 = vpop.f32.mrf.mxu1 }
  0xa2   :  { %2209 = vmatpush.bf16.msra.mxu2 %v1919_v49 }
  0xa3   :  { %2217 = vmatpush.bf16.msra.mxu3 %v1983_v61  ;;  %v1043_v41 = vadd.f32 %v1042_v40, %v1024_v39  ;;  %1326 = vmatmul.bf16.vlgmr.msra.gmra.mxu0 %v2794_v11 }
  0xa4   :  { %1345 = vmatmul.bf16.vlgmr.msra.gmra.mxu1 %v3031_v22 }
  0xa5   :  { %1331 = vmatmul.bf16.vlgmr.msra.gmra.mxu2 %v2926_v19 }
  0xa6   :  { %1350 = vmatmul.bf16.vlgmr.msra.gmra.mxu3 %v3139_v23 }
  0xa8   :  { %v1061_v18 = vpop.f32.mrf.mxu2  ;;  %v1025_v42 = vpop.f32.mrf.mxu0 }
  0xa9   :  { %v1062_v56 = vadd.f32 %v1061_v18, %v1043_v41  ;;  %v1080_v58 = vpop.f32.mrf.mxu3  ;;  %v1026_v53 = vadd.f32 %v1025_v42, %v3301_v14  ;;  %v1044_v54 = vpop.f32.mrf.mxu1 }
  0xaa   :  { %v3307_v52 = vpop.permute.xlu1 %199 }
  0xab   :  { %v1081_v43 = vadd.f32 %v1080_v58, %v1062_v56  ;;  %v1045_v44 = vadd.f32 %v1044_v54, %v1026_v53 }
  0xb0   :  { %v1063_v11 = vpop.f32.mrf.mxu2  ;;  %v1028_v47 = vpop.f32.mrf.mxu0 }
  0xb1   :  { %v1064_v46 = vadd.f32 %v1063_v11, %v1045_v44  ;;  %v1082_v22 = vpop.f32.mrf.mxu3  ;;  %v1029_v19 = vadd.f32 %v1028_v47, %v3304_v45  ;;  %v1047_v23 = vpop.f32.mrf.mxu1 }
  0xb3   :  { %v1083_v50 = vadd.f32 %v1082_v22, %v1064_v46  ;;  %v1048_v51 = vadd.f32 %v1047_v23, %v1029_v19 }
  0xb8   :  { %v1066_v55 = vpop.f32.mrf.mxu2  ;;  %v1030_v62 = vpop.f32.mrf.mxu0 }
  0xb9   :  { %v1067_v59 = vadd.f32 %v1066_v55, %v1048_v51  ;;  %v1085_v60 = vpop.f32.mrf.mxu3  ;;  %v1031_v63 = vadd.f32 %v1030_v62, %v3307_v52  ;;  %v1049_v0 = vpop.f32.mrf.mxu1 }
  0xbb   :  { %v1086_v1 = vadd.f32 %v1085_v60, %v1067_v59  ;;  %v1050_v2 = vadd.f32 %v1049_v0, %v1031_v63 }
  0xc0   :  { %v1068_v3 = vpop.f32.mrf.mxu2  ;;  %v1099_v8 = vpop.f32.mrf.mxu0 }
  0xc1   :  { %v1069_v4 = vadd.f32 %v1068_v3, %v1050_v2  ;;  %v1087_v7 = vpop.f32.mrf.mxu3  ;;  %v1118_v9 = vpop.f32.mrf.mxu1  ;;  %v1100_v15 = vadd.f32 %v1099_v8, %v1081_v43 }
  0xc3   :  { %v1088_v12 = vadd.f32 %v1087_v7, %v1069_v4  ;;  %v1119_v57 = vadd.f32 %v1118_v9, %v1100_v15 }
  0xc8   :  { %v1137_v5 = vpop.f32.mrf.mxu2  ;;  %v1101_v10 = vpop.f32.mrf.mxu0 }
  0xc9   :  { %v1156_v16 = vpop.f32.mrf.mxu3  ;;  %v1138_v6 = vadd.f32 %v1137_v5, %v1119_v57  ;;  %v1120_v17 = vpop.f32.mrf.mxu1  ;;  %v1102_v20 = vadd.f32 %v1101_v10, %v1083_v50 }
  0xcb   :  { %v1157_v21 = vadd.f32 %v1156_v16, %v1138_v6  ;;  %v1121_v24 = vadd.f32 %v1120_v17, %v1102_v20 }
  0xd0   :  { %v1139_v25 = vpop.f32.mrf.mxu2  ;;  %v1104_v28 = vpop.f32.mrf.mxu0 }
  0xd1   :  { %v1158_v26 = vpop.f32.mrf.mxu3  ;;  %v1140_v27 = vadd.f32 %v1139_v25, %v1121_v24  ;;  %v1123_v29 = vpop.f32.mrf.mxu1  ;;  %v1105_v30 = vadd.f32 %v1104_v28, %v1086_v1 }
  0xd3   :  { %v1159_v31 = vadd.f32 %v1158_v26, %v1140_v27  ;;  %v1124_v32 = vadd.f32 %v1123_v29, %v1105_v30 }
  0xd8   :  { %v1142_v33 = vpop.f32.mrf.mxu2  ;;  %v1106_v36 = vpop.f32.mrf.mxu0 }
  0xd9   :  { %v1161_v34 = vpop.f32.mrf.mxu3  ;;  %v1143_v35 = vadd.f32 %v1142_v33, %v1124_v32  ;;  %v1125_v37 = vpop.f32.mrf.mxu1  ;;  %v1107_v38 = vadd.f32 %v1106_v36, %v1088_v12 }
  0xdb   :  { %v3310_v49 = vadd.f32 %v1161_v34, %v1143_v35  ;;  %v1126_v61 = vadd.f32 %v1125_v37, %v1107_v38 }
  0xe0   :  { %v1144_v48 = vpop.f32.mrf.mxu2  ;;  %v1175_v41 = vpop.f32.mrf.mxu0 }
  0xe1   :  { %v1163_v39 = vpop.f32.mrf.mxu3  ;;  %v1145_v40 = vadd.f32 %v1144_v48, %v1126_v61  ;;  %v1194_v18 = vpop.f32.mrf.mxu1  ;;  %v3312_v56 = vadd.f32 %v1175_v41, %v1157_v21 }
  0xe2   :  { %v1195_v3 = vadd.f32 %v1194_v18, %v3294_v13 }
  0xe3   :  { %v3314_v58 = vadd.f32 %v1163_v39, %v1145_v40  ;;  %v1364_v48 = vmul.f32 0.1, %v3312_v56  ;;  %vm1356_vm0 = vcmp.gt.f32.partialorder %v3312_v56, 0.0 }
  0xe8   :  { %v1213_v42 = vpop.f32.mrf.mxu2  ;;  %v1177_v54 = vpop.f32.mrf.mxu0 }
  0xe9   :  { %v1232_v53 = vpop.f32.mrf.mxu3  ;;  %v1196_v43 = vpop.f32.mrf.mxu1  ;;  %v3316_v44 = vadd.f32 %v1177_v54, %v1159_v31  ;;  %v1214_v4 = vadd.f32 %v1213_v42, %v1195_v3 }
  0xea   :  { %v1197_v5 = vadd.f32 %v1196_v43, %v3301_v14 }
  0xeb   :  { %v1233_v57 = vadd.f32 %v1232_v53, %v1214_v4  ;;  %v1372_v53 = vsel %vm1356_vm0, %v3312_v56, %v1364_v48  ;;  %vm1358_vm3 = vcmp.gt.f32.partialorder %v3316_v44, 0.0 }
  0xf0   :  { %v1215_v11 = vpop.f32.mrf.mxu2  ;;  %v1180_v22 = vpop.f32.mrf.mxu0 }
  0xf1   :  { %v1234_v46 = vpop.f32.mrf.mxu3  ;;  %v1199_v47 = vpop.f32.mrf.mxu1  ;;  %v1216_v10 = vadd.f32 %v1215_v11, %v1197_v5  ;;  %v1181_v18 = vadd.f32 %v1180_v22, %v3310_v49  ;;  %v1366_v22 = vmul.f32 0.1, %v3316_v44 }
  0xf2   :  { %v1200_v15 = vadd.f32 %v1199_v47, %v3304_v45 }
  0xf3   :  { %v1235_v13 = vadd.f32 %v1234_v46, %v1216_v10  ;;  %vm1360_vm2 = vcmp.gt.f32.partialorder %v1181_v18, 0.0 }
  0xf8   :  { %v1218_v19 = vpop.f32.mrf.mxu2  ;;  %v3318_v50 = vpop.f32.mrf.mxu0 }
  0xf9   :  { %v1237_v23 = vpop.f32.mrf.mxu3  ;;  %v1201_v51 = vpop.f32.mrf.mxu1  ;;  %v1219_v6 = vadd.f32 %v1218_v19, %v1200_v15 }
  0xfa   :  { %v1202_v28 = vadd.f32 %v1201_v51, %v3307_v52 }
  0xfb   :  { %v1238_v26 = vadd.f32 %v1237_v23, %v1219_v6 }
 0x100   :  { %v1220_v55 = vpop.f32.mrf.mxu2  ;;  %v1251_v60 = vpop.f32.mrf.mxu0 }
 0x101   :  { %v1239_v59 = vpop.f32.mrf.mxu3  ;;  %v1270_v62 = vpop.f32.mrf.mxu1  ;;  %v1252_v16 = vadd.f32 %v1251_v60, %v1233_v57  ;;  %v1221_v31 = vadd.f32 %v1220_v55, %v1202_v28 }
 0x103   :  { %v1271_v25 = vadd.f32 %v1270_v62, %v1252_v16  ;;  %v1240_v38 = vadd.f32 %v1239_v59, %v1221_v31  ;;  %v1368_v59 = vmul.f32 0.1, %v1181_v18 }
 0x108   :  { %v1289_v63 = vpop.f32.mrf.mxu2  ;;  %v1253_v1 = vpop.f32.mrf.mxu0 }
 0x109   :  { %v1308_v0 = vpop.f32.mrf.mxu3  ;;  %v1272_v2 = vpop.f32.mrf.mxu1  ;;  %v1290_v27 = vadd.f32 %v1289_v63, %v1271_v25  ;;  %v1254_v30 = vadd.f32 %v1253_v1, %v1235_v13  ;;  %v1376_v1 = vsel %vm1360_vm2, %v1181_v18, %v1368_v59 }
 0x10b   :  { %v1309_v45 = vadd.f32 %v1308_v0, %v1290_v27  ;;  %v1273_v36 = vadd.f32 %v1272_v2, %v1254_v30  ;;  %v1183_v2 = vadd.f32 %v3318_v50, %v3314_v58 }
 0x10d   :  { %v1370_v16 = vmul.f32 0.1, %v1183_v2  ;;  %vm1362_vm6 = vcmp.gt.f32.partialorder %v1183_v2, 0.0 }
 0x110   :  { %v1291_v7 = vpop.f32.mrf.mxu2  ;;  %v1256_v9 = vpop.f32.mrf.mxu0 }
 0x111   :  { %v1310_v8 = vpop.f32.mrf.mxu3  ;;  %v1275_v12 = vpop.f32.mrf.mxu1  ;;  %v1257_v29 = vadd.f32 %v1256_v9, %v1238_v26  ;;  %v1292_v39 = vadd.f32 %v1291_v7, %v1273_v36  ;;  %v1374_v7 = vsel %vm1358_vm3, %v3316_v44, %v1366_v22  ;;  %v1378_v44 = vsel %vm1362_vm6, %v1183_v2, %v1370_v16 }
 0x113   :  { %v1276_v14 = vadd.f32 %v1275_v12, %v1257_v29  ;;  %v1311_v54 = vadd.f32 %v1310_v8, %v1292_v39 }
 0x118   :  { %v1294_v17 = vpop.f32.mrf.mxu2  ;;  %v1258_v21 = vpop.f32.mrf.mxu0 }
 0x119   :  { %v1313_v20 = vpop.f32.mrf.mxu3  ;;  %v1277_v24 = vpop.f32.mrf.mxu1  ;;  %v1295_v61 = vadd.f32 %v1294_v17, %v1276_v14  ;;  %v1259_v52 = vadd.f32 %v1258_v21, %v1240_v38 }
 0x11b   :  { %v1314_v42 = vadd.f32 %v1313_v20, %v1295_v61  ;;  %v1278_v47 = vadd.f32 %v1277_v24, %v1259_v52 }
 0x120   :  { %v1296_v32 = vpop.f32.mrf.mxu2  ;;  %v1327_v34 = vpop.f32.mrf.mxu0 }
 0x121   :  { %v1315_v33 = vpop.f32.mrf.mxu3  ;;  %v1346_v35 = vpop.f32.mrf.mxu1  ;;  %v1328_v37 = vadd.f32 %v1327_v34, %v1309_v45  ;;  %v1297_v60 = vadd.f32 %v1296_v32, %v1278_v47 }
 0x123   :  { %v1347_v40 = vadd.f32 %v1346_v35, %v1328_v37  ;;  %v1316_v3 = vadd.f32 %v1315_v33, %v1297_v60 }
 0x125   :  { %vm1357_vm1 = vcmp.gt.f32.partialorder %v1347_v40, 0.0  ;;  %v1365_v41 = vmul.f32 0.1, %v1347_v40 }
 0x127   :  { %v1373_v43 = vsel %vm1357_vm1, %v1347_v40, %v1365_v41 }
 0x128   :  { %v1332_v11 = vpop.f32.mrf.mxu2  ;;  %v1380_v19 = vpack.c.bf16 %v1373_v43, %v1372_v53  ;;  %v1329_v51 = vpop.f32.mrf.mxu0 }
 0x129   :  { %v1351_v46 = vpop.f32.mrf.mxu3  ;;  %v1333_v23 = vadd.f32 %v1332_v11, %v1314_v42  ;;  %v1330_v55 = vadd.f32 %v1329_v51, %v1311_v54  ;;  %v1348_v49 = vpop.f32.mrf.mxu1 }
 0x12a   :  { %1384 = vst [vmem:[%s3348_s3] sm:$0xff] %v1380_v19 }
 0x12b   :  { %v1352_v62 = vadd.f32 %v1351_v46, %v1333_v23  ;;  %v1349_v56 = vadd.f32 %v1348_v49, %v1330_v55 }
 0x12d   :  { %vm1361_vm4 = vcmp.gt.f32.partialorder %v1352_v62, 0.0  ;;  %v1369_v63 = vmul.f32 0.1, %v1352_v62  ;;  %vm1359_vm5 = vcmp.gt.f32.partialorder %v1349_v56, 0.0  ;;  %v1367_v0 = vmul.f32 0.1, %v1349_v56 }
 0x12f   :  { %v1377_v4 = vsel %vm1361_vm4, %v1352_v62, %v1369_v63  ;;  %v1375_v9 = vsel %vm1359_vm5, %v1349_v56, %v1367_v0 }
 0x130   :  { %v1382_v8 = vpack.c.bf16 %v1377_v4, %v1376_v1  ;;  %v1334_v12 = vpop.f32.mrf.mxu2  ;;  %v1381_v15 = vpack.c.bf16 %v1375_v9, %v1374_v7 }
 0x131   :  { %v1335_v57 = vadd.f32 %v1334_v12, %v1316_v3  ;;  %v1353_v5 = vpop.f32.mrf.mxu3 }
 0x132   :  { %1386 = vst [vmem:[%s3348_s3 + $0x10] sm:$0xff] %v1382_v8 }
 0x133   :  { %1385 = vst [vmem:[%s3348_s3 + $0x8] sm:$0xff] %v1381_v15  ;;  %v1354_v58 = vadd.f32 %v1353_v5, %v1335_v57 }
 0x135   :  { %vm1363_vm7 = vcmp.gt.f32.partialorder %v1354_v58, 0.0  ;;  %v1371_v50 = vmul.f32 0.1, %v1354_v58 }
 0x137   :  { %v1379_v6 = vsel %vm1363_vm7, %v1354_v58, %v1371_v50 }
 0x138   :  { %v1383_v10 = vpack.c.bf16 %v1379_v6, %v1378_v44 }
 0x13a   :  { %1387 = vst [vmem:[%s3348_s3 + $0x18] sm:$0xff] %v1383_v10 }

// kernel: text_vae_forward.12
= control target key start
LH: loop header
LB: loop body
LE: loop exit
PB: predicated region body
PF: predicated region fallthrough
CT: control target
= control target key end

     0   :  { %v453_v5 = vmov 0   ;;  %vm221_vm0 = vcmask 261120   ;;  %s584_s1 = inlined_call_operand.vmem [shape: bf16[288,128], index: 1, kind: input, shape index: {}]   ;;  %s585_s0 = inlined_call_operand.vmem [shape: bf16[32,288], index: 0, kind: input, shape index: {}]   ;;  %s586_s2 = inlined_call_operand.vmem [shape: f32[32,1], index: 2, kind: input, shape index: {}]   ;;  %s587_s3 = inlined_call_operand.vmem [shape: bf16[32,128], index: 3, kind: output, shape index: {}]  }
   0x1   :  { %v420_v0 = vld [vmem:[%s584_s1 + $0x38] sm:$0xff]  ;;  %v419_v2 = vld [vmem:[%s584_s1 + $0x30] sm:$0xff]  ;;  %v430_v3 = vld [vmem:[%s584_s1 + $0x88] sm:$0xff]  ;;  %451 = vset.pattern.permute.xlu0 %v453_v5  ;;  %452 = vset.pattern.permute.xlu1 %v453_v5 }
   0x2   :  { %v428_v1 = vld [vmem:[%s584_s1 + $0x78] sm:$0xff]  ;;  %228 = vmatpush.bf16.msra.mxu0 %v420_v0  ;;  %442 = vmatpush.bf16.msra.mxu3 %v420_v0  ;;  %v427_v4 = vld [vmem:[%s584_s1 + $0x70] sm:$0xff]  ;;  %v429_v6 = vld [vmem:[%s584_s1 + $0x80] sm:$0xff] }
   0x3   :  { %247 = vmatpush.bf16.msra.mxu1 %v428_v1  ;;  %272 = vmatpush.bf16.msra.mxu2 %v430_v3  ;;  %v319_v7 = vld [vmem:[%s585_s0 + $0x8] sm:$0xf]  ;;  %v409_v8 = vld [vmem:[%s585_s0 + $0x10] sm:$0xf0]  ;;  %v59_v12 = vld [vmem:[%s586_s2] sm:$0xff] }
   0x4   :  { %v418_v9 = vld [vmem:[%s584_s1 + $0x28] sm:$0xff]  ;;  %v320_v11 = vor.u32 %v409_v8, %v319_v7  ;;  %v417_v13 = vld [vmem:[%s584_s1 + $0x20] sm:$0xff]  ;;  %65 = vperm.xlu0 %451, %v59_v12   ;;  %v416_v15 = vld [vmem:[%s584_s1 + $0x18] sm:$0xff] }
   0x5   :  { %v426_v10 = vld [vmem:[%s584_s1 + $0x68] sm:$0xff]  ;;  %v425_v14 = vld [vmem:[%s584_s1 + $0x60] sm:$0xff]  ;;  %v424_v16 = vld [vmem:[%s584_s1 + $0x58] sm:$0xff] }
   0x6   :  { %229 = vmatpush.bf16.msra.mxu0 %v419_v2  ;;  %443 = vmatpush.bf16.msra.mxu3 %v419_v2  ;;  %v415_v17 = vld [vmem:[%s584_s1 + $0x10] sm:$0xff]  ;;  %v60_v19 = vld [vmem:[%s586_s2 + $0x8] sm:$0xff]  ;;  %v331_v21 = vld [vmem:[%s585_s0 + $0x20] sm:$0xf] }
   0x7   :  { %248 = vmatpush.bf16.msra.mxu1 %v427_v4  ;;  %273 = vmatpush.bf16.msra.mxu2 %v429_v6  ;;  %v61_v18 = vld [vmem:[%s586_s2 + $0x10] sm:$0xff]  ;;  %v412_v22 = vld [vmem:[%s585_s0 + $0x28] sm:$0xf0]  ;;  %v413_v26 = vld [vmem:[%s584_s1] sm:$0xff] }
   0x8   :  { %v423_v20 = vld [vmem:[%s584_s1 + $0x50] sm:$0xff]  ;;  %75 = vperm.xlu1 %452, %v61_v18   ;;  %v414_v23 = vld [vmem:[%s584_s1 + $0x8] sm:$0xff]  ;;  %v332_v25 = vor.u32 %v412_v22, %v331_v21  ;;  %v311_v27 = vld [vmem:[%s585_s0] sm:$0xf] }
   0x9   :  { %v422_v24 = vld [vmem:[%s584_s1 + $0x48] sm:$0xff]  ;;  %v62_v28 = vld [vmem:[%s586_s2 + $0x18] sm:$0xff]  ;;  %v411_v31 = vld [vmem:[%s585_s0 + $0x20] sm:$0xf0] }
   0xa   :  { %230 = vmatpush.bf16.msra.mxu0 %v418_v9  ;;  %444 = vmatpush.bf16.msra.mxu3 %v418_v9  ;;  %v408_v29 = vld [vmem:[%s585_s0 + $0x8] sm:$0xf0]  ;;  %v323_v30 = vld [vmem:[%s585_s0 + $0x18] sm:$0xf]  ;;  %v421_v32 = vld [vmem:[%s584_s1 + $0x40] sm:$0xff] }
   0xb   :  { %249 = vmatpush.bf16.msra.mxu1 %v426_v10  ;;  %405 = vmatmul.msk.bf16.vlgmr.msra.gmra.mxu2 %vm221_vm0, %v320_v11  ;;  %v407_v33 = vld [vmem:[%s585_s0 + $0x4] sm:$0xf]  ;;  %v313_v34 = vld [vmem:[%s585_s0 + $0xc] sm:$0xf0]  ;;  %v312_v35 = vor.u32 %v408_v29, %v311_v27  ;;  %v324_v36 = vor.u32 %v411_v31, %v323_v30  ;;  %v410_v38 = vld [vmem:[%s585_s0 + $0x1c] sm:$0xf] }
   0xc   :  { %70 = vperm.xlu0 %451, %v60_v19   ;;  %v316_v37 = vor.u32 %v407_v33, %v313_v34  ;;  %v325_v39 = vld [vmem:[%s585_s0 + $0x24] sm:$0xf0] }
   0xd   :  { %v328_v40 = vor.u32 %v410_v38, %v325_v39 }
   0xe   :  { %231 = vmatpush.bf16.msra.mxu0 %v417_v13  ;;  %445 = vmatpush.bf16.msra.mxu3 %v417_v13 }
   0xf   :  { %250 = vmatpush.bf16.msra.mxu1 %v425_v14 }
  0x10   :  { %80 = vperm.xlu1 %452, %v62_v28  }
  0x12   :  { %232 = vmatpush.bf16.msra.mxu0 %v416_v15  ;;  %446 = vmatpush.bf16.msra.mxu3 %v416_v15 }
  0x13   :  { %251 = vmatpush.bf16.msra.mxu1 %v424_v16 }
  0x16   :  { %233 = vmatpush.bf16.msra.mxu0 %v415_v17  ;;  %447 = vmatpush.bf16.msra.mxu3 %v415_v17 }
  0x17   :  { %252 = vmatpush.bf16.msra.mxu1 %v423_v20 }
  0x1a   :  { %234 = vmatpush.bf16.msra.mxu0 %v414_v23  ;;  %448 = vmatpush.bf16.msra.mxu3 %v414_v23 }
  0x1b   :  { %253 = vmatpush.bf16.msra.mxu1 %v422_v24  ;;  %406 = vmatmul.msk.bf16.gmra.mxu2 %vm221_vm0, %v332_v25 }
  0x1e   :  { %235 = vmatpush.bf16.msra.mxu0 %v413_v26  ;;  %449 = vmatpush.bf16.msra.mxu3 %v413_v26 }
  0x1f   :  { %254 = vmatpush.bf16.msra.mxu1 %v421_v32 }
  0x21   :  { %236 = vmatmul.bf16.vlgmr.msra.gmra.mxu0 %v312_v35  ;;  %241 = vmatmul.bf16.vlgmr.msra.gmra.mxu3 %v324_v36 }
  0x22   :  { %255 = vmatmul.bf16.vlgmr.msra.gmra.mxu1 %v316_v37 }
  0x32   :  { %260 = vmatmul.bf16.gmra.mxu1 %v328_v40 }
  0x76   :  { %v66_v41 = vpop.permute.xlu0 %65 }
  0x7a   :  { %v76_v53 = vpop.permute.xlu1 %75 }
  0x7e   :  { %v71_v47 = vpop.permute.xlu0 %70 }
  0x82   :  { %v81_v2 = vpop.permute.xlu1 %80 }
  0x8e   :  { %v275_v42 = vpop.f32.mrf.mxu2 }
  0x96   :  { %v277_v48 = vpop.f32.mrf.mxu2 }
  0x9e   :  { %v237_v43 = vpop.f32.mrf.mxu0  ;;  %v280_v62 = vpop.f32.mrf.mxu2 }
  0x9f   :  { %v238_v44 = vadd.f32 %v237_v43, %v66_v41  ;;  %v256_v45 = vpop.f32.mrf.mxu1 }
  0xa1   :  { %v257_v46 = vadd.f32 %v256_v45, %v238_v44 }
  0xa3   :  { %v276_v50 = vadd.f32 %v275_v42, %v257_v46 }
  0xa4   :  { %v242_v54 = vpop.f32.mrf.mxu3 }
  0xa5   :  { %v289_v56 = vmul.f32 0.1, %v276_v50  ;;  %vm285_vm1 = vcmp.gt.f32.partialorder %v276_v50, 0.0  ;;  %v243_v59 = vadd.f32 %v242_v54, %v76_v53 }
  0xa6   :  { %v239_v49 = vpop.f32.mrf.mxu0  ;;  %v282_v8 = vpop.f32.mrf.mxu2 }
  0xa7   :  { %v240_v51 = vadd.f32 %v239_v49, %v71_v47  ;;  %v258_v52 = vpop.f32.mrf.mxu1  ;;  %v293_v60 = vsel %vm285_vm1, %v276_v50, %v289_v56 }
  0xa9   :  { %v259_v55 = vadd.f32 %v258_v52, %v240_v51 }
  0xab   :  { %v278_v57 = vadd.f32 %v277_v48, %v259_v55 }
  0xac   :  { %v244_v3 = vpop.f32.mrf.mxu3 }
  0xad   :  { %vm286_vm2 = vcmp.gt.f32.partialorder %v278_v57, 0.0  ;;  %v290_v58 = vmul.f32 0.1, %v278_v57  ;;  %v245_v4 = vadd.f32 %v244_v3, %v81_v2 }
  0xaf   :  { %v294_v61 = vsel %vm286_vm2, %v278_v57, %v290_v58  ;;  %v261_v63 = vpop.f32.mrf.mxu1 }
  0xb0   :  { %v434_v0 = vpack.c.bf16 %v294_v61, %v293_v60  ;;  %v262_v1 = vadd.f32 %v261_v63, %v243_v59 }
  0xb2   :  { %435 = vst [vmem:[%s587_s3] sm:$0xff] %v434_v0   ;;  %v281_v5 = vadd.f32 %v280_v62, %v262_v1 }
  0xb4   :  { %v291_v9 = vmul.f32 0.1, %v281_v5  ;;  %vm287_vm3 = vcmp.gt.f32.partialorder %v281_v5, 0.0 }
  0xb6   :  { %v295_v12 = vsel %vm287_vm3, %v281_v5, %v291_v9 }
  0xb7   :  { %v263_v6 = vpop.f32.mrf.mxu1 }
  0xb8   :  { %v264_v7 = vadd.f32 %v263_v6, %v245_v4 }
  0xba   :  { %v283_v10 = vadd.f32 %v282_v8, %v264_v7 }
  0xbc   :  { %vm288_vm4 = vcmp.gt.f32.partialorder %v283_v10, 0.0  ;;  %v292_v11 = vmul.f32 0.1, %v283_v10 }
  0xbe   :  { %v296_v13 = vsel %vm288_vm4, %v283_v10, %v292_v11 }
  0xbf   :  { %v439_v14 = vpack.c.bf16 %v296_v13, %v295_v12 }
  0xc1   :  { %441 = vst [vmem:[%s587_s3 + $0x8] sm:$0xff] %v439_v14  }

// kernel: text_vae_forward.13
= control target key start
LH: loop header
LB: loop body
LE: loop exit
PB: predicated region body
PF: predicated region fallthrough
CT: control target
= control target key end

     0   :  { %v363_v5 = vmov 0   ;;  %vm190_vm0 = vcmask 261120   ;;  %s465_s1 = inlined_call_operand.vmem [shape: bf16[288,128], index: 1, kind: input, shape index: {}]   ;;  %s466_s0 = inlined_call_operand.vmem [shape: bf16[16,288], index: 0, kind: input, shape index: {}]   ;;  %s467_s2 = inlined_call_operand.vmem [shape: f32[16,1], index: 2, kind: input, shape index: {}]   ;;  %s468_s3 = inlined_call_operand.vmem [shape: bf16[16,128], index: 3, kind: output, shape index: {}]  }
   0x1   :  { %v345_v0 = vld [vmem:[%s465_s1 + $0x38] sm:$0xff]  ;;  %v344_v2 = vld [vmem:[%s465_s1 + $0x30] sm:$0xff]  ;;  %v355_v4 = vld [vmem:[%s465_s1 + $0x88] sm:$0xff]  ;;  %362 = vset.pattern.permute.xlu0 %v363_v5 }
   0x2   :  { %v353_v1 = vld [vmem:[%s465_s1 + $0x78] sm:$0xff]  ;;  %194 = vmatpush.bf16.msra.mxu0 %v345_v0  ;;  %v352_v3 = vld [vmem:[%s465_s1 + $0x70] sm:$0xff]  ;;  %228 = vmatpush.bf16.msra.mxu2 %v355_v4  ;;  %v354_v6 = vld [vmem:[%s465_s1 + $0x80] sm:$0xff] }
   0x3   :  { %208 = vmatpush.bf16.msra.mxu1 %v353_v1  ;;  %v260_v7 = vld [vmem:[%s466_s0 + $0x8] sm:$0xf]  ;;  %v337_v8 = vld [vmem:[%s466_s0 + $0x10] sm:$0xf0]  ;;  %v55_v12 = vld [vmem:[%s467_s2] sm:$0xff] }
   0x4   :  { %v343_v9 = vld [vmem:[%s465_s1 + $0x28] sm:$0xff]  ;;  %v261_v11 = vor.u32 %v337_v8, %v260_v7  ;;  %59 = vperm.xlu0 %362, %v55_v12   ;;  %v342_v13 = vld [vmem:[%s465_s1 + $0x20] sm:$0xff]  ;;  %v341_v15 = vld [vmem:[%s465_s1 + $0x18] sm:$0xff] }
   0x5   :  { %v351_v10 = vld [vmem:[%s465_s1 + $0x68] sm:$0xff]  ;;  %v350_v14 = vld [vmem:[%s465_s1 + $0x60] sm:$0xff]  ;;  %v349_v16 = vld [vmem:[%s465_s1 + $0x58] sm:$0xff] }
   0x6   :  { %195 = vmatpush.bf16.msra.mxu0 %v344_v2  ;;  %229 = vmatpush.bf16.msra.mxu2 %v354_v6  ;;  %v56_v17 = vld [vmem:[%s467_s2 + $0x8] sm:$0xff]  ;;  %v340_v18 = vld [vmem:[%s465_s1 + $0x10] sm:$0xff]  ;;  %v338_v22 = vld [vmem:[%s465_s1] sm:$0xff] }
   0x7   :  { %209 = vmatpush.bf16.msra.mxu1 %v352_v3  ;;  %v348_v19 = vld [vmem:[%s465_s1 + $0x50] sm:$0xff]  ;;  %v339_v20 = vld [vmem:[%s465_s1 + $0x8] sm:$0xff]  ;;  %v346_v23 = vld [vmem:[%s465_s1 + $0x40] sm:$0xff] }
   0x8   :  { %v347_v21 = vld [vmem:[%s465_s1 + $0x48] sm:$0xff]  ;;  %v252_v24 = vld [vmem:[%s466_s0] sm:$0xf]  ;;  %v335_v26 = vld [vmem:[%s466_s0 + $0x4] sm:$0xf] }
   0x9   :  { %334 = vmatmul.msk.bf16.vlgmr.msra.gmra.mxu2 %vm190_vm0, %v261_v11  ;;  %v336_v25 = vld [vmem:[%s466_s0 + $0x8] sm:$0xf0]  ;;  %v254_v27 = vld [vmem:[%s466_s0 + $0xc] sm:$0xf0] }
   0xa   :  { %196 = vmatpush.bf16.msra.mxu0 %v343_v9  ;;  %v253_v28 = vor.u32 %v336_v25, %v252_v24  ;;  %v257_v29 = vor.u32 %v335_v26, %v254_v27 }
   0xb   :  { %210 = vmatpush.bf16.msra.mxu1 %v351_v10 }
   0xc   :  { %64 = vperm.xlu0 %362, %v56_v17  }
   0xe   :  { %197 = vmatpush.bf16.msra.mxu0 %v342_v13 }
   0xf   :  { %211 = vmatpush.bf16.msra.mxu1 %v350_v14 }
  0x12   :  { %198 = vmatpush.bf16.msra.mxu0 %v341_v15 }
  0x13   :  { %212 = vmatpush.bf16.msra.mxu1 %v349_v16 }
  0x16   :  { %199 = vmatpush.bf16.msra.mxu0 %v340_v18 }
  0x17   :  { %213 = vmatpush.bf16.msra.mxu1 %v348_v19 }
  0x1a   :  { %200 = vmatpush.bf16.msra.mxu0 %v339_v20 }
  0x1b   :  { %214 = vmatpush.bf16.msra.mxu1 %v347_v21 }
  0x1e   :  { %201 = vmatpush.bf16.msra.mxu0 %v338_v22 }
  0x1f   :  { %215 = vmatpush.bf16.msra.mxu1 %v346_v23 }
  0x21   :  { %202 = vmatmul.bf16.vlgmr.msra.gmra.mxu0 %v253_v28 }
  0x22   :  { %216 = vmatmul.bf16.vlgmr.msra.gmra.mxu1 %v257_v29 }
  0x76   :  { %v60_v30 = vpop.permute.xlu0 %59 }
  0x7e   :  { %v65_v36 = vpop.permute.xlu0 %64 }
  0x8c   :  { %v231_v34 = vpop.f32.mrf.mxu2 }
  0x94   :  { %v233_v42 = vpop.f32.mrf.mxu2 }
  0x9e   :  { %v203_v31 = vpop.f32.mrf.mxu0 }
  0x9f   :  { %v217_v32 = vpop.f32.mrf.mxu1  ;;  %v204_v33 = vadd.f32 %v203_v31, %v60_v30 }
  0xa1   :  { %v218_v35 = vadd.f32 %v217_v32, %v204_v33 }
  0xa3   :  { %v232_v38 = vadd.f32 %v231_v34, %v218_v35 }
  0xa5   :  { %v238_v43 = vmul.f32 0.1, %v232_v38  ;;  %vm236_vm1 = vcmp.gt.f32.partialorder %v232_v38, 0.0 }
  0xa6   :  { %v205_v37 = vpop.f32.mrf.mxu0 }
  0xa7   :  { %v206_v39 = vadd.f32 %v205_v37, %v65_v36  ;;  %v219_v40 = vpop.f32.mrf.mxu1  ;;  %v240_v46 = vsel %vm236_vm1, %v232_v38, %v238_v43 }
  0xa9   :  { %v220_v41 = vadd.f32 %v219_v40, %v206_v39 }
  0xab   :  { %v234_v44 = vadd.f32 %v233_v42, %v220_v41 }
  0xad   :  { %vm237_vm2 = vcmp.gt.f32.partialorder %v234_v44, 0.0  ;;  %v239_v45 = vmul.f32 0.1, %v234_v44 }
  0xaf   :  { %v241_v47 = vsel %vm237_vm2, %v234_v44, %v239_v45 }
  0xb0   :  { %v359_v48 = vpack.c.bf16 %v241_v47, %v240_v46 }
  0xb2   :  { %360 = vst [vmem:[%s468_s3] sm:$0xff] %v359_v48  }

// kernel: text_vae_forward.14
= control target key start
LH: loop header
LB: loop body
LE: loop exit
PB: predicated region body
PF: predicated region fallthrough
CT: control target
= control target key end

     0   :  { %vm68_vm0 = vcmask 785408   ;;  %s169_s1 = inlined_call_operand.vmem [shape: bf16[96,128], index: 1, kind: input, shape index: {}]   ;;  %s170_s2 = inlined_call_operand.vmem [shape: f32[1,128], index: 2, kind: input, shape index: {}]   ;;  %s171_s0 = inlined_call_operand.vmem [shape: bf16[8,96], index: 0, kind: input, shape index: {}]   ;;  %s172_s3 = inlined_call_operand.vmem [shape: f32[8,128], index: 3, kind: output, shape index: {}]  }
   0x1   :  { %v120_v0 = vld [vmem:[%s169_s1 + $0x28] sm:$0xff]  ;;  %v119_v1 = vld [vmem:[%s169_s1 + $0x20] sm:$0xff]  ;;  %v118_v2 = vld [vmem:[%s169_s1 + $0x18] sm:$0xff] }
   0x2   :  { %74 = vmatpush.bf16.msra.mxu0 %v120_v0  ;;  %v117_v3 = vld [vmem:[%s169_s1 + $0x10] sm:$0xff]  ;;  %v116_v4 = vld [vmem:[%s169_s1 + $0x8] sm:$0xff]  ;;  %v115_v5 = vld [vmem:[%s169_s1] sm:$0xff] }
   0x3   :  { %v15_v6 = vld [vmem:[%s171_s0] sm:$0xf] }
   0x4   :  { %v121_v7 = vld [vmem:[%s170_s2] ss:$0 sm:$0xff] }
   0x6   :  { %75 = vmatpush.bf16.msra.mxu0 %v119_v1 }
   0xa   :  { %76 = vmatpush.bf16.msra.mxu0 %v118_v2 }
   0xe   :  { %77 = vmatpush.bf16.msra.mxu0 %v117_v3 }
  0x12   :  { %78 = vmatpush.bf16.msra.mxu0 %v116_v4 }
  0x16   :  { %79 = vmatpush.bf16.msra.mxu0 %v115_v5 }
  0x19   :  { %114 = vmatmul.msk.bf16.vlgmr.msra.gmra.mxu0 %vm68_vm0, %v15_v6 }
  0x96   :  { %v81_v8 = vpop.f32.mrf.mxu0 }
  0x97   :  { %v82_v9 = vadd.f32 %v121_v7, %v81_v8 }
  0x99   :  { %85 = vst [vmem:[%s172_s3] sm:$0xff] %v82_v9 }
  0x9e   :  { %v83_v10 = vpop.f32.mrf.mxu0 }

// kernel: text_vae_forward.16
= control target key start
LH: loop header
LB: loop body
LE: loop exit
PB: predicated region body
PF: predicated region fallthrough
CT: control target
= control target key end

     0   :  { %vm77_vm0 = vcmask 261120   ;;  %s386_s1 = inlined_call_operand.vmem [shape: bf16[32,384], index: 1, kind: input, shape index: {}]   ;;  %s387_s0 = inlined_call_operand.vmem [shape: bf16[56,32], index: 0, kind: input, shape index: {}]   ;;  %s388_s2 = inlined_call_operand.vmem [shape: bf16[56,384], index: 2, kind: output, shape index: {}]  }
   0x1   :  { %v232_v0 = vld [vmem:[%s386_s1 + $0x18] sm:$0xf]  ;;  %v261_v1 = vld [vmem:[%s386_s1 + $0x20] sm:$0xf0]  ;;  %v260_v2 = vld [vmem:[%s386_s1 + $0x1c] sm:$0xf] }
   0x2   :  { %v233_v3 = vor.u32 %v261_v1, %v232_v0  ;;  %v234_v4 = vld [vmem:[%s386_s1 + $0x24] sm:$0xf0]  ;;  %v240_v5 = vld [vmem:[%s386_s1 + $0x20] sm:$0xf]  ;;  %v262_v6 = vld [vmem:[%s386_s1 + $0x28] sm:$0xf0] }
   0x3   :  { %v237_v7 = vor.u32 %v260_v2, %v234_v4  ;;  %v241_v8 = vor.u32 %v262_v6, %v240_v5  ;;  %v220_v9 = vld [vmem:[%s386_s1] sm:$0xf]  ;;  %v258_v10 = vld [vmem:[%s386_s1 + $0x8] sm:$0xf0]  ;;  %v257_v11 = vld [vmem:[%s386_s1 + $0x4] sm:$0xf] }
   0x4   :  { %96 = vmatpush.bf16.msra.mxu0 %v233_v3  ;;  %263 = vmatpush.bf16.msra.mxu3 %v233_v3  ;;  %v221_v12 = vor.u32 %v258_v10, %v220_v9  ;;  %v222_v13 = vld [vmem:[%s386_s1 + $0xc] sm:$0xf0]  ;;  %v228_v14 = vld [vmem:[%s386_s1 + $0x8] sm:$0xf]  ;;  %v259_v15 = vld [vmem:[%s386_s1 + $0x10] sm:$0xf0] }
   0x5   :  { %265 = vmatpush.bf16.msra.mxu1 %v237_v7  ;;  %267 = vmatpush.bf16.msra.mxu2 %v241_v8  ;;  %v225_v16 = vor.u32 %v257_v11, %v222_v13  ;;  %v229_v17 = vor.u32 %v259_v15, %v228_v14  ;;  %v254_v18 = vld [vmem:[%s387_s0] sm:$0xff]  ;;  %v255_v19 = vld [vmem:[%s387_s0 + $0x8] sm:$0xff]  ;;  %v256_v20 = vld [vmem:[%s387_s0 + $0x10] sm:$0xff] }
   0x6   :  { %v18_v21 = vld [vmem:[%s387_s0 + $0x18] sm:$0xf] }
   0x7   :  { %v40_v22 = vunpack.c.l.b16 %v18_v21 }
   0x8   :  { %97 = vmatpush.bf16.msra.mxu0 %v221_v12  ;;  %264 = vmatpush.bf16.msra.mxu3 %v221_v12 }
   0x9   :  { %266 = vmatpush.bf16.msra.mxu1 %v225_v16  ;;  %268 = vmatpush.bf16.msra.mxu2 %v229_v17  ;;  %v44_v23 = vpack.c.b16 %v40_v22, %v40_v22 }
   0xb   :  { %242 = vmatmul.msk.bf16.vlgmr.msra.gmra.mxu0 %vm77_vm0, %v254_v18  ;;  %243 = vmatmul.msk.bf16.vlgmr.msra.gmra.mxu3 %vm77_vm0, %v255_v19 }
   0xc   :  { %124 = vmatpush.bf16.msrb.mxu0 %v237_v7  ;;  %247 = vmatmul.msk.bf16.vlgmr.msra.gmra.mxu1 %vm77_vm0, %v255_v19 }
   0xd   :  { %251 = vmatmul.msk.bf16.vlgmr.msra.gmra.mxu2 %vm77_vm0, %v255_v19 }
  0x10   :  { %125 = vmatpush.bf16.msrb.mxu0 %v225_v16 }
  0x14   :  { %152 = vmatpush.bf16.msra.mxu0 %v241_v8 }
  0x18   :  { %153 = vmatpush.bf16.msra.mxu0 %v229_v17 }
  0x1b   :  { %244 = vmatmul.msk.bf16.gmra.mxu3 %vm77_vm0, %v256_v20  ;;  %246 = vmatmul.msk.bf16.vlgmr.msrb.gmra.mxu0 %vm77_vm0, %v254_v18 }
  0x1c   :  { %248 = vmatmul.msk.bf16.gmra.mxu1 %vm77_vm0, %v256_v20 }
  0x1d   :  { %252 = vmatmul.msk.bf16.gmra.mxu2 %vm77_vm0, %v256_v20 }
  0x2b   :  { %245 = vmatmul.msk.bf16.gmra.mxu3 %vm77_vm0, %v44_v23  ;;  %250 = vmatmul.msk.bf16.vlgmr.msra.gmra.mxu0 %vm77_vm0, %v254_v18 }
  0x2c   :  { %249 = vmatmul.msk.bf16.gmra.mxu1 %vm77_vm0, %v44_v23 }
  0x2d   :  { %253 = vmatmul.msk.bf16.gmra.mxu2 %vm77_vm0, %v44_v23 }
  0x88   :  { %v99_v24 = vpop.f32.mrf.mxu0 }
  0x89   :  { %v132_v25 = vpop.f32.mrf.mxu1 }
  0x8e   :  { %v104_v26 = vpop.f32.mrf.mxu3 }
  0x8f   :  { %v178_v27 = vpack.c.bf16 %v132_v25, %v104_v26 }
  0x90   :  { %v160_v28 = vpop.f32.mrf.mxu2  ;;  %v101_v30 = vpop.f32.mrf.mxu0 }
  0x91   :  { %v179_v29 = vpack.c.bf16 %v160_v28, %v160_v28  ;;  %192 = vst [vmem:[%s388_s2 + $0x18] sm:$0xff] %v178_v27  ;;  %v134_v31 = vpop.f32.mrf.mxu1 }
  0x93   :  { %193 = vst [vmem:[%s388_s2 + $0x20] sm:$0xf] %v179_v29 }
  0x96   :  { %v106_v32 = vpop.f32.mrf.mxu3 }
  0x97   :  { %v180_v33 = vpack.c.bf16 %v134_v31, %v106_v32 }
  0x98   :  { %v162_v34 = vpop.f32.mrf.mxu2  ;;  %v127_v36 = vpop.f32.mrf.mxu0 }
  0x99   :  { %v181_v35 = vpack.c.bf16 %v162_v34, %v162_v34  ;;  %194 = vst [vmem:[%s388_s2 + $0x24] sm:$0xff] %v180_v33  ;;  %v174_v37 = vpack.c.bf16 %v127_v36, %v99_v24  ;;  %v137_v38 = vpop.f32.mrf.mxu1 }
  0x9b   :  { %195 = vst [vmem:[%s388_s2 + $0x2c] sm:$0xf] %v181_v35 }
  0x9c   :  { %188 = vst [vmem:[%s388_s2] sm:$0xff] %v174_v37 }
  0x9e   :  { %v109_v39 = vpop.f32.mrf.mxu3 }
  0x9f   :  { %v182_v40 = vpack.c.bf16 %v137_v38, %v109_v39 }
  0xa0   :  { %v165_v41 = vpop.f32.mrf.mxu2  ;;  %v129_v43 = vpop.f32.mrf.mxu0 }
  0xa1   :  { %v183_v42 = vpack.c.bf16 %v165_v41, %v165_v41  ;;  %196 = vst [vmem:[%s388_s2 + $0x30] sm:$0xff] %v182_v40  ;;  %v176_v44 = vpack.c.bf16 %v129_v43, %v101_v30  ;;  %v139_v45 = vpop.f32.mrf.mxu1 }
  0xa3   :  { %197 = vst [vmem:[%s388_s2 + $0x38] sm:$0xf] %v183_v42 }
  0xa4   :  { %190 = vst [vmem:[%s388_s2 + $0xc] sm:$0xff] %v176_v44 }
  0xa6   :  { %v111_v46 = vpop.f32.mrf.mxu3 }
  0xa7   :  { %v184_v47 = vpack.c.bf16 %v139_v45, %v111_v46 }
  0xa8   :  { %v167_v48 = vpop.f32.mrf.mxu2  ;;  %v155_v50 = vpop.f32.mrf.mxu0 }
  0xa9   :  { %v185_v49 = vpack.c.bf16 %v167_v48, %v167_v48  ;;  %198 = vst [vmem:[%s388_s2 + $0x3c] sm:$0xff] %v184_v47  ;;  %v142_v51 = vpop.f32.mrf.mxu1  ;;  %v175_v52 = vpack.c.bf16 %v155_v50, %v155_v50 }
  0xab   :  { %199 = vst [vmem:[%s388_s2 + $0x44] sm:$0xf] %v185_v49 }
  0xac   :  { %189 = vst [vmem:[%s388_s2 + $0x8] sm:$0xf] %v175_v52 }
  0xae   :  { %v114_v53 = vpop.f32.mrf.mxu3 }
  0xaf   :  { %v186_v54 = vpack.c.bf16 %v142_v51, %v114_v53 }
  0xb0   :  { %v170_v55 = vpop.f32.mrf.mxu2  ;;  %v157_v57 = vpop.f32.mrf.mxu0 }
  0xb1   :  { %v187_v56 = vpack.c.bf16 %v170_v55, %v170_v55  ;;  %200 = vst [vmem:[%s388_s2 + $0x48] sm:$0xff] %v186_v54  ;;  %v144_v58 = vpop.f32.mrf.mxu1  ;;  %v177_v59 = vpack.c.bf16 %v157_v57, %v157_v57 }
  0xb3   :  { %201 = vst [vmem:[%s388_s2 + $0x50] sm:$0xf] %v187_v56 }
  0xb4   :  { %191 = vst [vmem:[%s388_s2 + $0x14] sm:$0xf] %v177_v59 }
  0xb6   :  { %v116_v60 = vpop.f32.mrf.mxu3 }
  0xb8   :  { %v172_v61 = vpop.f32.mrf.mxu2 }

// kernel: text_vae_forward.15
= control target key start
LH: loop header
LB: loop body
LE: loop exit
PB: predicated region body
PF: predicated region fallthrough
CT: control target
= control target key end

     0   :  { %vm76_vm0 = vcmask 130048   ;;  %s319_s1 = inlined_call_operand.vmem [shape: bf16[16,896], index: 1, kind: input, shape index: {}]   ;;  %s320_s0 = inlined_call_operand.vmem [shape: bf16[8,16], index: 0, kind: input, shape index: {}]   ;;  %s321_s2 = inlined_call_operand.vmem [shape: f32[1,896], index: 2, kind: input, shape index: {}]   ;;  %s322_s3 = inlined_call_operand.vmem [shape: bf16[8,896], index: 3, kind: output, shape index: {}]  }
   0x1   :  { %v192_v0 = vld [vmem:[%s319_s1] sm:$0xf]  ;;  %v228_v1 = vld [vmem:[%s319_s1 + $0x18] sm:$0xf0]  ;;  %v225_v2 = vld [vmem:[%s319_s1 + $0x4] sm:$0xf] }
   0x2   :  { %v193_v3 = vor.u32 %v228_v1, %v192_v0  ;;  %v194_v4 = vld [vmem:[%s319_s1 + $0x1c] sm:$0xf0]  ;;  %v200_v5 = vld [vmem:[%s319_s1 + $0x8] sm:$0xf]  ;;  %v229_v6 = vld [vmem:[%s319_s1 + $0x20] sm:$0xf0] }
   0x3   :  { %v197_v7 = vor.u32 %v225_v2, %v194_v4  ;;  %v201_v8 = vor.u32 %v229_v6, %v200_v5  ;;  %v226_v9 = vld [vmem:[%s319_s1 + $0xc] sm:$0xf]  ;;  %v202_v10 = vld [vmem:[%s319_s1 + $0x24] sm:$0xf0]  ;;  %v15_v11 = vld [vmem:[%s320_s0] sm:$0xf] }
   0x4   :  { %87 = vmatpush.bf16.msra.mxu0 %v193_v3  ;;  %v205_v12 = vor.u32 %v226_v9, %v202_v10  ;;  %v216_v13 = vld [vmem:[%s319_s1 + $0x18] sm:$0xf]  ;;  %v231_v14 = vld [vmem:[%s319_s1 + $0x30] sm:$0xf0]  ;;  %v208_v15 = vld [vmem:[%s319_s1 + $0x10] sm:$0xf] }
   0x5   :  { %100 = vmatpush.bf16.msra.mxu1 %v197_v7  ;;  %113 = vmatpush.bf16.msra.mxu2 %v201_v8  ;;  %v217_v16 = vor.u32 %v231_v14, %v216_v13  ;;  %v230_v17 = vld [vmem:[%s319_s1 + $0x28] sm:$0xf0]  ;;  %v227_v18 = vld [vmem:[%s319_s1 + $0x14] sm:$0xf]  ;;  %v210_v19 = vld [vmem:[%s319_s1 + $0x2c] sm:$0xf0] }
   0x6   :  { %126 = vmatpush.bf16.msra.mxu3 %v205_v12  ;;  %v209_v20 = vor.u32 %v230_v17, %v208_v15  ;;  %v213_v21 = vor.u32 %v227_v18, %v210_v19  ;;  %v24_v22 = vld [vmem:[%s321_s2] sm:$0xff] }
   0x7   :  { %218 = vmatmul.msk.bf16.vlgmr.msra.gmra.mxu0 %vm76_vm0, %v15_v11  ;;  %v26_v23 = vperm.slane %v24_v22, 0  ;;  %v27_v24 = vperm.slane %v24_v22, 1  ;;  %v28_v31 = vperm.slane %v24_v22, 2  ;;  %v29_v32 = vperm.slane %v24_v22, 3 }
   0x8   :  { %219 = vmatmul.msk.bf16.vlgmr.msra.gmra.mxu1 %vm76_vm0, %v15_v11  ;;  %220 = vmatmul.msk.bf16.vlgmr.msra.gmra.mxu2 %vm76_vm0, %v15_v11  ;;  %v30_v43 = vperm.slane %v24_v22, 4  ;;  %v31_v44 = vperm.slane %v24_v22, 5  ;;  %v32_v53 = vperm.slane %v24_v22, 6 }
   0x9   :  { %165 = vmatpush.bf16.msrb.mxu2 %v217_v16  ;;  %221 = vmatmul.msk.bf16.vlgmr.msra.gmra.mxu3 %vm76_vm0, %v15_v11 }
   0xa   :  { %139 = vmatpush.bf16.msrb.mxu0 %v209_v20  ;;  %152 = vmatpush.bf16.msrb.mxu1 %v213_v21 }
  0x17   :  { %222 = vmatmul.msk.bf16.vlgmr.msrb.gmra.mxu0 %vm76_vm0, %v15_v11 }
  0x18   :  { %223 = vmatmul.msk.bf16.vlgmr.msrb.gmra.mxu1 %vm76_vm0, %v15_v11  ;;  %224 = vmatmul.msk.bf16.vlgmr.msrb.gmra.mxu2 %vm76_vm0, %v15_v11 }
  0x84   :  { %v89_v25 = vpop.f32.mrf.mxu0 }
  0x85   :  { %v90_v26 = vadd.f32 %v89_v25, %v26_v23  ;;  %v102_v27 = vpop.f32.mrf.mxu1 }
  0x86   :  { %v103_v28 = vadd.f32 %v102_v27, %v27_v24 }
  0x87   :  { %v171_v29 = vmax.f32 %v90_v26, 0.0 }
  0x88   :  { %v172_v30 = vmax.f32 %v103_v28, 0.0 }
  0x8a   :  { %v178_v33 = vpack.c.bf16 %v172_v30, %v171_v29 }
  0x8b   :  { %v115_v34 = vpop.f32.mrf.mxu2 }
  0x8c   :  { %182 = vst [vmem:[%s322_s3] sm:$0xff] %v178_v33  ;;  %v116_v35 = vadd.f32 %v115_v34, %v28_v31  ;;  %v128_v36 = vpop.f32.mrf.mxu3  ;;  %v91_v37 = vpop.f32.mrf.mxu0 }
  0x8d   :  { %v129_v38 = vadd.f32 %v128_v36, %v29_v32  ;;  %v104_v39 = vpop.f32.mrf.mxu1 }
  0x8e   :  { %v173_v40 = vmax.f32 %v116_v35, 0.0 }
  0x8f   :  { %v174_v41 = vmax.f32 %v129_v38, 0.0 }
  0x91   :  { %v179_v42 = vpack.c.bf16 %v174_v41, %v173_v40 }
  0x93   :  { %183 = vst [vmem:[%s322_s3 + $0x8] sm:$0xff] %v179_v42  ;;  %v117_v45 = vpop.f32.mrf.mxu2 }
  0x94   :  { %v141_v46 = vpop.f32.mrf.mxu0  ;;  %v130_v47 = vpop.f32.mrf.mxu3 }
  0x95   :  { %v142_v48 = vadd.f32 %v141_v46, %v30_v43  ;;  %v154_v49 = vpop.f32.mrf.mxu1 }
  0x96   :  { %v155_v50 = vadd.f32 %v154_v49, %v31_v44 }
  0x97   :  { %v175_v51 = vmax.f32 %v142_v48, 0.0 }
  0x98   :  { %v176_v52 = vmax.f32 %v155_v50, 0.0 }
  0x9a   :  { %v180_v54 = vpack.c.bf16 %v176_v52, %v175_v51 }
  0x9b   :  { %v167_v55 = vpop.f32.mrf.mxu2 }
  0x9c   :  { %184 = vst [vmem:[%s322_s3 + $0x10] sm:$0xff] %v180_v54  ;;  %v168_v56 = vadd.f32 %v167_v55, %v32_v53  ;;  %v143_v57 = vpop.f32.mrf.mxu0 }
  0x9d   :  { %v156_v58 = vpop.f32.mrf.mxu1 }
  0x9e   :  { %v177_v59 = vmax.f32 %v168_v56, 0.0 }
  0xa0   :  { %v181_v60 = vpack.c.bf16 %v177_v59, %v177_v59 }
  0xa2   :  { %185 = vst [vmem:[%s322_s3 + $0x18] sm:$0xf] %v181_v60 }
  0xa3   :  { %v169_v61 = vpop.f32.mrf.mxu2 }

// kernel: text_vae_forward.17
= control target key start
LH: loop header
LB: loop body
LE: loop exit
PB: predicated region body
PF: predicated region fallthrough
CT: control target
= control target key end

     0   :  { %vm205_vm0 = vcmask 261120   ;;  %s2211_s1 = inlined_call_operand.vmem [shape: bf16[32,1152], index: 1, kind: input, shape index: {}]   ;;  %s2212_s0 = inlined_call_operand.vmem [shape: bf16[184,32], index: 0, kind: input, shape index: {}]   ;;  %s2213_s2 = inlined_call_operand.vmem [shape: bf16[184,1152], index: 2, kind: output, shape index: {}]  }
   0x1   :  { %v1170_v0 = vld [vmem:[%s2211_s1 + $0x48] sm:$0xf]  ;;  %v1336_v1 = vld [vmem:[%s2211_s1 + $0x68] sm:$0xf0]  ;;  %v1134_v2 = vld [vmem:[%s2211_s1] sm:$0xf] }
   0x2   :  { %v1171_v3 = vor.u32 %v1336_v1, %v1170_v0  ;;  %v1327_v4 = vld [vmem:[%s2211_s1 + $0x20] sm:$0xf0]  ;;  %v1178_v5 = vld [vmem:[%s2211_s1 + $0x50] sm:$0xf]  ;;  %v1337_v7 = vld [vmem:[%s2211_s1 + $0x70] sm:$0xf0] }
   0x3   :  { %v1135_v6 = vor.u32 %v1327_v4, %v1134_v2  ;;  %v1333_v8 = vld [vmem:[%s2211_s1 + $0x54] sm:$0xf]  ;;  %v1180_v9 = vld [vmem:[%s2211_s1 + $0x74] sm:$0xf0]  ;;  %v1389_v10 = vld [vmem:[%s2212_s0] sm:$0xff]  ;;  %v1179_v13 = vor.u32 %v1337_v7, %v1178_v5 }
   0x4   :  { %248 = vmatpush.bf16.msra.mxu0 %v1171_v3  ;;  %1341 = vmatpush.bf16.msra.mxu1 %v1171_v3  ;;  %v1394_v11 = vld [vmem:[%s2212_s0 + $0x18] sm:$0xff]  ;;  %v1332_v12 = vld [vmem:[%s2211_s1 + $0x4c] sm:$0xf]  ;;  %v1183_v14 = vor.u32 %v1333_v8, %v1180_v9  ;;  %v1172_v15 = vld [vmem:[%s2211_s1 + $0x6c] sm:$0xf0] }
   0x5   :  { %1342 = vmatpush.bf16.msra.mxu2 %v1171_v3  ;;  %1343 = vmatpush.bf16.msra.mxu3 %v1171_v3  ;;  %v1186_v16 = vld [vmem:[%s2211_s1 + $0x58] sm:$0xf]  ;;  %v1338_v17 = vld [vmem:[%s2211_s1 + $0x78] sm:$0xf0]  ;;  %v1411_v18 = vld [vmem:[%s2212_s0 + $0x30] sm:$0xff]  ;;  %v1175_v24 = vor.u32 %v1332_v12, %v1172_v15 }
   0x6   :  { %v1416_v19 = vld [vmem:[%s2212_s0 + $0x48] sm:$0xff]  ;;  %v1144_v23 = vld [vmem:[%s2211_s1 + $0x2c] sm:$0xf0]  ;;  %v1187_v25 = vor.u32 %v1338_v17, %v1186_v16  ;;  %v1323_v26 = vld [vmem:[%s2211_s1 + $0x4] sm:$0xf] }
   0x7   :  { %v1142_v20 = vld [vmem:[%s2211_s1 + $0x8] sm:$0xf]  ;;  %v1328_v21 = vld [vmem:[%s2211_s1 + $0x28] sm:$0xf0]  ;;  %v1150_v30 = vld [vmem:[%s2211_s1 + $0x10] sm:$0xf] }
   0x8   :  { %249 = vmatpush.bf16.msra.mxu0 %v1135_v6  ;;  %1344 = vmatpush.bf16.msra.mxu1 %v1135_v6  ;;  %v1324_v22 = vld [vmem:[%s2211_s1 + $0xc] sm:$0xf]  ;;  %v1143_v27 = vor.u32 %v1328_v21, %v1142_v20  ;;  %v1136_v29 = vld [vmem:[%s2211_s1 + $0x24] sm:$0xf0]  ;;  %v1329_v31 = vld [vmem:[%s2211_s1 + $0x30] sm:$0xf0] }
   0x9   :  { %1345 = vmatpush.bf16.msra.mxu2 %v1135_v6  ;;  %1346 = vmatpush.bf16.msra.mxu3 %v1135_v6  ;;  %v1147_v28 = vor.u32 %v1324_v22, %v1144_v23  ;;  %v1139_v32 = vor.u32 %v1323_v26, %v1136_v29  ;;  %v1151_v33 = vor.u32 %v1329_v31, %v1150_v30  ;;  %v1453_v34 = vld [vmem:[%s2212_s0 + $0x8] sm:$0xff]  ;;  %v1458_v35 = vld [vmem:[%s2212_s0 + $0x20] sm:$0xff]  ;;  %v1463_v36 = vld [vmem:[%s2212_s0 + $0x38] sm:$0xff] }
   0xa   :  { %v1468_v37 = vld [vmem:[%s2212_s0 + $0x50] sm:$0xff]  ;;  %v1194_v38 = vld [vmem:[%s2211_s1 + $0x60] sm:$0xf]  ;;  %v1339_v39 = vld [vmem:[%s2211_s1 + $0x80] sm:$0xf0] }
   0xb   :  { %1204 = vmatmul.msk.bf16.vlgmr.msra.gmra.mxu0 %vm205_vm0, %v1389_v10  ;;  %1207 = vmatmul.msk.bf16.vlgmr.msra.gmra.mxu1 %vm205_vm0, %v1394_v11  ;;  %v1335_v40 = vld [vmem:[%s2211_s1 + $0x64] sm:$0xf]  ;;  %v1195_v41 = vor.u32 %v1339_v39, %v1194_v38  ;;  %v1196_v42 = vld [vmem:[%s2211_s1 + $0x84] sm:$0xf0]  ;;  %v1334_v43 = vld [vmem:[%s2211_s1 + $0x5c] sm:$0xf] }
   0xc   :  { %1210 = vmatmul.msk.bf16.vlgmr.msra.gmra.mxu2 %vm205_vm0, %v1411_v18  ;;  %1213 = vmatmul.msk.bf16.vlgmr.msra.gmra.mxu3 %vm205_vm0, %v1416_v19  ;;  %v1188_v44 = vld [vmem:[%s2211_s1 + $0x7c] sm:$0xf0]  ;;  %v1199_v45 = vor.u32 %v1335_v40, %v1196_v42  ;;  %v1202_v47 = vld [vmem:[%s2211_s1 + $0x68] sm:$0xf]  ;;  %v1340_v48 = vld [vmem:[%s2211_s1 + $0x88] sm:$0xf0] }
   0xd   :  { %384 = vmatpush.bf16.msrb.mxu2 %v1179_v13  ;;  %452 = vmatpush.bf16.msrb.mxu3 %v1183_v14  ;;  %v1191_v46 = vor.u32 %v1334_v43, %v1188_v44  ;;  %v1203_v49 = vor.u32 %v1340_v48, %v1202_v47  ;;  %v34_v50 = vld [vmem:[%s2212_s0 + $0x58] sm:$0xf]  ;;  %v1508_v52 = vld [vmem:[%s2212_s0 + $0x10] sm:$0xff]  ;;  %v1513_v53 = vld [vmem:[%s2212_s0 + $0x28] sm:$0xff] }
   0xe   :  { %316 = vmatpush.bf16.msrb.mxu1 %v1175_v24  ;;  %520 = vmatpush.bf16.msrb.mxu0 %v1187_v25  ;;  %v100_v51 = vunpack.c.l.b16 %v34_v50  ;;  %v1518_v54 = vld [vmem:[%s2212_s0 + $0x40] sm:$0xff]  ;;  %v1158_v56 = vld [vmem:[%s2211_s1 + $0x18] sm:$0xf]  ;;  %v1330_v57 = vld [vmem:[%s2211_s1 + $0x38] sm:$0xf0] }
   0xf   :  { %v1326_v58 = vld [vmem:[%s2211_s1 + $0x1c] sm:$0xf]  ;;  %v1159_v59 = vor.u32 %v1330_v57, %v1158_v56  ;;  %v1160_v60 = vld [vmem:[%s2211_s1 + $0x3c] sm:$0xf0]  ;;  %v1325_v62 = vld [vmem:[%s2211_s1 + $0x14] sm:$0xf] }
  0x10   :  { %v1520_v55 = vpack.c.b16 %v100_v51, %v100_v51  ;;  %v1163_v61 = vor.u32 %v1326_v58, %v1160_v60  ;;  %v1152_v63 = vld [vmem:[%s2211_s1 + $0x34] sm:$0xf0]  ;;  %v1166_v0 = vld [vmem:[%s2211_s1 + $0x20] sm:$0xf]  ;;  %v1331_v2 = vld [vmem:[%s2211_s1 + $0x40] sm:$0xf0] }
  0x11   :  { %385 = vmatpush.bf16.msrb.mxu2 %v1143_v27  ;;  %453 = vmatpush.bf16.msrb.mxu3 %v1147_v28  ;;  %v1155_v1 = vor.u32 %v1325_v62, %v1152_v63  ;;  %v1167_v3 = vor.u32 %v1331_v2, %v1166_v0 }
  0x12   :  { %317 = vmatpush.bf16.msrb.mxu1 %v1139_v32  ;;  %521 = vmatpush.bf16.msrb.mxu0 %v1151_v33 }
  0x15   :  { %656 = vmatpush.bf16.msra.mxu2 %v1195_v41  ;;  %724 = vmatpush.bf16.msra.mxu3 %v1199_v45 }
  0x16   :  { %588 = vmatpush.bf16.msra.mxu1 %v1191_v46  ;;  %792 = vmatpush.bf16.msra.mxu0 %v1203_v49 }
  0x19   :  { %657 = vmatpush.bf16.msra.mxu2 %v1159_v59  ;;  %725 = vmatpush.bf16.msra.mxu3 %v1163_v61 }
  0x1a   :  { %589 = vmatpush.bf16.msra.mxu1 %v1155_v1  ;;  %793 = vmatpush.bf16.msra.mxu0 %v1167_v3 }
  0x1b   :  { %1205 = vmatmul.msk.bf16.gmra.mxu0 %vm205_vm0, %v1453_v34  ;;  %1208 = vmatmul.msk.bf16.gmra.mxu1 %vm205_vm0, %v1458_v35 }
  0x1c   :  { %1211 = vmatmul.msk.bf16.gmra.mxu2 %vm205_vm0, %v1463_v36  ;;  %1214 = vmatmul.msk.bf16.gmra.mxu3 %vm205_vm0, %v1468_v37 }
  0x2b   :  { %1206 = vmatmul.msk.bf16.gmra.mxu0 %vm205_vm0, %v1508_v52  ;;  %1209 = vmatmul.msk.bf16.gmra.mxu1 %vm205_vm0, %v1513_v53 }
  0x2c   :  { %1212 = vmatmul.msk.bf16.gmra.mxu2 %vm205_vm0, %v1518_v54  ;;  %1215 = vmatmul.msk.bf16.gmra.mxu3 %vm205_vm0, %v1520_v55 }
  0x3b   :  { %1216 = vmatmul.msk.bf16.vlgmr.msrb.gmra.mxu1 %vm205_vm0, %v1389_v10  ;;  %1252 = vmatmul.msk.bf16.vlgmr.msrb.gmra.mxu0 %vm205_vm0, %v1389_v10 }
  0x3c   :  { %1228 = vmatmul.msk.bf16.vlgmr.msrb.gmra.mxu2 %vm205_vm0, %v1389_v10  ;;  %1240 = vmatmul.msk.bf16.vlgmr.msrb.gmra.mxu3 %vm205_vm0, %v1389_v10 }
  0x4b   :  { %1217 = vmatmul.msk.bf16.gmra.mxu1 %vm205_vm0, %v1453_v34  ;;  %1253 = vmatmul.msk.bf16.gmra.mxu0 %vm205_vm0, %v1453_v34 }
  0x4c   :  { %1229 = vmatmul.msk.bf16.gmra.mxu2 %vm205_vm0, %v1453_v34  ;;  %1241 = vmatmul.msk.bf16.gmra.mxu3 %vm205_vm0, %v1453_v34 }
  0x5b   :  { %1218 = vmatmul.msk.bf16.gmra.mxu1 %vm205_vm0, %v1508_v52  ;;  %1254 = vmatmul.msk.bf16.gmra.mxu0 %vm205_vm0, %v1508_v52 }
  0x5c   :  { %1230 = vmatmul.msk.bf16.gmra.mxu2 %vm205_vm0, %v1508_v52  ;;  %1242 = vmatmul.msk.bf16.gmra.mxu3 %vm205_vm0, %v1508_v52 }
  0x6b   :  { %1219 = vmatmul.msk.bf16.gmra.mxu1 %vm205_vm0, %v1394_v11  ;;  %1255 = vmatmul.msk.bf16.gmra.mxu0 %vm205_vm0, %v1394_v11 }
  0x6c   :  { %1231 = vmatmul.msk.bf16.gmra.mxu2 %vm205_vm0, %v1394_v11  ;;  %1243 = vmatmul.msk.bf16.gmra.mxu3 %vm205_vm0, %v1394_v11 }
  0x7b   :  { %1220 = vmatmul.msk.bf16.gmra.mxu1 %vm205_vm0, %v1458_v35  ;;  %1256 = vmatmul.msk.bf16.gmra.mxu0 %vm205_vm0, %v1458_v35 }
  0x7c   :  { %1232 = vmatmul.msk.bf16.gmra.mxu2 %vm205_vm0, %v1458_v35  ;;  %1244 = vmatmul.msk.bf16.gmra.mxu3 %vm205_vm0, %v1458_v35 }
  0x88   :  { %v251_v4 = vpop.f32.mrf.mxu0  ;;  %v1594_v5 = vpop.f32.mrf.mxu1 }
  0x8b   :  { %1221 = vmatmul.msk.bf16.gmra.mxu1 %vm205_vm0, %v1513_v53  ;;  %1257 = vmatmul.msk.bf16.gmra.mxu0 %vm205_vm0, %v1513_v53 }
  0x8c   :  { %1233 = vmatmul.msk.bf16.gmra.mxu2 %vm205_vm0, %v1513_v53  ;;  %1245 = vmatmul.msk.bf16.gmra.mxu3 %vm205_vm0, %v1513_v53 }
  0x8f   :  { %v1604_v6 = vpop.f32.mrf.mxu2  ;;  %v1606_v7 = vpop.f32.mrf.mxu3 }
  0x90   :  { %v253_v8 = vpop.f32.mrf.mxu0  ;;  %v1608_v9 = vpop.f32.mrf.mxu1 }
  0x97   :  { %v1610_v12 = vpop.f32.mrf.mxu2  ;;  %v1612_v13 = vpop.f32.mrf.mxu3 }
  0x98   :  { %v256_v14 = vpop.f32.mrf.mxu0  ;;  %v1614_v15 = vpop.f32.mrf.mxu1 }
  0x9b   :  { %1222 = vmatmul.msk.bf16.gmra.mxu1 %vm205_vm0, %v1411_v18  ;;  %1258 = vmatmul.msk.bf16.gmra.mxu0 %vm205_vm0, %v1411_v18 }
  0x9c   :  { %1234 = vmatmul.msk.bf16.gmra.mxu2 %vm205_vm0, %v1411_v18  ;;  %1246 = vmatmul.msk.bf16.gmra.mxu3 %vm205_vm0, %v1411_v18 }
  0x9f   :  { %v1624_v16 = vpop.f32.mrf.mxu2  ;;  %v1626_v17 = vpop.f32.mrf.mxu3 }
  0xa0   :  { %v258_v20 = vpop.f32.mrf.mxu0  ;;  %v1628_v21 = vpop.f32.mrf.mxu1 }
  0xa7   :  { %v1630_v22 = vpop.f32.mrf.mxu2  ;;  %v1632_v23 = vpop.f32.mrf.mxu3 }
  0xa8   :  { %v261_v24 = vpop.f32.mrf.mxu0  ;;  %v1634_v25 = vpop.f32.mrf.mxu1 }
  0xab   :  { %1223 = vmatmul.msk.bf16.gmra.mxu1 %vm205_vm0, %v1463_v36  ;;  %1259 = vmatmul.msk.bf16.gmra.mxu0 %vm205_vm0, %v1463_v36 }
  0xac   :  { %1235 = vmatmul.msk.bf16.gmra.mxu2 %vm205_vm0, %v1463_v36  ;;  %1247 = vmatmul.msk.bf16.gmra.mxu3 %vm205_vm0, %v1463_v36 }
  0xaf   :  { %v1644_v26 = vpop.f32.mrf.mxu2  ;;  %v1646_v27 = vpop.f32.mrf.mxu3 }
  0xb0   :  { %v263_v28 = vpop.f32.mrf.mxu0  ;;  %v1648_v29 = vpop.f32.mrf.mxu1 }
  0xb7   :  { %v1650_v30 = vpop.f32.mrf.mxu2  ;;  %v308_v31 = vpop.f32.mrf.mxu3 }
  0xb8   :  { %v319_v32 = vpop.f32.mrf.mxu1  ;;  %v1652_v33 = vpop.f32.mrf.mxu0 }
  0xb9   :  { %v854_v38 = vpack.c.bf16 %v319_v32, %v251_v4 }
  0xbb   :  { %969 = vst [vmem:[%s2213_s2] sm:$0xff] %v854_v38  ;;  %1224 = vmatmul.msk.bf16.gmra.mxu1 %vm205_vm0, %v1518_v54  ;;  %1260 = vmatmul.msk.bf16.gmra.mxu0 %vm205_vm0, %v1518_v54 }
  0xbc   :  { %1236 = vmatmul.msk.bf16.gmra.mxu2 %vm205_vm0, %v1518_v54  ;;  %1248 = vmatmul.msk.bf16.gmra.mxu3 %vm205_vm0, %v1518_v54 }
  0xbf   :  { %v387_v39 = vpop.f32.mrf.mxu2  ;;  %v455_v40 = vpop.f32.mrf.mxu3 }
  0xc0   :  { %v855_v41 = vpack.c.bf16 %v455_v40, %v387_v39  ;;  %v321_v42 = vpop.f32.mrf.mxu1  ;;  %v1665_v43 = vpop.f32.mrf.mxu0 }
  0xc1   :  { %v859_v44 = vpack.c.bf16 %v321_v42, %v253_v8 }
  0xc2   :  { %970 = vst [vmem:[%s2213_s2 + $0x8] sm:$0xff] %v855_v41 }
  0xc3   :  { %974 = vst [vmem:[%s2213_s2 + $0x24] sm:$0xff] %v859_v44 }
  0xc7   :  { %v389_v45 = vpop.f32.mrf.mxu2  ;;  %v457_v46 = vpop.f32.mrf.mxu3 }
  0xc8   :  { %v860_v47 = vpack.c.bf16 %v457_v46, %v389_v45  ;;  %v324_v48 = vpop.f32.mrf.mxu1  ;;  %v1673_v49 = vpop.f32.mrf.mxu0 }
  0xc9   :  { %v864_v50 = vpack.c.bf16 %v324_v48, %v256_v14 }
  0xca   :  { %975 = vst [vmem:[%s2213_s2 + $0x2c] sm:$0xff] %v860_v47 }
  0xcb   :  { %979 = vst [vmem:[%s2213_s2 + $0x48] sm:$0xff] %v864_v50  ;;  %1225 = vmatmul.msk.bf16.gmra.mxu1 %vm205_vm0, %v1416_v19  ;;  %1261 = vmatmul.msk.bf16.gmra.mxu0 %vm205_vm0, %v1416_v19 }
  0xcc   :  { %1237 = vmatmul.msk.bf16.gmra.mxu2 %vm205_vm0, %v1416_v19  ;;  %1249 = vmatmul.msk.bf16.gmra.mxu3 %vm205_vm0, %v1416_v19 }
  0xcf   :  { %v392_v51 = vpop.f32.mrf.mxu2  ;;  %v460_v56 = vpop.f32.mrf.mxu3 }
  0xd0   :  { %v865_v57 = vpack.c.bf16 %v460_v56, %v392_v51  ;;  %v326_v58 = vpop.f32.mrf.mxu1  ;;  %v1689_v59 = vpop.f32.mrf.mxu0 }
  0xd1   :  { %v869_v60 = vpack.c.bf16 %v326_v58, %v258_v20 }
  0xd2   :  { %980 = vst [vmem:[%s2213_s2 + $0x50] sm:$0xff] %v865_v57 }
  0xd3   :  { %984 = vst [vmem:[%s2213_s2 + $0x6c] sm:$0xff] %v869_v60 }
  0xd7   :  { %v394_v61 = vpop.f32.mrf.mxu2  ;;  %v462_v62 = vpop.f32.mrf.mxu3 }
  0xd8   :  { %v870_v63 = vpack.c.bf16 %v462_v62, %v394_v61  ;;  %v329_v0 = vpop.f32.mrf.mxu1  ;;  %v1697_v1 = vpop.f32.mrf.mxu0 }
  0xd9   :  { %v874_v2 = vpack.c.bf16 %v329_v0, %v261_v24 }
  0xda   :  { %985 = vst [vmem:[%s2213_s2 + $0x74] sm:$0xff] %v870_v63 }
  0xdb   :  { %989 = vst [vmem:[%s2213_s2 + $0x90] sm:$0xff] %v874_v2  ;;  %1226 = vmatmul.msk.bf16.gmra.mxu1 %vm205_vm0, %v1468_v37  ;;  %1262 = vmatmul.msk.bf16.gmra.mxu0 %vm205_vm0, %v1468_v37 }
  0xdc   :  { %1238 = vmatmul.msk.bf16.gmra.mxu2 %vm205_vm0, %v1468_v37  ;;  %1250 = vmatmul.msk.bf16.gmra.mxu3 %vm205_vm0, %v1468_v37 }
  0xdf   :  { %v397_v3 = vpop.f32.mrf.mxu2  ;;  %v465_v4 = vpop.f32.mrf.mxu3 }
  0xe0   :  { %v875_v8 = vpack.c.bf16 %v465_v4, %v397_v3  ;;  %v331_v14 = vpop.f32.mrf.mxu1  ;;  %v1713_v20 = vpop.f32.mrf.mxu0 }
  0xe1   :  { %v879_v24 = vpack.c.bf16 %v331_v14, %v263_v28 }
  0xe2   :  { %990 = vst [vmem:[%s2213_s2 + $0x98] sm:$0xff] %v875_v8 }
  0xe3   :  { %994 = vst [vmem:[%s2213_s2 + $0xb4] sm:$0xff] %v879_v24 }
  0xe7   :  { %v399_v31 = vpop.f32.mrf.mxu2  ;;  %v467_v32 = vpop.f32.mrf.mxu3 }
  0xe8   :  { %v880_v38 = vpack.c.bf16 %v467_v32, %v399_v31  ;;  %v334_v39 = vpop.f32.mrf.mxu1  ;;  %v1721_v40 = vpop.f32.mrf.mxu0 }
  0xe9   :  { %v884_v41 = vpack.c.bf16 %v334_v39, %v1594_v5 }
  0xea   :  { %995 = vst [vmem:[%s2213_s2 + $0xbc] sm:$0xff] %v880_v38 }
  0xeb   :  { %999 = vst [vmem:[%s2213_s2 + $0xd8] sm:$0xff] %v884_v41  ;;  %1227 = vmatmul.msk.bf16.gmra.mxu1 %vm205_vm0, %v1520_v55  ;;  %1263 = vmatmul.msk.bf16.gmra.mxu0 %vm205_vm0, %v1520_v55 }
  0xec   :  { %1239 = vmatmul.msk.bf16.gmra.mxu2 %vm205_vm0, %v1520_v55  ;;  %1251 = vmatmul.msk.bf16.gmra.mxu3 %vm205_vm0, %v1520_v55 }
  0xef   :  { %v402_v5 = vpop.f32.mrf.mxu2  ;;  %v470_v28 = vpop.f32.mrf.mxu3 }
  0xf0   :  { %v885_v42 = vpack.c.bf16 %v470_v28, %v402_v5  ;;  %v336_v44 = vpop.f32.mrf.mxu1  ;;  %v1738_v45 = vpop.f32.mrf.mxu0 }
  0xf1   :  { %v889_v46 = vpack.c.bf16 %v336_v44, %v1608_v9 }
  0xf2   :  { %1000 = vst [vmem:[%s2213_s2 + $0xe0] sm:$0xff] %v885_v42 }
  0xf3   :  { %1004 = vst [vmem:[%s2213_s2 + $0xfc] sm:$0xff] %v889_v46 }
  0xf7   :  { %v404_v47 = vpop.f32.mrf.mxu2  ;;  %v472_v48 = vpop.f32.mrf.mxu3 }
  0xf8   :  { %v890_v50 = vpack.c.bf16 %v472_v48, %v404_v47  ;;  %v339_v51 = vpop.f32.mrf.mxu1  ;;  %v1747_v56 = vpop.f32.mrf.mxu0 }
  0xf9   :  { %v894_v57 = vpack.c.bf16 %v339_v51, %v1614_v15 }
  0xfa   :  { %1005 = vst [vmem:[%s2213_s2 + $0x104] sm:$0xff] %v890_v50 }
  0xfb   :  { %1009 = vst [vmem:[%s2213_s2 + $0x120] sm:$0xff] %v894_v57  ;;  %1264 = vmatmul.msk.bf16.vlgmr.msra.gmra.mxu1 %vm205_vm0, %v1389_v10  ;;  %1300 = vmatmul.msk.bf16.vlgmr.msra.gmra.mxu0 %vm205_vm0, %v1389_v10 }
  0xfc   :  { %1276 = vmatmul.msk.bf16.vlgmr.msra.gmra.mxu2 %vm205_vm0, %v1389_v10  ;;  %1288 = vmatmul.msk.bf16.vlgmr.msra.gmra.mxu3 %vm205_vm0, %v1389_v10 }
  0xff   :  { %v407_v9 = vpop.f32.mrf.mxu2  ;;  %v475_v15 = vpop.f32.mrf.mxu3 }
 0x100   :  { %v895_v58 = vpack.c.bf16 %v475_v15, %v407_v9  ;;  %v341_v60 = vpop.f32.mrf.mxu1  ;;  %v1764_v61 = vpop.f32.mrf.mxu0 }
 0x101   :  { %v899_v62 = vpack.c.bf16 %v341_v60, %v1628_v21 }
 0x102   :  { %1010 = vst [vmem:[%s2213_s2 + $0x128] sm:$0xff] %v895_v58 }
 0x103   :  { %1014 = vst [vmem:[%s2213_s2 + $0x144] sm:$0xff] %v899_v62 }
 0x107   :  { %v409_v63 = vpop.f32.mrf.mxu2  ;;  %v477_v0 = vpop.f32.mrf.mxu3 }
 0x108   :  { %v900_v2 = vpack.c.bf16 %v477_v0, %v409_v63  ;;  %v344_v10 = vpop.f32.mrf.mxu1  ;;  %v1773_v3 = vpop.f32.mrf.mxu0 }
 0x109   :  { %v904_v4 = vpack.c.bf16 %v344_v10, %v1634_v25 }
 0x10a   :  { %1015 = vst [vmem:[%s2213_s2 + $0x14c] sm:$0xff] %v900_v2 }
 0x10b   :  { %1019 = vst [vmem:[%s2213_s2 + $0x168] sm:$0xff] %v904_v4  ;;  %1265 = vmatmul.msk.bf16.gmra.mxu1 %vm205_vm0, %v1453_v34  ;;  %1301 = vmatmul.msk.bf16.gmra.mxu0 %vm205_vm0, %v1453_v34 }
 0x10c   :  { %1277 = vmatmul.msk.bf16.gmra.mxu2 %vm205_vm0, %v1453_v34  ;;  %1289 = vmatmul.msk.bf16.gmra.mxu3 %vm205_vm0, %v1453_v34 }
 0x10f   :  { %v412_v21 = vpop.f32.mrf.mxu2  ;;  %v480_v25 = vpop.f32.mrf.mxu3 }
 0x110   :  { %v905_v8 = vpack.c.bf16 %v480_v25, %v412_v21  ;;  %v346_v14 = vpop.f32.mrf.mxu1  ;;  %v1790_v24 = vpop.f32.mrf.mxu0 }
 0x111   :  { %v909_v31 = vpack.c.bf16 %v346_v14, %v1648_v29 }
 0x112   :  { %1020 = vst [vmem:[%s2213_s2 + $0x170] sm:$0xff] %v905_v8 }
 0x113   :  { %1024 = vst [vmem:[%s2213_s2 + $0x18c] sm:$0xff] %v909_v31 }
 0x117   :  { %v414_v32 = vpop.f32.mrf.mxu2  ;;  %v482_v38 = vpop.f32.mrf.mxu3 }
 0x118   :  { %v910_v39 = vpack.c.bf16 %v482_v38, %v414_v32  ;;  %v349_v34 = vpop.f32.mrf.mxu1  ;;  %v1799_v41 = vpop.f32.mrf.mxu0 }
 0x119   :  { %v914_v5 = vpack.c.bf16 %v349_v34, %v1604_v6 }
 0x11a   :  { %1025 = vst [vmem:[%s2213_s2 + $0x194] sm:$0xff] %v910_v39 }
 0x11b   :  { %1029 = vst [vmem:[%s2213_s2 + $0x1b0] sm:$0xff] %v914_v5  ;;  %1266 = vmatmul.msk.bf16.gmra.mxu1 %vm205_vm0, %v1508_v52  ;;  %1302 = vmatmul.msk.bf16.gmra.mxu0 %vm205_vm0, %v1508_v52 }
 0x11c   :  { %1278 = vmatmul.msk.bf16.gmra.mxu2 %vm205_vm0, %v1508_v52  ;;  %1290 = vmatmul.msk.bf16.gmra.mxu3 %vm205_vm0, %v1508_v52 }
 0x11f   :  { %v417_v6 = vpop.f32.mrf.mxu2  ;;  %v485_v29 = vpop.f32.mrf.mxu3 }
 0x120   :  { %v915_v28 = vpack.c.bf16 %v485_v29, %v417_v6  ;;  %v351_v42 = vpop.f32.mrf.mxu1  ;;  %v1816_v44 = vpop.f32.mrf.mxu0 }
 0x121   :  { %v919_v46 = vpack.c.bf16 %v351_v42, %v1610_v12 }
 0x122   :  { %1030 = vst [vmem:[%s2213_s2 + $0x1b8] sm:$0xff] %v915_v28 }
 0x123   :  { %1034 = vst [vmem:[%s2213_s2 + $0x1d4] sm:$0xff] %v919_v46 }
 0x127   :  { %v419_v47 = vpop.f32.mrf.mxu2  ;;  %v487_v48 = vpop.f32.mrf.mxu3 }
 0x128   :  { %v920_v50 = vpack.c.bf16 %v487_v48, %v419_v47  ;;  %v354_v52 = vpop.f32.mrf.mxu1  ;;  %v1825_v51 = vpop.f32.mrf.mxu0 }
 0x129   :  { %v924_v57 = vpack.c.bf16 %v354_v52, %v1624_v16 }
 0x12a   :  { %1035 = vst [vmem:[%s2213_s2 + $0x1dc] sm:$0xff] %v920_v50 }
 0x12b   :  { %1039 = vst [vmem:[%s2213_s2 + $0x1f8] sm:$0xff] %v924_v57  ;;  %1267 = vmatmul.msk.bf16.gmra.mxu1 %vm205_vm0, %v1394_v11  ;;  %1303 = vmatmul.msk.bf16.gmra.mxu0 %vm205_vm0, %v1394_v11 }
 0x12c   :  { %1279 = vmatmul.msk.bf16.gmra.mxu2 %vm205_vm0, %v1394_v11  ;;  %1291 = vmatmul.msk.bf16.gmra.mxu3 %vm205_vm0, %v1394_v11 }
 0x12f   :  { %v422_v12 = vpop.f32.mrf.mxu2  ;;  %v490_v16 = vpop.f32.mrf.mxu3 }
 0x130   :  { %v925_v9 = vpack.c.bf16 %v490_v16, %v422_v12  ;;  %v356_v15 = vpop.f32.mrf.mxu1  ;;  %v1842_v58 = vpop.f32.mrf.mxu0 }
 0x131   :  { %v929_v60 = vpack.c.bf16 %v356_v15, %v1630_v22 }
 0x132   :  { %1040 = vst [vmem:[%s2213_s2 + $0x200] sm:$0xff] %v925_v9 }
 0x133   :  { %1044 = vst [vmem:[%s2213_s2 + $0x21c] sm:$0xff] %v929_v60 }
 0x137   :  { %v424_v62 = vpop.f32.mrf.mxu2  ;;  %v492_v63 = vpop.f32.mrf.mxu3 }
 0x138   :  { %v930_v0 = vpack.c.bf16 %v492_v63, %v424_v62  ;;  %v359_v11 = vpop.f32.mrf.mxu1  ;;  %v1851_v2 = vpop.f32.mrf.mxu0 }
 0x139   :  { %v934_v10 = vpack.c.bf16 %v359_v11, %v1644_v26 }
 0x13a   :  { %1045 = vst [vmem:[%s2213_s2 + $0x224] sm:$0xff] %v930_v0 }
 0x13b   :  { %1049 = vst [vmem:[%s2213_s2 + $0x240] sm:$0xff] %v934_v10  ;;  %1268 = vmatmul.msk.bf16.gmra.mxu1 %vm205_vm0, %v1458_v35  ;;  %1304 = vmatmul.msk.bf16.gmra.mxu0 %vm205_vm0, %v1458_v35 }
 0x13c   :  { %1280 = vmatmul.msk.bf16.gmra.mxu2 %vm205_vm0, %v1458_v35  ;;  %1292 = vmatmul.msk.bf16.gmra.mxu3 %vm205_vm0, %v1458_v35 }
 0x13f   :  { %v427_v22 = vpop.f32.mrf.mxu2  ;;  %v495_v26 = vpop.f32.mrf.mxu3 }
 0x140   :  { %v935_v4 = vpack.c.bf16 %v495_v26, %v427_v22  ;;  %v361_v21 = vpop.f32.mrf.mxu1  ;;  %v1868_v25 = vpop.f32.mrf.mxu0 }
 0x141   :  { %v939_v8 = vpack.c.bf16 %v361_v21, %v1650_v30 }
 0x142   :  { %1050 = vst [vmem:[%s2213_s2 + $0x248] sm:$0xff] %v935_v4 }
 0x143   :  { %1054 = vst [vmem:[%s2213_s2 + $0x264] sm:$0xff] %v939_v8 }
 0x147   :  { %v429_v14 = vpop.f32.mrf.mxu2  ;;  %v497_v31 = vpop.f32.mrf.mxu3 }
 0x148   :  { %v940_v32 = vpack.c.bf16 %v497_v31, %v429_v14  ;;  %v364_v35 = vpop.f32.mrf.mxu1  ;;  %v1877_v38 = vpop.f32.mrf.mxu0 }
 0x149   :  { %v944_v39 = vpack.c.bf16 %v364_v35, %v1606_v7 }
 0x14a   :  { %1055 = vst [vmem:[%s2213_s2 + $0x26c] sm:$0xff] %v940_v32 }
 0x14b   :  { %1059 = vst [vmem:[%s2213_s2 + $0x288] sm:$0xff] %v944_v39  ;;  %1269 = vmatmul.msk.bf16.gmra.mxu1 %vm205_vm0, %v1513_v53  ;;  %1305 = vmatmul.msk.bf16.gmra.mxu0 %vm205_vm0, %v1513_v53 }
 0x14c   :  { %1281 = vmatmul.msk.bf16.gmra.mxu2 %vm205_vm0, %v1513_v53  ;;  %1293 = vmatmul.msk.bf16.gmra.mxu3 %vm205_vm0, %v1513_v53 }
 0x14f   :  { %v432_v7 = vpop.f32.mrf.mxu2  ;;  %v500_v30 = vpop.f32.mrf.mxu3 }
 0x150   :  { %v945_v34 = vpack.c.bf16 %v500_v30, %v432_v7  ;;  %v366_v5 = vpop.f32.mrf.mxu1  ;;  %v1894_v6 = vpop.f32.mrf.mxu0 }
 0x151   :  { %v949_v29 = vpack.c.bf16 %v366_v5, %v1612_v13 }
 0x152   :  { %1060 = vst [vmem:[%s2213_s2 + $0x290] sm:$0xff] %v945_v34 }
 0x153   :  { %1064 = vst [vmem:[%s2213_s2 + $0x2ac] sm:$0xff] %v949_v29 }
 0x157   :  { %v434_v28 = vpop.f32.mrf.mxu2  ;;  %v502_v42 = vpop.f32.mrf.mxu3 }
 0x158   :  { %v950_v46 = vpack.c.bf16 %v502_v42, %v434_v28  ;;  %v369_v53 = vpop.f32.mrf.mxu1  ;;  %v1903_v47 = vpop.f32.mrf.mxu0 }
 0x159   :  { %v954_v48 = vpack.c.bf16 %v369_v53, %v1626_v17 }
 0x15a   :  { %1065 = vst [vmem:[%s2213_s2 + $0x2b4] sm:$0xff] %v950_v46 }
 0x15b   :  { %1069 = vst [vmem:[%s2213_s2 + $0x2d0] sm:$0xff] %v954_v48  ;;  %1270 = vmatmul.msk.bf16.gmra.mxu1 %vm205_vm0, %v1411_v18  ;;  %1306 = vmatmul.msk.bf16.gmra.mxu0 %vm205_vm0, %v1411_v18 }
 0x15c   :  { %1282 = vmatmul.msk.bf16.gmra.mxu2 %vm205_vm0, %v1411_v18  ;;  %1294 = vmatmul.msk.bf16.gmra.mxu3 %vm205_vm0, %v1411_v18 }
 0x15f   :  { %v437_v13 = vpop.f32.mrf.mxu2  ;;  %v505_v17 = vpop.f32.mrf.mxu3 }
 0x160   :  { %v955_v50 = vpack.c.bf16 %v505_v17, %v437_v13  ;;  %v371_v52 = vpop.f32.mrf.mxu1  ;;  %v1920_v57 = vpop.f32.mrf.mxu0 }
 0x161   :  { %v959_v12 = vpack.c.bf16 %v371_v52, %v1632_v23 }
 0x162   :  { %1070 = vst [vmem:[%s2213_s2 + $0x2d8] sm:$0xff] %v955_v50 }
 0x163   :  { %1074 = vst [vmem:[%s2213_s2 + $0x2f4] sm:$0xff] %v959_v12 }
 0x167   :  { %v439_v16 = vpop.f32.mrf.mxu2  ;;  %v507_v9 = vpop.f32.mrf.mxu3 }
 0x168   :  { %v960_v15 = vpack.c.bf16 %v507_v9, %v439_v16  ;;  %v374_v18 = vpop.f32.mrf.mxu1  ;;  %v1929_v60 = vpop.f32.mrf.mxu0 }
 0x169   :  { %v964_v62 = vpack.c.bf16 %v374_v18, %v1646_v27 }
 0x16a   :  { %1075 = vst [vmem:[%s2213_s2 + $0x2fc] sm:$0xff] %v960_v15 }
 0x16b   :  { %1079 = vst [vmem:[%s2213_s2 + $0x318] sm:$0xff] %v964_v62  ;;  %1271 = vmatmul.msk.bf16.gmra.mxu1 %vm205_vm0, %v1463_v36  ;;  %1307 = vmatmul.msk.bf16.gmra.mxu0 %vm205_vm0, %v1463_v36 }
 0x16c   :  { %1283 = vmatmul.msk.bf16.gmra.mxu2 %vm205_vm0, %v1463_v36  ;;  %1295 = vmatmul.msk.bf16.gmra.mxu3 %vm205_vm0, %v1463_v36 }
 0x16f   :  { %v442_v23 = vpop.f32.mrf.mxu2  ;;  %v510_v27 = vpop.f32.mrf.mxu3 }
 0x170   :  { %v965_v63 = vpack.c.bf16 %v510_v27, %v442_v23  ;;  %v376_v0 = vpop.f32.mrf.mxu1  ;;  %v580_v11 = vpop.f32.mrf.mxu0 }
 0x172   :  { %1080 = vst [vmem:[%s2213_s2 + $0x320] sm:$0xff] %v965_v63 }
 0x177   :  { %v444_v10 = vpop.f32.mrf.mxu2  ;;  %v512_v22 = vpop.f32.mrf.mxu3 }
 0x178   :  { %v591_v26 = vpop.f32.mrf.mxu1  ;;  %v795_v4 = vpop.f32.mrf.mxu0 }
 0x179   :  { %v856_v21 = vpack.c.bf16 %v591_v26, %v1652_v33  ;;  %v858_v8 = vpack.c.bf16 %v795_v4, %v795_v4 }
 0x17b   :  { %971 = vst [vmem:[%s2213_s2 + $0x10] sm:$0xff] %v856_v21  ;;  %1272 = vmatmul.msk.bf16.gmra.mxu1 %vm205_vm0, %v1518_v54  ;;  %1308 = vmatmul.msk.bf16.gmra.mxu0 %vm205_vm0, %v1518_v54 }
 0x17c   :  { %973 = vst [vmem:[%s2213_s2 + $0x20] sm:$0xf] %v858_v8  ;;  %1284 = vmatmul.msk.bf16.gmra.mxu2 %vm205_vm0, %v1518_v54  ;;  %1296 = vmatmul.msk.bf16.gmra.mxu3 %vm205_vm0, %v1518_v54 }
 0x17f   :  { %v659_v36 = vpop.f32.mrf.mxu2  ;;  %v727_v33 = vpop.f32.mrf.mxu3 }
 0x180   :  { %v857_v14 = vpack.c.bf16 %v727_v33, %v659_v36  ;;  %v593_v31 = vpop.f32.mrf.mxu1  ;;  %v797_v32 = vpop.f32.mrf.mxu0 }
 0x181   :  { %v861_v35 = vpack.c.bf16 %v593_v31, %v1665_v43  ;;  %v863_v39 = vpack.c.bf16 %v797_v32, %v797_v32 }
 0x182   :  { %972 = vst [vmem:[%s2213_s2 + $0x18] sm:$0xff] %v857_v14 }
 0x183   :  { %976 = vst [vmem:[%s2213_s2 + $0x34] sm:$0xff] %v861_v35 }
 0x184   :  { %978 = vst [vmem:[%s2213_s2 + $0x44] sm:$0xf] %v863_v39 }
 0x187   :  { %v661_v54 = vpop.f32.mrf.mxu2  ;;  %v729_v7 = vpop.f32.mrf.mxu3 }
 0x188   :  { %v862_v30 = vpack.c.bf16 %v729_v7, %v661_v54  ;;  %v596_v34 = vpop.f32.mrf.mxu1  ;;  %v800_v5 = vpop.f32.mrf.mxu0 }
 0x189   :  { %v866_v43 = vpack.c.bf16 %v596_v34, %v1673_v49  ;;  %v868_v29 = vpack.c.bf16 %v800_v5, %v800_v5 }
 0x18a   :  { %977 = vst [vmem:[%s2213_s2 + $0x3c] sm:$0xff] %v862_v30 }
 0x18b   :  { %981 = vst [vmem:[%s2213_s2 + $0x58] sm:$0xff] %v866_v43  ;;  %1273 = vmatmul.msk.bf16.gmra.mxu1 %vm205_vm0, %v1416_v19  ;;  %1309 = vmatmul.msk.bf16.gmra.mxu0 %vm205_vm0, %v1416_v19 }
 0x18c   :  { %983 = vst [vmem:[%s2213_s2 + $0x68] sm:$0xf] %v868_v29  ;;  %1285 = vmatmul.msk.bf16.gmra.mxu2 %vm205_vm0, %v1416_v19  ;;  %1297 = vmatmul.msk.bf16.gmra.mxu3 %vm205_vm0, %v1416_v19 }
 0x18f   :  { %v664_v49 = vpop.f32.mrf.mxu2  ;;  %v732_v28 = vpop.f32.mrf.mxu3 }
 0x190   :  { %v867_v42 = vpack.c.bf16 %v732_v28, %v664_v49  ;;  %v598_v46 = vpop.f32.mrf.mxu1  ;;  %v802_v53 = vpop.f32.mrf.mxu0 }
 0x191   :  { %v871_v48 = vpack.c.bf16 %v598_v46, %v1689_v59  ;;  %v873_v13 = vpack.c.bf16 %v802_v53, %v802_v53 }
 0x192   :  { %982 = vst [vmem:[%s2213_s2 + $0x60] sm:$0xff] %v867_v42 }
 0x193   :  { %986 = vst [vmem:[%s2213_s2 + $0x7c] sm:$0xff] %v871_v48 }
 0x194   :  { %988 = vst [vmem:[%s2213_s2 + $0x8c] sm:$0xf] %v873_v13 }
 0x197   :  { %v666_v19 = vpop.f32.mrf.mxu2  ;;  %v734_v17 = vpop.f32.mrf.mxu3 }
 0x198   :  { %v872_v50 = vpack.c.bf16 %v734_v17, %v666_v19  ;;  %v601_v52 = vpop.f32.mrf.mxu1  ;;  %v805_v12 = vpop.f32.mrf.mxu0 }
 0x199   :  { %v876_v59 = vpack.c.bf16 %v601_v52, %v1697_v1  ;;  %v878_v16 = vpack.c.bf16 %v805_v12, %v805_v12 }
 0x19a   :  { %987 = vst [vmem:[%s2213_s2 + $0x84] sm:$0xff] %v872_v50 }
 0x19b   :  { %991 = vst [vmem:[%s2213_s2 + $0xa0] sm:$0xff] %v876_v59  ;;  %1274 = vmatmul.msk.bf16.gmra.mxu1 %vm205_vm0, %v1468_v37  ;;  %1310 = vmatmul.msk.bf16.gmra.mxu0 %vm205_vm0, %v1468_v37 }
 0x19c   :  { %993 = vst [vmem:[%s2213_s2 + $0xb0] sm:$0xf] %v878_v16  ;;  %1286 = vmatmul.msk.bf16.gmra.mxu2 %vm205_vm0, %v1468_v37  ;;  %1298 = vmatmul.msk.bf16.gmra.mxu3 %vm205_vm0, %v1468_v37 }
 0x19f   :  { %v669_v1 = vpop.f32.mrf.mxu2  ;;  %v737_v9 = vpop.f32.mrf.mxu3 }
 0x1a0   :  { %v877_v15 = vpack.c.bf16 %v737_v9, %v669_v1  ;;  %v603_v18 = vpop.f32.mrf.mxu1  ;;  %v807_v62 = vpop.f32.mrf.mxu0 }
 0x1a1   :  { %v881_v23 = vpack.c.bf16 %v603_v18, %v1713_v20  ;;  %v883_v27 = vpack.c.bf16 %v807_v62, %v807_v62 }
 0x1a2   :  { %992 = vst [vmem:[%s2213_s2 + $0xa8] sm:$0xff] %v877_v15 }
 0x1a3   :  { %996 = vst [vmem:[%s2213_s2 + $0xc4] sm:$0xff] %v881_v23 }
 0x1a4   :  { %998 = vst [vmem:[%s2213_s2 + $0xd4] sm:$0xf] %v883_v27 }
 0x1a7   :  { %v671_v37 = vpop.f32.mrf.mxu2  ;;  %v739_v63 = vpop.f32.mrf.mxu3 }
 0x1a8   :  { %v882_v0 = vpack.c.bf16 %v739_v63, %v671_v37  ;;  %v606_v11 = vpop.f32.mrf.mxu1  ;;  %v810_v10 = vpop.f32.mrf.mxu0 }
 0x1a9   :  { %v886_v20 = vpack.c.bf16 %v606_v11, %v1721_v40  ;;  %v888_v22 = vpack.c.bf16 %v810_v10, %v810_v10 }
 0x1aa   :  { %997 = vst [vmem:[%s2213_s2 + $0xcc] sm:$0xff] %v882_v0 }
 0x1ab   :  { %1001 = vst [vmem:[%s2213_s2 + $0xe8] sm:$0xff] %v886_v20  ;;  %1275 = vmatmul.msk.bf16.gmra.mxu1 %vm205_vm0, %v1520_v55  ;;  %1311 = vmatmul.msk.bf16.gmra.mxu0 %vm205_vm0, %v1520_v55 }
 0x1ac   :  { %1003 = vst [vmem:[%s2213_s2 + $0xf8] sm:$0xf] %v888_v22  ;;  %1287 = vmatmul.msk.bf16.gmra.mxu2 %vm205_vm0, %v1520_v55  ;;  %1299 = vmatmul.msk.bf16.gmra.mxu3 %vm205_vm0, %v1520_v55 }
 0x1af   :  { %v674_v40 = vpop.f32.mrf.mxu2  ;;  %v742_v26 = vpop.f32.mrf.mxu3 }
 0x1b0   :  { %v887_v4 = vpack.c.bf16 %v742_v26, %v674_v40  ;;  %v608_v21 = vpop.f32.mrf.mxu1  ;;  %v812_v8 = vpop.f32.mrf.mxu0 }
 0x1b1   :  { %v891_v36 = vpack.c.bf16 %v608_v21, %v1738_v45  ;;  %v893_v33 = vpack.c.bf16 %v812_v8, %v812_v8 }
 0x1b2   :  { %1002 = vst [vmem:[%s2213_s2 + $0xf0] sm:$0xff] %v887_v4 }
 0x1b3   :  { %1006 = vst [vmem:[%s2213_s2 + $0x10c] sm:$0xff] %v891_v36 }
 0x1b4   :  { %1008 = vst [vmem:[%s2213_s2 + $0x11c] sm:$0xf] %v893_v33 }
 0x1b7   :  { %v676_v55 = vpop.f32.mrf.mxu2  ;;  %v744_v14 = vpop.f32.mrf.mxu3 }
 0x1b8   :  { %v892_v31 = vpack.c.bf16 %v744_v14, %v676_v55  ;;  %v611_v32 = vpop.f32.mrf.mxu1  ;;  %v815_v35 = vpop.f32.mrf.mxu0 }
 0x1b9   :  { %v896_v45 = vpack.c.bf16 %v611_v32, %v1747_v56  ;;  %v898_v39 = vpack.c.bf16 %v815_v35, %v815_v35 }
 0x1ba   :  { %1007 = vst [vmem:[%s2213_s2 + $0x114] sm:$0xff] %v892_v31 }
 0x1bb   :  { %1011 = vst [vmem:[%s2213_s2 + $0x130] sm:$0xff] %v896_v45 }
 0x1bc   :  { %1013 = vst [vmem:[%s2213_s2 + $0x140] sm:$0xf] %v898_v39 }
 0x1bf   :  { %v679_v54 = vpop.f32.mrf.mxu2  ;;  %v747_v7 = vpop.f32.mrf.mxu3 }
 0x1c0   :  { %v897_v30 = vpack.c.bf16 %v747_v7, %v679_v54  ;;  %v613_v34 = vpop.f32.mrf.mxu1  ;;  %v817_v5 = vpop.f32.mrf.mxu0 }
 0x1c1   :  { %v901_v56 = vpack.c.bf16 %v613_v34, %v1764_v61  ;;  %v903_v43 = vpack.c.bf16 %v817_v5, %v817_v5 }
 0x1c2   :  { %1012 = vst [vmem:[%s2213_s2 + $0x138] sm:$0xff] %v897_v30 }
 0x1c3   :  { %1016 = vst [vmem:[%s2213_s2 + $0x154] sm:$0xff] %v901_v56 }
 0x1c4   :  { %1018 = vst [vmem:[%s2213_s2 + $0x164] sm:$0xf] %v903_v43 }
 0x1c7   :  { %v681_v29 = vpop.f32.mrf.mxu2  ;;  %v749_v49 = vpop.f32.mrf.mxu3 }
 0x1c8   :  { %v902_v28 = vpack.c.bf16 %v749_v49, %v681_v29  ;;  %v616_v42 = vpop.f32.mrf.mxu1  ;;  %v820_v46 = vpop.f32.mrf.mxu0 }
 0x1c9   :  { %v906_v61 = vpack.c.bf16 %v616_v42, %v1773_v3  ;;  %v908_v53 = vpack.c.bf16 %v820_v46, %v820_v46 }
 0x1ca   :  { %1017 = vst [vmem:[%s2213_s2 + $0x15c] sm:$0xff] %v902_v28 }
 0x1cb   :  { %1021 = vst [vmem:[%s2213_s2 + $0x178] sm:$0xff] %v906_v61 }
 0x1cc   :  { %1023 = vst [vmem:[%s2213_s2 + $0x188] sm:$0xf] %v908_v53 }
 0x1cf   :  { %v684_v48 = vpop.f32.mrf.mxu2  ;;  %v752_v13 = vpop.f32.mrf.mxu3 }
 0x1d0   :  { %v907_v19 = vpack.c.bf16 %v752_v13, %v684_v48  ;;  %v618_v17 = vpop.f32.mrf.mxu1  ;;  %v822_v50 = vpop.f32.mrf.mxu0 }
 0x1d1   :  { %v911_v3 = vpack.c.bf16 %v618_v17, %v1790_v24  ;;  %v913_v52 = vpack.c.bf16 %v822_v50, %v822_v50 }
 0x1d2   :  { %1022 = vst [vmem:[%s2213_s2 + $0x180] sm:$0xff] %v907_v19 }
 0x1d3   :  { %1026 = vst [vmem:[%s2213_s2 + $0x19c] sm:$0xff] %v911_v3 }
 0x1d4   :  { %1028 = vst [vmem:[%s2213_s2 + $0x1ac] sm:$0xf] %v913_v52 }
 0x1d7   :  { %v686_v12 = vpop.f32.mrf.mxu2  ;;  %v754_v59 = vpop.f32.mrf.mxu3 }
 0x1d8   :  { %v912_v16 = vpack.c.bf16 %v754_v59, %v686_v12  ;;  %v621_v1 = vpop.f32.mrf.mxu1  ;;  %v825_v9 = vpop.f32.mrf.mxu0 }
 0x1d9   :  { %v916_v24 = vpack.c.bf16 %v621_v1, %v1799_v41  ;;  %v918_v15 = vpack.c.bf16 %v825_v9, %v825_v9 }
 0x1da   :  { %1027 = vst [vmem:[%s2213_s2 + $0x1a4] sm:$0xff] %v912_v16 }
 0x1db   :  { %1031 = vst [vmem:[%s2213_s2 + $0x1c0] sm:$0xff] %v916_v24 }
 0x1dc   :  { %1033 = vst [vmem:[%s2213_s2 + $0x1d0] sm:$0xf] %v918_v15 }
 0x1df   :  { %v689_v18 = vpop.f32.mrf.mxu2  ;;  %v757_v62 = vpop.f32.mrf.mxu3 }
 0x1e0   :  { %v917_v23 = vpack.c.bf16 %v757_v62, %v689_v18  ;;  %v623_v27 = vpop.f32.mrf.mxu1  ;;  %v827_v37 = vpop.f32.mrf.mxu0 }
 0x1e1   :  { %v921_v41 = vpack.c.bf16 %v623_v27, %v1816_v44  ;;  %v923_v63 = vpack.c.bf16 %v827_v37, %v827_v37 }
 0x1e2   :  { %1032 = vst [vmem:[%s2213_s2 + $0x1c8] sm:$0xff] %v917_v23 }
 0x1e3   :  { %1036 = vst [vmem:[%s2213_s2 + $0x1e4] sm:$0xff] %v921_v41 }
 0x1e4   :  { %1038 = vst [vmem:[%s2213_s2 + $0x1f4] sm:$0xf] %v923_v63 }
 0x1e7   :  { %v691_v0 = vpop.f32.mrf.mxu2  ;;  %v759_v11 = vpop.f32.mrf.mxu3 }
 0x1e8   :  { %v922_v10 = vpack.c.bf16 %v759_v11, %v691_v0  ;;  %v626_v20 = vpop.f32.mrf.mxu1  ;;  %v830_v22 = vpop.f32.mrf.mxu0 }
 0x1e9   :  { %v926_v44 = vpack.c.bf16 %v626_v20, %v1825_v51  ;;  %v928_v40 = vpack.c.bf16 %v830_v22, %v830_v22 }
 0x1ea   :  { %1037 = vst [vmem:[%s2213_s2 + $0x1ec] sm:$0xff] %v922_v10 }
 0x1eb   :  { %1041 = vst [vmem:[%s2213_s2 + $0x208] sm:$0xff] %v926_v44 }
 0x1ec   :  { %1043 = vst [vmem:[%s2213_s2 + $0x218] sm:$0xf] %v928_v40 }
 0x1ef   :  { %v694_v26 = vpop.f32.mrf.mxu2  ;;  %v762_v4 = vpop.f32.mrf.mxu3 }
 0x1f0   :  { %v927_v21 = vpack.c.bf16 %v762_v4, %v694_v26  ;;  %v628_v8 = vpop.f32.mrf.mxu1  ;;  %v832_v36 = vpop.f32.mrf.mxu0 }
 0x1f1   :  { %v931_v51 = vpack.c.bf16 %v628_v8, %v1842_v58  ;;  %v933_v33 = vpack.c.bf16 %v832_v36, %v832_v36 }
 0x1f2   :  { %1042 = vst [vmem:[%s2213_s2 + $0x210] sm:$0xff] %v927_v21 }
 0x1f3   :  { %1046 = vst [vmem:[%s2213_s2 + $0x22c] sm:$0xff] %v931_v51 }
 0x1f4   :  { %1048 = vst [vmem:[%s2213_s2 + $0x23c] sm:$0xf] %v933_v33 }
 0x1f7   :  { %v696_v55 = vpop.f32.mrf.mxu2  ;;  %v764_v14 = vpop.f32.mrf.mxu3 }
 0x1f8   :  { %v932_v31 = vpack.c.bf16 %v764_v14, %v696_v55  ;;  %v631_v32 = vpop.f32.mrf.mxu1  ;;  %v835_v35 = vpop.f32.mrf.mxu0 }
 0x1f9   :  { %v936_v58 = vpack.c.bf16 %v631_v32, %v1851_v2  ;;  %v938_v45 = vpack.c.bf16 %v835_v35, %v835_v35 }
 0x1fa   :  { %1047 = vst [vmem:[%s2213_s2 + $0x234] sm:$0xff] %v932_v31 }
 0x1fb   :  { %1051 = vst [vmem:[%s2213_s2 + $0x250] sm:$0xff] %v936_v58 }
 0x1fc   :  { %1053 = vst [vmem:[%s2213_s2 + $0x260] sm:$0xf] %v938_v45 }
 0x1ff   :  { %v699_v39 = vpop.f32.mrf.mxu2  ;;  %v767_v54 = vpop.f32.mrf.mxu3 }
 0x200   :  { %v937_v7 = vpack.c.bf16 %v767_v54, %v699_v39  ;;  %v633_v30 = vpop.f32.mrf.mxu1  ;;  %v837_v34 = vpop.f32.mrf.mxu0 }
 0x201   :  { %v941_v2 = vpack.c.bf16 %v633_v30, %v1868_v25  ;;  %v943_v5 = vpack.c.bf16 %v837_v34, %v837_v34 }
 0x202   :  { %1052 = vst [vmem:[%s2213_s2 + $0x258] sm:$0xff] %v937_v7 }
 0x203   :  { %1056 = vst [vmem:[%s2213_s2 + $0x274] sm:$0xff] %v941_v2 }
 0x204   :  { %1058 = vst [vmem:[%s2213_s2 + $0x284] sm:$0xf] %v943_v5 }
 0x207   :  { %v701_v56 = vpop.f32.mrf.mxu2  ;;  %v769_v43 = vpop.f32.mrf.mxu3 }
 0x208   :  { %v942_v29 = vpack.c.bf16 %v769_v43, %v701_v56  ;;  %v636_v49 = vpop.f32.mrf.mxu1  ;;  %v840_v28 = vpop.f32.mrf.mxu0 }
 0x209   :  { %v946_v25 = vpack.c.bf16 %v636_v49, %v1877_v38  ;;  %v948_v42 = vpack.c.bf16 %v840_v28, %v840_v28 }
 0x20a   :  { %1057 = vst [vmem:[%s2213_s2 + $0x27c] sm:$0xff] %v942_v29 }
 0x20b   :  { %1061 = vst [vmem:[%s2213_s2 + $0x298] sm:$0xff] %v946_v25 }
 0x20c   :  { %1063 = vst [vmem:[%s2213_s2 + $0x2a8] sm:$0xf] %v948_v42 }
 0x20f   :  { %v704_v46 = vpop.f32.mrf.mxu2  ;;  %v772_v61 = vpop.f32.mrf.mxu3 }
 0x210   :  { %v947_v53 = vpack.c.bf16 %v772_v61, %v704_v46  ;;  %v638_v48 = vpop.f32.mrf.mxu1  ;;  %v842_v13 = vpop.f32.mrf.mxu0 }
 0x211   :  { %v951_v38 = vpack.c.bf16 %v638_v48, %v1894_v6  ;;  %v953_v19 = vpack.c.bf16 %v842_v13, %v842_v13 }
 0x212   :  { %1062 = vst [vmem:[%s2213_s2 + $0x2a0] sm:$0xff] %v947_v53 }
 0x213   :  { %1066 = vst [vmem:[%s2213_s2 + $0x2bc] sm:$0xff] %v951_v38 }
 0x214   :  { %1068 = vst [vmem:[%s2213_s2 + $0x2cc] sm:$0xf] %v953_v19 }
 0x217   :  { %v706_v17 = vpop.f32.mrf.mxu2  ;;  %v774_v50 = vpop.f32.mrf.mxu3 }
 0x218   :  { %v952_v3 = vpack.c.bf16 %v774_v50, %v706_v17  ;;  %v641_v52 = vpop.f32.mrf.mxu1  ;;  %v845_v12 = vpop.f32.mrf.mxu0 }
 0x219   :  { %v956_v6 = vpack.c.bf16 %v641_v52, %v1903_v47  ;;  %v958_v59 = vpack.c.bf16 %v845_v12, %v845_v12 }
 0x21a   :  { %1067 = vst [vmem:[%s2213_s2 + $0x2c4] sm:$0xff] %v952_v3 }
 0x21b   :  { %1071 = vst [vmem:[%s2213_s2 + $0x2e0] sm:$0xff] %v956_v6 }
 0x21c   :  { %1073 = vst [vmem:[%s2213_s2 + $0x2f0] sm:$0xf] %v958_v59 }
 0x21f   :  { %v709_v16 = vpop.f32.mrf.mxu2  ;;  %v777_v1 = vpop.f32.mrf.mxu3 }
 0x220   :  { %v957_v9 = vpack.c.bf16 %v777_v1, %v709_v16  ;;  %v643_v24 = vpop.f32.mrf.mxu1  ;;  %v847_v15 = vpop.f32.mrf.mxu0 }
 0x221   :  { %v961_v47 = vpack.c.bf16 %v643_v24, %v1920_v57  ;;  %v963_v18 = vpack.c.bf16 %v847_v15, %v847_v15 }
 0x222   :  { %1072 = vst [vmem:[%s2213_s2 + $0x2e8] sm:$0xff] %v957_v9 }
 0x223   :  { %1076 = vst [vmem:[%s2213_s2 + $0x304] sm:$0xff] %v961_v47 }
 0x224   :  { %1078 = vst [vmem:[%s2213_s2 + $0x314] sm:$0xf] %v963_v18 }
 0x227   :  { %v711_v62 = vpop.f32.mrf.mxu2  ;;  %v779_v23 = vpop.f32.mrf.mxu3 }
 0x228   :  { %v962_v27 = vpack.c.bf16 %v779_v23, %v711_v62  ;;  %v646_v37 = vpop.f32.mrf.mxu1  ;;  %v850_v41 = vpop.f32.mrf.mxu0 }
 0x229   :  { %v966_v57 = vpack.c.bf16 %v646_v37, %v1929_v60  ;;  %v968_v63 = vpack.c.bf16 %v850_v41, %v850_v41 }
 0x22a   :  { %1077 = vst [vmem:[%s2213_s2 + $0x30c] sm:$0xff] %v962_v27 }
 0x22b   :  { %1081 = vst [vmem:[%s2213_s2 + $0x328] sm:$0xff] %v966_v57 }
 0x22c   :  { %1083 = vst [vmem:[%s2213_s2 + $0x338] sm:$0xf] %v968_v63 }
 0x22f   :  { %v714_v0 = vpop.f32.mrf.mxu2  ;;  %v782_v11 = vpop.f32.mrf.mxu3 }
 0x230   :  { %v967_v10 = vpack.c.bf16 %v782_v11, %v714_v0  ;;  %v648_v20 = vpop.f32.mrf.mxu1  ;;  %v852_v22 = vpop.f32.mrf.mxu0 }
 0x232   :  { %1082 = vst [vmem:[%s2213_s2 + $0x330] sm:$0xff] %v967_v10 }
 0x237   :  { %v716_v60 = vpop.f32.mrf.mxu2  ;;  %v784_v44 = vpop.f32.mrf.mxu3 }

// kernel: text_vae_forward.18
= control target key start
LH: loop header
LB: loop body
LE: loop exit
PB: predicated region body
PF: predicated region fallthrough
CT: control target
= control target key end

     0   :  { %vm658_vm0 = vcmask 261120   ;;  %s3498_s1 = inlined_call_operand.vmem [shape: bf16[32,128], index: 1, kind: input, shape index: {}]   ;;  %s3499_s0 = inlined_call_operand.vmem [shape: bf16[1440,32], index: 0, kind: input, shape index: {}]   ;;  %s3500_s2 = inlined_call_operand.vmem [shape: bf16[1440,128], index: 2, kind: output, shape index: {}]  }
   0x1   :  { %v2301_v0 = vld [vmem:[%s3498_s1 + $0x8] sm:$0xff]  ;;  %v2300_v1 = vld [vmem:[%s3498_s1] sm:$0xff]  ;;  %v2233_v3 = vld [vmem:[%s3499_s0 + $0xb8] sm:$0xff] }
   0x2   :  { %935 = vmatpush.bf16.msra.mxu0 %v2301_v0  ;;  %2841 = vmatpush.bf16.msra.mxu1 %v2301_v0  ;;  %v2210_v2 = vld [vmem:[%s3499_s0] sm:$0xff]  ;;  %v2256_v4 = vld [vmem:[%s3499_s0 + $0x170] sm:$0xff]  ;;  %v2279_v5 = vld [vmem:[%s3499_s0 + $0x228] sm:$0xff] }
   0x3   :  { %2842 = vmatpush.bf16.msra.mxu2 %v2301_v0  ;;  %2843 = vmatpush.bf16.msra.mxu3 %v2301_v0  ;;  %v2211_v6 = vld [vmem:[%s3499_s0 + $0x8] sm:$0xff]  ;;  %v2234_v7 = vld [vmem:[%s3499_s0 + $0xc0] sm:$0xff]  ;;  %v2257_v8 = vld [vmem:[%s3499_s0 + $0x178] sm:$0xff] }
   0x4   :  { %v2280_v9 = vld [vmem:[%s3499_s0 + $0x230] sm:$0xff]  ;;  %v2235_v11 = vld [vmem:[%s3499_s0 + $0xc8] sm:$0xff]  ;;  %v2258_v12 = vld [vmem:[%s3499_s0 + $0x180] sm:$0xff] }
   0x5   :  { %v2212_v10 = vld [vmem:[%s3499_s0 + $0x10] sm:$0xff]  ;;  %v2281_v13 = vld [vmem:[%s3499_s0 + $0x238] sm:$0xff]  ;;  %v2259_v16 = vld [vmem:[%s3499_s0 + $0x188] sm:$0xff] }
   0x6   :  { %936 = vmatpush.bf16.msra.mxu0 %v2300_v1  ;;  %2844 = vmatpush.bf16.msra.mxu1 %v2300_v1  ;;  %v2213_v14 = vld [vmem:[%s3499_s0 + $0x18] sm:$0xff]  ;;  %v2236_v15 = vld [vmem:[%s3499_s0 + $0xd0] sm:$0xff]  ;;  %v2282_v17 = vld [vmem:[%s3499_s0 + $0x240] sm:$0xff] }
   0x7   :  { %2845 = vmatpush.bf16.msra.mxu2 %v2300_v1  ;;  %2846 = vmatpush.bf16.msra.mxu3 %v2300_v1  ;;  %v2214_v18 = vld [vmem:[%s3499_s0 + $0x20] sm:$0xff]  ;;  %v2237_v19 = vld [vmem:[%s3499_s0 + $0xd8] sm:$0xff]  ;;  %v2260_v20 = vld [vmem:[%s3499_s0 + $0x190] sm:$0xff] }
   0x8   :  { %v2283_v21 = vld [vmem:[%s3499_s0 + $0x248] sm:$0xff]  ;;  %v2238_v23 = vld [vmem:[%s3499_s0 + $0xe0] sm:$0xff]  ;;  %v2261_v24 = vld [vmem:[%s3499_s0 + $0x198] sm:$0xff] }
   0x9   :  { %2120 = vmatmul.msk.bf16.vlgmr.msra.gmra.mxu0 %vm658_vm0, %v2210_v2  ;;  %2143 = vmatmul.msk.bf16.vlgmr.msra.gmra.mxu1 %vm658_vm0, %v2233_v3  ;;  %v2215_v22 = vld [vmem:[%s3499_s0 + $0x28] sm:$0xff]  ;;  %v2284_v25 = vld [vmem:[%s3499_s0 + $0x250] sm:$0xff]  ;;  %v2262_v28 = vld [vmem:[%s3499_s0 + $0x1a0] sm:$0xff] }
   0xa   :  { %2166 = vmatmul.msk.bf16.vlgmr.msra.gmra.mxu2 %vm658_vm0, %v2256_v4  ;;  %2189 = vmatmul.msk.bf16.vlgmr.msra.gmra.mxu3 %vm658_vm0, %v2279_v5  ;;  %v2216_v26 = vld [vmem:[%s3499_s0 + $0x30] sm:$0xff]  ;;  %v2239_v27 = vld [vmem:[%s3499_s0 + $0xe8] sm:$0xff]  ;;  %v2285_v29 = vld [vmem:[%s3499_s0 + $0x258] sm:$0xff] }
   0xb   :  { %v2217_v30 = vld [vmem:[%s3499_s0 + $0x38] sm:$0xff]  ;;  %v2240_v31 = vld [vmem:[%s3499_s0 + $0xf0] sm:$0xff]  ;;  %v2263_v32 = vld [vmem:[%s3499_s0 + $0x1a8] sm:$0xff] }
   0xc   :  { %v2286_v33 = vld [vmem:[%s3499_s0 + $0x260] sm:$0xff]  ;;  %v2241_v35 = vld [vmem:[%s3499_s0 + $0xf8] sm:$0xff]  ;;  %v2264_v38 = vld [vmem:[%s3499_s0 + $0x1b0] sm:$0xff] }
   0xd   :  { %v2218_v34 = vld [vmem:[%s3499_s0 + $0x40] sm:$0xff]  ;;  %v2287_v39 = vld [vmem:[%s3499_s0 + $0x268] sm:$0xff]  ;;  %v2265_v53 = vld [vmem:[%s3499_s0 + $0x1b8] sm:$0xff] }
   0xe   :  { %v2219_v47 = vld [vmem:[%s3499_s0 + $0x48] sm:$0xff]  ;;  %v2242_v48 = vld [vmem:[%s3499_s0 + $0x100] sm:$0xff]  ;;  %v2288_v55 = vld [vmem:[%s3499_s0 + $0x270] sm:$0xff] }
   0xf   :  { %v2220_v63 = vld [vmem:[%s3499_s0 + $0x50] sm:$0xff]  ;;  %v2243_v0 = vld [vmem:[%s3499_s0 + $0x108] sm:$0xff]  ;;  %v2266_v5 = vld [vmem:[%s3499_s0 + $0x1c0] sm:$0xff] }
  0x19   :  { %2121 = vmatmul.msk.bf16.gmra.mxu0 %vm658_vm0, %v2211_v6  ;;  %2144 = vmatmul.msk.bf16.gmra.mxu1 %vm658_vm0, %v2234_v7  ;;  %v2289_v7 = vld [vmem:[%s3499_s0 + $0x278] sm:$0xff] }
  0x1a   :  { %2167 = vmatmul.msk.bf16.gmra.mxu2 %vm658_vm0, %v2257_v8  ;;  %2190 = vmatmul.msk.bf16.gmra.mxu3 %vm658_vm0, %v2280_v9 }
  0x29   :  { %2122 = vmatmul.msk.bf16.gmra.mxu0 %vm658_vm0, %v2212_v10  ;;  %2145 = vmatmul.msk.bf16.gmra.mxu1 %vm658_vm0, %v2235_v11 }
  0x2a   :  { %2168 = vmatmul.msk.bf16.gmra.mxu2 %vm658_vm0, %v2258_v12  ;;  %2191 = vmatmul.msk.bf16.gmra.mxu3 %vm658_vm0, %v2281_v13 }
  0x39   :  { %2123 = vmatmul.msk.bf16.gmra.mxu0 %vm658_vm0, %v2213_v14  ;;  %2146 = vmatmul.msk.bf16.gmra.mxu1 %vm658_vm0, %v2236_v15  ;;  %v2221_v15 = vld [vmem:[%s3499_s0 + $0x58] sm:$0xff] }
  0x3a   :  { %2169 = vmatmul.msk.bf16.gmra.mxu2 %vm658_vm0, %v2259_v16  ;;  %2192 = vmatmul.msk.bf16.gmra.mxu3 %vm658_vm0, %v2282_v17  ;;  %v2244_v16 = vld [vmem:[%s3499_s0 + $0x110] sm:$0xff] }
  0x49   :  { %2124 = vmatmul.msk.bf16.gmra.mxu0 %vm658_vm0, %v2214_v18  ;;  %2147 = vmatmul.msk.bf16.gmra.mxu1 %vm658_vm0, %v2237_v19 }
  0x4a   :  { %2170 = vmatmul.msk.bf16.gmra.mxu2 %vm658_vm0, %v2260_v20  ;;  %2193 = vmatmul.msk.bf16.gmra.mxu3 %vm658_vm0, %v2283_v21  ;;  %v2267_v21 = vld [vmem:[%s3499_s0 + $0x1c8] sm:$0xff] }
  0x59   :  { %2125 = vmatmul.msk.bf16.gmra.mxu0 %vm658_vm0, %v2215_v22  ;;  %2148 = vmatmul.msk.bf16.gmra.mxu1 %vm658_vm0, %v2238_v23  ;;  %v2290_v23 = vld [vmem:[%s3499_s0 + $0x280] sm:$0xff] }
  0x5a   :  { %2171 = vmatmul.msk.bf16.gmra.mxu2 %vm658_vm0, %v2261_v24  ;;  %2194 = vmatmul.msk.bf16.gmra.mxu3 %vm658_vm0, %v2284_v25 }
  0x69   :  { %2126 = vmatmul.msk.bf16.gmra.mxu0 %vm658_vm0, %v2216_v26  ;;  %2149 = vmatmul.msk.bf16.gmra.mxu1 %vm658_vm0, %v2239_v27 }
  0x6a   :  { %2172 = vmatmul.msk.bf16.gmra.mxu2 %vm658_vm0, %v2262_v28  ;;  %2195 = vmatmul.msk.bf16.gmra.mxu3 %vm658_vm0, %v2285_v29 }
  0x79   :  { %2127 = vmatmul.msk.bf16.gmra.mxu0 %vm658_vm0, %v2217_v30  ;;  %2150 = vmatmul.msk.bf16.gmra.mxu1 %vm658_vm0, %v2240_v31  ;;  %v2222_v31 = vld [vmem:[%s3499_s0 + $0x60] sm:$0xff] }
  0x7a   :  { %2173 = vmatmul.msk.bf16.gmra.mxu2 %vm658_vm0, %v2263_v32  ;;  %2196 = vmatmul.msk.bf16.gmra.mxu3 %vm658_vm0, %v2286_v33  ;;  %v2245_v32 = vld [vmem:[%s3499_s0 + $0x118] sm:$0xff] }
  0x86   :  { %v938_v36 = vpop.f32.mrf.mxu0  ;;  %v1053_v37 = vpop.f32.mrf.mxu1 }
  0x89   :  { %2128 = vmatmul.msk.bf16.gmra.mxu0 %vm658_vm0, %v2218_v34  ;;  %2151 = vmatmul.msk.bf16.gmra.mxu1 %vm658_vm0, %v2241_v35 }
  0x8a   :  { %2174 = vmatmul.msk.bf16.gmra.mxu2 %vm658_vm0, %v2264_v38  ;;  %2197 = vmatmul.msk.bf16.gmra.mxu3 %vm658_vm0, %v2287_v39  ;;  %v2291_v39 = vld [vmem:[%s3499_s0 + $0x288] sm:$0xff] }
  0x8d   :  { %v1168_v40 = vpop.f32.mrf.mxu2  ;;  %v1283_v41 = vpop.f32.mrf.mxu3 }
  0x8e   :  { %v940_v42 = vpop.f32.mrf.mxu0  ;;  %v1055_v43 = vpop.f32.mrf.mxu1 }
  0x8f   :  { %v2305_v44 = vpack.c.bf16 %v940_v42, %v938_v36  ;;  %v2420_v45 = vpack.c.bf16 %v1055_v43, %v1053_v37  ;;  %v2268_v37 = vld [vmem:[%s3499_s0 + $0x1d0] sm:$0xff] }
  0x91   :  { %2306 = vst [vmem:[%s3500_s2] sm:$0xff] %v2305_v44  }
  0x92   :  { %2774 = vst [vmem:[%s3500_s2 + $0xb8] sm:$0xff] %v2420_v45  }
  0x95   :  { %v1170_v46 = vpop.f32.mrf.mxu2  ;;  %v1285_v49 = vpop.f32.mrf.mxu3 }
  0x96   :  { %v2535_v50 = vpack.c.bf16 %v1170_v46, %v1168_v40  ;;  %v943_v51 = vpop.f32.mrf.mxu0  ;;  %v1058_v52 = vpop.f32.mrf.mxu1  ;;  %v2650_v54 = vpack.c.bf16 %v1285_v49, %v1283_v41 }
  0x98   :  { %2797 = vst [vmem:[%s3500_s2 + $0x170] sm:$0xff] %v2535_v50  }
  0x99   :  { %2129 = vmatmul.msk.bf16.gmra.mxu0 %vm658_vm0, %v2219_v47  ;;  %2152 = vmatmul.msk.bf16.gmra.mxu1 %vm658_vm0, %v2242_v48  ;;  %2820 = vst [vmem:[%s3500_s2 + $0x228] sm:$0xff] %v2650_v54   ;;  %v2223_v47 = vld [vmem:[%s3499_s0 + $0x68] sm:$0xff]  ;;  %v2246_v48 = vld [vmem:[%s3499_s0 + $0x120] sm:$0xff] }
  0x9a   :  { %2175 = vmatmul.msk.bf16.gmra.mxu2 %vm658_vm0, %v2265_v53  ;;  %2198 = vmatmul.msk.bf16.gmra.mxu3 %vm658_vm0, %v2288_v55  ;;  %v2269_v53 = vld [vmem:[%s3499_s0 + $0x1d8] sm:$0xff]  ;;  %v2292_v55 = vld [vmem:[%s3499_s0 + $0x290] sm:$0xff] }
  0x9d   :  { %v1173_v56 = vpop.f32.mrf.mxu2  ;;  %v1288_v57 = vpop.f32.mrf.mxu3 }
  0x9e   :  { %v945_v58 = vpop.f32.mrf.mxu0  ;;  %v1060_v59 = vpop.f32.mrf.mxu1 }
  0x9f   :  { %v2310_v60 = vpack.c.bf16 %v945_v58, %v943_v51  ;;  %v2425_v61 = vpack.c.bf16 %v1060_v59, %v1058_v52 }
  0xa1   :  { %2752 = vst [vmem:[%s3500_s2 + $0x8] sm:$0xff] %v2310_v60  }
  0xa2   :  { %2775 = vst [vmem:[%s3500_s2 + $0xc0] sm:$0xff] %v2425_v61  }
  0xa5   :  { %v1175_v62 = vpop.f32.mrf.mxu2  ;;  %v1290_v1 = vpop.f32.mrf.mxu3 }
  0xa6   :  { %v2540_v2 = vpack.c.bf16 %v1175_v62, %v1173_v56  ;;  %v948_v3 = vpop.f32.mrf.mxu0  ;;  %v1063_v4 = vpop.f32.mrf.mxu1  ;;  %v2655_v6 = vpack.c.bf16 %v1290_v1, %v1288_v57 }
  0xa8   :  { %2798 = vst [vmem:[%s3500_s2 + $0x178] sm:$0xff] %v2540_v2  }
  0xa9   :  { %2130 = vmatmul.msk.bf16.gmra.mxu0 %vm658_vm0, %v2220_v63  ;;  %2153 = vmatmul.msk.bf16.gmra.mxu1 %vm658_vm0, %v2243_v0  ;;  %2821 = vst [vmem:[%s3500_s2 + $0x230] sm:$0xff] %v2655_v6   ;;  %v2224_v63 = vld [vmem:[%s3499_s0 + $0x70] sm:$0xff]  ;;  %v2247_v0 = vld [vmem:[%s3499_s0 + $0x128] sm:$0xff] }
  0xaa   :  { %2176 = vmatmul.msk.bf16.gmra.mxu2 %vm658_vm0, %v2266_v5  ;;  %2199 = vmatmul.msk.bf16.gmra.mxu3 %vm658_vm0, %v2289_v7  ;;  %v2270_v5 = vld [vmem:[%s3499_s0 + $0x1e0] sm:$0xff]  ;;  %v2293_v7 = vld [vmem:[%s3499_s0 + $0x298] sm:$0xff] }
  0xad   :  { %v1178_v8 = vpop.f32.mrf.mxu2  ;;  %v1293_v9 = vpop.f32.mrf.mxu3 }
  0xae   :  { %v950_v10 = vpop.f32.mrf.mxu0  ;;  %v1065_v11 = vpop.f32.mrf.mxu1 }
  0xaf   :  { %v2315_v12 = vpack.c.bf16 %v950_v10, %v948_v3  ;;  %v2430_v13 = vpack.c.bf16 %v1065_v11, %v1063_v4 }
  0xb1   :  { %2753 = vst [vmem:[%s3500_s2 + $0x10] sm:$0xff] %v2315_v12  }
  0xb2   :  { %2776 = vst [vmem:[%s3500_s2 + $0xc8] sm:$0xff] %v2430_v13  }
  0xb5   :  { %v1180_v14 = vpop.f32.mrf.mxu2  ;;  %v1295_v17 = vpop.f32.mrf.mxu3 }
  0xb6   :  { %v2545_v18 = vpack.c.bf16 %v1180_v14, %v1178_v8  ;;  %v953_v19 = vpop.f32.mrf.mxu0  ;;  %v1068_v20 = vpop.f32.mrf.mxu1  ;;  %v2660_v22 = vpack.c.bf16 %v1295_v17, %v1293_v9 }
  0xb8   :  { %2799 = vst [vmem:[%s3500_s2 + $0x180] sm:$0xff] %v2545_v18  }
  0xb9   :  { %2131 = vmatmul.msk.bf16.gmra.mxu0 %vm658_vm0, %v2221_v15  ;;  %2154 = vmatmul.msk.bf16.gmra.mxu1 %vm658_vm0, %v2244_v16  ;;  %2822 = vst [vmem:[%s3500_s2 + $0x238] sm:$0xff] %v2660_v22   ;;  %v2225_v15 = vld [vmem:[%s3499_s0 + $0x78] sm:$0xff]  ;;  %v2248_v16 = vld [vmem:[%s3499_s0 + $0x130] sm:$0xff] }
  0xba   :  { %2177 = vmatmul.msk.bf16.gmra.mxu2 %vm658_vm0, %v2267_v21  ;;  %2200 = vmatmul.msk.bf16.gmra.mxu3 %vm658_vm0, %v2290_v23  ;;  %v2271_v21 = vld [vmem:[%s3499_s0 + $0x1e8] sm:$0xff]  ;;  %v2294_v23 = vld [vmem:[%s3499_s0 + $0x2a0] sm:$0xff] }
  0xbd   :  { %v1183_v24 = vpop.f32.mrf.mxu2  ;;  %v1298_v25 = vpop.f32.mrf.mxu3 }
  0xbe   :  { %v955_v26 = vpop.f32.mrf.mxu0  ;;  %v1070_v27 = vpop.f32.mrf.mxu1 }
  0xbf   :  { %v2320_v28 = vpack.c.bf16 %v955_v26, %v953_v19  ;;  %v2435_v29 = vpack.c.bf16 %v1070_v27, %v1068_v20 }
  0xc1   :  { %2754 = vst [vmem:[%s3500_s2 + $0x18] sm:$0xff] %v2320_v28  }
  0xc2   :  { %2777 = vst [vmem:[%s3500_s2 + $0xd0] sm:$0xff] %v2435_v29  }
  0xc5   :  { %v1185_v30 = vpop.f32.mrf.mxu2  ;;  %v1300_v33 = vpop.f32.mrf.mxu3 }
  0xc6   :  { %v2550_v34 = vpack.c.bf16 %v1185_v30, %v1183_v24  ;;  %v958_v35 = vpop.f32.mrf.mxu0  ;;  %v1073_v36 = vpop.f32.mrf.mxu1  ;;  %v2665_v38 = vpack.c.bf16 %v1300_v33, %v1298_v25 }
  0xc8   :  { %2800 = vst [vmem:[%s3500_s2 + $0x188] sm:$0xff] %v2550_v34  }
  0xc9   :  { %2132 = vmatmul.msk.bf16.gmra.mxu0 %vm658_vm0, %v2222_v31  ;;  %2155 = vmatmul.msk.bf16.gmra.mxu1 %vm658_vm0, %v2245_v32  ;;  %2823 = vst [vmem:[%s3500_s2 + $0x240] sm:$0xff] %v2665_v38   ;;  %v2226_v31 = vld [vmem:[%s3499_s0 + $0x80] sm:$0xff]  ;;  %v2249_v32 = vld [vmem:[%s3499_s0 + $0x138] sm:$0xff] }
  0xca   :  { %2178 = vmatmul.msk.bf16.gmra.mxu2 %vm658_vm0, %v2268_v37  ;;  %2201 = vmatmul.msk.bf16.gmra.mxu3 %vm658_vm0, %v2291_v39  ;;  %v2272_v37 = vld [vmem:[%s3499_s0 + $0x1f0] sm:$0xff]  ;;  %v2295_v39 = vld [vmem:[%s3499_s0 + $0x2a8] sm:$0xff] }
  0xcd   :  { %v1188_v40 = vpop.f32.mrf.mxu2  ;;  %v1303_v41 = vpop.f32.mrf.mxu3 }
  0xce   :  { %v960_v42 = vpop.f32.mrf.mxu0  ;;  %v1075_v43 = vpop.f32.mrf.mxu1 }
  0xcf   :  { %v2325_v44 = vpack.c.bf16 %v960_v42, %v958_v35  ;;  %v2440_v45 = vpack.c.bf16 %v1075_v43, %v1073_v36 }
  0xd1   :  { %2755 = vst [vmem:[%s3500_s2 + $0x20] sm:$0xff] %v2325_v44  }
  0xd2   :  { %2778 = vst [vmem:[%s3500_s2 + $0xd8] sm:$0xff] %v2440_v45  }
  0xd5   :  { %v1190_v46 = vpop.f32.mrf.mxu2  ;;  %v1305_v49 = vpop.f32.mrf.mxu3 }
  0xd6   :  { %v2555_v50 = vpack.c.bf16 %v1190_v46, %v1188_v40  ;;  %v963_v51 = vpop.f32.mrf.mxu0  ;;  %v1078_v52 = vpop.f32.mrf.mxu1  ;;  %v2670_v54 = vpack.c.bf16 %v1305_v49, %v1303_v41 }
  0xd8   :  { %2801 = vst [vmem:[%s3500_s2 + $0x190] sm:$0xff] %v2555_v50  }
  0xd9   :  { %2133 = vmatmul.msk.bf16.gmra.mxu0 %vm658_vm0, %v2223_v47  ;;  %2156 = vmatmul.msk.bf16.gmra.mxu1 %vm658_vm0, %v2246_v48  ;;  %2824 = vst [vmem:[%s3500_s2 + $0x248] sm:$0xff] %v2670_v54   ;;  %v2227_v47 = vld [vmem:[%s3499_s0 + $0x88] sm:$0xff]  ;;  %v2250_v48 = vld [vmem:[%s3499_s0 + $0x140] sm:$0xff] }
  0xda   :  { %2179 = vmatmul.msk.bf16.gmra.mxu2 %vm658_vm0, %v2269_v53  ;;  %2202 = vmatmul.msk.bf16.gmra.mxu3 %vm658_vm0, %v2292_v55  ;;  %v2273_v53 = vld [vmem:[%s3499_s0 + $0x1f8] sm:$0xff]  ;;  %v2296_v55 = vld [vmem:[%s3499_s0 + $0x2b0] sm:$0xff] }
  0xdd   :  { %v1193_v56 = vpop.f32.mrf.mxu2  ;;  %v1308_v57 = vpop.f32.mrf.mxu3 }
  0xde   :  { %v965_v58 = vpop.f32.mrf.mxu0  ;;  %v1080_v59 = vpop.f32.mrf.mxu1 }
  0xdf   :  { %v2330_v60 = vpack.c.bf16 %v965_v58, %v963_v51  ;;  %v2445_v61 = vpack.c.bf16 %v1080_v59, %v1078_v52 }
  0xe1   :  { %2756 = vst [vmem:[%s3500_s2 + $0x28] sm:$0xff] %v2330_v60  }
  0xe2   :  { %2779 = vst [vmem:[%s3500_s2 + $0xe0] sm:$0xff] %v2445_v61  }
  0xe5   :  { %v1195_v62 = vpop.f32.mrf.mxu2  ;;  %v1310_v1 = vpop.f32.mrf.mxu3 }
  0xe6   :  { %v2560_v2 = vpack.c.bf16 %v1195_v62, %v1193_v56  ;;  %v968_v3 = vpop.f32.mrf.mxu0  ;;  %v1083_v4 = vpop.f32.mrf.mxu1  ;;  %v2675_v6 = vpack.c.bf16 %v1310_v1, %v1308_v57 }
  0xe8   :  { %2802 = vst [vmem:[%s3500_s2 + $0x198] sm:$0xff] %v2560_v2  }
  0xe9   :  { %2134 = vmatmul.msk.bf16.gmra.mxu0 %vm658_vm0, %v2224_v63  ;;  %2157 = vmatmul.msk.bf16.gmra.mxu1 %vm658_vm0, %v2247_v0  ;;  %2825 = vst [vmem:[%s3500_s2 + $0x250] sm:$0xff] %v2675_v6   ;;  %v2228_v63 = vld [vmem:[%s3499_s0 + $0x90] sm:$0xff]  ;;  %v2251_v0 = vld [vmem:[%s3499_s0 + $0x148] sm:$0xff] }
  0xea   :  { %2180 = vmatmul.msk.bf16.gmra.mxu2 %vm658_vm0, %v2270_v5  ;;  %2203 = vmatmul.msk.bf16.gmra.mxu3 %vm658_vm0, %v2293_v7  ;;  %v2274_v5 = vld [vmem:[%s3499_s0 + $0x200] sm:$0xff]  ;;  %v2297_v7 = vld [vmem:[%s3499_s0 + $0x2b8] sm:$0xff] }
  0xed   :  { %v1198_v8 = vpop.f32.mrf.mxu2  ;;  %v1313_v9 = vpop.f32.mrf.mxu3 }
  0xee   :  { %v970_v10 = vpop.f32.mrf.mxu0  ;;  %v1085_v11 = vpop.f32.mrf.mxu1 }
  0xef   :  { %v2335_v12 = vpack.c.bf16 %v970_v10, %v968_v3  ;;  %v2450_v13 = vpack.c.bf16 %v1085_v11, %v1083_v4 }
  0xf1   :  { %2757 = vst [vmem:[%s3500_s2 + $0x30] sm:$0xff] %v2335_v12  }
  0xf2   :  { %2780 = vst [vmem:[%s3500_s2 + $0xe8] sm:$0xff] %v2450_v13  }
  0xf5   :  { %v1200_v14 = vpop.f32.mrf.mxu2  ;;  %v1315_v17 = vpop.f32.mrf.mxu3 }
  0xf6   :  { %v2565_v18 = vpack.c.bf16 %v1200_v14, %v1198_v8  ;;  %v973_v19 = vpop.f32.mrf.mxu0  ;;  %v1088_v20 = vpop.f32.mrf.mxu1  ;;  %v2680_v22 = vpack.c.bf16 %v1315_v17, %v1313_v9 }
  0xf8   :  { %2803 = vst [vmem:[%s3500_s2 + $0x1a0] sm:$0xff] %v2565_v18  }
  0xf9   :  { %2135 = vmatmul.msk.bf16.gmra.mxu0 %vm658_vm0, %v2225_v15  ;;  %2158 = vmatmul.msk.bf16.gmra.mxu1 %vm658_vm0, %v2248_v16  ;;  %2826 = vst [vmem:[%s3500_s2 + $0x258] sm:$0xff] %v2680_v22   ;;  %v2229_v15 = vld [vmem:[%s3499_s0 + $0x98] sm:$0xff]  ;;  %v2252_v16 = vld [vmem:[%s3499_s0 + $0x150] sm:$0xff] }
  0xfa   :  { %2181 = vmatmul.msk.bf16.gmra.mxu2 %vm658_vm0, %v2271_v21  ;;  %2204 = vmatmul.msk.bf16.gmra.mxu3 %vm658_vm0, %v2294_v23  ;;  %v2275_v21 = vld [vmem:[%s3499_s0 + $0x208] sm:$0xff]  ;;  %v2298_v23 = vld [vmem:[%s3499_s0 + $0x2c0] sm:$0xff] }
  0xfd   :  { %v1203_v24 = vpop.f32.mrf.mxu2  ;;  %v1318_v25 = vpop.f32.mrf.mxu3 }
  0xfe   :  { %v975_v26 = vpop.f32.mrf.mxu0  ;;  %v1090_v27 = vpop.f32.mrf.mxu1 }
  0xff   :  { %v2340_v28 = vpack.c.bf16 %v975_v26, %v973_v19  ;;  %v2455_v29 = vpack.c.bf16 %v1090_v27, %v1088_v20 }
 0x101   :  { %2758 = vst [vmem:[%s3500_s2 + $0x38] sm:$0xff] %v2340_v28  }
 0x102   :  { %2781 = vst [vmem:[%s3500_s2 + $0xf0] sm:$0xff] %v2455_v29  }
 0x105   :  { %v1205_v30 = vpop.f32.mrf.mxu2  ;;  %v1320_v33 = vpop.f32.mrf.mxu3 }
 0x106   :  { %v2570_v34 = vpack.c.bf16 %v1205_v30, %v1203_v24  ;;  %v978_v35 = vpop.f32.mrf.mxu0  ;;  %v1093_v36 = vpop.f32.mrf.mxu1  ;;  %v2685_v38 = vpack.c.bf16 %v1320_v33, %v1318_v25 }
 0x108   :  { %2804 = vst [vmem:[%s3500_s2 + $0x1a8] sm:$0xff] %v2570_v34  }
 0x109   :  { %2136 = vmatmul.msk.bf16.gmra.mxu0 %vm658_vm0, %v2226_v31  ;;  %2159 = vmatmul.msk.bf16.gmra.mxu1 %vm658_vm0, %v2249_v32  ;;  %2827 = vst [vmem:[%s3500_s2 + $0x260] sm:$0xff] %v2685_v38   ;;  %v2230_v31 = vld [vmem:[%s3499_s0 + $0xa0] sm:$0xff]  ;;  %v2253_v32 = vld [vmem:[%s3499_s0 + $0x158] sm:$0xff] }
 0x10a   :  { %2182 = vmatmul.msk.bf16.gmra.mxu2 %vm658_vm0, %v2272_v37  ;;  %2205 = vmatmul.msk.bf16.gmra.mxu3 %vm658_vm0, %v2295_v39  ;;  %v2276_v37 = vld [vmem:[%s3499_s0 + $0x210] sm:$0xff]  ;;  %v2299_v39 = vld [vmem:[%s3499_s0 + $0x2c8] sm:$0xff] }
 0x10d   :  { %v1208_v40 = vpop.f32.mrf.mxu2  ;;  %v1323_v41 = vpop.f32.mrf.mxu3 }
 0x10e   :  { %v980_v42 = vpop.f32.mrf.mxu0  ;;  %v1095_v43 = vpop.f32.mrf.mxu1 }
 0x10f   :  { %v2345_v44 = vpack.c.bf16 %v980_v42, %v978_v35  ;;  %v2460_v45 = vpack.c.bf16 %v1095_v43, %v1093_v36 }
 0x111   :  { %2759 = vst [vmem:[%s3500_s2 + $0x40] sm:$0xff] %v2345_v44  }
 0x112   :  { %2782 = vst [vmem:[%s3500_s2 + $0xf8] sm:$0xff] %v2460_v45  }
 0x115   :  { %v1210_v46 = vpop.f32.mrf.mxu2  ;;  %v1325_v49 = vpop.f32.mrf.mxu3 }
 0x116   :  { %v2575_v50 = vpack.c.bf16 %v1210_v46, %v1208_v40  ;;  %v983_v51 = vpop.f32.mrf.mxu0  ;;  %v1098_v52 = vpop.f32.mrf.mxu1  ;;  %v2690_v54 = vpack.c.bf16 %v1325_v49, %v1323_v41 }
 0x118   :  { %2805 = vst [vmem:[%s3500_s2 + $0x1b0] sm:$0xff] %v2575_v50  }
 0x119   :  { %2137 = vmatmul.msk.bf16.gmra.mxu0 %vm658_vm0, %v2227_v47  ;;  %2160 = vmatmul.msk.bf16.gmra.mxu1 %vm658_vm0, %v2250_v48  ;;  %2828 = vst [vmem:[%s3500_s2 + $0x268] sm:$0xff] %v2690_v54   ;;  %v2231_v47 = vld [vmem:[%s3499_s0 + $0xa8] sm:$0xff]  ;;  %v2254_v48 = vld [vmem:[%s3499_s0 + $0x160] sm:$0xff] }
 0x11a   :  { %2183 = vmatmul.msk.bf16.gmra.mxu2 %vm658_vm0, %v2273_v53  ;;  %2206 = vmatmul.msk.bf16.gmra.mxu3 %vm658_vm0, %v2296_v55  ;;  %v2277_v53 = vld [vmem:[%s3499_s0 + $0x218] sm:$0xff] }
 0x11d   :  { %v1213_v56 = vpop.f32.mrf.mxu2  ;;  %v1328_v57 = vpop.f32.mrf.mxu3 }
 0x11e   :  { %v985_v58 = vpop.f32.mrf.mxu0  ;;  %v1100_v59 = vpop.f32.mrf.mxu1 }
 0x11f   :  { %v2350_v60 = vpack.c.bf16 %v985_v58, %v983_v51  ;;  %v2465_v61 = vpack.c.bf16 %v1100_v59, %v1098_v52 }
 0x121   :  { %2760 = vst [vmem:[%s3500_s2 + $0x48] sm:$0xff] %v2350_v60  }
 0x122   :  { %2783 = vst [vmem:[%s3500_s2 + $0x100] sm:$0xff] %v2465_v61  }
 0x125   :  { %v1215_v62 = vpop.f32.mrf.mxu2  ;;  %v1330_v1 = vpop.f32.mrf.mxu3 }
 0x126   :  { %v2580_v2 = vpack.c.bf16 %v1215_v62, %v1213_v56  ;;  %v988_v3 = vpop.f32.mrf.mxu0  ;;  %v1103_v4 = vpop.f32.mrf.mxu1  ;;  %v2695_v6 = vpack.c.bf16 %v1330_v1, %v1328_v57  ;;  %v2232_v62 = vld [vmem:[%s3499_s0 + $0xb0] sm:$0xff] }
 0x128   :  { %2806 = vst [vmem:[%s3500_s2 + $0x1b8] sm:$0xff] %v2580_v2  }
 0x129   :  { %2138 = vmatmul.msk.bf16.gmra.mxu0 %vm658_vm0, %v2228_v63  ;;  %2161 = vmatmul.msk.bf16.gmra.mxu1 %vm658_vm0, %v2251_v0  ;;  %2829 = vst [vmem:[%s3500_s2 + $0x270] sm:$0xff] %v2695_v6   ;;  %v2255_v63 = vld [vmem:[%s3499_s0 + $0x168] sm:$0xff] }
 0x12a   :  { %2184 = vmatmul.msk.bf16.gmra.mxu2 %vm658_vm0, %v2274_v5  ;;  %2207 = vmatmul.msk.bf16.gmra.mxu3 %vm658_vm0, %v2297_v7 }
 0x12d   :  { %v1218_v8 = vpop.f32.mrf.mxu2  ;;  %v1333_v9 = vpop.f32.mrf.mxu3 }
 0x12e   :  { %v990_v10 = vpop.f32.mrf.mxu0  ;;  %v1105_v11 = vpop.f32.mrf.mxu1 }
 0x12f   :  { %v2355_v12 = vpack.c.bf16 %v990_v10, %v988_v3  ;;  %v2470_v13 = vpack.c.bf16 %v1105_v11, %v1103_v4  ;;  %v2278_v4 = vld [vmem:[%s3499_s0 + $0x220] sm:$0xff] }
 0x131   :  { %2761 = vst [vmem:[%s3500_s2 + $0x50] sm:$0xff] %v2355_v12  }
 0x132   :  { %2784 = vst [vmem:[%s3500_s2 + $0x108] sm:$0xff] %v2470_v13  }
 0x135   :  { %v1220_v14 = vpop.f32.mrf.mxu2  ;;  %v1335_v17 = vpop.f32.mrf.mxu3 }
 0x136   :  { %v2585_v18 = vpack.c.bf16 %v1220_v14, %v1218_v8  ;;  %v993_v19 = vpop.f32.mrf.mxu0  ;;  %v1108_v20 = vpop.f32.mrf.mxu1  ;;  %v2700_v22 = vpack.c.bf16 %v1335_v17, %v1333_v9 }
 0x138   :  { %2807 = vst [vmem:[%s3500_s2 + $0x1c0] sm:$0xff] %v2585_v18  }
 0x139   :  { %2139 = vmatmul.msk.bf16.gmra.mxu0 %vm658_vm0, %v2229_v15  ;;  %2162 = vmatmul.msk.bf16.gmra.mxu1 %vm658_vm0, %v2252_v16  ;;  %2830 = vst [vmem:[%s3500_s2 + $0x278] sm:$0xff] %v2700_v22  }
 0x13a   :  { %2185 = vmatmul.msk.bf16.gmra.mxu2 %vm658_vm0, %v2275_v21  ;;  %2208 = vmatmul.msk.bf16.gmra.mxu3 %vm658_vm0, %v2298_v23 }
 0x13d   :  { %v1223_v24 = vpop.f32.mrf.mxu2  ;;  %v1338_v25 = vpop.f32.mrf.mxu3 }
 0x13e   :  { %v995_v26 = vpop.f32.mrf.mxu0  ;;  %v1110_v27 = vpop.f32.mrf.mxu1 }
 0x13f   :  { %v2360_v28 = vpack.c.bf16 %v995_v26, %v993_v19  ;;  %v2475_v29 = vpack.c.bf16 %v1110_v27, %v1108_v20 }
 0x141   :  { %2762 = vst [vmem:[%s3500_s2 + $0x58] sm:$0xff] %v2360_v28  }
 0x142   :  { %2785 = vst [vmem:[%s3500_s2 + $0x110] sm:$0xff] %v2475_v29  }
 0x145   :  { %v1225_v30 = vpop.f32.mrf.mxu2  ;;  %v1340_v33 = vpop.f32.mrf.mxu3 }
 0x146   :  { %v2590_v34 = vpack.c.bf16 %v1225_v30, %v1223_v24  ;;  %v998_v35 = vpop.f32.mrf.mxu0  ;;  %v1113_v36 = vpop.f32.mrf.mxu1  ;;  %v2705_v38 = vpack.c.bf16 %v1340_v33, %v1338_v25 }
 0x148   :  { %2808 = vst [vmem:[%s3500_s2 + $0x1c8] sm:$0xff] %v2590_v34  }
 0x149   :  { %2140 = vmatmul.msk.bf16.gmra.mxu0 %vm658_vm0, %v2230_v31  ;;  %2163 = vmatmul.msk.bf16.gmra.mxu1 %vm658_vm0, %v2253_v32  ;;  %2831 = vst [vmem:[%s3500_s2 + $0x280] sm:$0xff] %v2705_v38  }
 0x14a   :  { %2186 = vmatmul.msk.bf16.gmra.mxu2 %vm658_vm0, %v2276_v37  ;;  %2209 = vmatmul.msk.bf16.gmra.mxu3 %vm658_vm0, %v2299_v39 }
 0x14d   :  { %v1228_v40 = vpop.f32.mrf.mxu2  ;;  %v1343_v41 = vpop.f32.mrf.mxu3 }
 0x14e   :  { %v1000_v42 = vpop.f32.mrf.mxu0  ;;  %v1115_v43 = vpop.f32.mrf.mxu1 }
 0x14f   :  { %v2365_v44 = vpack.c.bf16 %v1000_v42, %v998_v35  ;;  %v2480_v45 = vpack.c.bf16 %v1115_v43, %v1113_v36 }
 0x151   :  { %2763 = vst [vmem:[%s3500_s2 + $0x60] sm:$0xff] %v2365_v44  }
 0x152   :  { %2786 = vst [vmem:[%s3500_s2 + $0x118] sm:$0xff] %v2480_v45  }
 0x155   :  { %v1230_v46 = vpop.f32.mrf.mxu2  ;;  %v1345_v49 = vpop.f32.mrf.mxu3 }
 0x156   :  { %v2595_v50 = vpack.c.bf16 %v1230_v46, %v1228_v40  ;;  %v1003_v51 = vpop.f32.mrf.mxu0  ;;  %v1118_v52 = vpop.f32.mrf.mxu1  ;;  %v2710_v54 = vpack.c.bf16 %v1345_v49, %v1343_v41 }
 0x158   :  { %2809 = vst [vmem:[%s3500_s2 + $0x1d0] sm:$0xff] %v2595_v50  }
 0x159   :  { %2141 = vmatmul.msk.bf16.gmra.mxu0 %vm658_vm0, %v2231_v47  ;;  %2164 = vmatmul.msk.bf16.gmra.mxu1 %vm658_vm0, %v2254_v48  ;;  %2832 = vst [vmem:[%s3500_s2 + $0x288] sm:$0xff] %v2710_v54  }
 0x15a   :  { %2187 = vmatmul.msk.bf16.gmra.mxu2 %vm658_vm0, %v2277_v53 }
 0x15d   :  { %v1233_v55 = vpop.f32.mrf.mxu2  ;;  %v1348_v56 = vpop.f32.mrf.mxu3 }
 0x15e   :  { %v1005_v57 = vpop.f32.mrf.mxu0  ;;  %v1120_v58 = vpop.f32.mrf.mxu1 }
 0x15f   :  { %v2370_v59 = vpack.c.bf16 %v1005_v57, %v1003_v51  ;;  %v2485_v60 = vpack.c.bf16 %v1120_v58, %v1118_v52 }
 0x161   :  { %2764 = vst [vmem:[%s3500_s2 + $0x68] sm:$0xff] %v2370_v59  }
 0x162   :  { %2787 = vst [vmem:[%s3500_s2 + $0x120] sm:$0xff] %v2485_v60  }
 0x165   :  { %v1235_v61 = vpop.f32.mrf.mxu2  ;;  %v1350_v0 = vpop.f32.mrf.mxu3 }
 0x166   :  { %v2600_v1 = vpack.c.bf16 %v1235_v61, %v1233_v55  ;;  %v1008_v2 = vpop.f32.mrf.mxu0  ;;  %v1123_v3 = vpop.f32.mrf.mxu1  ;;  %v2715_v5 = vpack.c.bf16 %v1350_v0, %v1348_v56 }
 0x168   :  { %2810 = vst [vmem:[%s3500_s2 + $0x1d8] sm:$0xff] %v2600_v1  }
 0x169   :  { %2142 = vmatmul.msk.bf16.gmra.mxu0 %vm658_vm0, %v2232_v62  ;;  %2165 = vmatmul.msk.bf16.gmra.mxu1 %vm658_vm0, %v2255_v63  ;;  %2833 = vst [vmem:[%s3500_s2 + $0x290] sm:$0xff] %v2715_v5  }
 0x16a   :  { %2188 = vmatmul.msk.bf16.gmra.mxu2 %vm658_vm0, %v2278_v4 }
 0x16d   :  { %v1238_v6 = vpop.f32.mrf.mxu2  ;;  %v1353_v7 = vpop.f32.mrf.mxu3 }
 0x16e   :  { %v1010_v8 = vpop.f32.mrf.mxu0  ;;  %v1125_v9 = vpop.f32.mrf.mxu1 }
 0x16f   :  { %v2375_v10 = vpack.c.bf16 %v1010_v8, %v1008_v2  ;;  %v2490_v11 = vpack.c.bf16 %v1125_v9, %v1123_v3 }
 0x171   :  { %2765 = vst [vmem:[%s3500_s2 + $0x70] sm:$0xff] %v2375_v10  }
 0x172   :  { %2788 = vst [vmem:[%s3500_s2 + $0x128] sm:$0xff] %v2490_v11  }
 0x175   :  { %v1240_v12 = vpop.f32.mrf.mxu2  ;;  %v1355_v13 = vpop.f32.mrf.mxu3 }
 0x176   :  { %v2605_v14 = vpack.c.bf16 %v1240_v12, %v1238_v6  ;;  %v1013_v15 = vpop.f32.mrf.mxu0  ;;  %v1128_v16 = vpop.f32.mrf.mxu1  ;;  %v2720_v17 = vpack.c.bf16 %v1355_v13, %v1353_v7 }
 0x178   :  { %2811 = vst [vmem:[%s3500_s2 + $0x1e0] sm:$0xff] %v2605_v14  }
 0x179   :  { %2834 = vst [vmem:[%s3500_s2 + $0x298] sm:$0xff] %v2720_v17  }
 0x17d   :  { %v1243_v18 = vpop.f32.mrf.mxu2  ;;  %v1358_v19 = vpop.f32.mrf.mxu3 }
 0x17e   :  { %v1015_v20 = vpop.f32.mrf.mxu0  ;;  %v1130_v21 = vpop.f32.mrf.mxu1 }
 0x17f   :  { %v2380_v22 = vpack.c.bf16 %v1015_v20, %v1013_v15  ;;  %v2495_v23 = vpack.c.bf16 %v1130_v21, %v1128_v16 }
 0x181   :  { %2766 = vst [vmem:[%s3500_s2 + $0x78] sm:$0xff] %v2380_v22  }
 0x182   :  { %2789 = vst [vmem:[%s3500_s2 + $0x130] sm:$0xff] %v2495_v23  }
 0x185   :  { %v1245_v24 = vpop.f32.mrf.mxu2  ;;  %v1360_v25 = vpop.f32.mrf.mxu3 }
 0x186   :  { %v2610_v26 = vpack.c.bf16 %v1245_v24, %v1243_v18  ;;  %v1018_v27 = vpop.f32.mrf.mxu0  ;;  %v1133_v28 = vpop.f32.mrf.mxu1  ;;  %v2725_v29 = vpack.c.bf16 %v1360_v25, %v1358_v19 }
 0x188   :  { %2812 = vst [vmem:[%s3500_s2 + $0x1e8] sm:$0xff] %v2610_v26  }
 0x189   :  { %2835 = vst [vmem:[%s3500_s2 + $0x2a0] sm:$0xff] %v2725_v29  }
 0x18d   :  { %v1248_v30 = vpop.f32.mrf.mxu2  ;;  %v1363_v31 = vpop.f32.mrf.mxu3 }
 0x18e   :  { %v1020_v32 = vpop.f32.mrf.mxu0  ;;  %v1135_v33 = vpop.f32.mrf.mxu1 }
 0x18f   :  { %v2385_v34 = vpack.c.bf16 %v1020_v32, %v1018_v27  ;;  %v2500_v35 = vpack.c.bf16 %v1135_v33, %v1133_v28 }
 0x191   :  { %2767 = vst [vmem:[%s3500_s2 + $0x80] sm:$0xff] %v2385_v34  }
 0x192   :  { %2790 = vst [vmem:[%s3500_s2 + $0x138] sm:$0xff] %v2500_v35  }
 0x195   :  { %v1250_v36 = vpop.f32.mrf.mxu2  ;;  %v1365_v37 = vpop.f32.mrf.mxu3 }
 0x196   :  { %v2615_v38 = vpack.c.bf16 %v1250_v36, %v1248_v30  ;;  %v1023_v39 = vpop.f32.mrf.mxu0  ;;  %v1138_v40 = vpop.f32.mrf.mxu1  ;;  %v2730_v41 = vpack.c.bf16 %v1365_v37, %v1363_v31 }
 0x198   :  { %2813 = vst [vmem:[%s3500_s2 + $0x1f0] sm:$0xff] %v2615_v38  }
 0x199   :  { %2836 = vst [vmem:[%s3500_s2 + $0x2a8] sm:$0xff] %v2730_v41  }
 0x19d   :  { %v1253_v42 = vpop.f32.mrf.mxu2  ;;  %v1368_v43 = vpop.f32.mrf.mxu3 }
 0x19e   :  { %v1025_v44 = vpop.f32.mrf.mxu0  ;;  %v1140_v45 = vpop.f32.mrf.mxu1 }
 0x19f   :  { %v2390_v46 = vpack.c.bf16 %v1025_v44, %v1023_v39  ;;  %v2505_v47 = vpack.c.bf16 %v1140_v45, %v1138_v40 }
 0x1a1   :  { %2768 = vst [vmem:[%s3500_s2 + $0x88] sm:$0xff] %v2390_v46  }
 0x1a2   :  { %2791 = vst [vmem:[%s3500_s2 + $0x140] sm:$0xff] %v2505_v47  }
 0x1a5   :  { %v1255_v48 = vpop.f32.mrf.mxu2  ;;  %v1370_v49 = vpop.f32.mrf.mxu3 }
 0x1a6   :  { %v2620_v50 = vpack.c.bf16 %v1255_v48, %v1253_v42  ;;  %v1028_v51 = vpop.f32.mrf.mxu0  ;;  %v1143_v52 = vpop.f32.mrf.mxu1  ;;  %v2735_v53 = vpack.c.bf16 %v1370_v49, %v1368_v43 }
 0x1a8   :  { %2814 = vst [vmem:[%s3500_s2 + $0x1f8] sm:$0xff] %v2620_v50  }
 0x1a9   :  { %2837 = vst [vmem:[%s3500_s2 + $0x2b0] sm:$0xff] %v2735_v53  }
 0x1ad   :  { %v1258_v54 = vpop.f32.mrf.mxu2  ;;  %v1373_v55 = vpop.f32.mrf.mxu3 }
 0x1ae   :  { %v1030_v56 = vpop.f32.mrf.mxu0  ;;  %v1145_v57 = vpop.f32.mrf.mxu1 }
 0x1af   :  { %v2395_v58 = vpack.c.bf16 %v1030_v56, %v1028_v51  ;;  %v2510_v59 = vpack.c.bf16 %v1145_v57, %v1143_v52 }
 0x1b1   :  { %2769 = vst [vmem:[%s3500_s2 + $0x90] sm:$0xff] %v2395_v58  }
 0x1b2   :  { %2792 = vst [vmem:[%s3500_s2 + $0x148] sm:$0xff] %v2510_v59  }
 0x1b5   :  { %v1260_v60 = vpop.f32.mrf.mxu2  ;;  %v1375_v61 = vpop.f32.mrf.mxu3 }
 0x1b6   :  { %v2625_v62 = vpack.c.bf16 %v1260_v60, %v1258_v54  ;;  %v1033_v63 = vpop.f32.mrf.mxu0  ;;  %v1148_v0 = vpop.f32.mrf.mxu1  ;;  %v2740_v1 = vpack.c.bf16 %v1375_v61, %v1373_v55 }
 0x1b8   :  { %2815 = vst [vmem:[%s3500_s2 + $0x200] sm:$0xff] %v2625_v62  }
 0x1b9   :  { %2838 = vst [vmem:[%s3500_s2 + $0x2b8] sm:$0xff] %v2740_v1  }
 0x1bd   :  { %v1263_v2 = vpop.f32.mrf.mxu2  ;;  %v1378_v3 = vpop.f32.mrf.mxu3 }
 0x1be   :  { %v1035_v4 = vpop.f32.mrf.mxu0  ;;  %v1150_v5 = vpop.f32.mrf.mxu1 }
 0x1bf   :  { %v2400_v6 = vpack.c.bf16 %v1035_v4, %v1033_v63  ;;  %v2515_v7 = vpack.c.bf16 %v1150_v5, %v1148_v0 }
 0x1c1   :  { %2770 = vst [vmem:[%s3500_s2 + $0x98] sm:$0xff] %v2400_v6  }
 0x1c2   :  { %2793 = vst [vmem:[%s3500_s2 + $0x150] sm:$0xff] %v2515_v7  }
 0x1c5   :  { %v1265_v8 = vpop.f32.mrf.mxu2  ;;  %v1380_v9 = vpop.f32.mrf.mxu3 }
 0x1c6   :  { %v2630_v10 = vpack.c.bf16 %v1265_v8, %v1263_v2  ;;  %v1038_v11 = vpop.f32.mrf.mxu0  ;;  %v1153_v12 = vpop.f32.mrf.mxu1  ;;  %v2745_v13 = vpack.c.bf16 %v1380_v9, %v1378_v3 }
 0x1c8   :  { %2816 = vst [vmem:[%s3500_s2 + $0x208] sm:$0xff] %v2630_v10  }
 0x1c9   :  { %2839 = vst [vmem:[%s3500_s2 + $0x2c0] sm:$0xff] %v2745_v13  }
 0x1cd   :  { %v1268_v14 = vpop.f32.mrf.mxu2  ;;  %v1383_v15 = vpop.f32.mrf.mxu3 }
 0x1ce   :  { %v1040_v16 = vpop.f32.mrf.mxu0  ;;  %v1155_v17 = vpop.f32.mrf.mxu1 }
 0x1cf   :  { %v2405_v18 = vpack.c.bf16 %v1040_v16, %v1038_v11  ;;  %v2520_v19 = vpack.c.bf16 %v1155_v17, %v1153_v12 }
 0x1d1   :  { %2771 = vst [vmem:[%s3500_s2 + $0xa0] sm:$0xff] %v2405_v18  }
 0x1d2   :  { %2794 = vst [vmem:[%s3500_s2 + $0x158] sm:$0xff] %v2520_v19  }
 0x1d5   :  { %v1270_v20 = vpop.f32.mrf.mxu2  ;;  %v1385_v21 = vpop.f32.mrf.mxu3 }
 0x1d6   :  { %v2635_v22 = vpack.c.bf16 %v1270_v20, %v1268_v14  ;;  %v1043_v23 = vpop.f32.mrf.mxu0  ;;  %v1158_v24 = vpop.f32.mrf.mxu1  ;;  %v2750_v25 = vpack.c.bf16 %v1385_v21, %v1383_v15 }
 0x1d8   :  { %2817 = vst [vmem:[%s3500_s2 + $0x210] sm:$0xff] %v2635_v22  }
 0x1d9   :  { %2840 = vst [vmem:[%s3500_s2 + $0x2c8] sm:$0xff] %v2750_v25  }
 0x1dd   :  { %v1273_v26 = vpop.f32.mrf.mxu2 }
 0x1de   :  { %v1045_v27 = vpop.f32.mrf.mxu0  ;;  %v1160_v28 = vpop.f32.mrf.mxu1 }
 0x1df   :  { %v2410_v29 = vpack.c.bf16 %v1045_v27, %v1043_v23  ;;  %v2525_v30 = vpack.c.bf16 %v1160_v28, %v1158_v24 }
 0x1e1   :  { %2772 = vst [vmem:[%s3500_s2 + $0xa8] sm:$0xff] %v2410_v29  }
 0x1e2   :  { %2795 = vst [vmem:[%s3500_s2 + $0x160] sm:$0xff] %v2525_v30  }
 0x1e5   :  { %v1275_v31 = vpop.f32.mrf.mxu2 }
 0x1e6   :  { %v2640_v32 = vpack.c.bf16 %v1275_v31, %v1273_v26  ;;  %v1048_v33 = vpop.f32.mrf.mxu0  ;;  %v1163_v34 = vpop.f32.mrf.mxu1 }
 0x1e8   :  { %2818 = vst [vmem:[%s3500_s2 + $0x218] sm:$0xff] %v2640_v32  }
 0x1ed   :  { %v1278_v35 = vpop.f32.mrf.mxu2 }
 0x1ee   :  { %v1050_v36 = vpop.f32.mrf.mxu0  ;;  %v1165_v37 = vpop.f32.mrf.mxu1 }
 0x1ef   :  { %v2415_v38 = vpack.c.bf16 %v1050_v36, %v1048_v33  ;;  %v2530_v39 = vpack.c.bf16 %v1165_v37, %v1163_v34 }
 0x1f1   :  { %2773 = vst [vmem:[%s3500_s2 + $0xb0] sm:$0xff] %v2415_v38  }
 0x1f2   :  { %2796 = vst [vmem:[%s3500_s2 + $0x168] sm:$0xff] %v2530_v39  }
 0x1f5   :  { %v1280_v40 = vpop.f32.mrf.mxu2 }
 0x1f6   :  { %v2645_v41 = vpack.c.bf16 %v1280_v40, %v1278_v35 }
 0x1f8   :  { %2819 = vst [vmem:[%s3500_s2 + $0x220] sm:$0xff] %v2645_v41  }

// kernel: text_vae_forward.19
= control target key start
LH: loop header
LB: loop body
LE: loop exit
PB: predicated region body
PF: predicated region fallthrough
CT: control target
= control target key end

     0   :  { %s2209_s0 = inlined_call_operand.vmem [shape: bf16[32,768], index: 0, kind: input, shape index: {}]   ;;  %s2210_s1 = inlined_call_operand.vmem [shape: bf16[768,256], index: 1, kind: input, shape index: {}]   ;;  %s2211_s2 = inlined_call_operand.vmem [shape: f32[1,256], index: 2, kind: input, shape index: {}]   ;;  %s2212_s3 = inlined_call_operand.hbm [shape: f32[32,256], index: 3, kind: output, shape index: {}]  }
   0x1   :  { %v1029_v0 = vld [vmem:[%s2210_s1 + $0x70] sm:$0xf]  ;;  %v1382_v1 = vld [vmem:[%s2210_s1 + $0x74] sm:$0xf0]  ;;  %v1021_v11 = vld [vmem:[%s2210_s1 + $0x60] sm:$0xf] }
   0x2   :  { %v1093_v2 = vld [vmem:[%s2210_s1 + $0xf0] sm:$0xf]  ;;  %v1030_v3 = vor.u32 %v1382_v1, %v1029_v0  ;;  %v1398_v4 = vld [vmem:[%s2210_s1 + $0xf4] sm:$0xf0]  ;;  %v1380_v13 = vld [vmem:[%s2210_s1 + $0x64] sm:$0xf0] }
   0x3   :  { %v1157_v5 = vld [vmem:[%s2210_s1 + $0x170] sm:$0xf]  ;;  %v1414_v6 = vld [vmem:[%s2210_s1 + $0x174] sm:$0xf0]  ;;  %v1094_v7 = vor.u32 %v1398_v4, %v1093_v2  ;;  %v1085_v14 = vld [vmem:[%s2210_s1 + $0xe0] sm:$0xf]  ;;  %v1022_v16 = vor.u32 %v1380_v13, %v1021_v11 }
   0x4   :  { %v1158_v8 = vor.u32 %v1414_v6, %v1157_v5  ;;  %v1221_v9 = vld [vmem:[%s2210_s1 + $0x1f0] sm:$0xf]  ;;  %v1430_v10 = vld [vmem:[%s2210_s1 + $0x1f4] sm:$0xf0]  ;;  %669 = vmatpush.bf16.msra.mxu0 %v1030_v3  ;;  %v1396_v15 = vld [vmem:[%s2210_s1 + $0xe4] sm:$0xf0] }
   0x5   :  { %v1222_v12 = vor.u32 %v1430_v10, %v1221_v9  ;;  %688 = vmatpush.bf16.msra.mxu1 %v1094_v7  ;;  %v1086_v17 = vor.u32 %v1396_v15, %v1085_v14  ;;  %v1149_v18 = vld [vmem:[%s2210_s1 + $0x160] sm:$0xf]  ;;  %v1412_v19 = vld [vmem:[%s2210_s1 + $0x164] sm:$0xf0]  ;;  %v1013_v23 = vld [vmem:[%s2210_s1 + $0x50] sm:$0xf] }
   0x6   :  { %707 = vmatpush.bf16.msra.mxu2 %v1158_v8  ;;  %v1213_v20 = vld [vmem:[%s2210_s1 + $0x1e0] sm:$0xf]  ;;  %v1150_v21 = vor.u32 %v1412_v19, %v1149_v18  ;;  %v1428_v22 = vld [vmem:[%s2210_s1 + $0x1e4] sm:$0xf0]  ;;  %v1378_v24 = vld [vmem:[%s2210_s1 + $0x54] sm:$0xf0] }
   0x7   :  { %726 = vmatpush.bf16.msra.mxu3 %v1222_v12  ;;  %v1214_v25 = vor.u32 %v1428_v22, %v1213_v20  ;;  %v1077_v26 = vld [vmem:[%s2210_s1 + $0xd0] sm:$0xf]  ;;  %v1394_v27 = vld [vmem:[%s2210_s1 + $0xd4] sm:$0xf0]  ;;  %v1014_v29 = vor.u32 %v1378_v24, %v1013_v23  ;;  %v1005_v35 = vld [vmem:[%s2210_s1 + $0x40] sm:$0xf] }
   0x8   :  { %v1141_v28 = vld [vmem:[%s2210_s1 + $0x150] sm:$0xf]  ;;  %670 = vmatpush.bf16.msra.mxu0 %v1022_v16  ;;  %v1410_v30 = vld [vmem:[%s2210_s1 + $0x154] sm:$0xf0]  ;;  %v1078_v33 = vor.u32 %v1394_v27, %v1077_v26  ;;  %v1376_v36 = vld [vmem:[%s2210_s1 + $0x44] sm:$0xf0] }
   0x9   :  { %v1205_v31 = vld [vmem:[%s2210_s1 + $0x1d0] sm:$0xf]  ;;  %v1426_v32 = vld [vmem:[%s2210_s1 + $0x1d4] sm:$0xf0]  ;;  %689 = vmatpush.bf16.msra.mxu1 %v1086_v17  ;;  %v1142_v34 = vor.u32 %v1410_v30, %v1141_v28  ;;  %v1069_v37 = vld [vmem:[%s2210_s1 + $0xc0] sm:$0xf]  ;;  %v1006_v44 = vor.u32 %v1376_v36, %v1005_v35 }
   0xa   :  { %708 = vmatpush.bf16.msra.mxu2 %v1150_v21  ;;  %v1206_v38 = vor.u32 %v1426_v32, %v1205_v31  ;;  %v1392_v39 = vld [vmem:[%s2210_s1 + $0xc4] sm:$0xf0]  ;;  %v1133_v40 = vld [vmem:[%s2210_s1 + $0x140] sm:$0xf]  ;;  %v997_v47 = vld [vmem:[%s2210_s1 + $0x30] sm:$0xf] }
   0xb   :  { %727 = vmatpush.bf16.msra.mxu3 %v1214_v25  ;;  %v1408_v41 = vld [vmem:[%s2210_s1 + $0x144] sm:$0xf0]  ;;  %v1197_v42 = vld [vmem:[%s2210_s1 + $0x1c0] sm:$0xf]  ;;  %v1070_v45 = vor.u32 %v1392_v39, %v1069_v37  ;;  %v1374_v48 = vld [vmem:[%s2210_s1 + $0x34] sm:$0xf0] }
   0xc   :  { %v1424_v43 = vld [vmem:[%s2210_s1 + $0x1c4] sm:$0xf0]  ;;  %671 = vmatpush.bf16.msra.mxu0 %v1014_v29  ;;  %v1134_v46 = vor.u32 %v1408_v41, %v1133_v40  ;;  %v1061_v49 = vld [vmem:[%s2210_s1 + $0xb0] sm:$0xf]  ;;  %v1390_v51 = vld [vmem:[%s2210_s1 + $0xb4] sm:$0xf0]  ;;  %v998_v56 = vor.u32 %v1374_v48, %v997_v47 }
   0xd   :  { %690 = vmatpush.bf16.msra.mxu1 %v1078_v33  ;;  %v1198_v50 = vor.u32 %v1424_v43, %v1197_v42  ;;  %v1125_v52 = vld [vmem:[%s2210_s1 + $0x130] sm:$0xf]  ;;  %v1406_v53 = vld [vmem:[%s2210_s1 + $0x134] sm:$0xf0]  ;;  %v1062_v57 = vor.u32 %v1390_v51, %v1061_v49  ;;  %v989_v59 = vld [vmem:[%s2210_s1 + $0x20] sm:$0xf] }
   0xe   :  { %709 = vmatpush.bf16.msra.mxu2 %v1142_v34  ;;  %v1189_v54 = vld [vmem:[%s2210_s1 + $0x1b0] sm:$0xf]  ;;  %v1422_v55 = vld [vmem:[%s2210_s1 + $0x1b4] sm:$0xf0]  ;;  %v1126_v58 = vor.u32 %v1406_v53, %v1125_v52  ;;  %v1372_v60 = vld [vmem:[%s2210_s1 + $0x24] sm:$0xf0] }
   0xf   :  { %728 = vmatpush.bf16.msra.mxu3 %v1206_v38  ;;  %v1053_v61 = vld [vmem:[%s2210_s1 + $0xa0] sm:$0xf]  ;;  %v1190_v62 = vor.u32 %v1422_v55, %v1189_v54  ;;  %v1388_v63 = vld [vmem:[%s2210_s1 + $0xa4] sm:$0xf0]  ;;  %v990_v4 = vor.u32 %v1372_v60, %v989_v59  ;;  %v981_v7 = vld [vmem:[%s2210_s1 + $0x10] sm:$0xf] }
  0x10   :  { %672 = vmatpush.bf16.msra.mxu0 %v1006_v44  ;;  %v1117_v0 = vld [vmem:[%s2210_s1 + $0x120] sm:$0xf]  ;;  %v1404_v1 = vld [vmem:[%s2210_s1 + $0x124] sm:$0xf0]  ;;  %v1054_v5 = vor.u32 %v1388_v63, %v1053_v61  ;;  %v1370_v8 = vld [vmem:[%s2210_s1 + $0x14] sm:$0xf0] }
  0x11   :  { %691 = vmatpush.bf16.msra.mxu1 %v1070_v45  ;;  %v1181_v2 = vld [vmem:[%s2210_s1 + $0x1a0] sm:$0xf]  ;;  %v1420_v3 = vld [vmem:[%s2210_s1 + $0x1a4] sm:$0xf0]  ;;  %v1118_v6 = vor.u32 %v1404_v1, %v1117_v0  ;;  %v1045_v9 = vld [vmem:[%s2210_s1 + $0x90] sm:$0xf]  ;;  %v982_v17 = vor.u32 %v1370_v8, %v981_v7 }
  0x12   :  { %710 = vmatpush.bf16.msra.mxu2 %v1134_v46  ;;  %v1182_v10 = vor.u32 %v1420_v3, %v1181_v2  ;;  %v1386_v11 = vld [vmem:[%s2210_s1 + $0x94] sm:$0xf0]  ;;  %v1109_v12 = vld [vmem:[%s2210_s1 + $0x110] sm:$0xf]  ;;  %v973_v16 = vld [vmem:[%s2210_s1] sm:$0xf] }
  0x13   :  { %729 = vmatpush.bf16.msra.mxu3 %v1198_v50  ;;  %v1402_v13 = vld [vmem:[%s2210_s1 + $0x114] sm:$0xf0]  ;;  %v1173_v14 = vld [vmem:[%s2210_s1 + $0x190] sm:$0xf]  ;;  %v1368_v18 = vld [vmem:[%s2210_s1 + $0x4] sm:$0xf0]  ;;  %v1046_v21 = vor.u32 %v1386_v11, %v1045_v9 }
  0x14   :  { %673 = vmatpush.bf16.msra.mxu0 %v998_v56  ;;  %v1418_v15 = vld [vmem:[%s2210_s1 + $0x194] sm:$0xf0]  ;;  %v1037_v19 = vld [vmem:[%s2210_s1 + $0x80] sm:$0xf]  ;;  %v1384_v20 = vld [vmem:[%s2210_s1 + $0x84] sm:$0xf0]  ;;  %v1110_v22 = vor.u32 %v1402_v13, %v1109_v12  ;;  %v974_v34 = vor.u32 %v1368_v18, %v973_v16 }
  0x15   :  { %692 = vmatpush.bf16.msra.mxu1 %v1062_v57  ;;  %v1101_v23 = vld [vmem:[%s2210_s1 + $0x100] sm:$0xf]  ;;  %v1400_v24 = vld [vmem:[%s2210_s1 + $0x104] sm:$0xf0]  ;;  %v1174_v26 = vor.u32 %v1418_v15, %v1173_v14  ;;  %v1358_v29 = vld [vmem:[%s2209_s0 + $0x14] sm:$0xf0]  ;;  %v1038_v38 = vor.u32 %v1384_v20, %v1037_v19 }
  0x16   :  { %711 = vmatpush.bf16.msra.mxu2 %v1126_v58  ;;  %v1165_v25 = vld [vmem:[%s2210_s1 + $0x180] sm:$0xf]  ;;  %v1416_v27 = vld [vmem:[%s2210_s1 + $0x184] sm:$0xf0]  ;;  %v1355_v30 = vld [vmem:[%s2209_s0 + $0x4] sm:$0xf]  ;;  %v1102_v39 = vor.u32 %v1400_v24, %v1101_v23 }
  0x17   :  { %730 = vmatpush.bf16.msra.mxu3 %v1190_v62  ;;  %v925_v28 = vld [vmem:[%s2209_s0] sm:$0xf]  ;;  %v927_v31 = vld [vmem:[%s2209_s0 + $0x18] sm:$0xf0]  ;;  %v1381_v32 = vld [vmem:[%s2210_s1 + $0x74] sm:$0xf]  ;;  %v1166_v43 = vor.u32 %v1416_v27, %v1165_v25 }
  0x18   :  { %674 = vmatpush.bf16.msra.mxu0 %v990_v4  ;;  %v1031_v33 = vld [vmem:[%s2210_s1 + $0x78] sm:$0xf0]  ;;  %v933_v35 = vld [vmem:[%s2209_s0 + $0x8] sm:$0xf]  ;;  %v1349_v36 = vld [vmem:[%s2210_s1 + $0x2f0] sm:$0xf]  ;;  %v1752_v48 = vor.u32 %v1358_v29, %v925_v28  ;;  %v1763_v53 = vor.u32 %v1355_v30, %v927_v31 }
  0x19   :  { %693 = vmatpush.bf16.msra.mxu1 %v1054_v5  ;;  %v1462_v37 = vld [vmem:[%s2210_s1 + $0x2f4] sm:$0xf0]  ;;  %v1359_v40 = vld [vmem:[%s2209_s0 + $0x1c] sm:$0xf0]  ;;  %v1356_v41 = vld [vmem:[%s2209_s0 + $0xc] sm:$0xf]  ;;  %v1034_v44 = vor.u32 %v1381_v32, %v1031_v33 }
  0x1a   :  { %712 = vmatpush.bf16.msra.mxu2 %v1118_v6  ;;  %v935_v42 = vld [vmem:[%s2209_s0 + $0x20] sm:$0xf0]  ;;  %v1285_v45 = vld [vmem:[%s2210_s1 + $0x270] sm:$0xf]  ;;  %v1446_v46 = vld [vmem:[%s2210_s1 + $0x274] sm:$0xf0]  ;;  %v1350_v49 = vor.u32 %v1462_v37, %v1349_v36  ;;  %v1765_v54 = vor.u32 %v1359_v40, %v933_v35 }
  0x1b   :  { %731 = vmatpush.bf16.msra.mxu3 %v1182_v10  ;;  %v1397_v47 = vld [vmem:[%s2210_s1 + $0xf4] sm:$0xf]  ;;  %v1095_v50 = vld [vmem:[%s2210_s1 + $0xf8] sm:$0xf0]  ;;  %v1379_v51 = vld [vmem:[%s2210_s1 + $0x64] sm:$0xf]  ;;  %v1773_v57 = vor.u32 %v1356_v41, %v935_v42  ;;  %v1286_v58 = vor.u32 %v1446_v46, %v1285_v45 }
  0x1c   :  { %675 = vmatpush.bf16.msra.mxu0 %v982_v17  ;;  %v1023_v52 = vld [vmem:[%s2210_s1 + $0x68] sm:$0xf0]  ;;  %v1341_v55 = vld [vmem:[%s2210_s1 + $0x2e0] sm:$0xf]  ;;  %v1460_v56 = vld [vmem:[%s2210_s1 + $0x2e4] sm:$0xf0]  ;;  %v1098_v59 = vor.u32 %v1397_v47, %v1095_v50 }
  0x1d   :  { %694 = vmatpush.bf16.msra.mxu1 %v1046_v21  ;;  %v1026_v60 = vor.u32 %v1379_v51, %v1023_v52  ;;  %v1277_v61 = vld [vmem:[%s2210_s1 + $0x260] sm:$0xf]  ;;  %v1444_v62 = vld [vmem:[%s2210_s1 + $0x264] sm:$0xf0]  ;;  %v1395_v63 = vld [vmem:[%s2210_s1 + $0xe4] sm:$0xf]  ;;  %v1342_v0 = vor.u32 %v1460_v56, %v1341_v55 }
  0x1e   :  { %713 = vmatpush.bf16.msra.mxu2 %v1110_v22  ;;  %v1087_v1 = vld [vmem:[%s2210_s1 + $0xe8] sm:$0xf0]  ;;  %v1377_v2 = vld [vmem:[%s2210_s1 + $0x54] sm:$0xf]  ;;  %v1015_v3 = vld [vmem:[%s2210_s1 + $0x58] sm:$0xf0]  ;;  %v1278_v6 = vor.u32 %v1444_v62, %v1277_v61 }
  0x1f   :  { %732 = vmatpush.bf16.msra.mxu3 %v1174_v26  ;;  %v1333_v4 = vld [vmem:[%s2210_s1 + $0x2d0] sm:$0xf]  ;;  %v1458_v5 = vld [vmem:[%s2210_s1 + $0x2d4] sm:$0xf0]  ;;  %v1090_v7 = vor.u32 %v1395_v63, %v1087_v1  ;;  %v1018_v8 = vor.u32 %v1377_v2, %v1015_v3  ;;  %v1393_v11 = vld [vmem:[%s2210_s1 + $0xd4] sm:$0xf] }
  0x20   :  { %676 = vmatpush.bf16.msra.mxu0 %v974_v34  ;;  %v1269_v9 = vld [vmem:[%s2210_s1 + $0x250] sm:$0xf]  ;;  %v1442_v10 = vld [vmem:[%s2210_s1 + $0x254] sm:$0xf0]  ;;  %v1334_v12 = vor.u32 %v1458_v5, %v1333_v4  ;;  %v1079_v13 = vld [vmem:[%s2210_s1 + $0xd8] sm:$0xf0] }
  0x21   :  { %695 = vmatpush.bf16.msra.mxu1 %v1038_v38  ;;  %v1375_v14 = vld [vmem:[%s2210_s1 + $0x44] sm:$0xf]  ;;  %v1007_v15 = vld [vmem:[%s2210_s1 + $0x48] sm:$0xf0]  ;;  %v1325_v16 = vld [vmem:[%s2210_s1 + $0x2c0] sm:$0xf]  ;;  %v1270_v18 = vor.u32 %v1442_v10, %v1269_v9  ;;  %v1082_v22 = vor.u32 %v1393_v11, %v1079_v13 }
  0x22   :  { %714 = vmatpush.bf16.msra.mxu2 %v1102_v39  ;;  %v1456_v17 = vld [vmem:[%s2210_s1 + $0x2c4] sm:$0xf0]  ;;  %v1261_v19 = vld [vmem:[%s2210_s1 + $0x240] sm:$0xf]  ;;  %v1391_v21 = vld [vmem:[%s2210_s1 + $0xc4] sm:$0xf]  ;;  %v1010_v23 = vor.u32 %v1375_v14, %v1007_v15 }
  0x23   :  { %733 = vmatpush.bf16.msra.mxu3 %v1166_v43  ;;  %677 = vmatmul.bf16.vlgmr.msra.gmra.mxu0 %v1752_v48  ;;  %v1440_v20 = vld [vmem:[%s2210_s1 + $0x244] sm:$0xf0]  ;;  %v1071_v24 = vld [vmem:[%s2210_s1 + $0xc8] sm:$0xf0]  ;;  %v949_v25 = vld [vmem:[%s2209_s0 + $0x30] sm:$0xf]  ;;  %v1326_v27 = vor.u32 %v1456_v17, %v1325_v16 }
  0x24   :  { %696 = vmatmul.bf16.vlgmr.msra.gmra.mxu1 %v1763_v53  ;;  %745 = vmatpush.bf16.msrb.mxu0 %v1286_v58  ;;  %v1364_v26 = vld [vmem:[%s2209_s0 + $0x44] sm:$0xf0]  ;;  %v1361_v28 = vld [vmem:[%s2209_s0 + $0x34] sm:$0xf]  ;;  %v951_v29 = vld [vmem:[%s2209_s0 + $0x48] sm:$0xf0]  ;;  %v1262_v35 = vor.u32 %v1440_v20, %v1261_v19  ;;  %v1074_v39 = vor.u32 %v1391_v21, %v1071_v24 }
  0x25   :  { %764 = vmatpush.bf16.msrb.mxu1 %v1350_v49  ;;  %715 = vmatmul.bf16.vlgmr.msra.gmra.mxu2 %v1765_v54  ;;  %v1373_v30 = vld [vmem:[%s2210_s1 + $0x34] sm:$0xf]  ;;  %v999_v31 = vld [vmem:[%s2210_s1 + $0x38] sm:$0xf0]  ;;  %v957_v32 = vld [vmem:[%s2209_s0 + $0x38] sm:$0xf]  ;;  %v1895_v50 = vor.u32 %v1361_v28, %v951_v29 }
  0x26   :  { %783 = vmatpush.bf16.msrb.mxu2 %v1034_v44  ;;  %734 = vmatmul.bf16.vlgmr.msra.gmra.mxu3 %v1773_v57  ;;  %v1317_v33 = vld [vmem:[%s2210_s1 + $0x2b0] sm:$0xf]  ;;  %v1454_v34 = vld [vmem:[%s2210_s1 + $0x2b4] sm:$0xf0]  ;;  %v1362_v37 = vld [vmem:[%s2209_s0 + $0x3c] sm:$0xf]  ;;  %v1002_v40 = vor.u32 %v1373_v30, %v999_v31  ;;  %v1884_v44 = vor.u32 %v1364_v26, %v949_v25 }
  0x27   :  { %802 = vmatpush.bf16.msrb.mxu3 %v1098_v59  ;;  %v1365_v36 = vld [vmem:[%s2209_s0 + $0x4c] sm:$0xf0]  ;;  %v959_v38 = vld [vmem:[%s2209_s0 + $0x50] sm:$0xf0]  ;;  %v1438_v42 = vld [vmem:[%s2210_s1 + $0x234] sm:$0xf0]  ;;  %v1318_v45 = vor.u32 %v1454_v34, %v1317_v33 }
  0x28   :  { %746 = vmatpush.bf16.msrb.mxu0 %v1278_v6  ;;  %v1253_v41 = vld [vmem:[%s2210_s1 + $0x230] sm:$0xf]  ;;  %v1389_v43 = vld [vmem:[%s2210_s1 + $0xb4] sm:$0xf]  ;;  %v1063_v46 = vld [vmem:[%s2210_s1 + $0xb8] sm:$0xf0]  ;;  %v1897_v51 = vor.u32 %v1365_v36, %v957_v32  ;;  %v1905_v56 = vor.u32 %v1362_v37, %v959_v38 }
  0x29   :  { %765 = vmatpush.bf16.msrb.mxu1 %v1342_v0  ;;  %v1371_v47 = vld [vmem:[%s2210_s1 + $0x24] sm:$0xf]  ;;  %v991_v49 = vld [vmem:[%s2210_s1 + $0x28] sm:$0xf0]  ;;  %v1309_v52 = vld [vmem:[%s2210_s1 + $0x2a0] sm:$0xf]  ;;  %v1254_v58 = vor.u32 %v1438_v42, %v1253_v41  ;;  %v1066_v59 = vor.u32 %v1389_v43, %v1063_v46 }
  0x2a   :  { %784 = vmatpush.bf16.msrb.mxu2 %v1026_v60  ;;  %v1452_v55 = vld [vmem:[%s2210_s1 + $0x2a4] sm:$0xf0]  ;;  %v994_v60 = vor.u32 %v1371_v47, %v991_v49  ;;  %v1245_v61 = vld [vmem:[%s2210_s1 + $0x220] sm:$0xf]  ;;  %v1387_v63 = vld [vmem:[%s2210_s1 + $0xa4] sm:$0xf] }
  0x2b   :  { %803 = vmatpush.bf16.msrb.mxu3 %v1090_v7  ;;  %v1436_v62 = vld [vmem:[%s2210_s1 + $0x224] sm:$0xf0]  ;;  %v1310_v0 = vor.u32 %v1452_v55, %v1309_v52  ;;  %v1055_v1 = vld [vmem:[%s2210_s1 + $0xa8] sm:$0xf0]  ;;  %v1369_v2 = vld [vmem:[%s2210_s1 + $0x14] sm:$0xf] }
  0x2c   :  { %747 = vmatpush.bf16.msrb.mxu0 %v1270_v18  ;;  %v983_v3 = vld [vmem:[%s2210_s1 + $0x18] sm:$0xf0]  ;;  %v1301_v4 = vld [vmem:[%s2210_s1 + $0x290] sm:$0xf]  ;;  %v1450_v5 = vld [vmem:[%s2210_s1 + $0x294] sm:$0xf0]  ;;  %v1246_v6 = vor.u32 %v1436_v62, %v1245_v61 }
  0x2d   :  { %766 = vmatpush.bf16.msrb.mxu1 %v1334_v12  ;;  %v1237_v7 = vld [vmem:[%s2210_s1 + $0x210] sm:$0xf]  ;;  %v986_v9 = vor.u32 %v1369_v2, %v983_v3  ;;  %v1434_v10 = vld [vmem:[%s2210_s1 + $0x214] sm:$0xf0]  ;;  %v1385_v11 = vld [vmem:[%s2210_s1 + $0x94] sm:$0xf]  ;;  %v1302_v13 = vor.u32 %v1450_v5, %v1301_v4 }
  0x2e   :  { %785 = vmatpush.bf16.msrb.mxu2 %v1018_v8  ;;  %v1058_v8 = vor.u32 %v1387_v63, %v1055_v1  ;;  %v1047_v12 = vld [vmem:[%s2210_s1 + $0x98] sm:$0xf0]  ;;  %v1367_v14 = vld [vmem:[%s2210_s1 + $0x4] sm:$0xf]  ;;  %v975_v15 = vld [vmem:[%s2210_s1 + $0x8] sm:$0xf0]  ;;  %v1238_v20 = vor.u32 %v1434_v10, %v1237_v7 }
  0x2f   :  { %804 = vmatpush.bf16.msrb.mxu3 %v1082_v22  ;;  %v1293_v16 = vld [vmem:[%s2210_s1 + $0x280] sm:$0xf]  ;;  %v1448_v17 = vld [vmem:[%s2210_s1 + $0x284] sm:$0xf0]  ;;  %v1445_v18 = vld [vmem:[%s2210_s1 + $0x274] sm:$0xf]  ;;  %v1050_v24 = vor.u32 %v1385_v11, %v1047_v12  ;;  %v978_v25 = vor.u32 %v1367_v14, %v975_v15 }
  0x30   :  { %748 = vmatpush.bf16.msrb.mxu0 %v1262_v35  ;;  %v1287_v19 = vld [vmem:[%s2210_s1 + $0x278] sm:$0xf0]  ;;  %v1229_v21 = vld [vmem:[%s2210_s1 + $0x200] sm:$0xf]  ;;  %v1429_v22 = vld [vmem:[%s2210_s1 + $0x1f4] sm:$0xf]  ;;  %v1294_v29 = vor.u32 %v1448_v17, %v1293_v16 }
  0x31   :  { %767 = vmatpush.bf16.msrb.mxu1 %v1326_v27  ;;  %v1432_v26 = vld [vmem:[%s2210_s1 + $0x204] sm:$0xf0]  ;;  %v1383_v27 = vld [vmem:[%s2210_s1 + $0x84] sm:$0xf]  ;;  %v1039_v28 = vld [vmem:[%s2210_s1 + $0x88] sm:$0xf0]  ;;  %v1290_v31 = vor.u32 %v1445_v18, %v1287_v19 }
  0x32   :  { %786 = vmatpush.bf16.msrb.mxu2 %v1010_v23  ;;  %v1223_v23 = vld [vmem:[%s2210_s1 + $0x1f8] sm:$0xf0]  ;;  %v941_v30 = vld [vmem:[%s2209_s0 + $0x10] sm:$0xf]  ;;  %v1413_v32 = vld [vmem:[%s2210_s1 + $0x174] sm:$0xf]  ;;  %v1042_v43 = vor.u32 %v1383_v27, %v1039_v28 }
  0x33   :  { %805 = vmatpush.bf16.msrb.mxu3 %v1074_v39  ;;  %682 = vmatmul.bf16.gmra.mxu0 %v1884_v44  ;;  %v1159_v33 = vld [vmem:[%s2210_s1 + $0x178] sm:$0xf0]  ;;  %v1461_v34 = vld [vmem:[%s2210_s1 + $0x2f4] sm:$0xf]  ;;  %v1226_v35 = vor.u32 %v1429_v22, %v1223_v23  ;;  %v1443_v37 = vld [vmem:[%s2210_s1 + $0x264] sm:$0xf]  ;;  %v1230_v39 = vor.u32 %v1432_v26, %v1229_v21 }
  0x34   :  { %701 = vmatmul.bf16.gmra.mxu1 %v1895_v50  ;;  %749 = vmatpush.bf16.msrb.mxu0 %v1254_v58  ;;  %v1351_v36 = vld [vmem:[%s2210_s1 + $0x2f8] sm:$0xf0]  ;;  %v1279_v38 = vld [vmem:[%s2210_s1 + $0x268] sm:$0xf0]  ;;  %v1357_v41 = vld [vmem:[%s2209_s0 + $0x14] sm:$0xf] }
  0x35   :  { %768 = vmatpush.bf16.msrb.mxu1 %v1318_v45  ;;  %720 = vmatmul.bf16.gmra.mxu2 %v1897_v51  ;;  %v943_v42 = vld [vmem:[%s2209_s0 + $0x28] sm:$0xf0]  ;;  %v1162_v45 = vor.u32 %v1413_v32, %v1159_v33  ;;  %v1411_v46 = vld [vmem:[%s2210_s1 + $0x164] sm:$0xf]  ;;  %v1354_v49 = vor.u32 %v1461_v34, %v1351_v36  ;;  %v1282_v52 = vor.u32 %v1443_v37, %v1279_v38  ;;  %v1441_v63 = vld [vmem:[%s2210_s1 + $0x254] sm:$0xf] }
  0x36   :  { %787 = vmatpush.bf16.msrb.mxu2 %v1002_v40  ;;  %739 = vmatmul.bf16.gmra.mxu3 %v1905_v56  ;;  %v1360_v40 = vld [vmem:[%s2209_s0 + $0x24] sm:$0xf0]  ;;  %v1151_v47 = vld [vmem:[%s2210_s1 + $0x168] sm:$0xf0]  ;;  %v1427_v55 = vld [vmem:[%s2210_s1 + $0x1e4] sm:$0xf]  ;;  %v2030_v61 = vor.u32 %v1357_v41, %v943_v42 }
  0x37   :  { %806 = vmatpush.bf16.msrb.mxu3 %v1066_v59  ;;  %v1215_v58 = vld [vmem:[%s2210_s1 + $0x1e8] sm:$0xf0]  ;;  %v1459_v59 = vld [vmem:[%s2210_s1 + $0x2e4] sm:$0xf]  ;;  %v1154_v1 = vor.u32 %v1411_v46, %v1151_v47  ;;  %v1409_v3 = vld [vmem:[%s2210_s1 + $0x154] sm:$0xf] }
  0x38   :  { %750 = vmatpush.bf16.msrb.mxu0 %v1246_v6  ;;  %v1343_v62 = vld [vmem:[%s2210_s1 + $0x2e8] sm:$0xf0]  ;;  %v1218_v2 = vor.u32 %v1427_v55, %v1215_v58  ;;  %v1143_v4 = vld [vmem:[%s2210_s1 + $0x158] sm:$0xf0]  ;;  %v1425_v7 = vld [vmem:[%s2210_s1 + $0x1d4] sm:$0xf] }
  0x39   :  { %769 = vmatpush.bf16.msrb.mxu1 %v1310_v0  ;;  %v1271_v0 = vld [vmem:[%s2210_s1 + $0x258] sm:$0xf0]  ;;  %v1346_v5 = vor.u32 %v1459_v59, %v1343_v62  ;;  %v1439_v11 = vld [vmem:[%s2210_s1 + $0x244] sm:$0xf]  ;;  %v1263_v12 = vld [vmem:[%s2210_s1 + $0x248] sm:$0xf0] }
  0x3a   :  { %788 = vmatpush.bf16.msrb.mxu2 %v994_v60  ;;  %v2028_v60 = vor.u32 %v1360_v40, %v941_v30  ;;  %v1274_v6 = vor.u32 %v1441_v63, %v1271_v0  ;;  %v1335_v10 = vld [vmem:[%s2210_s1 + $0x2d8] sm:$0xf0]  ;;  %v1407_v15 = vld [vmem:[%s2210_s1 + $0x144] sm:$0xf]  ;;  %v1135_v16 = vld [vmem:[%s2210_s1 + $0x148] sm:$0xf0]  ;;  %v1266_v18 = vor.u32 %v1439_v11, %v1263_v12 }
  0x3b   :  { %807 = vmatpush.bf16.msrb.mxu3 %v1058_v8  ;;  %v1207_v8 = vld [vmem:[%s2210_s1 + $0x1d8] sm:$0xf0]  ;;  %v1455_v19 = vld [vmem:[%s2210_s1 + $0x2c4] sm:$0xf]  ;;  %v1437_v21 = vld [vmem:[%s2210_s1 + $0x234] sm:$0xf] }
  0x3c   :  { %751 = vmatpush.bf16.msrb.mxu0 %v1238_v20  ;;  %v1210_v14 = vor.u32 %v1425_v7, %v1207_v8  ;;  %v1327_v20 = vld [vmem:[%s2210_s1 + $0x2c8] sm:$0xf0]  ;;  %v1255_v22 = vld [vmem:[%s2210_s1 + $0x238] sm:$0xf0] }
  0x3d   :  { %770 = vmatpush.bf16.msrb.mxu1 %v1302_v13  ;;  %v1146_v13 = vor.u32 %v1409_v3, %v1143_v4 }
  0x3e   :  { %789 = vmatpush.bf16.msrb.mxu2 %v986_v9  ;;  %v1457_v9 = vld [vmem:[%s2210_s1 + $0x2d4] sm:$0xf] }
  0x3f   :  { %808 = vmatpush.bf16.msrb.mxu3 %v1050_v24  ;;  %v1338_v17 = vor.u32 %v1457_v9, %v1335_v10 }
  0x40   :  { %752 = vmatpush.bf16.msrb.mxu0 %v1230_v39 }
  0x41   :  { %771 = vmatpush.bf16.msrb.mxu1 %v1294_v29 }
  0x42   :  { %790 = vmatpush.bf16.msrb.mxu2 %v978_v25 }
  0x43   :  { %809 = vmatpush.bf16.msrb.mxu3 %v1042_v43  ;;  %753 = vmatmul.bf16.vlgmr.msrb.gmra.mxu0 %v2028_v60 }
  0x44   :  { %821 = vmatpush.bf16.msra.mxu0 %v1162_v45  ;;  %772 = vmatmul.bf16.vlgmr.msrb.gmra.mxu1 %v2030_v61 }
  0x45   :  { %840 = vmatpush.bf16.msra.mxu1 %v1226_v35  ;;  %791 = vmatmul.bf16.vlgmr.msrb.gmra.mxu2 %v1752_v48  ;;  %v1423_v48 = vld [vmem:[%s2210_s1 + $0x1c4] sm:$0xf] }
  0x46   :  { %859 = vmatpush.bf16.msra.mxu2 %v1290_v31  ;;  %810 = vmatmul.bf16.vlgmr.msrb.gmra.mxu3 %v1763_v53  ;;  %v1199_v53 = vld [vmem:[%s2210_s1 + $0x1c8] sm:$0xf0] }
  0x47   :  { %878 = vmatpush.bf16.msra.mxu3 %v1354_v49 }
  0x48   :  { %822 = vmatpush.bf16.msra.mxu0 %v1154_v1 }
  0x49   :  { %841 = vmatpush.bf16.msra.mxu1 %v1218_v2 }
  0x4a   :  { %860 = vmatpush.bf16.msra.mxu2 %v1282_v52 }
  0x4b   :  { %879 = vmatpush.bf16.msra.mxu3 %v1346_v5 }
  0x4e   :  { %861 = vmatpush.bf16.msra.mxu2 %v1274_v6 }
  0x4f   :  { %8 = vsyncpa [#allocation3], 0  ;;  %823 = vmatpush.bf16.msra.mxu0 %v1146_v13  ;;  %842 = vmatpush.bf16.msra.mxu1 %v1210_v14  ;;  %v1138_v23 = vor.u32 %v1407_v15, %v1135_v16  ;;  %v1202_v24 = vor.u32 %v1423_v48, %v1199_v53  ;;  %v1405_v25 = vld [vmem:[%s2210_s1 + $0x134] sm:$0xf]  ;;  %v1127_v26 = vld [vmem:[%s2210_s1 + $0x138] sm:$0xf0]  ;;  %v1330_v27 = vor.u32 %v1455_v19, %v1327_v20 }
  0x50   :  { %880 = vmatpush.bf16.msra.mxu3 %v1338_v17  ;;  %v965_v28 = vld [vmem:[%s2209_s0 + $0x40] sm:$0xf]  ;;  %v1258_v29 = vor.u32 %v1437_v21, %v1255_v22  ;;  %v1421_v30 = vld [vmem:[%s2210_s1 + $0x1b4] sm:$0xf]  ;;  %v1191_v31 = vld [vmem:[%s2210_s1 + $0x1b8] sm:$0xf0]  ;;  %v1130_v39 = vor.u32 %v1405_v25, %v1127_v26 }
  0x51   :  { %v1453_v32 = vld [vmem:[%s2210_s1 + $0x2b4] sm:$0xf]  ;;  %v1319_v33 = vld [vmem:[%s2210_s1 + $0x2b8] sm:$0xf0]  ;;  %v1435_v34 = vld [vmem:[%s2210_s1 + $0x224] sm:$0xf]  ;;  %v1194_v40 = vor.u32 %v1421_v30, %v1191_v31 }
  0x52   :  { %862 = vmatpush.bf16.msra.mxu2 %v1266_v18  ;;  %v1247_v35 = vld [vmem:[%s2210_s1 + $0x228] sm:$0xf0]  ;;  %v1366_v36 = vld [vmem:[%s2209_s0 + $0x54] sm:$0xf0]  ;;  %v1363_v37 = vld [vmem:[%s2209_s0 + $0x44] sm:$0xf]  ;;  %v1322_v43 = vor.u32 %v1453_v32, %v1319_v33 }
  0x53   :  { %v967_v38 = vld [vmem:[%s2209_s0 + $0x58] sm:$0xf0]  ;;  %824 = vmatpush.bf16.msra.mxu0 %v1138_v23  ;;  %843 = vmatpush.bf16.msra.mxu1 %v1202_v24  ;;  %v1403_v41 = vld [vmem:[%s2210_s1 + $0x124] sm:$0xf]  ;;  %v1119_v42 = vld [vmem:[%s2210_s1 + $0x128] sm:$0xf0]  ;;  %v1250_v45 = vor.u32 %v1435_v34, %v1247_v35  ;;  %v966_v52 = vor.u32 %v1366_v36, %v965_v28 }
  0x54   :  { %881 = vmatpush.bf16.msra.mxu3 %v1330_v27  ;;  %v1419_v46 = vld [vmem:[%s2210_s1 + $0x1a4] sm:$0xf]  ;;  %v1183_v47 = vld [vmem:[%s2210_s1 + $0x1a8] sm:$0xf0]  ;;  %v970_v55 = vor.u32 %v1363_v37, %v967_v38  ;;  %v1433_v59 = vld [vmem:[%s2210_s1 + $0x214] sm:$0xf]  ;;  %v1122_v63 = vor.u32 %v1403_v41, %v1119_v42 }
  0x55   :  { %v1451_v49 = vld [vmem:[%s2210_s1 + $0x2a4] sm:$0xf]  ;;  %v1311_v58 = vld [vmem:[%s2210_s1 + $0x2a8] sm:$0xf0]  ;;  %v1239_v62 = vld [vmem:[%s2210_s1 + $0x218] sm:$0xf0]  ;;  %v1186_v0 = vor.u32 %v1419_v46, %v1183_v47  ;;  %758 = vmatmul.bf16.gmra.mxu0 %v966_v52  ;;  %796 = vmatmul.bf16.gmra.mxu2 %v1884_v44 }
  0x56   :  { %863 = vmatpush.bf16.msra.mxu2 %v1258_v29  ;;  %v1401_v1 = vld [vmem:[%s2210_s1 + $0x114] sm:$0xf]  ;;  %v1111_v2 = vld [vmem:[%s2210_s1 + $0x118] sm:$0xf0]  ;;  %v1314_v3 = vor.u32 %v1451_v49, %v1311_v58  ;;  %v1242_v4 = vor.u32 %v1433_v59, %v1239_v62  ;;  %777 = vmatmul.bf16.gmra.mxu1 %v970_v55  ;;  %v1431_v9 = vld [vmem:[%s2210_s1 + $0x204] sm:$0xf] }
  0x57   :  { %825 = vmatpush.bf16.msra.mxu0 %v1130_v39  ;;  %844 = vmatpush.bf16.msra.mxu1 %v1194_v40  ;;  %v1417_v5 = vld [vmem:[%s2210_s1 + $0x194] sm:$0xf]  ;;  %v1175_v6 = vld [vmem:[%s2210_s1 + $0x198] sm:$0xf0]  ;;  %v1231_v10 = vld [vmem:[%s2210_s1 + $0x208] sm:$0xf0]  ;;  %v1114_v11 = vor.u32 %v1401_v1, %v1111_v2 }
  0x58   :  { %882 = vmatpush.bf16.msra.mxu3 %v1322_v43  ;;  %v1449_v7 = vld [vmem:[%s2210_s1 + $0x294] sm:$0xf]  ;;  %v1303_v8 = vld [vmem:[%s2210_s1 + $0x298] sm:$0xf0]  ;;  %v1178_v12 = vor.u32 %v1417_v5, %v1175_v6  ;;  %v1399_v13 = vld [vmem:[%s2210_s1 + $0x104] sm:$0xf]  ;;  %v1234_v15 = vor.u32 %v1431_v9, %v1231_v10 }
  0x59   :  { %815 = vmatmul.bf16.gmra.mxu3 %v1895_v50  ;;  %v1306_v14 = vor.u32 %v1449_v7, %v1303_v8  ;;  %v1103_v16 = vld [vmem:[%s2210_s1 + $0x108] sm:$0xf0]  ;;  %v1415_v44 = vld [vmem:[%s2210_s1 + $0x184] sm:$0xf]  ;;  %s911_s14 = sshll.u32 %s2212_s3, 4  ;;  %s1493_s15 = smov 256   ;;  %s912_s14 = int_to_ptr.hbm [resolvable:$true] %s911_s14 }
  0x5a   :  { %864 = vmatpush.bf16.msra.mxu2 %v1250_v45  ;;  %v1167_v50 = vld [vmem:[%s2210_s1 + $0x188] sm:$0xf0]  ;;  %v1447_v17 = vld [vmem:[%s2210_s1 + $0x284] sm:$0xf]  ;;  %v1106_v48 = vor.u32 %v1399_v13, %v1103_v16  ;;  %s1494_s16 = smov 16  }
  0x5b   :  { %826 = vmatpush.bf16.msra.mxu0 %v1122_v63  ;;  %845 = vmatpush.bf16.msra.mxu1 %v1186_v0  ;;  %v1295_v18 = vld [vmem:[%s2210_s1 + $0x288] sm:$0xf0]  ;;  %v1170_v53 = vor.u32 %v1415_v44, %v1167_v50 }
  0x5c   :  { %883 = vmatpush.bf16.msra.mxu3 %v1314_v3  ;;  %v1298_v19 = vor.u32 %v1447_v17, %v1295_v18 }
  0x5e   :  { %865 = vmatpush.bf16.msra.mxu2 %v1242_v4 }
  0x5f   :  { %827 = vmatpush.bf16.msra.mxu0 %v1114_v11  ;;  %846 = vmatpush.bf16.msra.mxu1 %v1178_v12 }
  0x60   :  { %884 = vmatpush.bf16.msra.mxu3 %v1306_v14 }
  0x62   :  { %866 = vmatpush.bf16.msra.mxu2 %v1234_v15 }
  0x63   :  { %828 = vmatpush.bf16.msra.mxu0 %v1106_v48  ;;  %847 = vmatpush.bf16.msra.mxu1 %v1170_v53 }
  0x64   :  { %885 = vmatpush.bf16.msra.mxu3 %v1298_v19 }
  0x65   :  { %867 = vmatmul.bf16.vlgmr.msra.gmra.mxu2 %v2028_v60 }
  0x66   :  { %829 = vmatmul.bf16.vlgmr.msra.gmra.mxu0 %v1765_v54  ;;  %848 = vmatmul.bf16.vlgmr.msra.gmra.mxu1 %v1773_v57  ;;  %v123_v54 = vld [vmem:[%s2211_s2] sm:$0x3]  ;;  %s1492_s2 = smov [#allocation2]  }
  0x67   :  { %v125_v60 = vperm.slane %v123_v54, 0  ;;  %v126_v12 = vperm.slane %v123_v54, 1  ;;  %s909_s11 = sshll.u32 %s1492_s2, 4  ;;  %s910_s11 = int_to_ptr.vmem [resolvable:$true] %s909_s11 }
  0x69   :  { %886 = vmatmul.bf16.vlgmr.msra.gmra.mxu3 %v2030_v61 }
  0x75   :  { %872 = vmatmul.bf16.gmra.mxu2 %v966_v52 }
  0x76   :  { %834 = vmatmul.bf16.gmra.mxu0 %v1897_v51  ;;  %853 = vmatmul.bf16.gmra.mxu1 %v1905_v56 }
  0x79   :  { %891 = vmatmul.bf16.gmra.mxu3 %v970_v55 }
  0xa0   :  { %v678_v20 = vpop.f32.mrf.mxu0 }
  0xa1   :  { %v697_v21 = vpop.f32.mrf.mxu1  ;;  %v679_v51 = vadd.f32 %v678_v20, %v125_v60 }
  0xa3   :  { %v698_v56 = vadd.f32 %v697_v21, %v679_v51 }
  0xa8   :  { %v716_v22 = vpop.f32.mrf.mxu2  ;;  %v680_v24 = vpop.f32.mrf.mxu0 }
  0xa9   :  { %v735_v23 = vpop.f32.mrf.mxu3  ;;  %v699_v25 = vpop.f32.mrf.mxu1  ;;  %v717_v32 = vadd.f32 %v716_v22, %v698_v56  ;;  %v681_v33 = vadd.f32 %v680_v24, %v125_v60 }
  0xab   :  { %v736_v35 = vadd.f32 %v735_v23, %v717_v32  ;;  %v700_v39 = vadd.f32 %v699_v25, %v681_v33 }
  0xb0   :  { %v718_v57 = vpop.f32.mrf.mxu2  ;;  %v683_v61 = vpop.f32.mrf.mxu0 }
  0xb1   :  { %v737_v26 = vpop.f32.mrf.mxu3  ;;  %v702_v27 = vpop.f32.mrf.mxu1  ;;  %v719_v41 = vadd.f32 %v718_v57, %v700_v39  ;;  %v684_v42 = vadd.f32 %v683_v61, %v125_v60 }
  0xb3   :  { %v738_v45 = vadd.f32 %v737_v26, %v719_v41  ;;  %v703_v46 = vadd.f32 %v702_v27, %v684_v42 }
  0xb8   :  { %v721_v28 = vpop.f32.mrf.mxu2  ;;  %v685_v30 = vpop.f32.mrf.mxu0 }
  0xb9   :  { %v740_v29 = vpop.f32.mrf.mxu3  ;;  %v704_v31 = vpop.f32.mrf.mxu1  ;;  %v722_v59 = vadd.f32 %v721_v28, %v703_v46  ;;  %v686_v63 = vadd.f32 %v685_v30, %v125_v60 }
  0xbb   :  { %v741_v0 = vadd.f32 %v740_v29, %v722_v59  ;;  %v705_v5 = vadd.f32 %v704_v31, %v686_v63 }
  0xc0   :  { %v723_v34 = vpop.f32.mrf.mxu2  ;;  %v754_v37 = vpop.f32.mrf.mxu0 }
  0xc1   :  { %v742_v36 = vpop.f32.mrf.mxu3  ;;  %v773_v38 = vpop.f32.mrf.mxu1  ;;  %v755_v40 = vadd.f32 %v754_v37, %v736_v35  ;;  %v724_v7 = vadd.f32 %v723_v34, %v705_v5 }
  0xc3   :  { %v774_v43 = vadd.f32 %v773_v38, %v755_v40  ;;  %v743_v9 = vadd.f32 %v742_v36, %v724_v7 }
  0xc5   :  { %897 = vst [vmem:[#allocation2] sm:$0xff] %v774_v43 }
  0xc8   :  { %v792_v47 = vpop.f32.mrf.mxu2  ;;  %v756_v52 = vpop.f32.mrf.mxu0 }
  0xc9   :  { %v811_v49 = vpop.f32.mrf.mxu3  ;;  %v775_v55 = vpop.f32.mrf.mxu1  ;;  %v757_v58 = vadd.f32 %v756_v52, %v738_v45  ;;  %v793_v44 = vadd.f32 %v792_v47, %v126_v12 }
  0xcb   :  { %v776_v62 = vadd.f32 %v775_v55, %v757_v58  ;;  %v812_v18 = vadd.f32 %v811_v49, %v793_v44 }
  0xcd   :  { %899 = vst [vmem:[#allocation2 + $0x10] sm:$0xff] %v776_v62 }
  0xd0   :  { %v794_v1 = vpop.f32.mrf.mxu2 }
  0xd1   :  { %v813_v2 = vpop.f32.mrf.mxu3  ;;  %v795_v20 = vadd.f32 %v794_v1, %v126_v12 }
  0xd2   :  { %v759_v3 = vpop.f32.mrf.mxu0 }
  0xd3   :  { %v778_v4 = vpop.f32.mrf.mxu1  ;;  %v760_v6 = vadd.f32 %v759_v3, %v741_v0  ;;  %v814_v24 = vadd.f32 %v813_v2, %v795_v20 }
  0xd5   :  { %v779_v8 = vadd.f32 %v778_v4, %v760_v6 }
  0xd7   :  { %901 = vst [vmem:[#allocation2 + $0x20] sm:$0xff] %v779_v8 }
  0xd8   :  { %v797_v10 = vpop.f32.mrf.mxu2 }
  0xd9   :  { %v798_v61 = vadd.f32 %v797_v10, %v126_v12 }
  0xda   :  { %v761_v13 = vpop.f32.mrf.mxu0 }
  0xdb   :  { %v780_v14 = vpop.f32.mrf.mxu1  ;;  %v762_v15 = vadd.f32 %v761_v13, %v743_v9 }
  0xdc   :  { %v816_v11 = vpop.f32.mrf.mxu3 }
  0xdd   :  { %v781_v16 = vadd.f32 %v780_v14, %v762_v15  ;;  %v817_v56 = vadd.f32 %v816_v11, %v798_v61 }
  0xdf   :  { %903 = vst [vmem:[#allocation2 + $0x30] sm:$0xff] %v781_v16 }
  0xe0   :  { %v799_v50 = vpop.f32.mrf.mxu2 }
  0xe1   :  { %v800_v34 = vadd.f32 %v799_v50, %v126_v12 }
  0xe3   :  { %v830_v48 = vpop.f32.mrf.mxu0  ;;  %v849_v53 = vpop.f32.mrf.mxu1 }
  0xe4   :  { %v818_v17 = vpop.f32.mrf.mxu3  ;;  %v831_v19 = vadd.f32 %v830_v48, %v812_v18 }
  0xe5   :  { %v819_v38 = vadd.f32 %v818_v17, %v800_v34 }
  0xe6   :  { %v850_v21 = vadd.f32 %v849_v53, %v831_v19 }
  0xe8   :  { %v868_v22 = vpop.f32.mrf.mxu2 }
  0xe9   :  { %v869_v25 = vadd.f32 %v868_v22, %v850_v21 }
  0xeb   :  { %v832_v57 = vpop.f32.mrf.mxu0  ;;  %v851_v54 = vpop.f32.mrf.mxu1 }
  0xec   :  { %v887_v23 = vpop.f32.mrf.mxu3  ;;  %v833_v26 = vadd.f32 %v832_v57, %v814_v24 }
  0xed   :  { %v888_v60 = vadd.f32 %v887_v23, %v869_v25 }
  0xee   :  { %v852_v27 = vadd.f32 %v851_v54, %v833_v26 }
  0xef   :  { %898 = vst [vmem:[#allocation2 + $0x8] sm:$0xff] %v888_v60 }
  0xf0   :  { %v870_v51 = vpop.f32.mrf.mxu2 }
  0xf1   :  { %v871_v29 = vadd.f32 %v870_v51, %v852_v27 }
  0xf3   :  { %v835_v30 = vpop.f32.mrf.mxu0  ;;  %v854_v33 = vpop.f32.mrf.mxu1 }
  0xf4   :  { %v889_v28 = vpop.f32.mrf.mxu3  ;;  %v836_v32 = vadd.f32 %v835_v30, %v817_v56 }
  0xf5   :  { %v890_v31 = vadd.f32 %v889_v28, %v871_v29 }
  0xf6   :  { %v855_v35 = vadd.f32 %v854_v33, %v836_v32 }
  0xf7   :  { %900 = vst [vmem:[#allocation2 + $0x18] sm:$0xff] %v890_v31 }
  0xf8   :  { %v873_v36 = vpop.f32.mrf.mxu2 }
  0xf9   :  { %v874_v39 = vadd.f32 %v873_v36, %v855_v35 }
  0xfb   :  { %v837_v40 = vpop.f32.mrf.mxu0  ;;  %v856_v43 = vpop.f32.mrf.mxu1 }
  0xfc   :  { %v892_v37 = vpop.f32.mrf.mxu3  ;;  %v838_v42 = vadd.f32 %v837_v40, %v819_v38 }
  0xfd   :  { %v893_v41 = vadd.f32 %v892_v37, %v874_v39 }
  0xfe   :  { %v857_v45 = vadd.f32 %v856_v43, %v838_v42 }
  0xff   :  { %902 = vst [vmem:[#allocation2 + $0x28] sm:$0xff] %v893_v41 }
 0x100   :  { %v875_v46 = vpop.f32.mrf.mxu2 }
 0x101   :  { %v876_v47 = vadd.f32 %v875_v46, %v857_v45 }
 0x104   :  { %v894_v49 = vpop.f32.mrf.mxu3 }
 0x105   :  { %v895_v52 = vadd.f32 %v894_v49, %v876_v47 }
 0x107   :  { %904 = vst [vmem:[#allocation2 + $0x38] sm:$0xff] %v895_v52 }
 0x108   :  { %917 = dma.vmem_to_hbm [thread:$0]  %s910_s11, 1024, %s912_s14, [#allocation3], %s1493_s15, %s1493_s15, %s1494_s16  }
 0x109   :  { %1490 = dma.done.wait [#allocation3], 1024  }
 0x10a   :  { %1491 = vsyncadd [#allocation3], 4294966272 }
 0x10b   :  { %922 = vsyncpa [#allocation3], 1 }

</bundles_post_ra>
